<compile_context>
chip_gen: v6e
topology: v6e:2x2x1
jax: 0.10.0
libtpu: 0.0.40
codegen_flags: <defaults>
</compile_context>

<pallas_src>
import jax
import jax.numpy as jnp
from jax.experimental import pallas as pl
from jax.experimental.pallas import tpu as pltpu

VMEM = pltpu.MemorySpace.VMEM


# ------------------------------------------------------------------
# One fused kernel for the whole forward pass
# ------------------------------------------------------------------
def fused_slot_filling_kernel(*refs):
    x_ref = refs[0]                                   # (B, T, D_in) f32

    # encoder: 3 layers of (wf_emb, wb_emb, w_rec, b_fused)
    enc_w = []
    idx = 1
    for _ in range(3):
        enc_w.append(tuple(refs[idx + j][...] for j in range(4)))
        idx += 4
    (dwh, dv, w_s, dwih, db,
     gamma, beta, w1, b1fc, w2, b2fc) = [refs[idx + j][...] for j in range(11)]
    out_ref, att_ref = refs[idx + 11], refs[idx + 12]          # (B*T, O), (B, T, T)
    enc_buf, dec_buf = refs[idx + 13], refs[idx + 14]          # VMEM scratch

    B, T, Din = x_ref.shape
    H2 = enc_w[0][2].shape[0]        # 2H (rows of the block-diagonal w_rec)
    H = H2 // 2
    Hd = dwih.shape[1] // 4          # decoder hidden
    A = dv.shape[1]                  # attention dim
    f32 = jnp.float32
    bf16 = jnp.bfloat16

    def mm(a, w):
        # bf16 operands, f32 accumulation on the MXU.
        return jnp.dot(a.astype(bf16), w, preferred_element_type=f32)

    # ---------------- fused bidirectional LSTM layer ----------------
    # gxf/gxb: (B, T, 8H) input projections, zero-embedded in the interleaved
    # gate layout [i_f,i_b | f_f,f_b | g_f,g_b | o_f,o_b] (built in the wrapper).
    # fwd consumes time k, bwd consumes time T-1-k in the same fused step.
    def bilstm_layer(gxf, gxb, w_rec):
        h = jnp.zeros((B, 2 * H), f32)               # [h_fwd | h_bwd]
        c = jnp.zeros((B, 2 * H), f32)               # [c_fwd | c_bwd]
        for k in range(T):                           # static T -> fully unrolled
            gates = mm(h, w_rec) + gxf[:, k, :] + gxb[:, T - 1 - k, :]
            sig = jax.nn.sigmoid(gates)              # full-width: 1 EUP push
            tg = jnp.tanh(gates)                     # full-width: 1 EUP push
            i = sig[:, 0:2 * H]
            f = sig[:, 2 * H:4 * H]
            g = tg[:, 4 * H:6 * H]
            o = sig[:, 6 * H:8 * H]
            c = f * c + i * g
            h = o * jnp.tanh(c)                      # fused cell tanh: 1 push
            # time-aligned store: fwd half at time k, bwd half at time T-1-k
            enc_buf[:, k, 0:H] = h[:, 0:H]
            enc_buf[:, T - 1 - k, H:2 * H] = h[:, H:2 * H]
        return h                                     # [h_fwd(T-1) | h_bwd(0)]

    # ---------------- encoder layer 0 ----------------
    x_flat = x_ref[...].reshape(B * T, Din)
    wf_emb, wb_emb, w_rec, b_l = enc_w[0]
    gxf = mm(x_flat, wf_emb).reshape(B, T, 8 * H) + b_l
    gxb = mm(x_flat, wb_emb).reshape(B, T, 8 * H)
    h_last = bilstm_layer(gxf, gxb, w_rec)

    # ---------------- encoder layers 1, 2 ----------------
    for l in (1, 2):
        wf_emb, wb_emb, w_rec, b_l = enc_w[l]
        prev = enc_buf[...].reshape(B * T, 2 * H)    # snapshot before overwrite
        gxf = mm(prev, wf_emb).reshape(B, T, 8 * H) + b_l
        gxb = mm(prev, wb_emb).reshape(B, T, 8 * H)
        h_last = bilstm_layer(gxf, gxb, w_rec)

    # ---------------- decoder with additive attention (context-only input) ---
    enc = enc_buf[...]                               # (B, T, 2H) last-layer out
    enc_bf = enc.astype(bf16)                        # hoisted cast for ctx einsum
    enc_proj = mm(enc.reshape(B * T, 2 * H), dwh).reshape(B, T, A)   # Wh @ h_j
    v_b = jnp.broadcast_to(dv.reshape(1, 1, A), (B, T, A))           # hoisted

    s = h_last[:, 0:H]                               # decoder h0 = last fwd hidden
    c = jnp.zeros((B, Hd), f32)                      # TODO(synk): decoder cell seeded to zero (only h0 is passed in the original)
    for t in range(T):                               # decoder time, unrolled
        sp = mm(s, w_s)                              # fused [Ws | Whh]: (B, A+4Hd)
        s_proj = sp[:, 0:A]
        s_gate = sp[:, A:]
        e = jnp.sum(jnp.tanh(enc_proj + s_proj[:, None, :]) * v_b,
                    axis=-1)                                         # (B, T_enc)
        e = e - jnp.max(e, axis=-1, keepdims=True)
        ex = jnp.exp(e)
        alpha = ex * pl.reciprocal(jnp.sum(ex, axis=-1, keepdims=True),
                                   approx=False)                     # exact
        att_ref[:, t, :] = alpha                     # lane-dense: last dim = T_enc
        # context on the MXU over the fused 2H buffer
        ctx = jnp.einsum('bqt,btk->bqk',
                         alpha.reshape(B, 1, T).astype(bf16), enc_bf,
                         preferred_element_type=f32).reshape(B, 2 * H)
        gates = mm(ctx, dwih) + s_gate + db
        sig = jax.nn.sigmoid(gates)                  # full-width activations
        tg = jnp.tanh(gates)
        i = sig[:, 0:Hd]
        f = sig[:, Hd:2 * Hd]
        g = tg[:, 2 * Hd:3 * Hd]
        o = sig[:, 3 * Hd:4 * Hd]
        c = f * c + i * g
        s = o * jnp.tanh(c)
        dec_buf[:, t, :] = s

    # ---------------- head: BatchNorm1d -> Linear -> Tanh -> Linear -> Tanh -> Softmax
    dec = dec_buf[...].reshape(B * T, Hd)            # rows are (b, t), b-major
    mean = jnp.mean(dec, axis=0, keepdims=True)
    var = jnp.mean(jnp.square(dec - mean), axis=0, keepdims=True)
    # TODO(synk): BatchNorm uses per-batch (training-mode) statistics, not running stats.
    xn = (dec - mean) * jax.lax.rsqrt(var + 1e-5) * gamma + beta
    h1 = jnp.tanh(mm(xn, w1) + b1fc)
    z = jnp.tanh(mm(h1, w2) + b2fc)
    z = z - jnp.max(z, axis=-1, keepdims=True)
    ez = jnp.exp(z)
    out_ref[...] = ez * pl.reciprocal(jnp.sum(ez, axis=-1, keepdims=True),
                                      approx=False)


# ------------------------------------------------------------------
# Wrapper: builds fused / gate-interleaved weights and calls the kernel
# ------------------------------------------------------------------
def slot_filling_forward(batch_data, params):
    B, T, _ = batch_data.shape
    H = params["enc"][0]["fwd"]["whh"].shape[0]
    Hd = params["dec"]["whh"].shape[0]
    A = params["dec"]["ws"].shape[1]
    O = params["fc"]["w2"].shape[1]
    assert Hd == H, "decoder hidden must equal encoder hidden (h0 seeding)"
    bf16 = jnp.bfloat16

    def embed_dir(w, direction):
        """(K, 4H) [i,f,g,o] -> (K, 8H) interleaved [i_f,i_b,f_f,f_b,g_f,g_b,o_f,o_b]
        with the other direction's columns zeroed."""
        K = w.shape[0]
        w4 = w.reshape(K, 4, H)
        z = jnp.zeros_like(w4)
        pair = (w4, z) if direction == 0 else (z, w4)
        return jnp.stack(pair, axis=2).reshape(K, 8 * H)

    args = [batch_data]
    for layer in params["enc"]:
        pf, pb = layer["fwd"], layer["bwd"]
        wf_emb = embed_dir(pf["wih"], 0).astype(bf16)          # (K, 8H)
        wb_emb = embed_dir(pb["wih"], 1).astype(bf16)          # (K, 8H)
        w_rec = jnp.concatenate([embed_dir(pf["whh"], 0),      # block-diagonal
                                 embed_dir(pb["whh"], 1)], axis=0).astype(bf16)
        b_fused = embed_dir(pf["b"], 0) + embed_dir(pb["b"], 1)  # (1, 8H) f32
        args += [wf_emb, wb_emb, w_rec, b_fused]

    dec = params["dec"]
    w_s = jnp.concatenate([dec["ws"], dec["whh"]], axis=1).astype(bf16)  # (Hd, A+4Hd)
    args += [dec["wh"].astype(bf16), dec["v"], w_s,
             dec["wih"].astype(bf16), dec["b"]]

    fc = params["fc"]
    args += [fc["gamma"], fc["beta"], fc["w1"].astype(bf16), fc["b1"],
             fc["w2"].astype(bf16), fc["b2"]]

    out_flat, attention = pl.pallas_call(
        fused_slot_filling_kernel,
        out_shape=(jax.ShapeDtypeStruct((B * T, O), jnp.float32),
                   jax.ShapeDtypeStruct((B, T, T), jnp.float32)),
        in_specs=[pl.BlockSpec(memory_space=VMEM)] * len(args),
        out_specs=(pl.BlockSpec(memory_space=VMEM),
                   pl.BlockSpec(memory_space=VMEM)),
        scratch_shapes=[pltpu.VMEM((B, T, 2 * H), jnp.float32),  # fused encoder out
                        pltpu.VMEM((B, T, Hd), jnp.float32)],    # decoder outputs
    )(*args)

    output = out_flat.reshape(B, T, 1, O)             # rows already b-major
    # TODO(synk): original uses packed variable-length sequences; fixed length here.
    lengths = jnp.full((B,), T, dtype=jnp.int32)
    return output, lengths, attention


# ------------------------------------------------------------------
# Deterministic parameter init (PyTorch-like structure; LSTM bias = b_ih + b_hh)
# ------------------------------------------------------------------
def init_params(key, d_in, H, Hd, A, O):
    keys = iter(jax.random.split(key, 64))

    def u(shape, scale=0.1):
        return jax.random.uniform(next(keys), shape, jnp.float32, -scale, scale)

    enc = []
    d = d_in
    for _ in range(3):                                # 3 layers, 2 directions
        layer_p = {}
        for direction in ("fwd", "bwd"):
            layer_p[direction] = dict(wih=u((d, 4 * H)), whh=u((H, 4 * H)),
                                      b=u((1, 4 * H)))
        enc.append(layer_p)
        d = 2 * H
    dec = dict(wih=u((2 * H, 4 * Hd)), whh=u((Hd, 4 * Hd)), b=u((1, 4 * Hd)),
               ws=u((Hd, A)), wh=u((2 * H, A)), v=u((1, A)))
    fc = dict(gamma=jnp.ones((1, Hd), jnp.float32),
              beta=jnp.zeros((1, Hd), jnp.float32),
              w1=u((Hd, Hd)), b1=u((1, Hd)),
              w2=u((Hd, O)), b2=u((1, O)))
    return dict(enc=enc, dec=dec, fc=fc)


if __name__ == "__main__":
    B, T, D_IN, H, O = 2, 8, 16, 32, 8
    Hd, A = H, H                                      # decoder hidden == encoder hidden
    key = jax.random.PRNGKey(0)
    kx, kp = jax.random.split(key)
    batch_data = jax.random.normal(kx, (B, T, D_IN), jnp.float32)
    params = init_params(kp, D_IN, H, Hd, A, O)

    fwd = jax.jit(slot_filling_forward)
    out, lengths, attention = fwd(batch_data, params)
    jax.block_until_ready((out, lengths, attention))

    assert out.shape == (B, T, 1, O)
    assert lengths.shape == (B,)
    assert attention.shape == (B, T, T)
    assert bool(jnp.all(jnp.isfinite(out)))
    assert bool(jnp.all(jnp.isfinite(attention)))
    # output softmax rows sum to 1 (exact reciprocal)
    assert bool(jnp.allclose(jnp.sum(out, axis=-1), 1.0, atol=1e-5))
    # attention rows sum to 1 (exact reciprocal now used in the serial loop)
    assert bool(jnp.allclose(jnp.sum(attention, axis=-1), 1.0, atol=1e-4))
    print("KERNEL_OK")
</pallas_src>

<mosaic_0001>
module attributes {stable_mosaic.version = 11 : i64} {
  func.func @fused_slot_filling_kernel(%arg0: memref<2x8x16xf32, #tpu.memory_space<vmem>>, %arg1: memref<16x256xbf16, #tpu.memory_space<vmem>>, %arg2: memref<16x256xbf16, #tpu.memory_space<vmem>>, %arg3: memref<64x256xbf16, #tpu.memory_space<vmem>>, %arg4: memref<1x256xf32, #tpu.memory_space<vmem>>, %arg5: memref<64x256xbf16, #tpu.memory_space<vmem>>, %arg6: memref<64x256xbf16, #tpu.memory_space<vmem>>, %arg7: memref<64x256xbf16, #tpu.memory_space<vmem>>, %arg8: memref<1x256xf32, #tpu.memory_space<vmem>>, %arg9: memref<64x256xbf16, #tpu.memory_space<vmem>>, %arg10: memref<64x256xbf16, #tpu.memory_space<vmem>>, %arg11: memref<64x256xbf16, #tpu.memory_space<vmem>>, %arg12: memref<1x256xf32, #tpu.memory_space<vmem>>, %arg13: memref<64x32xbf16, #tpu.memory_space<vmem>>, %arg14: memref<1x32xf32, #tpu.memory_space<vmem>>, %arg15: memref<32x160xbf16, #tpu.memory_space<vmem>>, %arg16: memref<64x128xbf16, #tpu.memory_space<vmem>>, %arg17: memref<1x128xf32, #tpu.memory_space<vmem>>, %arg18: memref<1x32xf32, #tpu.memory_space<vmem>>, %arg19: memref<1x32xf32, #tpu.memory_space<vmem>>, %arg20: memref<32x32xbf16, #tpu.memory_space<vmem>>, %arg21: memref<1x32xf32, #tpu.memory_space<vmem>>, %arg22: memref<32x8xbf16, #tpu.memory_space<vmem>>, %arg23: memref<1x8xf32, #tpu.memory_space<vmem>>, %arg24: memref<16x8xf32, #tpu.memory_space<vmem>>, %arg25: memref<2x8x8xf32, #tpu.memory_space<vmem>>, %arg26: memref<2x8x64xf32, #tpu.memory_space<vmem>>, %arg27: memref<2x8x32xf32, #tpu.memory_space<vmem>>) attributes {dimension_semantics = [], scalar_prefetch = 0 : i64, scratch_operands = 2 : i64, tpu.core_type = #tpu.core_type<tc>} {
    %c0 = arith.constant 0 : index
    %c0_0 = arith.constant 0 : index
    %0 = vector.load %arg1[%c0, %c0_0] : memref<16x256xbf16, #tpu.memory_space<vmem>>, vector<16x256xbf16>
    %c0_1 = arith.constant 0 : index
    %c0_2 = arith.constant 0 : index
    %1 = vector.load %arg2[%c0_1, %c0_2] : memref<16x256xbf16, #tpu.memory_space<vmem>>, vector<16x256xbf16>
    %c0_3 = arith.constant 0 : index
    %c0_4 = arith.constant 0 : index
    %2 = vector.load %arg3[%c0_3, %c0_4] : memref<64x256xbf16, #tpu.memory_space<vmem>>, vector<64x256xbf16>
    %c0_5 = arith.constant 0 : index
    %c0_6 = arith.constant 0 : index
    %3 = vector.load %arg4[%c0_5, %c0_6] : memref<1x256xf32, #tpu.memory_space<vmem>>, vector<1x256xf32>
    %c0_7 = arith.constant 0 : index
    %c0_8 = arith.constant 0 : index
    %4 = vector.load %arg5[%c0_7, %c0_8] : memref<64x256xbf16, #tpu.memory_space<vmem>>, vector<64x256xbf16>
    %c0_9 = arith.constant 0 : index
    %c0_10 = arith.constant 0 : index
    %5 = vector.load %arg6[%c0_9, %c0_10] : memref<64x256xbf16, #tpu.memory_space<vmem>>, vector<64x256xbf16>
    %c0_11 = arith.constant 0 : index
    %c0_12 = arith.constant 0 : index
    %6 = vector.load %arg7[%c0_11, %c0_12] : memref<64x256xbf16, #tpu.memory_space<vmem>>, vector<64x256xbf16>
    %c0_13 = arith.constant 0 : index
    %c0_14 = arith.constant 0 : index
    %7 = vector.load %arg8[%c0_13, %c0_14] : memref<1x256xf32, #tpu.memory_space<vmem>>, vector<1x256xf32>
    %c0_15 = arith.constant 0 : index
    %c0_16 = arith.constant 0 : index
    %8 = vector.load %arg9[%c0_15, %c0_16] : memref<64x256xbf16, #tpu.memory_space<vmem>>, vector<64x256xbf16>
    %c0_17 = arith.constant 0 : index
    %c0_18 = arith.constant 0 : index
    %9 = vector.load %arg10[%c0_17, %c0_18] : memref<64x256xbf16, #tpu.memory_space<vmem>>, vector<64x256xbf16>
    %c0_19 = arith.constant 0 : index
    %c0_20 = arith.constant 0 : index
    %10 = vector.load %arg11[%c0_19, %c0_20] : memref<64x256xbf16, #tpu.memory_space<vmem>>, vector<64x256xbf16>
    %c0_21 = arith.constant 0 : index
    %c0_22 = arith.constant 0 : index
    %11 = vector.load %arg12[%c0_21, %c0_22] : memref<1x256xf32, #tpu.memory_space<vmem>>, vector<1x256xf32>
    %c0_23 = arith.constant 0 : index
    %c0_24 = arith.constant 0 : index
    %12 = vector.load %arg13[%c0_23, %c0_24] : memref<64x32xbf16, #tpu.memory_space<vmem>>, vector<64x32xbf16>
    %c0_25 = arith.constant 0 : index
    %c0_26 = arith.constant 0 : index
    %13 = vector.load %arg14[%c0_25, %c0_26] : memref<1x32xf32, #tpu.memory_space<vmem>>, vector<1x32xf32>
    %c0_27 = arith.constant 0 : index
    %c0_28 = arith.constant 0 : index
    %14 = vector.load %arg15[%c0_27, %c0_28] : memref<32x160xbf16, #tpu.memory_space<vmem>>, vector<32x160xbf16>
    %c0_29 = arith.constant 0 : index
    %c0_30 = arith.constant 0 : index
    %15 = vector.load %arg16[%c0_29, %c0_30] : memref<64x128xbf16, #tpu.memory_space<vmem>>, vector<64x128xbf16>
    %c0_31 = arith.constant 0 : index
    %c0_32 = arith.constant 0 : index
    %16 = vector.load %arg17[%c0_31, %c0_32] : memref<1x128xf32, #tpu.memory_space<vmem>>, vector<1x128xf32>
    %c0_33 = arith.constant 0 : index
    %c0_34 = arith.constant 0 : index
    %17 = vector.load %arg18[%c0_33, %c0_34] : memref<1x32xf32, #tpu.memory_space<vmem>>, vector<1x32xf32>
    %c0_35 = arith.constant 0 : index
    %c0_36 = arith.constant 0 : index
    %18 = vector.load %arg19[%c0_35, %c0_36] : memref<1x32xf32, #tpu.memory_space<vmem>>, vector<1x32xf32>
    %c0_37 = arith.constant 0 : index
    %c0_38 = arith.constant 0 : index
    %19 = vector.load %arg20[%c0_37, %c0_38] : memref<32x32xbf16, #tpu.memory_space<vmem>>, vector<32x32xbf16>
    %c0_39 = arith.constant 0 : index
    %c0_40 = arith.constant 0 : index
    %20 = vector.load %arg21[%c0_39, %c0_40] : memref<1x32xf32, #tpu.memory_space<vmem>>, vector<1x32xf32>
    %c0_41 = arith.constant 0 : index
    %c0_42 = arith.constant 0 : index
    %21 = vector.load %arg22[%c0_41, %c0_42] : memref<32x8xbf16, #tpu.memory_space<vmem>>, vector<32x8xbf16>
    %c0_43 = arith.constant 0 : index
    %c0_44 = arith.constant 0 : index
    %22 = vector.load %arg23[%c0_43, %c0_44] : memref<1x8xf32, #tpu.memory_space<vmem>>, vector<1x8xf32>
    %c0_45 = arith.constant 0 : index
    %c0_46 = arith.constant 0 : index
    %c0_47 = arith.constant 0 : index
    %23 = vector.load %arg0[%c0_45, %c0_46, %c0_47] : memref<2x8x16xf32, #tpu.memory_space<vmem>>, vector<2x8x16xf32>
    %24 = vector.shape_cast %23 : vector<2x8x16xf32> to vector<16x16xf32>
    %25 = arith.truncf %24 : vector<16x16xf32> to vector<16x16xbf16>
    %cst = arith.constant dense<0.000000e+00> : vector<16x256xf32>
    %26 = tpu.matmul %25, %0, %cst {dimension_numbers = #tpu.dot_dimension_numbers<[1], [0], [0], [1], [0, 0, 1, 1], [], []>} : vector<16x16xbf16>, vector<16x256xbf16>, vector<16x256xf32> -> vector<16x256xf32>
    %27 = vector.shape_cast %26 : vector<16x256xf32> to vector<2x8x256xf32>
    %28 = vector.shape_cast %3 : vector<1x256xf32> to vector<1x1x256xf32>
    %29 = vector.broadcast %28 : vector<1x1x256xf32> to vector<2x8x256xf32>
    %30 = arith.addf %27, %29 : vector<2x8x256xf32>
    %31 = arith.truncf %24 : vector<16x16xf32> to vector<16x16xbf16>
    %cst_48 = arith.constant dense<0.000000e+00> : vector<16x256xf32>
    %32 = tpu.matmul %31, %1, %cst_48 {dimension_numbers = #tpu.dot_dimension_numbers<[1], [0], [0], [1], [0, 0, 1, 1], [], []>} : vector<16x16xbf16>, vector<16x256xbf16>, vector<16x256xf32> -> vector<16x256xf32>
    %33 = vector.shape_cast %32 : vector<16x256xf32> to vector<2x8x256xf32>
    %cst_49 = arith.constant 0.000000e+00 : f32
    %34 = vector.broadcast %cst_49 : f32 to vector<2x64xf32>
    %cst_50 = arith.constant 0.000000e+00 : f32
    %35 = vector.broadcast %cst_50 : f32 to vector<2x64xf32>
    %36 = arith.truncf %34 : vector<2x64xf32> to vector<2x64xbf16>
    %cst_51 = arith.constant dense<0.000000e+00> : vector<2x256xf32>
    %37 = tpu.matmul %36, %2, %cst_51 {dimension_numbers = #tpu.dot_dimension_numbers<[1], [0], [0], [1], [0, 0, 1, 1], [], []>} : vector<2x64xbf16>, vector<64x256xbf16>, vector<2x256xf32> -> vector<2x256xf32>
    %38 = vector.extract_strided_slice %30 {offsets = [0, 0, 0], sizes = [2, 1, 256], strides = [1, 1, 1]} : vector<2x8x256xf32> to vector<2x1x256xf32>
    %39 = vector.shape_cast %38 : vector<2x1x256xf32> to vector<2x256xf32>
    %40 = arith.addf %37, %39 : vector<2x256xf32>
    %41 = vector.extract_strided_slice %33 {offsets = [0, 7, 0], sizes = [2, 1, 256], strides = [1, 1, 1]} : vector<2x8x256xf32> to vector<2x1x256xf32>
    %42 = vector.shape_cast %41 : vector<2x1x256xf32> to vector<2x256xf32>
    %43 = arith.addf %40, %42 : vector<2x256xf32>
    %44 = arith.negf %43 : vector<2x256xf32>
    %45 = math.exp %44 : vector<2x256xf32>
    %cst_52 = arith.constant 1.000000e+00 : f32
    %46 = vector.broadcast %cst_52 : f32 to vector<2x256xf32>
    %47 = arith.addf %46, %45 : vector<2x256xf32>
    %48 = arith.divf %46, %47 : vector<2x256xf32>
    %49 = math.tanh %43 : vector<2x256xf32>
    %50 = vector.extract_strided_slice %48 {offsets = [0, 0], sizes = [2, 64], strides = [1, 1]} : vector<2x256xf32> to vector<2x64xf32>
    %51 = vector.extract_strided_slice %48 {offsets = [0, 64], sizes = [2, 64], strides = [1, 1]} : vector<2x256xf32> to vector<2x64xf32>
    %52 = vector.extract_strided_slice %49 {offsets = [0, 128], sizes = [2, 64], strides = [1, 1]} : vector<2x256xf32> to vector<2x64xf32>
    %53 = vector.extract_strided_slice %48 {offsets = [0, 192], sizes = [2, 64], strides = [1, 1]} : vector<2x256xf32> to vector<2x64xf32>
    %54 = arith.mulf %51, %35 : vector<2x64xf32>
    %55 = arith.mulf %50, %52 : vector<2x64xf32>
    %56 = arith.addf %54, %55 : vector<2x64xf32>
    %57 = math.tanh %56 : vector<2x64xf32>
    %58 = arith.mulf %53, %57 : vector<2x64xf32>
    %59 = vector.extract_strided_slice %58 {offsets = [0, 0], sizes = [2, 32], strides = [1, 1]} : vector<2x64xf32> to vector<2x32xf32>
    %c0_53 = arith.constant 0 : index
    %c0_54 = arith.constant 0 : index
    %c0_55 = arith.constant 0 : index
    %60 = vector.load %arg26[%c0_53, %c0_54, %c0_55] : memref<2x8x64xf32, #tpu.memory_space<vmem>>, vector<2x1x32xf32>
    %61 = vector.shape_cast %60 : vector<2x1x32xf32> to vector<2x32xf32>
    %62 = vector.shape_cast %59 : vector<2x32xf32> to vector<2x1x32xf32>
    tpu.vector_store %arg26[%c0_53, %c0_54, %c0_55], %62 {strides = array<i32>} : memref<2x8x64xf32, #tpu.memory_space<vmem>>, vector<2x1x32xf32>,
    %63 = vector.extract_strided_slice %58 {offsets = [0, 32], sizes = [2, 32], strides = [1, 1]} : vector<2x64xf32> to vector<2x32xf32>
    %c0_56 = arith.constant 0 : index
    %c7 = arith.constant 7 : index
    %c32 = arith.constant 32 : index
    %64 = vector.load %arg26[%c0_56, %c7, %c32] : memref<2x8x64xf32, #tpu.memory_space<vmem>>, vector<2x1x32xf32>
    %65 = vector.shape_cast %64 : vector<2x1x32xf32> to vector<2x32xf32>
    %66 = vector.shape_cast %63 : vector<2x32xf32> to vector<2x1x32xf32>
    tpu.vector_store %arg26[%c0_56, %c7, %c32], %66 {strides = array<i32>} : memref<2x8x64xf32, #tpu.memory_space<vmem>>, vector<2x1x32xf32>,
    %67 = arith.truncf %58 : vector<2x64xf32> to vector<2x64xbf16>
    %cst_57 = arith.constant dense<0.000000e+00> : vector<2x256xf32>
    %68 = tpu.matmul %67, %2, %cst_57 {dimension_numbers = #tpu.dot_dimension_numbers<[1], [0], [0], [1], [0, 0, 1, 1], [], []>} : vector<2x64xbf16>, vector<64x256xbf16>, vector<2x256xf32> -> vector<2x256xf32>
    %69 = vector.extract_strided_slice %30 {offsets = [0, 1, 0], sizes = [2, 1, 256], strides = [1, 1, 1]} : vector<2x8x256xf32> to vector<2x1x256xf32>
    %70 = vector.shape_cast %69 : vector<2x1x256xf32> to vector<2x256xf32>
    %71 = arith.addf %68, %70 : vector<2x256xf32>
    %72 = vector.extract_strided_slice %33 {offsets = [0, 6, 0], sizes = [2, 1, 256], strides = [1, 1, 1]} : vector<2x8x256xf32> to vector<2x1x256xf32>
    %73 = vector.shape_cast %72 : vector<2x1x256xf32> to vector<2x256xf32>
    %74 = arith.addf %71, %73 : vector<2x256xf32>
    %75 = arith.negf %74 : vector<2x256xf32>
    %76 = math.exp %75 : vector<2x256xf32>
    %cst_58 = arith.constant 1.000000e+00 : f32
    %77 = vector.broadcast %cst_58 : f32 to vector<2x256xf32>
    %78 = arith.addf %77, %76 : vector<2x256xf32>
    %79 = arith.divf %77, %78 : vector<2x256xf32>
    %80 = math.tanh %74 : vector<2x256xf32>
    %81 = vector.extract_strided_slice %79 {offsets = [0, 0], sizes = [2, 64], strides = [1, 1]} : vector<2x256xf32> to vector<2x64xf32>
    %82 = vector.extract_strided_slice %79 {offsets = [0, 64], sizes = [2, 64], strides = [1, 1]} : vector<2x256xf32> to vector<2x64xf32>
    %83 = vector.extract_strided_slice %80 {offsets = [0, 128], sizes = [2, 64], strides = [1, 1]} : vector<2x256xf32> to vector<2x64xf32>
    %84 = vector.extract_strided_slice %79 {offsets = [0, 192], sizes = [2, 64], strides = [1, 1]} : vector<2x256xf32> to vector<2x64xf32>
    %85 = arith.mulf %82, %56 : vector<2x64xf32>
    %86 = arith.mulf %81, %83 : vector<2x64xf32>
    %87 = arith.addf %85, %86 : vector<2x64xf32>
    %88 = math.tanh %87 : vector<2x64xf32>
    %89 = arith.mulf %84, %88 : vector<2x64xf32>
    %90 = vector.extract_strided_slice %89 {offsets = [0, 0], sizes = [2, 32], strides = [1, 1]} : vector<2x64xf32> to vector<2x32xf32>
    %c0_59 = arith.constant 0 : index
    %c1 = arith.constant 1 : index
    %c0_60 = arith.constant 0 : index
    %91 = vector.load %arg26[%c0_59, %c1, %c0_60] : memref<2x8x64xf32, #tpu.memory_space<vmem>>, vector<2x1x32xf32>
    %92 = vector.shape_cast %91 : vector<2x1x32xf32> to vector<2x32xf32>
    %93 = vector.shape_cast %90 : vector<2x32xf32> to vector<2x1x32xf32>
    tpu.vector_store %arg26[%c0_59, %c1, %c0_60], %93 {strides = array<i32>} : memref<2x8x64xf32, #tpu.memory_space<vmem>>, vector<2x1x32xf32>,
    %94 = vector.extract_strided_slice %89 {offsets = [0, 32], sizes = [2, 32], strides = [1, 1]} : vector<2x64xf32> to vector<2x32xf32>
    %c0_61 = arith.constant 0 : index
    %c6 = arith.constant 6 : index
    %c32_62 = arith.constant 32 : index
    %95 = vector.load %arg26[%c0_61, %c6, %c32_62] : memref<2x8x64xf32, #tpu.memory_space<vmem>>, vector<2x1x32xf32>
    %96 = vector.shape_cast %95 : vector<2x1x32xf32> to vector<2x32xf32>
    %97 = vector.shape_cast %94 : vector<2x32xf32> to vector<2x1x32xf32>
    tpu.vector_store %arg26[%c0_61, %c6, %c32_62], %97 {strides = array<i32>} : memref<2x8x64xf32, #tpu.memory_space<vmem>>, vector<2x1x32xf32>,
    %98 = arith.truncf %89 : vector<2x64xf32> to vector<2x64xbf16>
    %cst_63 = arith.constant dense<0.000000e+00> : vector<2x256xf32>
    %99 = tpu.matmul %98, %2, %cst_63 {dimension_numbers = #tpu.dot_dimension_numbers<[1], [0], [0], [1], [0, 0, 1, 1], [], []>} : vector<2x64xbf16>, vector<64x256xbf16>, vector<2x256xf32> -> vector<2x256xf32>
    %100 = vector.extract_strided_slice %30 {offsets = [0, 2, 0], sizes = [2, 1, 256], strides = [1, 1, 1]} : vector<2x8x256xf32> to vector<2x1x256xf32>
    %101 = vector.shape_cast %100 : vector<2x1x256xf32> to vector<2x256xf32>
    %102 = arith.addf %99, %101 : vector<2x256xf32>
    %103 = vector.extract_strided_slice %33 {offsets = [0, 5, 0], sizes = [2, 1, 256], strides = [1, 1, 1]} : vector<2x8x256xf32> to vector<2x1x256xf32>
    %104 = vector.shape_cast %103 : vector<2x1x256xf32> to vector<2x256xf32>
    %105 = arith.addf %102, %104 : vector<2x256xf32>
    %106 = arith.negf %105 : vector<2x256xf32>
    %107 = math.exp %106 : vector<2x256xf32>
    %cst_64 = arith.constant 1.000000e+00 : f32
    %108 = vector.broadcast %cst_64 : f32 to vector<2x256xf32>
    %109 = arith.addf %108, %107 : vector<2x256xf32>
    %110 = arith.divf %108, %109 : vector<2x256xf32>
    %111 = math.tanh %105 : vector<2x256xf32>
    %112 = vector.extract_strided_slice %110 {offsets = [0, 0], sizes = [2, 64], strides = [1, 1]} : vector<2x256xf32> to vector<2x64xf32>
    %113 = vector.extract_strided_slice %110 {offsets = [0, 64], sizes = [2, 64], strides = [1, 1]} : vector<2x256xf32> to vector<2x64xf32>
    %114 = vector.extract_strided_slice %111 {offsets = [0, 128], sizes = [2, 64], strides = [1, 1]} : vector<2x256xf32> to vector<2x64xf32>
    %115 = vector.extract_strided_slice %110 {offsets = [0, 192], sizes = [2, 64], strides = [1, 1]} : vector<2x256xf32> to vector<2x64xf32>
    %116 = arith.mulf %113, %87 : vector<2x64xf32>
    %117 = arith.mulf %112, %114 : vector<2x64xf32>
    %118 = arith.addf %116, %117 : vector<2x64xf32>
    %119 = math.tanh %118 : vector<2x64xf32>
    %120 = arith.mulf %115, %119 : vector<2x64xf32>
    %121 = vector.extract_strided_slice %120 {offsets = [0, 0], sizes = [2, 32], strides = [1, 1]} : vector<2x64xf32> to vector<2x32xf32>
    %c0_65 = arith.constant 0 : index
    %c2 = arith.constant 2 : index
    %c0_66 = arith.constant 0 : index
    %122 = vector.load %arg26[%c0_65, %c2, %c0_66] : memref<2x8x64xf32, #tpu.memory_space<vmem>>, vector<2x1x32xf32>
    %123 = vector.shape_cast %122 : vector<2x1x32xf32> to vector<2x32xf32>
    %124 = vector.shape_cast %121 : vector<2x32xf32> to vector<2x1x32xf32>
    tpu.vector_store %arg26[%c0_65, %c2, %c0_66], %124 {strides = array<i32>} : memref<2x8x64xf32, #tpu.memory_space<vmem>>, vector<2x1x32xf32>,
    %125 = vector.extract_strided_slice %120 {offsets = [0, 32], sizes = [2, 32], strides = [1, 1]} : vector<2x64xf32> to vector<2x32xf32>
    %c0_67 = arith.constant 0 : index
    %c5 = arith.constant 5 : index
    %c32_68 = arith.constant 32 : index
    %126 = vector.load %arg26[%c0_67, %c5, %c32_68] : memref<2x8x64xf32, #tpu.memory_space<vmem>>, vector<2x1x32xf32>
    %127 = vector.shape_cast %126 : vector<2x1x32xf32> to vector<2x32xf32>
    %128 = vector.shape_cast %125 : vector<2x32xf32> to vector<2x1x32xf32>
    tpu.vector_store %arg26[%c0_67, %c5, %c32_68], %128 {strides = array<i32>} : memref<2x8x64xf32, #tpu.memory_space<vmem>>, vector<2x1x32xf32>,
    %129 = arith.truncf %120 : vector<2x64xf32> to vector<2x64xbf16>
    %cst_69 = arith.constant dense<0.000000e+00> : vector<2x256xf32>
    %130 = tpu.matmul %129, %2, %cst_69 {dimension_numbers = #tpu.dot_dimension_numbers<[1], [0], [0], [1], [0, 0, 1, 1], [], []>} : vector<2x64xbf16>, vector<64x256xbf16>, vector<2x256xf32> -> vector<2x256xf32>
    %131 = vector.extract_strided_slice %30 {offsets = [0, 3, 0], sizes = [2, 1, 256], strides = [1, 1, 1]} : vector<2x8x256xf32> to vector<2x1x256xf32>
    %132 = vector.shape_cast %131 : vector<2x1x256xf32> to vector<2x256xf32>
    %133 = arith.addf %130, %132 : vector<2x256xf32>
    %134 = vector.extract_strided_slice %33 {offsets = [0, 4, 0], sizes = [2, 1, 256], strides = [1, 1, 1]} : vector<2x8x256xf32> to vector<2x1x256xf32>
    %135 = vector.shape_cast %134 : vector<2x1x256xf32> to vector<2x256xf32>
    %136 = arith.addf %133, %135 : vector<2x256xf32>
    %137 = arith.negf %136 : vector<2x256xf32>
    %138 = math.exp %137 : vector<2x256xf32>
    %cst_70 = arith.constant 1.000000e+00 : f32
    %139 = vector.broadcast %cst_70 : f32 to vector<2x256xf32>
    %140 = arith.addf %139, %138 : vector<2x256xf32>
    %141 = arith.divf %139, %140 : vector<2x256xf32>
    %142 = math.tanh %136 : vector<2x256xf32>
    %143 = vector.extract_strided_slice %141 {offsets = [0, 0], sizes = [2, 64], strides = [1, 1]} : vector<2x256xf32> to vector<2x64xf32>
    %144 = vector.extract_strided_slice %141 {offsets = [0, 64], sizes = [2, 64], strides = [1, 1]} : vector<2x256xf32> to vector<2x64xf32>
    %145 = vector.extract_strided_slice %142 {offsets = [0, 128], sizes = [2, 64], strides = [1, 1]} : vector<2x256xf32> to vector<2x64xf32>
    %146 = vector.extract_strided_slice %141 {offsets = [0, 192], sizes = [2, 64], strides = [1, 1]} : vector<2x256xf32> to vector<2x64xf32>
    %147 = arith.mulf %144, %118 : vector<2x64xf32>
    %148 = arith.mulf %143, %145 : vector<2x64xf32>
    %149 = arith.addf %147, %148 : vector<2x64xf32>
    %150 = math.tanh %149 : vector<2x64xf32>
    %151 = arith.mulf %146, %150 : vector<2x64xf32>
    %152 = vector.extract_strided_slice %151 {offsets = [0, 0], sizes = [2, 32], strides = [1, 1]} : vector<2x64xf32> to vector<2x32xf32>
    %c0_71 = arith.constant 0 : index
    %c3 = arith.constant 3 : index
    %c0_72 = arith.constant 0 : index
    %153 = vector.load %arg26[%c0_71, %c3, %c0_72] : memref<2x8x64xf32, #tpu.memory_space<vmem>>, vector<2x1x32xf32>
    %154 = vector.shape_cast %153 : vector<2x1x32xf32> to vector<2x32xf32>
    %155 = vector.shape_cast %152 : vector<2x32xf32> to vector<2x1x32xf32>
    tpu.vector_store %arg26[%c0_71, %c3, %c0_72], %155 {strides = array<i32>} : memref<2x8x64xf32, #tpu.memory_space<vmem>>, vector<2x1x32xf32>,
    %156 = vector.extract_strided_slice %151 {offsets = [0, 32], sizes = [2, 32], strides = [1, 1]} : vector<2x64xf32> to vector<2x32xf32>
    %c0_73 = arith.constant 0 : index
    %c4 = arith.constant 4 : index
    %c32_74 = arith.constant 32 : index
    %157 = vector.load %arg26[%c0_73, %c4, %c32_74] : memref<2x8x64xf32, #tpu.memory_space<vmem>>, vector<2x1x32xf32>
    %158 = vector.shape_cast %157 : vector<2x1x32xf32> to vector<2x32xf32>
    %159 = vector.shape_cast %156 : vector<2x32xf32> to vector<2x1x32xf32>
    tpu.vector_store %arg26[%c0_73, %c4, %c32_74], %159 {strides = array<i32>} : memref<2x8x64xf32, #tpu.memory_space<vmem>>, vector<2x1x32xf32>,
    %160 = arith.truncf %151 : vector<2x64xf32> to vector<2x64xbf16>
    %cst_75 = arith.constant dense<0.000000e+00> : vector<2x256xf32>
    %161 = tpu.matmul %160, %2, %cst_75 {dimension_numbers = #tpu.dot_dimension_numbers<[1], [0], [0], [1], [0, 0, 1, 1], [], []>} : vector<2x64xbf16>, vector<64x256xbf16>, vector<2x256xf32> -> vector<2x256xf32>
    %162 = vector.extract_strided_slice %30 {offsets = [0, 4, 0], sizes = [2, 1, 256], strides = [1, 1, 1]} : vector<2x8x256xf32> to vector<2x1x256xf32>
    %163 = vector.shape_cast %162 : vector<2x1x256xf32> to vector<2x256xf32>
    %164 = arith.addf %161, %163 : vector<2x256xf32>
    %165 = vector.extract_strided_slice %33 {offsets = [0, 3, 0], sizes = [2, 1, 256], strides = [1, 1, 1]} : vector<2x8x256xf32> to vector<2x1x256xf32>
    %166 = vector.shape_cast %165 : vector<2x1x256xf32> to vector<2x256xf32>
    %167 = arith.addf %164, %166 : vector<2x256xf32>
    %168 = arith.negf %167 : vector<2x256xf32>
    %169 = math.exp %168 : vector<2x256xf32>
    %cst_76 = arith.constant 1.000000e+00 : f32
    %170 = vector.broadcast %cst_76 : f32 to vector<2x256xf32>
    %171 = arith.addf %170, %169 : vector<2x256xf32>
    %172 = arith.divf %170, %171 : vector<2x256xf32>
    %173 = math.tanh %167 : vector<2x256xf32>
    %174 = vector.extract_strided_slice %172 {offsets = [0, 0], sizes = [2, 64], strides = [1, 1]} : vector<2x256xf32> to vector<2x64xf32>
    %175 = vector.extract_strided_slice %172 {offsets = [0, 64], sizes = [2, 64], strides = [1, 1]} : vector<2x256xf32> to vector<2x64xf32>
    %176 = vector.extract_strided_slice %173 {offsets = [0, 128], sizes = [2, 64], strides = [1, 1]} : vector<2x256xf32> to vector<2x64xf32>
    %177 = vector.extract_strided_slice %172 {offsets = [0, 192], sizes = [2, 64], strides = [1, 1]} : vector<2x256xf32> to vector<2x64xf32>
    %178 = arith.mulf %175, %149 : vector<2x64xf32>
    %179 = arith.mulf %174, %176 : vector<2x64xf32>
    %180 = arith.addf %178, %179 : vector<2x64xf32>
    %181 = math.tanh %180 : vector<2x64xf32>
    %182 = arith.mulf %177, %181 : vector<2x64xf32>
    %183 = vector.extract_strided_slice %182 {offsets = [0, 0], sizes = [2, 32], strides = [1, 1]} : vector<2x64xf32> to vector<2x32xf32>
    %c0_77 = arith.constant 0 : index
    %c4_78 = arith.constant 4 : index
    %c0_79 = arith.constant 0 : index
    %184 = vector.load %arg26[%c0_77, %c4_78, %c0_79] : memref<2x8x64xf32, #tpu.memory_space<vmem>>, vector<2x1x32xf32>
    %185 = vector.shape_cast %184 : vector<2x1x32xf32> to vector<2x32xf32>
    %186 = vector.shape_cast %183 : vector<2x32xf32> to vector<2x1x32xf32>
    tpu.vector_store %arg26[%c0_77, %c4_78, %c0_79], %186 {strides = array<i32>} : memref<2x8x64xf32, #tpu.memory_space<vmem>>, vector<2x1x32xf32>,
    %187 = vector.extract_strided_slice %182 {offsets = [0, 32], sizes = [2, 32], strides = [1, 1]} : vector<2x64xf32> to vector<2x32xf32>
    %c0_80 = arith.constant 0 : index
    %c3_81 = arith.constant 3 : index
    %c32_82 = arith.constant 32 : index
    %188 = vector.load %arg26[%c0_80, %c3_81, %c32_82] : memref<2x8x64xf32, #tpu.memory_space<vmem>>, vector<2x1x32xf32>
    %189 = vector.shape_cast %188 : vector<2x1x32xf32> to vector<2x32xf32>
    %190 = vector.shape_cast %187 : vector<2x32xf32> to vector<2x1x32xf32>
    tpu.vector_store %arg26[%c0_80, %c3_81, %c32_82], %190 {strides = array<i32>} : memref<2x8x64xf32, #tpu.memory_space<vmem>>, vector<2x1x32xf32>,
    %191 = arith.truncf %182 : vector<2x64xf32> to vector<2x64xbf16>
    %cst_83 = arith.constant dense<0.000000e+00> : vector<2x256xf32>
    %192 = tpu.matmul %191, %2, %cst_83 {dimension_numbers = #tpu.dot_dimension_numbers<[1], [0], [0], [1], [0, 0, 1, 1], [], []>} : vector<2x64xbf16>, vector<64x256xbf16>, vector<2x256xf32> -> vector<2x256xf32>
    %193 = vector.extract_strided_slice %30 {offsets = [0, 5, 0], sizes = [2, 1, 256], strides = [1, 1, 1]} : vector<2x8x256xf32> to vector<2x1x256xf32>
    %194 = vector.shape_cast %193 : vector<2x1x256xf32> to vector<2x256xf32>
    %195 = arith.addf %192, %194 : vector<2x256xf32>
    %196 = vector.extract_strided_slice %33 {offsets = [0, 2, 0], sizes = [2, 1, 256], strides = [1, 1, 1]} : vector<2x8x256xf32> to vector<2x1x256xf32>
    %197 = vector.shape_cast %196 : vector<2x1x256xf32> to vector<2x256xf32>
    %198 = arith.addf %195, %197 : vector<2x256xf32>
    %199 = arith.negf %198 : vector<2x256xf32>
    %200 = math.exp %199 : vector<2x256xf32>
    %cst_84 = arith.constant 1.000000e+00 : f32
    %201 = vector.broadcast %cst_84 : f32 to vector<2x256xf32>
    %202 = arith.addf %201, %200 : vector<2x256xf32>
    %203 = arith.divf %201, %202 : vector<2x256xf32>
    %204 = math.tanh %198 : vector<2x256xf32>
    %205 = vector.extract_strided_slice %203 {offsets = [0, 0], sizes = [2, 64], strides = [1, 1]} : vector<2x256xf32> to vector<2x64xf32>
    %206 = vector.extract_strided_slice %203 {offsets = [0, 64], sizes = [2, 64], strides = [1, 1]} : vector<2x256xf32> to vector<2x64xf32>
    %207 = vector.extract_strided_slice %204 {offsets = [0, 128], sizes = [2, 64], strides = [1, 1]} : vector<2x256xf32> to vector<2x64xf32>
    %208 = vector.extract_strided_slice %203 {offsets = [0, 192], sizes = [2, 64], strides = [1, 1]} : vector<2x256xf32> to vector<2x64xf32>
    %209 = arith.mulf %206, %180 : vector<2x64xf32>
    %210 = arith.mulf %205, %207 : vector<2x64xf32>
    %211 = arith.addf %209, %210 : vector<2x64xf32>
    %212 = math.tanh %211 : vector<2x64xf32>
    %213 = arith.mulf %208, %212 : vector<2x64xf32>
    %214 = vector.extract_strided_slice %213 {offsets = [0, 0], sizes = [2, 32], strides = [1, 1]} : vector<2x64xf32> to vector<2x32xf32>
    %c0_85 = arith.constant 0 : index
    %c5_86 = arith.constant 5 : index
    %c0_87 = arith.constant 0 : index
    %215 = vector.load %arg26[%c0_85, %c5_86, %c0_87] : memref<2x8x64xf32, #tpu.memory_space<vmem>>, vector<2x1x32xf32>
    %216 = vector.shape_cast %215 : vector<2x1x32xf32> to vector<2x32xf32>
    %217 = vector.shape_cast %214 : vector<2x32xf32> to vector<2x1x32xf32>
    tpu.vector_store %arg26[%c0_85, %c5_86, %c0_87], %217 {strides = array<i32>} : memref<2x8x64xf32, #tpu.memory_space<vmem>>, vector<2x1x32xf32>,
    %218 = vector.extract_strided_slice %213 {offsets = [0, 32], sizes = [2, 32], strides = [1, 1]} : vector<2x64xf32> to vector<2x32xf32>
    %c0_88 = arith.constant 0 : index
    %c2_89 = arith.constant 2 : index
    %c32_90 = arith.constant 32 : index
    %219 = vector.load %arg26[%c0_88, %c2_89, %c32_90] : memref<2x8x64xf32, #tpu.memory_space<vmem>>, vector<2x1x32xf32>
    %220 = vector.shape_cast %219 : vector<2x1x32xf32> to vector<2x32xf32>
    %221 = vector.shape_cast %218 : vector<2x32xf32> to vector<2x1x32xf32>
    tpu.vector_store %arg26[%c0_88, %c2_89, %c32_90], %221 {strides = array<i32>} : memref<2x8x64xf32, #tpu.memory_space<vmem>>, vector<2x1x32xf32>,
    %222 = arith.truncf %213 : vector<2x64xf32> to vector<2x64xbf16>
    %cst_91 = arith.constant dense<0.000000e+00> : vector<2x256xf32>
    %223 = tpu.matmul %222, %2, %cst_91 {dimension_numbers = #tpu.dot_dimension_numbers<[1], [0], [0], [1], [0, 0, 1, 1], [], []>} : vector<2x64xbf16>, vector<64x256xbf16>, vector<2x256xf32> -> vector<2x256xf32>
    %224 = vector.extract_strided_slice %30 {offsets = [0, 6, 0], sizes = [2, 1, 256], strides = [1, 1, 1]} : vector<2x8x256xf32> to vector<2x1x256xf32>
    %225 = vector.shape_cast %224 : vector<2x1x256xf32> to vector<2x256xf32>
    %226 = arith.addf %223, %225 : vector<2x256xf32>
    %227 = vector.extract_strided_slice %33 {offsets = [0, 1, 0], sizes = [2, 1, 256], strides = [1, 1, 1]} : vector<2x8x256xf32> to vector<2x1x256xf32>
    %228 = vector.shape_cast %227 : vector<2x1x256xf32> to vector<2x256xf32>
    %229 = arith.addf %226, %228 : vector<2x256xf32>
    %230 = arith.negf %229 : vector<2x256xf32>
    %231 = math.exp %230 : vector<2x256xf32>
    %cst_92 = arith.constant 1.000000e+00 : f32
    %232 = vector.broadcast %cst_92 : f32 to vector<2x256xf32>
    %233 = arith.addf %232, %231 : vector<2x256xf32>
    %234 = arith.divf %232, %233 : vector<2x256xf32>
    %235 = math.tanh %229 : vector<2x256xf32>
    %236 = vector.extract_strided_slice %234 {offsets = [0, 0], sizes = [2, 64], strides = [1, 1]} : vector<2x256xf32> to vector<2x64xf32>
    %237 = vector.extract_strided_slice %234 {offsets = [0, 64], sizes = [2, 64], strides = [1, 1]} : vector<2x256xf32> to vector<2x64xf32>
    %238 = vector.extract_strided_slice %235 {offsets = [0, 128], sizes = [2, 64], strides = [1, 1]} : vector<2x256xf32> to vector<2x64xf32>
    %239 = vector.extract_strided_slice %234 {offsets = [0, 192], sizes = [2, 64], strides = [1, 1]} : vector<2x256xf32> to vector<2x64xf32>
    %240 = arith.mulf %237, %211 : vector<2x64xf32>
    %241 = arith.mulf %236, %238 : vector<2x64xf32>
    %242 = arith.addf %240, %241 : vector<2x64xf32>
    %243 = math.tanh %242 : vector<2x64xf32>
    %244 = arith.mulf %239, %243 : vector<2x64xf32>
    %245 = vector.extract_strided_slice %244 {offsets = [0, 0], sizes = [2, 32], strides = [1, 1]} : vector<2x64xf32> to vector<2x32xf32>
    %c0_93 = arith.constant 0 : index
    %c6_94 = arith.constant 6 : index
    %c0_95 = arith.constant 0 : index
    %246 = vector.load %arg26[%c0_93, %c6_94, %c0_95] : memref<2x8x64xf32, #tpu.memory_space<vmem>>, vector<2x1x32xf32>
    %247 = vector.shape_cast %246 : vector<2x1x32xf32> to vector<2x32xf32>
    %248 = vector.shape_cast %245 : vector<2x32xf32> to vector<2x1x32xf32>
    tpu.vector_store %arg26[%c0_93, %c6_94, %c0_95], %248 {strides = array<i32>} : memref<2x8x64xf32, #tpu.memory_space<vmem>>, vector<2x1x32xf32>,
    %249 = vector.extract_strided_slice %244 {offsets = [0, 32], sizes = [2, 32], strides = [1, 1]} : vector<2x64xf32> to vector<2x32xf32>
    %c0_96 = arith.constant 0 : index
    %c1_97 = arith.constant 1 : index
    %c32_98 = arith.constant 32 : index
    %250 = vector.load %arg26[%c0_96, %c1_97, %c32_98] : memref<2x8x64xf32, #tpu.memory_space<vmem>>, vector<2x1x32xf32>
    %251 = vector.shape_cast %250 : vector<2x1x32xf32> to vector<2x32xf32>
    %252 = vector.shape_cast %249 : vector<2x32xf32> to vector<2x1x32xf32>
    tpu.vector_store %arg26[%c0_96, %c1_97, %c32_98], %252 {strides = array<i32>} : memref<2x8x64xf32, #tpu.memory_space<vmem>>, vector<2x1x32xf32>,
    %253 = arith.truncf %244 : vector<2x64xf32> to vector<2x64xbf16>
    %cst_99 = arith.constant dense<0.000000e+00> : vector<2x256xf32>
    %254 = tpu.matmul %253, %2, %cst_99 {dimension_numbers = #tpu.dot_dimension_numbers<[1], [0], [0], [1], [0, 0, 1, 1], [], []>} : vector<2x64xbf16>, vector<64x256xbf16>, vector<2x256xf32> -> vector<2x256xf32>
    %255 = vector.extract_strided_slice %30 {offsets = [0, 7, 0], sizes = [2, 1, 256], strides = [1, 1, 1]} : vector<2x8x256xf32> to vector<2x1x256xf32>
    %256 = vector.shape_cast %255 : vector<2x1x256xf32> to vector<2x256xf32>
    %257 = arith.addf %254, %256 : vector<2x256xf32>
    %258 = vector.extract_strided_slice %33 {offsets = [0, 0, 0], sizes = [2, 1, 256], strides = [1, 1, 1]} : vector<2x8x256xf32> to vector<2x1x256xf32>
    %259 = vector.shape_cast %258 : vector<2x1x256xf32> to vector<2x256xf32>
    %260 = arith.addf %257, %259 : vector<2x256xf32>
    %261 = arith.negf %260 : vector<2x256xf32>
    %262 = math.exp %261 : vector<2x256xf32>
    %cst_100 = arith.constant 1.000000e+00 : f32
    %263 = vector.broadcast %cst_100 : f32 to vector<2x256xf32>
    %264 = arith.addf %263, %262 : vector<2x256xf32>
    %265 = arith.divf %263, %264 : vector<2x256xf32>
    %266 = math.tanh %260 : vector<2x256xf32>
    %267 = vector.extract_strided_slice %265 {offsets = [0, 0], sizes = [2, 64], strides = [1, 1]} : vector<2x256xf32> to vector<2x64xf32>
    %268 = vector.extract_strided_slice %265 {offsets = [0, 64], sizes = [2, 64], strides = [1, 1]} : vector<2x256xf32> to vector<2x64xf32>
    %269 = vector.extract_strided_slice %266 {offsets = [0, 128], sizes = [2, 64], strides = [1, 1]} : vector<2x256xf32> to vector<2x64xf32>
    %270 = vector.extract_strided_slice %265 {offsets = [0, 192], sizes = [2, 64], strides = [1, 1]} : vector<2x256xf32> to vector<2x64xf32>
    %271 = arith.mulf %268, %242 : vector<2x64xf32>
    %272 = arith.mulf %267, %269 : vector<2x64xf32>
    %273 = arith.addf %271, %272 : vector<2x64xf32>
    %274 = math.tanh %273 : vector<2x64xf32>
    %275 = arith.mulf %270, %274 : vector<2x64xf32>
    %276 = vector.extract_strided_slice %275 {offsets = [0, 0], sizes = [2, 32], strides = [1, 1]} : vector<2x64xf32> to vector<2x32xf32>
    %c0_101 = arith.constant 0 : index
    %c7_102 = arith.constant 7 : index
    %c0_103 = arith.constant 0 : index
    %277 = vector.load %arg26[%c0_101, %c7_102, %c0_103] : memref<2x8x64xf32, #tpu.memory_space<vmem>>, vector<2x1x32xf32>
    %278 = vector.shape_cast %277 : vector<2x1x32xf32> to vector<2x32xf32>
    %279 = vector.shape_cast %276 : vector<2x32xf32> to vector<2x1x32xf32>
    tpu.vector_store %arg26[%c0_101, %c7_102, %c0_103], %279 {strides = array<i32>} : memref<2x8x64xf32, #tpu.memory_space<vmem>>, vector<2x1x32xf32>,
    %280 = vector.extract_strided_slice %275 {offsets = [0, 32], sizes = [2, 32], strides = [1, 1]} : vector<2x64xf32> to vector<2x32xf32>
    %c0_104 = arith.constant 0 : index
    %c0_105 = arith.constant 0 : index
    %c32_106 = arith.constant 32 : index
    %281 = vector.load %arg26[%c0_104, %c0_105, %c32_106] : memref<2x8x64xf32, #tpu.memory_space<vmem>>, vector<2x1x32xf32>
    %282 = vector.shape_cast %281 : vector<2x1x32xf32> to vector<2x32xf32>
    %283 = vector.shape_cast %280 : vector<2x32xf32> to vector<2x1x32xf32>
    tpu.vector_store %arg26[%c0_104, %c0_105, %c32_106], %283 {strides = array<i32>} : memref<2x8x64xf32, #tpu.memory_space<vmem>>, vector<2x1x32xf32>,
    %c0_107 = arith.constant 0 : index
    %c0_108 = arith.constant 0 : index
    %c0_109 = arith.constant 0 : index
    %284 = vector.load %arg26[%c0_107, %c0_108, %c0_109] : memref<2x8x64xf32, #tpu.memory_space<vmem>>, vector<2x8x64xf32>
    %285 = vector.shape_cast %284 : vector<2x8x64xf32> to vector<16x64xf32>
    %286 = arith.truncf %285 : vector<16x64xf32> to vector<16x64xbf16>
    %cst_110 = arith.constant dense<0.000000e+00> : vector<16x256xf32>
    %287 = tpu.matmul %286, %4, %cst_110 {dimension_numbers = #tpu.dot_dimension_numbers<[1], [0], [0], [1], [0, 0, 1, 1], [], []>} : vector<16x64xbf16>, vector<64x256xbf16>, vector<16x256xf32> -> vector<16x256xf32>
    %288 = vector.shape_cast %287 : vector<16x256xf32> to vector<2x8x256xf32>
    %289 = vector.shape_cast %7 : vector<1x256xf32> to vector<1x1x256xf32>
    %290 = vector.broadcast %289 : vector<1x1x256xf32> to vector<2x8x256xf32>
    %291 = arith.addf %288, %290 : vector<2x8x256xf32>
    %292 = arith.truncf %285 : vector<16x64xf32> to vector<16x64xbf16>
    %cst_111 = arith.constant dense<0.000000e+00> : vector<16x256xf32>
    %293 = tpu.matmul %292, %5, %cst_111 {dimension_numbers = #tpu.dot_dimension_numbers<[1], [0], [0], [1], [0, 0, 1, 1], [], []>} : vector<16x64xbf16>, vector<64x256xbf16>, vector<16x256xf32> -> vector<16x256xf32>
    %294 = vector.shape_cast %293 : vector<16x256xf32> to vector<2x8x256xf32>
    %cst_112 = arith.constant 0.000000e+00 : f32
    %295 = vector.broadcast %cst_112 : f32 to vector<2x64xf32>
    %cst_113 = arith.constant 0.000000e+00 : f32
    %296 = vector.broadcast %cst_113 : f32 to vector<2x64xf32>
    %297 = arith.truncf %295 : vector<2x64xf32> to vector<2x64xbf16>
    %cst_114 = arith.constant dense<0.000000e+00> : vector<2x256xf32>
    %298 = tpu.matmul %297, %6, %cst_114 {dimension_numbers = #tpu.dot_dimension_numbers<[1], [0], [0], [1], [0, 0, 1, 1], [], []>} : vector<2x64xbf16>, vector<64x256xbf16>, vector<2x256xf32> -> vector<2x256xf32>
    %299 = vector.extract_strided_slice %291 {offsets = [0, 0, 0], sizes = [2, 1, 256], strides = [1, 1, 1]} : vector<2x8x256xf32> to vector<2x1x256xf32>
    %300 = vector.shape_cast %299 : vector<2x1x256xf32> to vector<2x256xf32>
    %301 = arith.addf %298, %300 : vector<2x256xf32>
    %302 = vector.extract_strided_slice %294 {offsets = [0, 7, 0], sizes = [2, 1, 256], strides = [1, 1, 1]} : vector<2x8x256xf32> to vector<2x1x256xf32>
    %303 = vector.shape_cast %302 : vector<2x1x256xf32> to vector<2x256xf32>
    %304 = arith.addf %301, %303 : vector<2x256xf32>
    %305 = arith.negf %304 : vector<2x256xf32>
    %306 = math.exp %305 : vector<2x256xf32>
    %cst_115 = arith.constant 1.000000e+00 : f32
    %307 = vector.broadcast %cst_115 : f32 to vector<2x256xf32>
    %308 = arith.addf %307, %306 : vector<2x256xf32>
    %309 = arith.divf %307, %308 : vector<2x256xf32>
    %310 = math.tanh %304 : vector<2x256xf32>
    %311 = vector.extract_strided_slice %309 {offsets = [0, 0], sizes = [2, 64], strides = [1, 1]} : vector<2x256xf32> to vector<2x64xf32>
    %312 = vector.extract_strided_slice %309 {offsets = [0, 64], sizes = [2, 64], strides = [1, 1]} : vector<2x256xf32> to vector<2x64xf32>
    %313 = vector.extract_strided_slice %310 {offsets = [0, 128], sizes = [2, 64], strides = [1, 1]} : vector<2x256xf32> to vector<2x64xf32>
    %314 = vector.extract_strided_slice %309 {offsets = [0, 192], sizes = [2, 64], strides = [1, 1]} : vector<2x256xf32> to vector<2x64xf32>
    %315 = arith.mulf %312, %296 : vector<2x64xf32>
    %316 = arith.mulf %311, %313 : vector<2x64xf32>
    %317 = arith.addf %315, %316 : vector<2x64xf32>
    %318 = math.tanh %317 : vector<2x64xf32>
    %319 = arith.mulf %314, %318 : vector<2x64xf32>
    %320 = vector.extract_strided_slice %319 {offsets = [0, 0], sizes = [2, 32], strides = [1, 1]} : vector<2x64xf32> to vector<2x32xf32>
    %c0_116 = arith.constant 0 : index
    %c0_117 = arith.constant 0 : index
    %c0_118 = arith.constant 0 : index
    %321 = vector.load %arg26[%c0_116, %c0_117, %c0_118] : memref<2x8x64xf32, #tpu.memory_space<vmem>>, vector<2x1x32xf32>
    %322 = vector.shape_cast %321 : vector<2x1x32xf32> to vector<2x32xf32>
    %323 = vector.shape_cast %320 : vector<2x32xf32> to vector<2x1x32xf32>
    tpu.vector_store %arg26[%c0_116, %c0_117, %c0_118], %323 {strides = array<i32>} : memref<2x8x64xf32, #tpu.memory_space<vmem>>, vector<2x1x32xf32>,
    %324 = vector.extract_strided_slice %319 {offsets = [0, 32], sizes = [2, 32], strides = [1, 1]} : vector<2x64xf32> to vector<2x32xf32>
    %c0_119 = arith.constant 0 : index
    %c7_120 = arith.constant 7 : index
    %c32_121 = arith.constant 32 : index
    %325 = vector.load %arg26[%c0_119, %c7_120, %c32_121] : memref<2x8x64xf32, #tpu.memory_space<vmem>>, vector<2x1x32xf32>
    %326 = vector.shape_cast %325 : vector<2x1x32xf32> to vector<2x32xf32>
    %327 = vector.shape_cast %324 : vector<2x32xf32> to vector<2x1x32xf32>
    tpu.vector_store %arg26[%c0_119, %c7_120, %c32_121], %327 {strides = array<i32>} : memref<2x8x64xf32, #tpu.memory_space<vmem>>, vector<2x1x32xf32>,
    %328 = arith.truncf %319 : vector<2x64xf32> to vector<2x64xbf16>
    %cst_122 = arith.constant dense<0.000000e+00> : vector<2x256xf32>
    %329 = tpu.matmul %328, %6, %cst_122 {dimension_numbers = #tpu.dot_dimension_numbers<[1], [0], [0], [1], [0, 0, 1, 1], [], []>} : vector<2x64xbf16>, vector<64x256xbf16>, vector<2x256xf32> -> vector<2x256xf32>
    %330 = vector.extract_strided_slice %291 {offsets = [0, 1, 0], sizes = [2, 1, 256], strides = [1, 1, 1]} : vector<2x8x256xf32> to vector<2x1x256xf32>
    %331 = vector.shape_cast %330 : vector<2x1x256xf32> to vector<2x256xf32>
    %332 = arith.addf %329, %331 : vector<2x256xf32>
    %333 = vector.extract_strided_slice %294 {offsets = [0, 6, 0], sizes = [2, 1, 256], strides = [1, 1, 1]} : vector<2x8x256xf32> to vector<2x1x256xf32>
    %334 = vector.shape_cast %333 : vector<2x1x256xf32> to vector<2x256xf32>
    %335 = arith.addf %332, %334 : vector<2x256xf32>
    %336 = arith.negf %335 : vector<2x256xf32>
    %337 = math.exp %336 : vector<2x256xf32>
    %cst_123 = arith.constant 1.000000e+00 : f32
    %338 = vector.broadcast %cst_123 : f32 to vector<2x256xf32>
    %339 = arith.addf %338, %337 : vector<2x256xf32>
    %340 = arith.divf %338, %339 : vector<2x256xf32>
    %341 = math.tanh %335 : vector<2x256xf32>
    %342 = vector.extract_strided_slice %340 {offsets = [0, 0], sizes = [2, 64], strides = [1, 1]} : vector<2x256xf32> to vector<2x64xf32>
    %343 = vector.extract_strided_slice %340 {offsets = [0, 64], sizes = [2, 64], strides = [1, 1]} : vector<2x256xf32> to vector<2x64xf32>
    %344 = vector.extract_strided_slice %341 {offsets = [0, 128], sizes = [2, 64], strides = [1, 1]} : vector<2x256xf32> to vector<2x64xf32>
    %345 = vector.extract_strided_slice %340 {offsets = [0, 192], sizes = [2, 64], strides = [1, 1]} : vector<2x256xf32> to vector<2x64xf32>
    %346 = arith.mulf %343, %317 : vector<2x64xf32>
    %347 = arith.mulf %342, %344 : vector<2x64xf32>
    %348 = arith.addf %346, %347 : vector<2x64xf32>
    %349 = math.tanh %348 : vector<2x64xf32>
    %350 = arith.mulf %345, %349 : vector<2x64xf32>
    %351 = vector.extract_strided_slice %350 {offsets = [0, 0], sizes = [2, 32], strides = [1, 1]} : vector<2x64xf32> to vector<2x32xf32>
    %c0_124 = arith.constant 0 : index
    %c1_125 = arith.constant 1 : index
    %c0_126 = arith.constant 0 : index
    %352 = vector.load %arg26[%c0_124, %c1_125, %c0_126] : memref<2x8x64xf32, #tpu.memory_space<vmem>>, vector<2x1x32xf32>
    %353 = vector.shape_cast %352 : vector<2x1x32xf32> to vector<2x32xf32>
    %354 = vector.shape_cast %351 : vector<2x32xf32> to vector<2x1x32xf32>
    tpu.vector_store %arg26[%c0_124, %c1_125, %c0_126], %354 {strides = array<i32>} : memref<2x8x64xf32, #tpu.memory_space<vmem>>, vector<2x1x32xf32>,
    %355 = vector.extract_strided_slice %350 {offsets = [0, 32], sizes = [2, 32], strides = [1, 1]} : vector<2x64xf32> to vector<2x32xf32>
    %c0_127 = arith.constant 0 : index
    %c6_128 = arith.constant 6 : index
    %c32_129 = arith.constant 32 : index
    %356 = vector.load %arg26[%c0_127, %c6_128, %c32_129] : memref<2x8x64xf32, #tpu.memory_space<vmem>>, vector<2x1x32xf32>
    %357 = vector.shape_cast %356 : vector<2x1x32xf32> to vector<2x32xf32>
    %358 = vector.shape_cast %355 : vector<2x32xf32> to vector<2x1x32xf32>
    tpu.vector_store %arg26[%c0_127, %c6_128, %c32_129], %358 {strides = array<i32>} : memref<2x8x64xf32, #tpu.memory_space<vmem>>, vector<2x1x32xf32>,
    %359 = arith.truncf %350 : vector<2x64xf32> to vector<2x64xbf16>
    %cst_130 = arith.constant dense<0.000000e+00> : vector<2x256xf32>
    %360 = tpu.matmul %359, %6, %cst_130 {dimension_numbers = #tpu.dot_dimension_numbers<[1], [0], [0], [1], [0, 0, 1, 1], [], []>} : vector<2x64xbf16>, vector<64x256xbf16>, vector<2x256xf32> -> vector<2x256xf32>
    %361 = vector.extract_strided_slice %291 {offsets = [0, 2, 0], sizes = [2, 1, 256], strides = [1, 1, 1]} : vector<2x8x256xf32> to vector<2x1x256xf32>
    %362 = vector.shape_cast %361 : vector<2x1x256xf32> to vector<2x256xf32>
    %363 = arith.addf %360, %362 : vector<2x256xf32>
    %364 = vector.extract_strided_slice %294 {offsets = [0, 5, 0], sizes = [2, 1, 256], strides = [1, 1, 1]} : vector<2x8x256xf32> to vector<2x1x256xf32>
    %365 = vector.shape_cast %364 : vector<2x1x256xf32> to vector<2x256xf32>
    %366 = arith.addf %363, %365 : vector<2x256xf32>
    %367 = arith.negf %366 : vector<2x256xf32>
    %368 = math.exp %367 : vector<2x256xf32>
    %cst_131 = arith.constant 1.000000e+00 : f32
    %369 = vector.broadcast %cst_131 : f32 to vector<2x256xf32>
    %370 = arith.addf %369, %368 : vector<2x256xf32>
    %371 = arith.divf %369, %370 : vector<2x256xf32>
    %372 = math.tanh %366 : vector<2x256xf32>
    %373 = vector.extract_strided_slice %371 {offsets = [0, 0], sizes = [2, 64], strides = [1, 1]} : vector<2x256xf32> to vector<2x64xf32>
    %374 = vector.extract_strided_slice %371 {offsets = [0, 64], sizes = [2, 64], strides = [1, 1]} : vector<2x256xf32> to vector<2x64xf32>
    %375 = vector.extract_strided_slice %372 {offsets = [0, 128], sizes = [2, 64], strides = [1, 1]} : vector<2x256xf32> to vector<2x64xf32>
    %376 = vector.extract_strided_slice %371 {offsets = [0, 192], sizes = [2, 64], strides = [1, 1]} : vector<2x256xf32> to vector<2x64xf32>
    %377 = arith.mulf %374, %348 : vector<2x64xf32>
    %378 = arith.mulf %373, %375 : vector<2x64xf32>
    %379 = arith.addf %377, %378 : vector<2x64xf32>
    %380 = math.tanh %379 : vector<2x64xf32>
    %381 = arith.mulf %376, %380 : vector<2x64xf32>
    %382 = vector.extract_strided_slice %381 {offsets = [0, 0], sizes = [2, 32], strides = [1, 1]} : vector<2x64xf32> to vector<2x32xf32>
    %c0_132 = arith.constant 0 : index
    %c2_133 = arith.constant 2 : index
    %c0_134 = arith.constant 0 : index
    %383 = vector.load %arg26[%c0_132, %c2_133, %c0_134] : memref<2x8x64xf32, #tpu.memory_space<vmem>>, vector<2x1x32xf32>
    %384 = vector.shape_cast %383 : vector<2x1x32xf32> to vector<2x32xf32>
    %385 = vector.shape_cast %382 : vector<2x32xf32> to vector<2x1x32xf32>
    tpu.vector_store %arg26[%c0_132, %c2_133, %c0_134], %385 {strides = array<i32>} : memref<2x8x64xf32, #tpu.memory_space<vmem>>, vector<2x1x32xf32>,
    %386 = vector.extract_strided_slice %381 {offsets = [0, 32], sizes = [2, 32], strides = [1, 1]} : vector<2x64xf32> to vector<2x32xf32>
    %c0_135 = arith.constant 0 : index
    %c5_136 = arith.constant 5 : index
    %c32_137 = arith.constant 32 : index
    %387 = vector.load %arg26[%c0_135, %c5_136, %c32_137] : memref<2x8x64xf32, #tpu.memory_space<vmem>>, vector<2x1x32xf32>
    %388 = vector.shape_cast %387 : vector<2x1x32xf32> to vector<2x32xf32>
    %389 = vector.shape_cast %386 : vector<2x32xf32> to vector<2x1x32xf32>
    tpu.vector_store %arg26[%c0_135, %c5_136, %c32_137], %389 {strides = array<i32>} : memref<2x8x64xf32, #tpu.memory_space<vmem>>, vector<2x1x32xf32>,
    %390 = arith.truncf %381 : vector<2x64xf32> to vector<2x64xbf16>
    %cst_138 = arith.constant dense<0.000000e+00> : vector<2x256xf32>
    %391 = tpu.matmul %390, %6, %cst_138 {dimension_numbers = #tpu.dot_dimension_numbers<[1], [0], [0], [1], [0, 0, 1, 1], [], []>} : vector<2x64xbf16>, vector<64x256xbf16>, vector<2x256xf32> -> vector<2x256xf32>
    %392 = vector.extract_strided_slice %291 {offsets = [0, 3, 0], sizes = [2, 1, 256], strides = [1, 1, 1]} : vector<2x8x256xf32> to vector<2x1x256xf32>
    %393 = vector.shape_cast %392 : vector<2x1x256xf32> to vector<2x256xf32>
    %394 = arith.addf %391, %393 : vector<2x256xf32>
    %395 = vector.extract_strided_slice %294 {offsets = [0, 4, 0], sizes = [2, 1, 256], strides = [1, 1, 1]} : vector<2x8x256xf32> to vector<2x1x256xf32>
    %396 = vector.shape_cast %395 : vector<2x1x256xf32> to vector<2x256xf32>
    %397 = arith.addf %394, %396 : vector<2x256xf32>
    %398 = arith.negf %397 : vector<2x256xf32>
    %399 = math.exp %398 : vector<2x256xf32>
    %cst_139 = arith.constant 1.000000e+00 : f32
    %400 = vector.broadcast %cst_139 : f32 to vector<2x256xf32>
    %401 = arith.addf %400, %399 : vector<2x256xf32>
    %402 = arith.divf %400, %401 : vector<2x256xf32>
    %403 = math.tanh %397 : vector<2x256xf32>
    %404 = vector.extract_strided_slice %402 {offsets = [0, 0], sizes = [2, 64], strides = [1, 1]} : vector<2x256xf32> to vector<2x64xf32>
    %405 = vector.extract_strided_slice %402 {offsets = [0, 64], sizes = [2, 64], strides = [1, 1]} : vector<2x256xf32> to vector<2x64xf32>
    %406 = vector.extract_strided_slice %403 {offsets = [0, 128], sizes = [2, 64], strides = [1, 1]} : vector<2x256xf32> to vector<2x64xf32>
    %407 = vector.extract_strided_slice %402 {offsets = [0, 192], sizes = [2, 64], strides = [1, 1]} : vector<2x256xf32> to vector<2x64xf32>
    %408 = arith.mulf %405, %379 : vector<2x64xf32>
    %409 = arith.mulf %404, %406 : vector<2x64xf32>
    %410 = arith.addf %408, %409 : vector<2x64xf32>
    %411 = math.tanh %410 : vector<2x64xf32>
    %412 = arith.mulf %407, %411 : vector<2x64xf32>
    %413 = vector.extract_strided_slice %412 {offsets = [0, 0], sizes = [2, 32], strides = [1, 1]} : vector<2x64xf32> to vector<2x32xf32>
    %c0_140 = arith.constant 0 : index
    %c3_141 = arith.constant 3 : index
    %c0_142 = arith.constant 0 : index
    %414 = vector.load %arg26[%c0_140, %c3_141, %c0_142] : memref<2x8x64xf32, #tpu.memory_space<vmem>>, vector<2x1x32xf32>
    %415 = vector.shape_cast %414 : vector<2x1x32xf32> to vector<2x32xf32>
    %416 = vector.shape_cast %413 : vector<2x32xf32> to vector<2x1x32xf32>
    tpu.vector_store %arg26[%c0_140, %c3_141, %c0_142], %416 {strides = array<i32>} : memref<2x8x64xf32, #tpu.memory_space<vmem>>, vector<2x1x32xf32>,
    %417 = vector.extract_strided_slice %412 {offsets = [0, 32], sizes = [2, 32], strides = [1, 1]} : vector<2x64xf32> to vector<2x32xf32>
    %c0_143 = arith.constant 0 : index
    %c4_144 = arith.constant 4 : index
    %c32_145 = arith.constant 32 : index
    %418 = vector.load %arg26[%c0_143, %c4_144, %c32_145] : memref<2x8x64xf32, #tpu.memory_space<vmem>>, vector<2x1x32xf32>
    %419 = vector.shape_cast %418 : vector<2x1x32xf32> to vector<2x32xf32>
    %420 = vector.shape_cast %417 : vector<2x32xf32> to vector<2x1x32xf32>
    tpu.vector_store %arg26[%c0_143, %c4_144, %c32_145], %420 {strides = array<i32>} : memref<2x8x64xf32, #tpu.memory_space<vmem>>, vector<2x1x32xf32>,
    %421 = arith.truncf %412 : vector<2x64xf32> to vector<2x64xbf16>
    %cst_146 = arith.constant dense<0.000000e+00> : vector<2x256xf32>
    %422 = tpu.matmul %421, %6, %cst_146 {dimension_numbers = #tpu.dot_dimension_numbers<[1], [0], [0], [1], [0, 0, 1, 1], [], []>} : vector<2x64xbf16>, vector<64x256xbf16>, vector<2x256xf32> -> vector<2x256xf32>
    %423 = vector.extract_strided_slice %291 {offsets = [0, 4, 0], sizes = [2, 1, 256], strides = [1, 1, 1]} : vector<2x8x256xf32> to vector<2x1x256xf32>
    %424 = vector.shape_cast %423 : vector<2x1x256xf32> to vector<2x256xf32>
    %425 = arith.addf %422, %424 : vector<2x256xf32>
    %426 = vector.extract_strided_slice %294 {offsets = [0, 3, 0], sizes = [2, 1, 256], strides = [1, 1, 1]} : vector<2x8x256xf32> to vector<2x1x256xf32>
    %427 = vector.shape_cast %426 : vector<2x1x256xf32> to vector<2x256xf32>
    %428 = arith.addf %425, %427 : vector<2x256xf32>
    %429 = arith.negf %428 : vector<2x256xf32>
    %430 = math.exp %429 : vector<2x256xf32>
    %cst_147 = arith.constant 1.000000e+00 : f32
    %431 = vector.broadcast %cst_147 : f32 to vector<2x256xf32>
    %432 = arith.addf %431, %430 : vector<2x256xf32>
    %433 = arith.divf %431, %432 : vector<2x256xf32>
    %434 = math.tanh %428 : vector<2x256xf32>
    %435 = vector.extract_strided_slice %433 {offsets = [0, 0], sizes = [2, 64], strides = [1, 1]} : vector<2x256xf32> to vector<2x64xf32>
    %436 = vector.extract_strided_slice %433 {offsets = [0, 64], sizes = [2, 64], strides = [1, 1]} : vector<2x256xf32> to vector<2x64xf32>
    %437 = vector.extract_strided_slice %434 {offsets = [0, 128], sizes = [2, 64], strides = [1, 1]} : vector<2x256xf32> to vector<2x64xf32>
    %438 = vector.extract_strided_slice %433 {offsets = [0, 192], sizes = [2, 64], strides = [1, 1]} : vector<2x256xf32> to vector<2x64xf32>
    %439 = arith.mulf %436, %410 : vector<2x64xf32>
    %440 = arith.mulf %435, %437 : vector<2x64xf32>
    %441 = arith.addf %439, %440 : vector<2x64xf32>
    %442 = math.tanh %441 : vector<2x64xf32>
    %443 = arith.mulf %438, %442 : vector<2x64xf32>
    %444 = vector.extract_strided_slice %443 {offsets = [0, 0], sizes = [2, 32], strides = [1, 1]} : vector<2x64xf32> to vector<2x32xf32>
    %c0_148 = arith.constant 0 : index
    %c4_149 = arith.constant 4 : index
    %c0_150 = arith.constant 0 : index
    %445 = vector.load %arg26[%c0_148, %c4_149, %c0_150] : memref<2x8x64xf32, #tpu.memory_space<vmem>>, vector<2x1x32xf32>
    %446 = vector.shape_cast %445 : vector<2x1x32xf32> to vector<2x32xf32>
    %447 = vector.shape_cast %444 : vector<2x32xf32> to vector<2x1x32xf32>
    tpu.vector_store %arg26[%c0_148, %c4_149, %c0_150], %447 {strides = array<i32>} : memref<2x8x64xf32, #tpu.memory_space<vmem>>, vector<2x1x32xf32>,
    %448 = vector.extract_strided_slice %443 {offsets = [0, 32], sizes = [2, 32], strides = [1, 1]} : vector<2x64xf32> to vector<2x32xf32>
    %c0_151 = arith.constant 0 : index
    %c3_152 = arith.constant 3 : index
    %c32_153 = arith.constant 32 : index
    %449 = vector.load %arg26[%c0_151, %c3_152, %c32_153] : memref<2x8x64xf32, #tpu.memory_space<vmem>>, vector<2x1x32xf32>
    %450 = vector.shape_cast %449 : vector<2x1x32xf32> to vector<2x32xf32>
    %451 = vector.shape_cast %448 : vector<2x32xf32> to vector<2x1x32xf32>
    tpu.vector_store %arg26[%c0_151, %c3_152, %c32_153], %451 {strides = array<i32>} : memref<2x8x64xf32, #tpu.memory_space<vmem>>, vector<2x1x32xf32>,
    %452 = arith.truncf %443 : vector<2x64xf32> to vector<2x64xbf16>
    %cst_154 = arith.constant dense<0.000000e+00> : vector<2x256xf32>
    %453 = tpu.matmul %452, %6, %cst_154 {dimension_numbers = #tpu.dot_dimension_numbers<[1], [0], [0], [1], [0, 0, 1, 1], [], []>} : vector<2x64xbf16>, vector<64x256xbf16>, vector<2x256xf32> -> vector<2x256xf32>
    %454 = vector.extract_strided_slice %291 {offsets = [0, 5, 0], sizes = [2, 1, 256], strides = [1, 1, 1]} : vector<2x8x256xf32> to vector<2x1x256xf32>
    %455 = vector.shape_cast %454 : vector<2x1x256xf32> to vector<2x256xf32>
    %456 = arith.addf %453, %455 : vector<2x256xf32>
    %457 = vector.extract_strided_slice %294 {offsets = [0, 2, 0], sizes = [2, 1, 256], strides = [1, 1, 1]} : vector<2x8x256xf32> to vector<2x1x256xf32>
    %458 = vector.shape_cast %457 : vector<2x1x256xf32> to vector<2x256xf32>
    %459 = arith.addf %456, %458 : vector<2x256xf32>
    %460 = arith.negf %459 : vector<2x256xf32>
    %461 = math.exp %460 : vector<2x256xf32>
    %cst_155 = arith.constant 1.000000e+00 : f32
    %462 = vector.broadcast %cst_155 : f32 to vector<2x256xf32>
    %463 = arith.addf %462, %461 : vector<2x256xf32>
    %464 = arith.divf %462, %463 : vector<2x256xf32>
    %465 = math.tanh %459 : vector<2x256xf32>
    %466 = vector.extract_strided_slice %464 {offsets = [0, 0], sizes = [2, 64], strides = [1, 1]} : vector<2x256xf32> to vector<2x64xf32>
    %467 = vector.extract_strided_slice %464 {offsets = [0, 64], sizes = [2, 64], strides = [1, 1]} : vector<2x256xf32> to vector<2x64xf32>
    %468 = vector.extract_strided_slice %465 {offsets = [0, 128], sizes = [2, 64], strides = [1, 1]} : vector<2x256xf32> to vector<2x64xf32>
    %469 = vector.extract_strided_slice %464 {offsets = [0, 192], sizes = [2, 64], strides = [1, 1]} : vector<2x256xf32> to vector<2x64xf32>
    %470 = arith.mulf %467, %441 : vector<2x64xf32>
    %471 = arith.mulf %466, %468 : vector<2x64xf32>
    %472 = arith.addf %470, %471 : vector<2x64xf32>
    %473 = math.tanh %472 : vector<2x64xf32>
    %474 = arith.mulf %469, %473 : vector<2x64xf32>
    %475 = vector.extract_strided_slice %474 {offsets = [0, 0], sizes = [2, 32], strides = [1, 1]} : vector<2x64xf32> to vector<2x32xf32>
    %c0_156 = arith.constant 0 : index
    %c5_157 = arith.constant 5 : index
    %c0_158 = arith.constant 0 : index
    %476 = vector.load %arg26[%c0_156, %c5_157, %c0_158] : memref<2x8x64xf32, #tpu.memory_space<vmem>>, vector<2x1x32xf32>
    %477 = vector.shape_cast %476 : vector<2x1x32xf32> to vector<2x32xf32>
    %478 = vector.shape_cast %475 : vector<2x32xf32> to vector<2x1x32xf32>
    tpu.vector_store %arg26[%c0_156, %c5_157, %c0_158], %478 {strides = array<i32>} : memref<2x8x64xf32, #tpu.memory_space<vmem>>, vector<2x1x32xf32>,
    %479 = vector.extract_strided_slice %474 {offsets = [0, 32], sizes = [2, 32], strides = [1, 1]} : vector<2x64xf32> to vector<2x32xf32>
    %c0_159 = arith.constant 0 : index
    %c2_160 = arith.constant 2 : index
    %c32_161 = arith.constant 32 : index
    %480 = vector.load %arg26[%c0_159, %c2_160, %c32_161] : memref<2x8x64xf32, #tpu.memory_space<vmem>>, vector<2x1x32xf32>
    %481 = vector.shape_cast %480 : vector<2x1x32xf32> to vector<2x32xf32>
    %482 = vector.shape_cast %479 : vector<2x32xf32> to vector<2x1x32xf32>
    tpu.vector_store %arg26[%c0_159, %c2_160, %c32_161], %482 {strides = array<i32>} : memref<2x8x64xf32, #tpu.memory_space<vmem>>, vector<2x1x32xf32>,
    %483 = arith.truncf %474 : vector<2x64xf32> to vector<2x64xbf16>
    %cst_162 = arith.constant dense<0.000000e+00> : vector<2x256xf32>
    %484 = tpu.matmul %483, %6, %cst_162 {dimension_numbers = #tpu.dot_dimension_numbers<[1], [0], [0], [1], [0, 0, 1, 1], [], []>} : vector<2x64xbf16>, vector<64x256xbf16>, vector<2x256xf32> -> vector<2x256xf32>
    %485 = vector.extract_strided_slice %291 {offsets = [0, 6, 0], sizes = [2, 1, 256], strides = [1, 1, 1]} : vector<2x8x256xf32> to vector<2x1x256xf32>
    %486 = vector.shape_cast %485 : vector<2x1x256xf32> to vector<2x256xf32>
    %487 = arith.addf %484, %486 : vector<2x256xf32>
    %488 = vector.extract_strided_slice %294 {offsets = [0, 1, 0], sizes = [2, 1, 256], strides = [1, 1, 1]} : vector<2x8x256xf32> to vector<2x1x256xf32>
    %489 = vector.shape_cast %488 : vector<2x1x256xf32> to vector<2x256xf32>
    %490 = arith.addf %487, %489 : vector<2x256xf32>
    %491 = arith.negf %490 : vector<2x256xf32>
    %492 = math.exp %491 : vector<2x256xf32>
    %cst_163 = arith.constant 1.000000e+00 : f32
    %493 = vector.broadcast %cst_163 : f32 to vector<2x256xf32>
    %494 = arith.addf %493, %492 : vector<2x256xf32>
    %495 = arith.divf %493, %494 : vector<2x256xf32>
    %496 = math.tanh %490 : vector<2x256xf32>
    %497 = vector.extract_strided_slice %495 {offsets = [0, 0], sizes = [2, 64], strides = [1, 1]} : vector<2x256xf32> to vector<2x64xf32>
    %498 = vector.extract_strided_slice %495 {offsets = [0, 64], sizes = [2, 64], strides = [1, 1]} : vector<2x256xf32> to vector<2x64xf32>
    %499 = vector.extract_strided_slice %496 {offsets = [0, 128], sizes = [2, 64], strides = [1, 1]} : vector<2x256xf32> to vector<2x64xf32>
    %500 = vector.extract_strided_slice %495 {offsets = [0, 192], sizes = [2, 64], strides = [1, 1]} : vector<2x256xf32> to vector<2x64xf32>
    %501 = arith.mulf %498, %472 : vector<2x64xf32>
    %502 = arith.mulf %497, %499 : vector<2x64xf32>
    %503 = arith.addf %501, %502 : vector<2x64xf32>
    %504 = math.tanh %503 : vector<2x64xf32>
    %505 = arith.mulf %500, %504 : vector<2x64xf32>
    %506 = vector.extract_strided_slice %505 {offsets = [0, 0], sizes = [2, 32], strides = [1, 1]} : vector<2x64xf32> to vector<2x32xf32>
    %c0_164 = arith.constant 0 : index
    %c6_165 = arith.constant 6 : index
    %c0_166 = arith.constant 0 : index
    %507 = vector.load %arg26[%c0_164, %c6_165, %c0_166] : memref<2x8x64xf32, #tpu.memory_space<vmem>>, vector<2x1x32xf32>
    %508 = vector.shape_cast %507 : vector<2x1x32xf32> to vector<2x32xf32>
    %509 = vector.shape_cast %506 : vector<2x32xf32> to vector<2x1x32xf32>
    tpu.vector_store %arg26[%c0_164, %c6_165, %c0_166], %509 {strides = array<i32>} : memref<2x8x64xf32, #tpu.memory_space<vmem>>, vector<2x1x32xf32>,
    %510 = vector.extract_strided_slice %505 {offsets = [0, 32], sizes = [2, 32], strides = [1, 1]} : vector<2x64xf32> to vector<2x32xf32>
    %c0_167 = arith.constant 0 : index
    %c1_168 = arith.constant 1 : index
    %c32_169 = arith.constant 32 : index
    %511 = vector.load %arg26[%c0_167, %c1_168, %c32_169] : memref<2x8x64xf32, #tpu.memory_space<vmem>>, vector<2x1x32xf32>
    %512 = vector.shape_cast %511 : vector<2x1x32xf32> to vector<2x32xf32>
    %513 = vector.shape_cast %510 : vector<2x32xf32> to vector<2x1x32xf32>
    tpu.vector_store %arg26[%c0_167, %c1_168, %c32_169], %513 {strides = array<i32>} : memref<2x8x64xf32, #tpu.memory_space<vmem>>, vector<2x1x32xf32>,
    %514 = arith.truncf %505 : vector<2x64xf32> to vector<2x64xbf16>
    %cst_170 = arith.constant dense<0.000000e+00> : vector<2x256xf32>
    %515 = tpu.matmul %514, %6, %cst_170 {dimension_numbers = #tpu.dot_dimension_numbers<[1], [0], [0], [1], [0, 0, 1, 1], [], []>} : vector<2x64xbf16>, vector<64x256xbf16>, vector<2x256xf32> -> vector<2x256xf32>
    %516 = vector.extract_strided_slice %291 {offsets = [0, 7, 0], sizes = [2, 1, 256], strides = [1, 1, 1]} : vector<2x8x256xf32> to vector<2x1x256xf32>
    %517 = vector.shape_cast %516 : vector<2x1x256xf32> to vector<2x256xf32>
    %518 = arith.addf %515, %517 : vector<2x256xf32>
    %519 = vector.extract_strided_slice %294 {offsets = [0, 0, 0], sizes = [2, 1, 256], strides = [1, 1, 1]} : vector<2x8x256xf32> to vector<2x1x256xf32>
    %520 = vector.shape_cast %519 : vector<2x1x256xf32> to vector<2x256xf32>
    %521 = arith.addf %518, %520 : vector<2x256xf32>
    %522 = arith.negf %521 : vector<2x256xf32>
    %523 = math.exp %522 : vector<2x256xf32>
    %cst_171 = arith.constant 1.000000e+00 : f32
    %524 = vector.broadcast %cst_171 : f32 to vector<2x256xf32>
    %525 = arith.addf %524, %523 : vector<2x256xf32>
    %526 = arith.divf %524, %525 : vector<2x256xf32>
    %527 = math.tanh %521 : vector<2x256xf32>
    %528 = vector.extract_strided_slice %526 {offsets = [0, 0], sizes = [2, 64], strides = [1, 1]} : vector<2x256xf32> to vector<2x64xf32>
    %529 = vector.extract_strided_slice %526 {offsets = [0, 64], sizes = [2, 64], strides = [1, 1]} : vector<2x256xf32> to vector<2x64xf32>
    %530 = vector.extract_strided_slice %527 {offsets = [0, 128], sizes = [2, 64], strides = [1, 1]} : vector<2x256xf32> to vector<2x64xf32>
    %531 = vector.extract_strided_slice %526 {offsets = [0, 192], sizes = [2, 64], strides = [1, 1]} : vector<2x256xf32> to vector<2x64xf32>
    %532 = arith.mulf %529, %503 : vector<2x64xf32>
    %533 = arith.mulf %528, %530 : vector<2x64xf32>
    %534 = arith.addf %532, %533 : vector<2x64xf32>
    %535 = math.tanh %534 : vector<2x64xf32>
    %536 = arith.mulf %531, %535 : vector<2x64xf32>
    %537 = vector.extract_strided_slice %536 {offsets = [0, 0], sizes = [2, 32], strides = [1, 1]} : vector<2x64xf32> to vector<2x32xf32>
    %c0_172 = arith.constant 0 : index
    %c7_173 = arith.constant 7 : index
    %c0_174 = arith.constant 0 : index
    %538 = vector.load %arg26[%c0_172, %c7_173, %c0_174] : memref<2x8x64xf32, #tpu.memory_space<vmem>>, vector<2x1x32xf32>
    %539 = vector.shape_cast %538 : vector<2x1x32xf32> to vector<2x32xf32>
    %540 = vector.shape_cast %537 : vector<2x32xf32> to vector<2x1x32xf32>
    tpu.vector_store %arg26[%c0_172, %c7_173, %c0_174], %540 {strides = array<i32>} : memref<2x8x64xf32, #tpu.memory_space<vmem>>, vector<2x1x32xf32>,
    %541 = vector.extract_strided_slice %536 {offsets = [0, 32], sizes = [2, 32], strides = [1, 1]} : vector<2x64xf32> to vector<2x32xf32>
    %c0_175 = arith.constant 0 : index
    %c0_176 = arith.constant 0 : index
    %c32_177 = arith.constant 32 : index
    %542 = vector.load %arg26[%c0_175, %c0_176, %c32_177] : memref<2x8x64xf32, #tpu.memory_space<vmem>>, vector<2x1x32xf32>
    %543 = vector.shape_cast %542 : vector<2x1x32xf32> to vector<2x32xf32>
    %544 = vector.shape_cast %541 : vector<2x32xf32> to vector<2x1x32xf32>
    tpu.vector_store %arg26[%c0_175, %c0_176, %c32_177], %544 {strides = array<i32>} : memref<2x8x64xf32, #tpu.memory_space<vmem>>, vector<2x1x32xf32>,
    %c0_178 = arith.constant 0 : index
    %c0_179 = arith.constant 0 : index
    %c0_180 = arith.constant 0 : index
    %545 = vector.load %arg26[%c0_178, %c0_179, %c0_180] : memref<2x8x64xf32, #tpu.memory_space<vmem>>, vector<2x8x64xf32>
    %546 = vector.shape_cast %545 : vector<2x8x64xf32> to vector<16x64xf32>
    %547 = arith.truncf %546 : vector<16x64xf32> to vector<16x64xbf16>
    %cst_181 = arith.constant dense<0.000000e+00> : vector<16x256xf32>
    %548 = tpu.matmul %547, %8, %cst_181 {dimension_numbers = #tpu.dot_dimension_numbers<[1], [0], [0], [1], [0, 0, 1, 1], [], []>} : vector<16x64xbf16>, vector<64x256xbf16>, vector<16x256xf32> -> vector<16x256xf32>
    %549 = vector.shape_cast %548 : vector<16x256xf32> to vector<2x8x256xf32>
    %550 = vector.shape_cast %11 : vector<1x256xf32> to vector<1x1x256xf32>
    %551 = vector.broadcast %550 : vector<1x1x256xf32> to vector<2x8x256xf32>
    %552 = arith.addf %549, %551 : vector<2x8x256xf32>
    %553 = arith.truncf %546 : vector<16x64xf32> to vector<16x64xbf16>
    %cst_182 = arith.constant dense<0.000000e+00> : vector<16x256xf32>
    %554 = tpu.matmul %553, %9, %cst_182 {dimension_numbers = #tpu.dot_dimension_numbers<[1], [0], [0], [1], [0, 0, 1, 1], [], []>} : vector<16x64xbf16>, vector<64x256xbf16>, vector<16x256xf32> -> vector<16x256xf32>
    %555 = vector.shape_cast %554 : vector<16x256xf32> to vector<2x8x256xf32>
    %cst_183 = arith.constant 0.000000e+00 : f32
    %556 = vector.broadcast %cst_183 : f32 to vector<2x64xf32>
    %cst_184 = arith.constant 0.000000e+00 : f32
    %557 = vector.broadcast %cst_184 : f32 to vector<2x64xf32>
    %558 = arith.truncf %556 : vector<2x64xf32> to vector<2x64xbf16>
    %cst_185 = arith.constant dense<0.000000e+00> : vector<2x256xf32>
    %559 = tpu.matmul %558, %10, %cst_185 {dimension_numbers = #tpu.dot_dimension_numbers<[1], [0], [0], [1], [0, 0, 1, 1], [], []>} : vector<2x64xbf16>, vector<64x256xbf16>, vector<2x256xf32> -> vector<2x256xf32>
    %560 = vector.extract_strided_slice %552 {offsets = [0, 0, 0], sizes = [2, 1, 256], strides = [1, 1, 1]} : vector<2x8x256xf32> to vector<2x1x256xf32>
    %561 = vector.shape_cast %560 : vector<2x1x256xf32> to vector<2x256xf32>
    %562 = arith.addf %559, %561 : vector<2x256xf32>
    %563 = vector.extract_strided_slice %555 {offsets = [0, 7, 0], sizes = [2, 1, 256], strides = [1, 1, 1]} : vector<2x8x256xf32> to vector<2x1x256xf32>
    %564 = vector.shape_cast %563 : vector<2x1x256xf32> to vector<2x256xf32>
    %565 = arith.addf %562, %564 : vector<2x256xf32>
    %566 = arith.negf %565 : vector<2x256xf32>
    %567 = math.exp %566 : vector<2x256xf32>
    %cst_186 = arith.constant 1.000000e+00 : f32
    %568 = vector.broadcast %cst_186 : f32 to vector<2x256xf32>
    %569 = arith.addf %568, %567 : vector<2x256xf32>
    %570 = arith.divf %568, %569 : vector<2x256xf32>
    %571 = math.tanh %565 : vector<2x256xf32>
    %572 = vector.extract_strided_slice %570 {offsets = [0, 0], sizes = [2, 64], strides = [1, 1]} : vector<2x256xf32> to vector<2x64xf32>
    %573 = vector.extract_strided_slice %570 {offsets = [0, 64], sizes = [2, 64], strides = [1, 1]} : vector<2x256xf32> to vector<2x64xf32>
    %574 = vector.extract_strided_slice %571 {offsets = [0, 128], sizes = [2, 64], strides = [1, 1]} : vector<2x256xf32> to vector<2x64xf32>
    %575 = vector.extract_strided_slice %570 {offsets = [0, 192], sizes = [2, 64], strides = [1, 1]} : vector<2x256xf32> to vector<2x64xf32>
    %576 = arith.mulf %573, %557 : vector<2x64xf32>
    %577 = arith.mulf %572, %574 : vector<2x64xf32>
    %578 = arith.addf %576, %577 : vector<2x64xf32>
    %579 = math.tanh %578 : vector<2x64xf32>
    %580 = arith.mulf %575, %579 : vector<2x64xf32>
    %581 = vector.extract_strided_slice %580 {offsets = [0, 0], sizes = [2, 32], strides = [1, 1]} : vector<2x64xf32> to vector<2x32xf32>
    %c0_187 = arith.constant 0 : index
    %c0_188 = arith.constant 0 : index
    %c0_189 = arith.constant 0 : index
    %582 = vector.load %arg26[%c0_187, %c0_188, %c0_189] : memref<2x8x64xf32, #tpu.memory_space<vmem>>, vector<2x1x32xf32>
    %583 = vector.shape_cast %582 : vector<2x1x32xf32> to vector<2x32xf32>
    %584 = vector.shape_cast %581 : vector<2x32xf32> to vector<2x1x32xf32>
    tpu.vector_store %arg26[%c0_187, %c0_188, %c0_189], %584 {strides = array<i32>} : memref<2x8x64xf32, #tpu.memory_space<vmem>>, vector<2x1x32xf32>,
    %585 = vector.extract_strided_slice %580 {offsets = [0, 32], sizes = [2, 32], strides = [1, 1]} : vector<2x64xf32> to vector<2x32xf32>
    %c0_190 = arith.constant 0 : index
    %c7_191 = arith.constant 7 : index
    %c32_192 = arith.constant 32 : index
    %586 = vector.load %arg26[%c0_190, %c7_191, %c32_192] : memref<2x8x64xf32, #tpu.memory_space<vmem>>, vector<2x1x32xf32>
    %587 = vector.shape_cast %586 : vector<2x1x32xf32> to vector<2x32xf32>
    %588 = vector.shape_cast %585 : vector<2x32xf32> to vector<2x1x32xf32>
    tpu.vector_store %arg26[%c0_190, %c7_191, %c32_192], %588 {strides = array<i32>} : memref<2x8x64xf32, #tpu.memory_space<vmem>>, vector<2x1x32xf32>,
    %589 = arith.truncf %580 : vector<2x64xf32> to vector<2x64xbf16>
    %cst_193 = arith.constant dense<0.000000e+00> : vector<2x256xf32>
    %590 = tpu.matmul %589, %10, %cst_193 {dimension_numbers = #tpu.dot_dimension_numbers<[1], [0], [0], [1], [0, 0, 1, 1], [], []>} : vector<2x64xbf16>, vector<64x256xbf16>, vector<2x256xf32> -> vector<2x256xf32>
    %591 = vector.extract_strided_slice %552 {offsets = [0, 1, 0], sizes = [2, 1, 256], strides = [1, 1, 1]} : vector<2x8x256xf32> to vector<2x1x256xf32>
    %592 = vector.shape_cast %591 : vector<2x1x256xf32> to vector<2x256xf32>
    %593 = arith.addf %590, %592 : vector<2x256xf32>
    %594 = vector.extract_strided_slice %555 {offsets = [0, 6, 0], sizes = [2, 1, 256], strides = [1, 1, 1]} : vector<2x8x256xf32> to vector<2x1x256xf32>
    %595 = vector.shape_cast %594 : vector<2x1x256xf32> to vector<2x256xf32>
    %596 = arith.addf %593, %595 : vector<2x256xf32>
    %597 = arith.negf %596 : vector<2x256xf32>
    %598 = math.exp %597 : vector<2x256xf32>
    %cst_194 = arith.constant 1.000000e+00 : f32
    %599 = vector.broadcast %cst_194 : f32 to vector<2x256xf32>
    %600 = arith.addf %599, %598 : vector<2x256xf32>
    %601 = arith.divf %599, %600 : vector<2x256xf32>
    %602 = math.tanh %596 : vector<2x256xf32>
    %603 = vector.extract_strided_slice %601 {offsets = [0, 0], sizes = [2, 64], strides = [1, 1]} : vector<2x256xf32> to vector<2x64xf32>
    %604 = vector.extract_strided_slice %601 {offsets = [0, 64], sizes = [2, 64], strides = [1, 1]} : vector<2x256xf32> to vector<2x64xf32>
    %605 = vector.extract_strided_slice %602 {offsets = [0, 128], sizes = [2, 64], strides = [1, 1]} : vector<2x256xf32> to vector<2x64xf32>
    %606 = vector.extract_strided_slice %601 {offsets = [0, 192], sizes = [2, 64], strides = [1, 1]} : vector<2x256xf32> to vector<2x64xf32>
    %607 = arith.mulf %604, %578 : vector<2x64xf32>
    %608 = arith.mulf %603, %605 : vector<2x64xf32>
    %609 = arith.addf %607, %608 : vector<2x64xf32>
    %610 = math.tanh %609 : vector<2x64xf32>
    %611 = arith.mulf %606, %610 : vector<2x64xf32>
    %612 = vector.extract_strided_slice %611 {offsets = [0, 0], sizes = [2, 32], strides = [1, 1]} : vector<2x64xf32> to vector<2x32xf32>
    %c0_195 = arith.constant 0 : index
    %c1_196 = arith.constant 1 : index
    %c0_197 = arith.constant 0 : index
    %613 = vector.load %arg26[%c0_195, %c1_196, %c0_197] : memref<2x8x64xf32, #tpu.memory_space<vmem>>, vector<2x1x32xf32>
    %614 = vector.shape_cast %613 : vector<2x1x32xf32> to vector<2x32xf32>
    %615 = vector.shape_cast %612 : vector<2x32xf32> to vector<2x1x32xf32>
    tpu.vector_store %arg26[%c0_195, %c1_196, %c0_197], %615 {strides = array<i32>} : memref<2x8x64xf32, #tpu.memory_space<vmem>>, vector<2x1x32xf32>,
    %616 = vector.extract_strided_slice %611 {offsets = [0, 32], sizes = [2, 32], strides = [1, 1]} : vector<2x64xf32> to vector<2x32xf32>
    %c0_198 = arith.constant 0 : index
    %c6_199 = arith.constant 6 : index
    %c32_200 = arith.constant 32 : index
    %617 = vector.load %arg26[%c0_198, %c6_199, %c32_200] : memref<2x8x64xf32, #tpu.memory_space<vmem>>, vector<2x1x32xf32>
    %618 = vector.shape_cast %617 : vector<2x1x32xf32> to vector<2x32xf32>
    %619 = vector.shape_cast %616 : vector<2x32xf32> to vector<2x1x32xf32>
    tpu.vector_store %arg26[%c0_198, %c6_199, %c32_200], %619 {strides = array<i32>} : memref<2x8x64xf32, #tpu.memory_space<vmem>>, vector<2x1x32xf32>,
    %620 = arith.truncf %611 : vector<2x64xf32> to vector<2x64xbf16>
    %cst_201 = arith.constant dense<0.000000e+00> : vector<2x256xf32>
    %621 = tpu.matmul %620, %10, %cst_201 {dimension_numbers = #tpu.dot_dimension_numbers<[1], [0], [0], [1], [0, 0, 1, 1], [], []>} : vector<2x64xbf16>, vector<64x256xbf16>, vector<2x256xf32> -> vector<2x256xf32>
    %622 = vector.extract_strided_slice %552 {offsets = [0, 2, 0], sizes = [2, 1, 256], strides = [1, 1, 1]} : vector<2x8x256xf32> to vector<2x1x256xf32>
    %623 = vector.shape_cast %622 : vector<2x1x256xf32> to vector<2x256xf32>
    %624 = arith.addf %621, %623 : vector<2x256xf32>
    %625 = vector.extract_strided_slice %555 {offsets = [0, 5, 0], sizes = [2, 1, 256], strides = [1, 1, 1]} : vector<2x8x256xf32> to vector<2x1x256xf32>
    %626 = vector.shape_cast %625 : vector<2x1x256xf32> to vector<2x256xf32>
    %627 = arith.addf %624, %626 : vector<2x256xf32>
    %628 = arith.negf %627 : vector<2x256xf32>
    %629 = math.exp %628 : vector<2x256xf32>
    %cst_202 = arith.constant 1.000000e+00 : f32
    %630 = vector.broadcast %cst_202 : f32 to vector<2x256xf32>
    %631 = arith.addf %630, %629 : vector<2x256xf32>
    %632 = arith.divf %630, %631 : vector<2x256xf32>
    %633 = math.tanh %627 : vector<2x256xf32>
    %634 = vector.extract_strided_slice %632 {offsets = [0, 0], sizes = [2, 64], strides = [1, 1]} : vector<2x256xf32> to vector<2x64xf32>
    %635 = vector.extract_strided_slice %632 {offsets = [0, 64], sizes = [2, 64], strides = [1, 1]} : vector<2x256xf32> to vector<2x64xf32>
    %636 = vector.extract_strided_slice %633 {offsets = [0, 128], sizes = [2, 64], strides = [1, 1]} : vector<2x256xf32> to vector<2x64xf32>
    %637 = vector.extract_strided_slice %632 {offsets = [0, 192], sizes = [2, 64], strides = [1, 1]} : vector<2x256xf32> to vector<2x64xf32>
    %638 = arith.mulf %635, %609 : vector<2x64xf32>
    %639 = arith.mulf %634, %636 : vector<2x64xf32>
    %640 = arith.addf %638, %639 : vector<2x64xf32>
    %641 = math.tanh %640 : vector<2x64xf32>
    %642 = arith.mulf %637, %641 : vector<2x64xf32>
    %643 = vector.extract_strided_slice %642 {offsets = [0, 0], sizes = [2, 32], strides = [1, 1]} : vector<2x64xf32> to vector<2x32xf32>
    %c0_203 = arith.constant 0 : index
    %c2_204 = arith.constant 2 : index
    %c0_205 = arith.constant 0 : index
    %644 = vector.load %arg26[%c0_203, %c2_204, %c0_205] : memref<2x8x64xf32, #tpu.memory_space<vmem>>, vector<2x1x32xf32>
    %645 = vector.shape_cast %644 : vector<2x1x32xf32> to vector<2x32xf32>
    %646 = vector.shape_cast %643 : vector<2x32xf32> to vector<2x1x32xf32>
    tpu.vector_store %arg26[%c0_203, %c2_204, %c0_205], %646 {strides = array<i32>} : memref<2x8x64xf32, #tpu.memory_space<vmem>>, vector<2x1x32xf32>,
    %647 = vector.extract_strided_slice %642 {offsets = [0, 32], sizes = [2, 32], strides = [1, 1]} : vector<2x64xf32> to vector<2x32xf32>
    %c0_206 = arith.constant 0 : index
    %c5_207 = arith.constant 5 : index
    %c32_208 = arith.constant 32 : index
    %648 = vector.load %arg26[%c0_206, %c5_207, %c32_208] : memref<2x8x64xf32, #tpu.memory_space<vmem>>, vector<2x1x32xf32>
    %649 = vector.shape_cast %648 : vector<2x1x32xf32> to vector<2x32xf32>
    %650 = vector.shape_cast %647 : vector<2x32xf32> to vector<2x1x32xf32>
    tpu.vector_store %arg26[%c0_206, %c5_207, %c32_208], %650 {strides = array<i32>} : memref<2x8x64xf32, #tpu.memory_space<vmem>>, vector<2x1x32xf32>,
    %651 = arith.truncf %642 : vector<2x64xf32> to vector<2x64xbf16>
    %cst_209 = arith.constant dense<0.000000e+00> : vector<2x256xf32>
    %652 = tpu.matmul %651, %10, %cst_209 {dimension_numbers = #tpu.dot_dimension_numbers<[1], [0], [0], [1], [0, 0, 1, 1], [], []>} : vector<2x64xbf16>, vector<64x256xbf16>, vector<2x256xf32> -> vector<2x256xf32>
    %653 = vector.extract_strided_slice %552 {offsets = [0, 3, 0], sizes = [2, 1, 256], strides = [1, 1, 1]} : vector<2x8x256xf32> to vector<2x1x256xf32>
    %654 = vector.shape_cast %653 : vector<2x1x256xf32> to vector<2x256xf32>
    %655 = arith.addf %652, %654 : vector<2x256xf32>
    %656 = vector.extract_strided_slice %555 {offsets = [0, 4, 0], sizes = [2, 1, 256], strides = [1, 1, 1]} : vector<2x8x256xf32> to vector<2x1x256xf32>
    %657 = vector.shape_cast %656 : vector<2x1x256xf32> to vector<2x256xf32>
    %658 = arith.addf %655, %657 : vector<2x256xf32>
    %659 = arith.negf %658 : vector<2x256xf32>
    %660 = math.exp %659 : vector<2x256xf32>
    %cst_210 = arith.constant 1.000000e+00 : f32
    %661 = vector.broadcast %cst_210 : f32 to vector<2x256xf32>
    %662 = arith.addf %661, %660 : vector<2x256xf32>
    %663 = arith.divf %661, %662 : vector<2x256xf32>
    %664 = math.tanh %658 : vector<2x256xf32>
    %665 = vector.extract_strided_slice %663 {offsets = [0, 0], sizes = [2, 64], strides = [1, 1]} : vector<2x256xf32> to vector<2x64xf32>
    %666 = vector.extract_strided_slice %663 {offsets = [0, 64], sizes = [2, 64], strides = [1, 1]} : vector<2x256xf32> to vector<2x64xf32>
    %667 = vector.extract_strided_slice %664 {offsets = [0, 128], sizes = [2, 64], strides = [1, 1]} : vector<2x256xf32> to vector<2x64xf32>
    %668 = vector.extract_strided_slice %663 {offsets = [0, 192], sizes = [2, 64], strides = [1, 1]} : vector<2x256xf32> to vector<2x64xf32>
    %669 = arith.mulf %666, %640 : vector<2x64xf32>
    %670 = arith.mulf %665, %667 : vector<2x64xf32>
    %671 = arith.addf %669, %670 : vector<2x64xf32>
    %672 = math.tanh %671 : vector<2x64xf32>
    %673 = arith.mulf %668, %672 : vector<2x64xf32>
    %674 = vector.extract_strided_slice %673 {offsets = [0, 0], sizes = [2, 32], strides = [1, 1]} : vector<2x64xf32> to vector<2x32xf32>
    %c0_211 = arith.constant 0 : index
    %c3_212 = arith.constant 3 : index
    %c0_213 = arith.constant 0 : index
    %675 = vector.load %arg26[%c0_211, %c3_212, %c0_213] : memref<2x8x64xf32, #tpu.memory_space<vmem>>, vector<2x1x32xf32>
    %676 = vector.shape_cast %675 : vector<2x1x32xf32> to vector<2x32xf32>
    %677 = vector.shape_cast %674 : vector<2x32xf32> to vector<2x1x32xf32>
    tpu.vector_store %arg26[%c0_211, %c3_212, %c0_213], %677 {strides = array<i32>} : memref<2x8x64xf32, #tpu.memory_space<vmem>>, vector<2x1x32xf32>,
    %678 = vector.extract_strided_slice %673 {offsets = [0, 32], sizes = [2, 32], strides = [1, 1]} : vector<2x64xf32> to vector<2x32xf32>
    %c0_214 = arith.constant 0 : index
    %c4_215 = arith.constant 4 : index
    %c32_216 = arith.constant 32 : index
    %679 = vector.load %arg26[%c0_214, %c4_215, %c32_216] : memref<2x8x64xf32, #tpu.memory_space<vmem>>, vector<2x1x32xf32>
    %680 = vector.shape_cast %679 : vector<2x1x32xf32> to vector<2x32xf32>
    %681 = vector.shape_cast %678 : vector<2x32xf32> to vector<2x1x32xf32>
    tpu.vector_store %arg26[%c0_214, %c4_215, %c32_216], %681 {strides = array<i32>} : memref<2x8x64xf32, #tpu.memory_space<vmem>>, vector<2x1x32xf32>,
    %682 = arith.truncf %673 : vector<2x64xf32> to vector<2x64xbf16>
    %cst_217 = arith.constant dense<0.000000e+00> : vector<2x256xf32>
    %683 = tpu.matmul %682, %10, %cst_217 {dimension_numbers = #tpu.dot_dimension_numbers<[1], [0], [0], [1], [0, 0, 1, 1], [], []>} : vector<2x64xbf16>, vector<64x256xbf16>, vector<2x256xf32> -> vector<2x256xf32>
    %684 = vector.extract_strided_slice %552 {offsets = [0, 4, 0], sizes = [2, 1, 256], strides = [1, 1, 1]} : vector<2x8x256xf32> to vector<2x1x256xf32>
    %685 = vector.shape_cast %684 : vector<2x1x256xf32> to vector<2x256xf32>
    %686 = arith.addf %683, %685 : vector<2x256xf32>
    %687 = vector.extract_strided_slice %555 {offsets = [0, 3, 0], sizes = [2, 1, 256], strides = [1, 1, 1]} : vector<2x8x256xf32> to vector<2x1x256xf32>
    %688 = vector.shape_cast %687 : vector<2x1x256xf32> to vector<2x256xf32>
    %689 = arith.addf %686, %688 : vector<2x256xf32>
    %690 = arith.negf %689 : vector<2x256xf32>
    %691 = math.exp %690 : vector<2x256xf32>
    %cst_218 = arith.constant 1.000000e+00 : f32
    %692 = vector.broadcast %cst_218 : f32 to vector<2x256xf32>
    %693 = arith.addf %692, %691 : vector<2x256xf32>
    %694 = arith.divf %692, %693 : vector<2x256xf32>
    %695 = math.tanh %689 : vector<2x256xf32>
    %696 = vector.extract_strided_slice %694 {offsets = [0, 0], sizes = [2, 64], strides = [1, 1]} : vector<2x256xf32> to vector<2x64xf32>
    %697 = vector.extract_strided_slice %694 {offsets = [0, 64], sizes = [2, 64], strides = [1, 1]} : vector<2x256xf32> to vector<2x64xf32>
    %698 = vector.extract_strided_slice %695 {offsets = [0, 128], sizes = [2, 64], strides = [1, 1]} : vector<2x256xf32> to vector<2x64xf32>
    %699 = vector.extract_strided_slice %694 {offsets = [0, 192], sizes = [2, 64], strides = [1, 1]} : vector<2x256xf32> to vector<2x64xf32>
    %700 = arith.mulf %697, %671 : vector<2x64xf32>
    %701 = arith.mulf %696, %698 : vector<2x64xf32>
    %702 = arith.addf %700, %701 : vector<2x64xf32>
    %703 = math.tanh %702 : vector<2x64xf32>
    %704 = arith.mulf %699, %703 : vector<2x64xf32>
    %705 = vector.extract_strided_slice %704 {offsets = [0, 0], sizes = [2, 32], strides = [1, 1]} : vector<2x64xf32> to vector<2x32xf32>
    %c0_219 = arith.constant 0 : index
    %c4_220 = arith.constant 4 : index
    %c0_221 = arith.constant 0 : index
    %706 = vector.load %arg26[%c0_219, %c4_220, %c0_221] : memref<2x8x64xf32, #tpu.memory_space<vmem>>, vector<2x1x32xf32>
    %707 = vector.shape_cast %706 : vector<2x1x32xf32> to vector<2x32xf32>
    %708 = vector.shape_cast %705 : vector<2x32xf32> to vector<2x1x32xf32>
    tpu.vector_store %arg26[%c0_219, %c4_220, %c0_221], %708 {strides = array<i32>} : memref<2x8x64xf32, #tpu.memory_space<vmem>>, vector<2x1x32xf32>,
    %709 = vector.extract_strided_slice %704 {offsets = [0, 32], sizes = [2, 32], strides = [1, 1]} : vector<2x64xf32> to vector<2x32xf32>
    %c0_222 = arith.constant 0 : index
    %c3_223 = arith.constant 3 : index
    %c32_224 = arith.constant 32 : index
    %710 = vector.load %arg26[%c0_222, %c3_223, %c32_224] : memref<2x8x64xf32, #tpu.memory_space<vmem>>, vector<2x1x32xf32>
    %711 = vector.shape_cast %710 : vector<2x1x32xf32> to vector<2x32xf32>
    %712 = vector.shape_cast %709 : vector<2x32xf32> to vector<2x1x32xf32>
    tpu.vector_store %arg26[%c0_222, %c3_223, %c32_224], %712 {strides = array<i32>} : memref<2x8x64xf32, #tpu.memory_space<vmem>>, vector<2x1x32xf32>,
    %713 = arith.truncf %704 : vector<2x64xf32> to vector<2x64xbf16>
    %cst_225 = arith.constant dense<0.000000e+00> : vector<2x256xf32>
    %714 = tpu.matmul %713, %10, %cst_225 {dimension_numbers = #tpu.dot_dimension_numbers<[1], [0], [0], [1], [0, 0, 1, 1], [], []>} : vector<2x64xbf16>, vector<64x256xbf16>, vector<2x256xf32> -> vector<2x256xf32>
    %715 = vector.extract_strided_slice %552 {offsets = [0, 5, 0], sizes = [2, 1, 256], strides = [1, 1, 1]} : vector<2x8x256xf32> to vector<2x1x256xf32>
    %716 = vector.shape_cast %715 : vector<2x1x256xf32> to vector<2x256xf32>
    %717 = arith.addf %714, %716 : vector<2x256xf32>
    %718 = vector.extract_strided_slice %555 {offsets = [0, 2, 0], sizes = [2, 1, 256], strides = [1, 1, 1]} : vector<2x8x256xf32> to vector<2x1x256xf32>
    %719 = vector.shape_cast %718 : vector<2x1x256xf32> to vector<2x256xf32>
    %720 = arith.addf %717, %719 : vector<2x256xf32>
    %721 = arith.negf %720 : vector<2x256xf32>
    %722 = math.exp %721 : vector<2x256xf32>
    %cst_226 = arith.constant 1.000000e+00 : f32
    %723 = vector.broadcast %cst_226 : f32 to vector<2x256xf32>
    %724 = arith.addf %723, %722 : vector<2x256xf32>
    %725 = arith.divf %723, %724 : vector<2x256xf32>
    %726 = math.tanh %720 : vector<2x256xf32>
    %727 = vector.extract_strided_slice %725 {offsets = [0, 0], sizes = [2, 64], strides = [1, 1]} : vector<2x256xf32> to vector<2x64xf32>
    %728 = vector.extract_strided_slice %725 {offsets = [0, 64], sizes = [2, 64], strides = [1, 1]} : vector<2x256xf32> to vector<2x64xf32>
    %729 = vector.extract_strided_slice %726 {offsets = [0, 128], sizes = [2, 64], strides = [1, 1]} : vector<2x256xf32> to vector<2x64xf32>
    %730 = vector.extract_strided_slice %725 {offsets = [0, 192], sizes = [2, 64], strides = [1, 1]} : vector<2x256xf32> to vector<2x64xf32>
    %731 = arith.mulf %728, %702 : vector<2x64xf32>
    %732 = arith.mulf %727, %729 : vector<2x64xf32>
    %733 = arith.addf %731, %732 : vector<2x64xf32>
    %734 = math.tanh %733 : vector<2x64xf32>
    %735 = arith.mulf %730, %734 : vector<2x64xf32>
    %736 = vector.extract_strided_slice %735 {offsets = [0, 0], sizes = [2, 32], strides = [1, 1]} : vector<2x64xf32> to vector<2x32xf32>
    %c0_227 = arith.constant 0 : index
    %c5_228 = arith.constant 5 : index
    %c0_229 = arith.constant 0 : index
    %737 = vector.load %arg26[%c0_227, %c5_228, %c0_229] : memref<2x8x64xf32, #tpu.memory_space<vmem>>, vector<2x1x32xf32>
    %738 = vector.shape_cast %737 : vector<2x1x32xf32> to vector<2x32xf32>
    %739 = vector.shape_cast %736 : vector<2x32xf32> to vector<2x1x32xf32>
    tpu.vector_store %arg26[%c0_227, %c5_228, %c0_229], %739 {strides = array<i32>} : memref<2x8x64xf32, #tpu.memory_space<vmem>>, vector<2x1x32xf32>,
    %740 = vector.extract_strided_slice %735 {offsets = [0, 32], sizes = [2, 32], strides = [1, 1]} : vector<2x64xf32> to vector<2x32xf32>
    %c0_230 = arith.constant 0 : index
    %c2_231 = arith.constant 2 : index
    %c32_232 = arith.constant 32 : index
    %741 = vector.load %arg26[%c0_230, %c2_231, %c32_232] : memref<2x8x64xf32, #tpu.memory_space<vmem>>, vector<2x1x32xf32>
    %742 = vector.shape_cast %741 : vector<2x1x32xf32> to vector<2x32xf32>
    %743 = vector.shape_cast %740 : vector<2x32xf32> to vector<2x1x32xf32>
    tpu.vector_store %arg26[%c0_230, %c2_231, %c32_232], %743 {strides = array<i32>} : memref<2x8x64xf32, #tpu.memory_space<vmem>>, vector<2x1x32xf32>,
    %744 = arith.truncf %735 : vector<2x64xf32> to vector<2x64xbf16>
    %cst_233 = arith.constant dense<0.000000e+00> : vector<2x256xf32>
    %745 = tpu.matmul %744, %10, %cst_233 {dimension_numbers = #tpu.dot_dimension_numbers<[1], [0], [0], [1], [0, 0, 1, 1], [], []>} : vector<2x64xbf16>, vector<64x256xbf16>, vector<2x256xf32> -> vector<2x256xf32>
    %746 = vector.extract_strided_slice %552 {offsets = [0, 6, 0], sizes = [2, 1, 256], strides = [1, 1, 1]} : vector<2x8x256xf32> to vector<2x1x256xf32>
    %747 = vector.shape_cast %746 : vector<2x1x256xf32> to vector<2x256xf32>
    %748 = arith.addf %745, %747 : vector<2x256xf32>
    %749 = vector.extract_strided_slice %555 {offsets = [0, 1, 0], sizes = [2, 1, 256], strides = [1, 1, 1]} : vector<2x8x256xf32> to vector<2x1x256xf32>
    %750 = vector.shape_cast %749 : vector<2x1x256xf32> to vector<2x256xf32>
    %751 = arith.addf %748, %750 : vector<2x256xf32>
    %752 = arith.negf %751 : vector<2x256xf32>
    %753 = math.exp %752 : vector<2x256xf32>
    %cst_234 = arith.constant 1.000000e+00 : f32
    %754 = vector.broadcast %cst_234 : f32 to vector<2x256xf32>
    %755 = arith.addf %754, %753 : vector<2x256xf32>
    %756 = arith.divf %754, %755 : vector<2x256xf32>
    %757 = math.tanh %751 : vector<2x256xf32>
    %758 = vector.extract_strided_slice %756 {offsets = [0, 0], sizes = [2, 64], strides = [1, 1]} : vector<2x256xf32> to vector<2x64xf32>
    %759 = vector.extract_strided_slice %756 {offsets = [0, 64], sizes = [2, 64], strides = [1, 1]} : vector<2x256xf32> to vector<2x64xf32>
    %760 = vector.extract_strided_slice %757 {offsets = [0, 128], sizes = [2, 64], strides = [1, 1]} : vector<2x256xf32> to vector<2x64xf32>
    %761 = vector.extract_strided_slice %756 {offsets = [0, 192], sizes = [2, 64], strides = [1, 1]} : vector<2x256xf32> to vector<2x64xf32>
    %762 = arith.mulf %759, %733 : vector<2x64xf32>
    %763 = arith.mulf %758, %760 : vector<2x64xf32>
    %764 = arith.addf %762, %763 : vector<2x64xf32>
    %765 = math.tanh %764 : vector<2x64xf32>
    %766 = arith.mulf %761, %765 : vector<2x64xf32>
    %767 = vector.extract_strided_slice %766 {offsets = [0, 0], sizes = [2, 32], strides = [1, 1]} : vector<2x64xf32> to vector<2x32xf32>
    %c0_235 = arith.constant 0 : index
    %c6_236 = arith.constant 6 : index
    %c0_237 = arith.constant 0 : index
    %768 = vector.load %arg26[%c0_235, %c6_236, %c0_237] : memref<2x8x64xf32, #tpu.memory_space<vmem>>, vector<2x1x32xf32>
    %769 = vector.shape_cast %768 : vector<2x1x32xf32> to vector<2x32xf32>
    %770 = vector.shape_cast %767 : vector<2x32xf32> to vector<2x1x32xf32>
    tpu.vector_store %arg26[%c0_235, %c6_236, %c0_237], %770 {strides = array<i32>} : memref<2x8x64xf32, #tpu.memory_space<vmem>>, vector<2x1x32xf32>,
    %771 = vector.extract_strided_slice %766 {offsets = [0, 32], sizes = [2, 32], strides = [1, 1]} : vector<2x64xf32> to vector<2x32xf32>
    %c0_238 = arith.constant 0 : index
    %c1_239 = arith.constant 1 : index
    %c32_240 = arith.constant 32 : index
    %772 = vector.load %arg26[%c0_238, %c1_239, %c32_240] : memref<2x8x64xf32, #tpu.memory_space<vmem>>, vector<2x1x32xf32>
    %773 = vector.shape_cast %772 : vector<2x1x32xf32> to vector<2x32xf32>
    %774 = vector.shape_cast %771 : vector<2x32xf32> to vector<2x1x32xf32>
    tpu.vector_store %arg26[%c0_238, %c1_239, %c32_240], %774 {strides = array<i32>} : memref<2x8x64xf32, #tpu.memory_space<vmem>>, vector<2x1x32xf32>,
    %775 = arith.truncf %766 : vector<2x64xf32> to vector<2x64xbf16>
    %cst_241 = arith.constant dense<0.000000e+00> : vector<2x256xf32>
    %776 = tpu.matmul %775, %10, %cst_241 {dimension_numbers = #tpu.dot_dimension_numbers<[1], [0], [0], [1], [0, 0, 1, 1], [], []>} : vector<2x64xbf16>, vector<64x256xbf16>, vector<2x256xf32> -> vector<2x256xf32>
    %777 = vector.extract_strided_slice %552 {offsets = [0, 7, 0], sizes = [2, 1, 256], strides = [1, 1, 1]} : vector<2x8x256xf32> to vector<2x1x256xf32>
    %778 = vector.shape_cast %777 : vector<2x1x256xf32> to vector<2x256xf32>
    %779 = arith.addf %776, %778 : vector<2x256xf32>
    %780 = vector.extract_strided_slice %555 {offsets = [0, 0, 0], sizes = [2, 1, 256], strides = [1, 1, 1]} : vector<2x8x256xf32> to vector<2x1x256xf32>
    %781 = vector.shape_cast %780 : vector<2x1x256xf32> to vector<2x256xf32>
    %782 = arith.addf %779, %781 : vector<2x256xf32>
    %783 = arith.negf %782 : vector<2x256xf32>
    %784 = math.exp %783 : vector<2x256xf32>
    %cst_242 = arith.constant 1.000000e+00 : f32
    %785 = vector.broadcast %cst_242 : f32 to vector<2x256xf32>
    %786 = arith.addf %785, %784 : vector<2x256xf32>
    %787 = arith.divf %785, %786 : vector<2x256xf32>
    %788 = math.tanh %782 : vector<2x256xf32>
    %789 = vector.extract_strided_slice %787 {offsets = [0, 0], sizes = [2, 64], strides = [1, 1]} : vector<2x256xf32> to vector<2x64xf32>
    %790 = vector.extract_strided_slice %787 {offsets = [0, 64], sizes = [2, 64], strides = [1, 1]} : vector<2x256xf32> to vector<2x64xf32>
    %791 = vector.extract_strided_slice %788 {offsets = [0, 128], sizes = [2, 64], strides = [1, 1]} : vector<2x256xf32> to vector<2x64xf32>
    %792 = vector.extract_strided_slice %787 {offsets = [0, 192], sizes = [2, 64], strides = [1, 1]} : vector<2x256xf32> to vector<2x64xf32>
    %793 = arith.mulf %790, %764 : vector<2x64xf32>
    %794 = arith.mulf %789, %791 : vector<2x64xf32>
    %795 = arith.addf %793, %794 : vector<2x64xf32>
    %796 = math.tanh %795 : vector<2x64xf32>
    %797 = arith.mulf %792, %796 : vector<2x64xf32>
    %798 = vector.extract_strided_slice %797 {offsets = [0, 0], sizes = [2, 32], strides = [1, 1]} : vector<2x64xf32> to vector<2x32xf32>
    %c0_243 = arith.constant 0 : index
    %c7_244 = arith.constant 7 : index
    %c0_245 = arith.constant 0 : index
    %799 = vector.load %arg26[%c0_243, %c7_244, %c0_245] : memref<2x8x64xf32, #tpu.memory_space<vmem>>, vector<2x1x32xf32>
    %800 = vector.shape_cast %799 : vector<2x1x32xf32> to vector<2x32xf32>
    %801 = vector.shape_cast %798 : vector<2x32xf32> to vector<2x1x32xf32>
    tpu.vector_store %arg26[%c0_243, %c7_244, %c0_245], %801 {strides = array<i32>} : memref<2x8x64xf32, #tpu.memory_space<vmem>>, vector<2x1x32xf32>,
    %802 = vector.extract_strided_slice %797 {offsets = [0, 32], sizes = [2, 32], strides = [1, 1]} : vector<2x64xf32> to vector<2x32xf32>
    %c0_246 = arith.constant 0 : index
    %c0_247 = arith.constant 0 : index
    %c32_248 = arith.constant 32 : index
    %803 = vector.load %arg26[%c0_246, %c0_247, %c32_248] : memref<2x8x64xf32, #tpu.memory_space<vmem>>, vector<2x1x32xf32>
    %804 = vector.shape_cast %803 : vector<2x1x32xf32> to vector<2x32xf32>
    %805 = vector.shape_cast %802 : vector<2x32xf32> to vector<2x1x32xf32>
    tpu.vector_store %arg26[%c0_246, %c0_247, %c32_248], %805 {strides = array<i32>} : memref<2x8x64xf32, #tpu.memory_space<vmem>>, vector<2x1x32xf32>,
    %c0_249 = arith.constant 0 : index
    %c0_250 = arith.constant 0 : index
    %c0_251 = arith.constant 0 : index
    %806 = vector.load %arg26[%c0_249, %c0_250, %c0_251] : memref<2x8x64xf32, #tpu.memory_space<vmem>>, vector<2x8x64xf32>
    %807 = arith.truncf %806 : vector<2x8x64xf32> to vector<2x8x64xbf16>
    %808 = vector.shape_cast %806 : vector<2x8x64xf32> to vector<16x64xf32>
    %809 = arith.truncf %808 : vector<16x64xf32> to vector<16x64xbf16>
    %cst_252 = arith.constant dense<0.000000e+00> : vector<16x32xf32>
    %810 = tpu.matmul %809, %12, %cst_252 {dimension_numbers = #tpu.dot_dimension_numbers<[1], [0], [0], [1], [0, 0, 1, 1], [], []>} : vector<16x64xbf16>, vector<64x32xbf16>, vector<16x32xf32> -> vector<16x32xf32>
    %811 = vector.shape_cast %810 : vector<16x32xf32> to vector<2x8x32xf32>
    %812 = vector.shape_cast %13 : vector<1x32xf32> to vector<1x1x32xf32>
    %813 = vector.shape_cast %812 : vector<1x1x32xf32> to vector<1x1x32xf32>
    %814 = vector.broadcast %813 : vector<1x1x32xf32> to vector<2x8x32xf32>
    %815 = vector.extract_strided_slice %797 {offsets = [0, 0], sizes = [2, 32], strides = [1, 1]} : vector<2x64xf32> to vector<2x32xf32>
    %cst_253 = arith.constant 0.000000e+00 : f32
    %816 = vector.broadcast %cst_253 : f32 to vector<2x32xf32>
    %817 = arith.truncf %815 : vector<2x32xf32> to vector<2x32xbf16>
    %cst_254 = arith.constant dense<0.000000e+00> : vector<2x160xf32>
    %818 = tpu.matmul %817, %14, %cst_254 {dimension_numbers = #tpu.dot_dimension_numbers<[1], [0], [0], [1], [0, 0, 1, 1], [], []>} : vector<2x32xbf16>, vector<32x160xbf16>, vector<2x160xf32> -> vector<2x160xf32>
    %819 = vector.extract_strided_slice %818 {offsets = [0, 0], sizes = [2, 32], strides = [1, 1]} : vector<2x160xf32> to vector<2x32xf32>
    %820 = vector.extract_strided_slice %818 {offsets = [0, 32], sizes = [2, 128], strides = [1, 1]} : vector<2x160xf32> to vector<2x128xf32>
    %821 = vector.shape_cast %819 : vector<2x32xf32> to vector<2x1x32xf32>
    %822 = vector.broadcast %821 : vector<2x1x32xf32> to vector<2x8x32xf32>
    %823 = arith.addf %811, %822 : vector<2x8x32xf32>
    %824 = math.tanh %823 : vector<2x8x32xf32>
    %825 = arith.mulf %824, %814 : vector<2x8x32xf32>
    %cst_255 = arith.constant dense<0.000000e+00> : vector<2x8xf32>
    %826 = vector.multi_reduction <add>, %825, %cst_255 [2] : vector<2x8x32xf32> to vector<2x8xf32>
    %cst_256 = arith.constant dense<0xFF800000> : vector<2xf32>
    %827 = vector.multi_reduction <maximumf>, %826, %cst_256 [1] : vector<2x8xf32> to vector<2xf32>
    %828 = vector.shape_cast %827 : vector<2xf32> to vector<2x1xf32>
    %829 = vector.broadcast %828 : vector<2x1xf32> to vector<2x8xf32>
    %830 = arith.subf %826, %829 : vector<2x8xf32>
    %831 = math.exp %830 : vector<2x8xf32>
    %cst_257 = arith.constant dense<0.000000e+00> : vector<2xf32>
    %832 = vector.multi_reduction <add>, %831, %cst_257 [1] : vector<2x8xf32> to vector<2xf32>
    %833 = vector.shape_cast %832 : vector<2xf32> to vector<2x1xf32>
    %834 = tpu.reciprocal %833 : vector<2x1xf32> -> vector<2x1xf32>
    %835 = vector.broadcast %834 : vector<2x1xf32> to vector<2x8xf32>
    %836 = arith.mulf %831, %835 : vector<2x8xf32>
    %c0_258 = arith.constant 0 : index
    %c0_259 = arith.constant 0 : index
    %c0_260 = arith.constant 0 : index
    %837 = vector.load %arg25[%c0_258, %c0_259, %c0_260] : memref<2x8x8xf32, #tpu.memory_space<vmem>>, vector<2x1x8xf32>
    %838 = vector.shape_cast %837 : vector<2x1x8xf32> to vector<2x8xf32>
    %839 = vector.shape_cast %836 : vector<2x8xf32> to vector<2x1x8xf32>
    tpu.vector_store %arg25[%c0_258, %c0_259, %c0_260], %839 {strides = array<i32>} : memref<2x8x8xf32, #tpu.memory_space<vmem>>, vector<2x1x8xf32>,
    %840 = vector.shape_cast %836 : vector<2x8xf32> to vector<2x1x8xf32>
    %841 = arith.truncf %840 : vector<2x1x8xf32> to vector<2x1x8xbf16>
    "tpu.trace_start"() <{level = 10 : i32, message = "bqt,btk->bqk"}> : () -> ()
    %cst_261 = arith.constant dense<0.000000e+00> : vector<2x1x64xf32>
    %842 = tpu.matmul %841, %807, %cst_261 {dimension_numbers = #tpu.dot_dimension_numbers<[2], [1], [1], [2], [0, 0, 0, 1, 1, 2], [0], [0]>} : vector<2x1x8xbf16>, vector<2x8x64xbf16>, vector<2x1x64xf32> -> vector<2x1x64xf32>
    "tpu.trace_stop"() : () -> ()
    %843 = vector.shape_cast %842 : vector<2x1x64xf32> to vector<2x64xf32>
    %844 = arith.truncf %843 : vector<2x64xf32> to vector<2x64xbf16>
    %cst_262 = arith.constant dense<0.000000e+00> : vector<2x128xf32>
    %845 = tpu.matmul %844, %15, %cst_262 {dimension_numbers = #tpu.dot_dimension_numbers<[1], [0], [0], [1], [0, 0, 1, 1], [], []>} : vector<2x64xbf16>, vector<64x128xbf16>, vector<2x128xf32> -> vector<2x128xf32>
    %846 = arith.addf %845, %820 : vector<2x128xf32>
    %847 = vector.broadcast %16 : vector<1x128xf32> to vector<2x128xf32>
    %848 = arith.addf %846, %847 : vector<2x128xf32>
    %849 = arith.negf %848 : vector<2x128xf32>
    %850 = math.exp %849 : vector<2x128xf32>
    %cst_263 = arith.constant 1.000000e+00 : f32
    %851 = vector.broadcast %cst_263 : f32 to vector<2x128xf32>
    %852 = arith.addf %851, %850 : vector<2x128xf32>
    %853 = arith.divf %851, %852 : vector<2x128xf32>
    %854 = math.tanh %848 : vector<2x128xf32>
    %855 = vector.extract_strided_slice %853 {offsets = [0, 0], sizes = [2, 32], strides = [1, 1]} : vector<2x128xf32> to vector<2x32xf32>
    %856 = vector.extract_strided_slice %853 {offsets = [0, 32], sizes = [2, 32], strides = [1, 1]} : vector<2x128xf32> to vector<2x32xf32>
    %857 = vector.extract_strided_slice %854 {offsets = [0, 64], sizes = [2, 32], strides = [1, 1]} : vector<2x128xf32> to vector<2x32xf32>
    %858 = vector.extract_strided_slice %853 {offsets = [0, 96], sizes = [2, 32], strides = [1, 1]} : vector<2x128xf32> to vector<2x32xf32>
    %859 = arith.mulf %856, %816 : vector<2x32xf32>
    %860 = arith.mulf %855, %857 : vector<2x32xf32>
    %861 = arith.addf %859, %860 : vector<2x32xf32>
    %862 = math.tanh %861 : vector<2x32xf32>
    %863 = arith.mulf %858, %862 : vector<2x32xf32>
    %c0_264 = arith.constant 0 : index
    %c0_265 = arith.constant 0 : index
    %c0_266 = arith.constant 0 : index
    %864 = vector.load %arg27[%c0_264, %c0_265, %c0_266] : memref<2x8x32xf32, #tpu.memory_space<vmem>>, vector<2x1x32xf32>
    %865 = vector.shape_cast %864 : vector<2x1x32xf32> to vector<2x32xf32>
    %866 = vector.shape_cast %863 : vector<2x32xf32> to vector<2x1x32xf32>
    tpu.vector_store %arg27[%c0_264, %c0_265, %c0_266], %866 {strides = array<i32>} : memref<2x8x32xf32, #tpu.memory_space<vmem>>, vector<2x1x32xf32>,
    %867 = arith.truncf %863 : vector<2x32xf32> to vector<2x32xbf16>
    %cst_267 = arith.constant dense<0.000000e+00> : vector<2x160xf32>
    %868 = tpu.matmul %867, %14, %cst_267 {dimension_numbers = #tpu.dot_dimension_numbers<[1], [0], [0], [1], [0, 0, 1, 1], [], []>} : vector<2x32xbf16>, vector<32x160xbf16>, vector<2x160xf32> -> vector<2x160xf32>
    %869 = vector.extract_strided_slice %868 {offsets = [0, 0], sizes = [2, 32], strides = [1, 1]} : vector<2x160xf32> to vector<2x32xf32>
    %870 = vector.extract_strided_slice %868 {offsets = [0, 32], sizes = [2, 128], strides = [1, 1]} : vector<2x160xf32> to vector<2x128xf32>
    %871 = vector.shape_cast %869 : vector<2x32xf32> to vector<2x1x32xf32>
    %872 = vector.broadcast %871 : vector<2x1x32xf32> to vector<2x8x32xf32>
    %873 = arith.addf %811, %872 : vector<2x8x32xf32>
    %874 = math.tanh %873 : vector<2x8x32xf32>
    %875 = arith.mulf %874, %814 : vector<2x8x32xf32>
    %cst_268 = arith.constant dense<0.000000e+00> : vector<2x8xf32>
    %876 = vector.multi_reduction <add>, %875, %cst_268 [2] : vector<2x8x32xf32> to vector<2x8xf32>
    %cst_269 = arith.constant dense<0xFF800000> : vector<2xf32>
    %877 = vector.multi_reduction <maximumf>, %876, %cst_269 [1] : vector<2x8xf32> to vector<2xf32>
    %878 = vector.shape_cast %877 : vector<2xf32> to vector<2x1xf32>
    %879 = vector.broadcast %878 : vector<2x1xf32> to vector<2x8xf32>
    %880 = arith.subf %876, %879 : vector<2x8xf32>
    %881 = math.exp %880 : vector<2x8xf32>
    %cst_270 = arith.constant dense<0.000000e+00> : vector<2xf32>
    %882 = vector.multi_reduction <add>, %881, %cst_270 [1] : vector<2x8xf32> to vector<2xf32>
    %883 = vector.shape_cast %882 : vector<2xf32> to vector<2x1xf32>
    %884 = tpu.reciprocal %883 : vector<2x1xf32> -> vector<2x1xf32>
    %885 = vector.broadcast %884 : vector<2x1xf32> to vector<2x8xf32>
    %886 = arith.mulf %881, %885 : vector<2x8xf32>
    %c0_271 = arith.constant 0 : index
    %c1_272 = arith.constant 1 : index
    %c0_273 = arith.constant 0 : index
    %887 = vector.load %arg25[%c0_271, %c1_272, %c0_273] : memref<2x8x8xf32, #tpu.memory_space<vmem>>, vector<2x1x8xf32>
    %888 = vector.shape_cast %887 : vector<2x1x8xf32> to vector<2x8xf32>
    %889 = vector.shape_cast %886 : vector<2x8xf32> to vector<2x1x8xf32>
    tpu.vector_store %arg25[%c0_271, %c1_272, %c0_273], %889 {strides = array<i32>} : memref<2x8x8xf32, #tpu.memory_space<vmem>>, vector<2x1x8xf32>,
    %890 = vector.shape_cast %886 : vector<2x8xf32> to vector<2x1x8xf32>
    %891 = arith.truncf %890 : vector<2x1x8xf32> to vector<2x1x8xbf16>
    "tpu.trace_start"() <{level = 10 : i32, message = "bqt,btk->bqk"}> : () -> ()
    %cst_274 = arith.constant dense<0.000000e+00> : vector<2x1x64xf32>
    %892 = tpu.matmul %891, %807, %cst_274 {dimension_numbers = #tpu.dot_dimension_numbers<[2], [1], [1], [2], [0, 0, 0, 1, 1, 2], [0], [0]>} : vector<2x1x8xbf16>, vector<2x8x64xbf16>, vector<2x1x64xf32> -> vector<2x1x64xf32>
    "tpu.trace_stop"() : () -> ()
    %893 = vector.shape_cast %892 : vector<2x1x64xf32> to vector<2x64xf32>
    %894 = arith.truncf %893 : vector<2x64xf32> to vector<2x64xbf16>
    %cst_275 = arith.constant dense<0.000000e+00> : vector<2x128xf32>
    %895 = tpu.matmul %894, %15, %cst_275 {dimension_numbers = #tpu.dot_dimension_numbers<[1], [0], [0], [1], [0, 0, 1, 1], [], []>} : vector<2x64xbf16>, vector<64x128xbf16>, vector<2x128xf32> -> vector<2x128xf32>
    %896 = arith.addf %895, %870 : vector<2x128xf32>
    %897 = vector.broadcast %16 : vector<1x128xf32> to vector<2x128xf32>
    %898 = arith.addf %896, %897 : vector<2x128xf32>
    %899 = arith.negf %898 : vector<2x128xf32>
    %900 = math.exp %899 : vector<2x128xf32>
    %cst_276 = arith.constant 1.000000e+00 : f32
    %901 = vector.broadcast %cst_276 : f32 to vector<2x128xf32>
    %902 = arith.addf %901, %900 : vector<2x128xf32>
    %903 = arith.divf %901, %902 : vector<2x128xf32>
    %904 = math.tanh %898 : vector<2x128xf32>
    %905 = vector.extract_strided_slice %903 {offsets = [0, 0], sizes = [2, 32], strides = [1, 1]} : vector<2x128xf32> to vector<2x32xf32>
    %906 = vector.extract_strided_slice %903 {offsets = [0, 32], sizes = [2, 32], strides = [1, 1]} : vector<2x128xf32> to vector<2x32xf32>
    %907 = vector.extract_strided_slice %904 {offsets = [0, 64], sizes = [2, 32], strides = [1, 1]} : vector<2x128xf32> to vector<2x32xf32>
    %908 = vector.extract_strided_slice %903 {offsets = [0, 96], sizes = [2, 32], strides = [1, 1]} : vector<2x128xf32> to vector<2x32xf32>
    %909 = arith.mulf %906, %861 : vector<2x32xf32>
    %910 = arith.mulf %905, %907 : vector<2x32xf32>
    %911 = arith.addf %909, %910 : vector<2x32xf32>
    %912 = math.tanh %911 : vector<2x32xf32>
    %913 = arith.mulf %908, %912 : vector<2x32xf32>
    %c0_277 = arith.constant 0 : index
    %c1_278 = arith.constant 1 : index
    %c0_279 = arith.constant 0 : index
    %914 = vector.load %arg27[%c0_277, %c1_278, %c0_279] : memref<2x8x32xf32, #tpu.memory_space<vmem>>, vector<2x1x32xf32>
    %915 = vector.shape_cast %914 : vector<2x1x32xf32> to vector<2x32xf32>
    %916 = vector.shape_cast %913 : vector<2x32xf32> to vector<2x1x32xf32>
    tpu.vector_store %arg27[%c0_277, %c1_278, %c0_279], %916 {strides = array<i32>} : memref<2x8x32xf32, #tpu.memory_space<vmem>>, vector<2x1x32xf32>,
    %917 = arith.truncf %913 : vector<2x32xf32> to vector<2x32xbf16>
    %cst_280 = arith.constant dense<0.000000e+00> : vector<2x160xf32>
    %918 = tpu.matmul %917, %14, %cst_280 {dimension_numbers = #tpu.dot_dimension_numbers<[1], [0], [0], [1], [0, 0, 1, 1], [], []>} : vector<2x32xbf16>, vector<32x160xbf16>, vector<2x160xf32> -> vector<2x160xf32>
    %919 = vector.extract_strided_slice %918 {offsets = [0, 0], sizes = [2, 32], strides = [1, 1]} : vector<2x160xf32> to vector<2x32xf32>
    %920 = vector.extract_strided_slice %918 {offsets = [0, 32], sizes = [2, 128], strides = [1, 1]} : vector<2x160xf32> to vector<2x128xf32>
    %921 = vector.shape_cast %919 : vector<2x32xf32> to vector<2x1x32xf32>
    %922 = vector.broadcast %921 : vector<2x1x32xf32> to vector<2x8x32xf32>
    %923 = arith.addf %811, %922 : vector<2x8x32xf32>
    %924 = math.tanh %923 : vector<2x8x32xf32>
    %925 = arith.mulf %924, %814 : vector<2x8x32xf32>
    %cst_281 = arith.constant dense<0.000000e+00> : vector<2x8xf32>
    %926 = vector.multi_reduction <add>, %925, %cst_281 [2] : vector<2x8x32xf32> to vector<2x8xf32>
    %cst_282 = arith.constant dense<0xFF800000> : vector<2xf32>
    %927 = vector.multi_reduction <maximumf>, %926, %cst_282 [1] : vector<2x8xf32> to vector<2xf32>
    %928 = vector.shape_cast %927 : vector<2xf32> to vector<2x1xf32>
    %929 = vector.broadcast %928 : vector<2x1xf32> to vector<2x8xf32>
    %930 = arith.subf %926, %929 : vector<2x8xf32>
    %931 = math.exp %930 : vector<2x8xf32>
    %cst_283 = arith.constant dense<0.000000e+00> : vector<2xf32>
    %932 = vector.multi_reduction <add>, %931, %cst_283 [1] : vector<2x8xf32> to vector<2xf32>
    %933 = vector.shape_cast %932 : vector<2xf32> to vector<2x1xf32>
    %934 = tpu.reciprocal %933 : vector<2x1xf32> -> vector<2x1xf32>
    %935 = vector.broadcast %934 : vector<2x1xf32> to vector<2x8xf32>
    %936 = arith.mulf %931, %935 : vector<2x8xf32>
    %c0_284 = arith.constant 0 : index
    %c2_285 = arith.constant 2 : index
    %c0_286 = arith.constant 0 : index
    %937 = vector.load %arg25[%c0_284, %c2_285, %c0_286] : memref<2x8x8xf32, #tpu.memory_space<vmem>>, vector<2x1x8xf32>
    %938 = vector.shape_cast %937 : vector<2x1x8xf32> to vector<2x8xf32>
    %939 = vector.shape_cast %936 : vector<2x8xf32> to vector<2x1x8xf32>
    tpu.vector_store %arg25[%c0_284, %c2_285, %c0_286], %939 {strides = array<i32>} : memref<2x8x8xf32, #tpu.memory_space<vmem>>, vector<2x1x8xf32>,
    %940 = vector.shape_cast %936 : vector<2x8xf32> to vector<2x1x8xf32>
    %941 = arith.truncf %940 : vector<2x1x8xf32> to vector<2x1x8xbf16>
    "tpu.trace_start"() <{level = 10 : i32, message = "bqt,btk->bqk"}> : () -> ()
    %cst_287 = arith.constant dense<0.000000e+00> : vector<2x1x64xf32>
    %942 = tpu.matmul %941, %807, %cst_287 {dimension_numbers = #tpu.dot_dimension_numbers<[2], [1], [1], [2], [0, 0, 0, 1, 1, 2], [0], [0]>} : vector<2x1x8xbf16>, vector<2x8x64xbf16>, vector<2x1x64xf32> -> vector<2x1x64xf32>
    "tpu.trace_stop"() : () -> ()
    %943 = vector.shape_cast %942 : vector<2x1x64xf32> to vector<2x64xf32>
    %944 = arith.truncf %943 : vector<2x64xf32> to vector<2x64xbf16>
    %cst_288 = arith.constant dense<0.000000e+00> : vector<2x128xf32>
    %945 = tpu.matmul %944, %15, %cst_288 {dimension_numbers = #tpu.dot_dimension_numbers<[1], [0], [0], [1], [0, 0, 1, 1], [], []>} : vector<2x64xbf16>, vector<64x128xbf16>, vector<2x128xf32> -> vector<2x128xf32>
    %946 = arith.addf %945, %920 : vector<2x128xf32>
    %947 = vector.broadcast %16 : vector<1x128xf32> to vector<2x128xf32>
    %948 = arith.addf %946, %947 : vector<2x128xf32>
    %949 = arith.negf %948 : vector<2x128xf32>
    %950 = math.exp %949 : vector<2x128xf32>
    %cst_289 = arith.constant 1.000000e+00 : f32
    %951 = vector.broadcast %cst_289 : f32 to vector<2x128xf32>
    %952 = arith.addf %951, %950 : vector<2x128xf32>
    %953 = arith.divf %951, %952 : vector<2x128xf32>
    %954 = math.tanh %948 : vector<2x128xf32>
    %955 = vector.extract_strided_slice %953 {offsets = [0, 0], sizes = [2, 32], strides = [1, 1]} : vector<2x128xf32> to vector<2x32xf32>
    %956 = vector.extract_strided_slice %953 {offsets = [0, 32], sizes = [2, 32], strides = [1, 1]} : vector<2x128xf32> to vector<2x32xf32>
    %957 = vector.extract_strided_slice %954 {offsets = [0, 64], sizes = [2, 32], strides = [1, 1]} : vector<2x128xf32> to vector<2x32xf32>
    %958 = vector.extract_strided_slice %953 {offsets = [0, 96], sizes = [2, 32], strides = [1, 1]} : vector<2x128xf32> to vector<2x32xf32>
    %959 = arith.mulf %956, %911 : vector<2x32xf32>
    %960 = arith.mulf %955, %957 : vector<2x32xf32>
    %961 = arith.addf %959, %960 : vector<2x32xf32>
    %962 = math.tanh %961 : vector<2x32xf32>
    %963 = arith.mulf %958, %962 : vector<2x32xf32>
    %c0_290 = arith.constant 0 : index
    %c2_291 = arith.constant 2 : index
    %c0_292 = arith.constant 0 : index
    %964 = vector.load %arg27[%c0_290, %c2_291, %c0_292] : memref<2x8x32xf32, #tpu.memory_space<vmem>>, vector<2x1x32xf32>
    %965 = vector.shape_cast %964 : vector<2x1x32xf32> to vector<2x32xf32>
    %966 = vector.shape_cast %963 : vector<2x32xf32> to vector<2x1x32xf32>
    tpu.vector_store %arg27[%c0_290, %c2_291, %c0_292], %966 {strides = array<i32>} : memref<2x8x32xf32, #tpu.memory_space<vmem>>, vector<2x1x32xf32>,
    %967 = arith.truncf %963 : vector<2x32xf32> to vector<2x32xbf16>
    %cst_293 = arith.constant dense<0.000000e+00> : vector<2x160xf32>
    %968 = tpu.matmul %967, %14, %cst_293 {dimension_numbers = #tpu.dot_dimension_numbers<[1], [0], [0], [1], [0, 0, 1, 1], [], []>} : vector<2x32xbf16>, vector<32x160xbf16>, vector<2x160xf32> -> vector<2x160xf32>
    %969 = vector.extract_strided_slice %968 {offsets = [0, 0], sizes = [2, 32], strides = [1, 1]} : vector<2x160xf32> to vector<2x32xf32>
    %970 = vector.extract_strided_slice %968 {offsets = [0, 32], sizes = [2, 128], strides = [1, 1]} : vector<2x160xf32> to vector<2x128xf32>
    %971 = vector.shape_cast %969 : vector<2x32xf32> to vector<2x1x32xf32>
    %972 = vector.broadcast %971 : vector<2x1x32xf32> to vector<2x8x32xf32>
    %973 = arith.addf %811, %972 : vector<2x8x32xf32>
    %974 = math.tanh %973 : vector<2x8x32xf32>
    %975 = arith.mulf %974, %814 : vector<2x8x32xf32>
    %cst_294 = arith.constant dense<0.000000e+00> : vector<2x8xf32>
    %976 = vector.multi_reduction <add>, %975, %cst_294 [2] : vector<2x8x32xf32> to vector<2x8xf32>
    %cst_295 = arith.constant dense<0xFF800000> : vector<2xf32>
    %977 = vector.multi_reduction <maximumf>, %976, %cst_295 [1] : vector<2x8xf32> to vector<2xf32>
    %978 = vector.shape_cast %977 : vector<2xf32> to vector<2x1xf32>
    %979 = vector.broadcast %978 : vector<2x1xf32> to vector<2x8xf32>
    %980 = arith.subf %976, %979 : vector<2x8xf32>
    %981 = math.exp %980 : vector<2x8xf32>
    %cst_296 = arith.constant dense<0.000000e+00> : vector<2xf32>
    %982 = vector.multi_reduction <add>, %981, %cst_296 [1] : vector<2x8xf32> to vector<2xf32>
    %983 = vector.shape_cast %982 : vector<2xf32> to vector<2x1xf32>
    %984 = tpu.reciprocal %983 : vector<2x1xf32> -> vector<2x1xf32>
    %985 = vector.broadcast %984 : vector<2x1xf32> to vector<2x8xf32>
    %986 = arith.mulf %981, %985 : vector<2x8xf32>
    %c0_297 = arith.constant 0 : index
    %c3_298 = arith.constant 3 : index
    %c0_299 = arith.constant 0 : index
    %987 = vector.load %arg25[%c0_297, %c3_298, %c0_299] : memref<2x8x8xf32, #tpu.memory_space<vmem>>, vector<2x1x8xf32>
    %988 = vector.shape_cast %987 : vector<2x1x8xf32> to vector<2x8xf32>
    %989 = vector.shape_cast %986 : vector<2x8xf32> to vector<2x1x8xf32>
    tpu.vector_store %arg25[%c0_297, %c3_298, %c0_299], %989 {strides = array<i32>} : memref<2x8x8xf32, #tpu.memory_space<vmem>>, vector<2x1x8xf32>,
    %990 = vector.shape_cast %986 : vector<2x8xf32> to vector<2x1x8xf32>
    %991 = arith.truncf %990 : vector<2x1x8xf32> to vector<2x1x8xbf16>
    "tpu.trace_start"() <{level = 10 : i32, message = "bqt,btk->bqk"}> : () -> ()
    %cst_300 = arith.constant dense<0.000000e+00> : vector<2x1x64xf32>
    %992 = tpu.matmul %991, %807, %cst_300 {dimension_numbers = #tpu.dot_dimension_numbers<[2], [1], [1], [2], [0, 0, 0, 1, 1, 2], [0], [0]>} : vector<2x1x8xbf16>, vector<2x8x64xbf16>, vector<2x1x64xf32> -> vector<2x1x64xf32>
    "tpu.trace_stop"() : () -> ()
    %993 = vector.shape_cast %992 : vector<2x1x64xf32> to vector<2x64xf32>
    %994 = arith.truncf %993 : vector<2x64xf32> to vector<2x64xbf16>
    %cst_301 = arith.constant dense<0.000000e+00> : vector<2x128xf32>
    %995 = tpu.matmul %994, %15, %cst_301 {dimension_numbers = #tpu.dot_dimension_numbers<[1], [0], [0], [1], [0, 0, 1, 1], [], []>} : vector<2x64xbf16>, vector<64x128xbf16>, vector<2x128xf32> -> vector<2x128xf32>
    %996 = arith.addf %995, %970 : vector<2x128xf32>
    %997 = vector.broadcast %16 : vector<1x128xf32> to vector<2x128xf32>
    %998 = arith.addf %996, %997 : vector<2x128xf32>
    %999 = arith.negf %998 : vector<2x128xf32>
    %1000 = math.exp %999 : vector<2x128xf32>
    %cst_302 = arith.constant 1.000000e+00 : f32
    %1001 = vector.broadcast %cst_302 : f32 to vector<2x128xf32>
    %1002 = arith.addf %1001, %1000 : vector<2x128xf32>
    %1003 = arith.divf %1001, %1002 : vector<2x128xf32>
    %1004 = math.tanh %998 : vector<2x128xf32>
    %1005 = vector.extract_strided_slice %1003 {offsets = [0, 0], sizes = [2, 32], strides = [1, 1]} : vector<2x128xf32> to vector<2x32xf32>
    %1006 = vector.extract_strided_slice %1003 {offsets = [0, 32], sizes = [2, 32], strides = [1, 1]} : vector<2x128xf32> to vector<2x32xf32>
    %1007 = vector.extract_strided_slice %1004 {offsets = [0, 64], sizes = [2, 32], strides = [1, 1]} : vector<2x128xf32> to vector<2x32xf32>
    %1008 = vector.extract_strided_slice %1003 {offsets = [0, 96], sizes = [2, 32], strides = [1, 1]} : vector<2x128xf32> to vector<2x32xf32>
    %1009 = arith.mulf %1006, %961 : vector<2x32xf32>
    %1010 = arith.mulf %1005, %1007 : vector<2x32xf32>
    %1011 = arith.addf %1009, %1010 : vector<2x32xf32>
    %1012 = math.tanh %1011 : vector<2x32xf32>
    %1013 = arith.mulf %1008, %1012 : vector<2x32xf32>
    %c0_303 = arith.constant 0 : index
    %c3_304 = arith.constant 3 : index
    %c0_305 = arith.constant 0 : index
    %1014 = vector.load %arg27[%c0_303, %c3_304, %c0_305] : memref<2x8x32xf32, #tpu.memory_space<vmem>>, vector<2x1x32xf32>
    %1015 = vector.shape_cast %1014 : vector<2x1x32xf32> to vector<2x32xf32>
    %1016 = vector.shape_cast %1013 : vector<2x32xf32> to vector<2x1x32xf32>
    tpu.vector_store %arg27[%c0_303, %c3_304, %c0_305], %1016 {strides = array<i32>} : memref<2x8x32xf32, #tpu.memory_space<vmem>>, vector<2x1x32xf32>,
    %1017 = arith.truncf %1013 : vector<2x32xf32> to vector<2x32xbf16>
    %cst_306 = arith.constant dense<0.000000e+00> : vector<2x160xf32>
    %1018 = tpu.matmul %1017, %14, %cst_306 {dimension_numbers = #tpu.dot_dimension_numbers<[1], [0], [0], [1], [0, 0, 1, 1], [], []>} : vector<2x32xbf16>, vector<32x160xbf16>, vector<2x160xf32> -> vector<2x160xf32>
    %1019 = vector.extract_strided_slice %1018 {offsets = [0, 0], sizes = [2, 32], strides = [1, 1]} : vector<2x160xf32> to vector<2x32xf32>
    %1020 = vector.extract_strided_slice %1018 {offsets = [0, 32], sizes = [2, 128], strides = [1, 1]} : vector<2x160xf32> to vector<2x128xf32>
    %1021 = vector.shape_cast %1019 : vector<2x32xf32> to vector<2x1x32xf32>
    %1022 = vector.broadcast %1021 : vector<2x1x32xf32> to vector<2x8x32xf32>
    %1023 = arith.addf %811, %1022 : vector<2x8x32xf32>
    %1024 = math.tanh %1023 : vector<2x8x32xf32>
    %1025 = arith.mulf %1024, %814 : vector<2x8x32xf32>
    %cst_307 = arith.constant dense<0.000000e+00> : vector<2x8xf32>
    %1026 = vector.multi_reduction <add>, %1025, %cst_307 [2] : vector<2x8x32xf32> to vector<2x8xf32>
    %cst_308 = arith.constant dense<0xFF800000> : vector<2xf32>
    %1027 = vector.multi_reduction <maximumf>, %1026, %cst_308 [1] : vector<2x8xf32> to vector<2xf32>
    %1028 = vector.shape_cast %1027 : vector<2xf32> to vector<2x1xf32>
    %1029 = vector.broadcast %1028 : vector<2x1xf32> to vector<2x8xf32>
    %1030 = arith.subf %1026, %1029 : vector<2x8xf32>
    %1031 = math.exp %1030 : vector<2x8xf32>
    %cst_309 = arith.constant dense<0.000000e+00> : vector<2xf32>
    %1032 = vector.multi_reduction <add>, %1031, %cst_309 [1] : vector<2x8xf32> to vector<2xf32>
    %1033 = vector.shape_cast %1032 : vector<2xf32> to vector<2x1xf32>
    %1034 = tpu.reciprocal %1033 : vector<2x1xf32> -> vector<2x1xf32>
    %1035 = vector.broadcast %1034 : vector<2x1xf32> to vector<2x8xf32>
    %1036 = arith.mulf %1031, %1035 : vector<2x8xf32>
    %c0_310 = arith.constant 0 : index
    %c4_311 = arith.constant 4 : index
    %c0_312 = arith.constant 0 : index
    %1037 = vector.load %arg25[%c0_310, %c4_311, %c0_312] : memref<2x8x8xf32, #tpu.memory_space<vmem>>, vector<2x1x8xf32>
    %1038 = vector.shape_cast %1037 : vector<2x1x8xf32> to vector<2x8xf32>
    %1039 = vector.shape_cast %1036 : vector<2x8xf32> to vector<2x1x8xf32>
    tpu.vector_store %arg25[%c0_310, %c4_311, %c0_312], %1039 {strides = array<i32>} : memref<2x8x8xf32, #tpu.memory_space<vmem>>, vector<2x1x8xf32>,
    %1040 = vector.shape_cast %1036 : vector<2x8xf32> to vector<2x1x8xf32>
    %1041 = arith.truncf %1040 : vector<2x1x8xf32> to vector<2x1x8xbf16>
    "tpu.trace_start"() <{level = 10 : i32, message = "bqt,btk->bqk"}> : () -> ()
    %cst_313 = arith.constant dense<0.000000e+00> : vector<2x1x64xf32>
    %1042 = tpu.matmul %1041, %807, %cst_313 {dimension_numbers = #tpu.dot_dimension_numbers<[2], [1], [1], [2], [0, 0, 0, 1, 1, 2], [0], [0]>} : vector<2x1x8xbf16>, vector<2x8x64xbf16>, vector<2x1x64xf32> -> vector<2x1x64xf32>
    "tpu.trace_stop"() : () -> ()
    %1043 = vector.shape_cast %1042 : vector<2x1x64xf32> to vector<2x64xf32>
    %1044 = arith.truncf %1043 : vector<2x64xf32> to vector<2x64xbf16>
    %cst_314 = arith.constant dense<0.000000e+00> : vector<2x128xf32>
    %1045 = tpu.matmul %1044, %15, %cst_314 {dimension_numbers = #tpu.dot_dimension_numbers<[1], [0], [0], [1], [0, 0, 1, 1], [], []>} : vector<2x64xbf16>, vector<64x128xbf16>, vector<2x128xf32> -> vector<2x128xf32>
    %1046 = arith.addf %1045, %1020 : vector<2x128xf32>
    %1047 = vector.broadcast %16 : vector<1x128xf32> to vector<2x128xf32>
    %1048 = arith.addf %1046, %1047 : vector<2x128xf32>
    %1049 = arith.negf %1048 : vector<2x128xf32>
    %1050 = math.exp %1049 : vector<2x128xf32>
    %cst_315 = arith.constant 1.000000e+00 : f32
    %1051 = vector.broadcast %cst_315 : f32 to vector<2x128xf32>
    %1052 = arith.addf %1051, %1050 : vector<2x128xf32>
    %1053 = arith.divf %1051, %1052 : vector<2x128xf32>
    %1054 = math.tanh %1048 : vector<2x128xf32>
    %1055 = vector.extract_strided_slice %1053 {offsets = [0, 0], sizes = [2, 32], strides = [1, 1]} : vector<2x128xf32> to vector<2x32xf32>
    %1056 = vector.extract_strided_slice %1053 {offsets = [0, 32], sizes = [2, 32], strides = [1, 1]} : vector<2x128xf32> to vector<2x32xf32>
    %1057 = vector.extract_strided_slice %1054 {offsets = [0, 64], sizes = [2, 32], strides = [1, 1]} : vector<2x128xf32> to vector<2x32xf32>
    %1058 = vector.extract_strided_slice %1053 {offsets = [0, 96], sizes = [2, 32], strides = [1, 1]} : vector<2x128xf32> to vector<2x32xf32>
    %1059 = arith.mulf %1056, %1011 : vector<2x32xf32>
    %1060 = arith.mulf %1055, %1057 : vector<2x32xf32>
    %1061 = arith.addf %1059, %1060 : vector<2x32xf32>
    %1062 = math.tanh %1061 : vector<2x32xf32>
    %1063 = arith.mulf %1058, %1062 : vector<2x32xf32>
    %c0_316 = arith.constant 0 : index
    %c4_317 = arith.constant 4 : index
    %c0_318 = arith.constant 0 : index
    %1064 = vector.load %arg27[%c0_316, %c4_317, %c0_318] : memref<2x8x32xf32, #tpu.memory_space<vmem>>, vector<2x1x32xf32>
    %1065 = vector.shape_cast %1064 : vector<2x1x32xf32> to vector<2x32xf32>
    %1066 = vector.shape_cast %1063 : vector<2x32xf32> to vector<2x1x32xf32>
    tpu.vector_store %arg27[%c0_316, %c4_317, %c0_318], %1066 {strides = array<i32>} : memref<2x8x32xf32, #tpu.memory_space<vmem>>, vector<2x1x32xf32>,
    %1067 = arith.truncf %1063 : vector<2x32xf32> to vector<2x32xbf16>
    %cst_319 = arith.constant dense<0.000000e+00> : vector<2x160xf32>
    %1068 = tpu.matmul %1067, %14, %cst_319 {dimension_numbers = #tpu.dot_dimension_numbers<[1], [0], [0], [1], [0, 0, 1, 1], [], []>} : vector<2x32xbf16>, vector<32x160xbf16>, vector<2x160xf32> -> vector<2x160xf32>
    %1069 = vector.extract_strided_slice %1068 {offsets = [0, 0], sizes = [2, 32], strides = [1, 1]} : vector<2x160xf32> to vector<2x32xf32>
    %1070 = vector.extract_strided_slice %1068 {offsets = [0, 32], sizes = [2, 128], strides = [1, 1]} : vector<2x160xf32> to vector<2x128xf32>
    %1071 = vector.shape_cast %1069 : vector<2x32xf32> to vector<2x1x32xf32>
    %1072 = vector.broadcast %1071 : vector<2x1x32xf32> to vector<2x8x32xf32>
    %1073 = arith.addf %811, %1072 : vector<2x8x32xf32>
    %1074 = math.tanh %1073 : vector<2x8x32xf32>
    %1075 = arith.mulf %1074, %814 : vector<2x8x32xf32>
    %cst_320 = arith.constant dense<0.000000e+00> : vector<2x8xf32>
    %1076 = vector.multi_reduction <add>, %1075, %cst_320 [2] : vector<2x8x32xf32> to vector<2x8xf32>
    %cst_321 = arith.constant dense<0xFF800000> : vector<2xf32>
    %1077 = vector.multi_reduction <maximumf>, %1076, %cst_321 [1] : vector<2x8xf32> to vector<2xf32>
    %1078 = vector.shape_cast %1077 : vector<2xf32> to vector<2x1xf32>
    %1079 = vector.broadcast %1078 : vector<2x1xf32> to vector<2x8xf32>
    %1080 = arith.subf %1076, %1079 : vector<2x8xf32>
    %1081 = math.exp %1080 : vector<2x8xf32>
    %cst_322 = arith.constant dense<0.000000e+00> : vector<2xf32>
    %1082 = vector.multi_reduction <add>, %1081, %cst_322 [1] : vector<2x8xf32> to vector<2xf32>
    %1083 = vector.shape_cast %1082 : vector<2xf32> to vector<2x1xf32>
    %1084 = tpu.reciprocal %1083 : vector<2x1xf32> -> vector<2x1xf32>
    %1085 = vector.broadcast %1084 : vector<2x1xf32> to vector<2x8xf32>
    %1086 = arith.mulf %1081, %1085 : vector<2x8xf32>
    %c0_323 = arith.constant 0 : index
    %c5_324 = arith.constant 5 : index
    %c0_325 = arith.constant 0 : index
    %1087 = vector.load %arg25[%c0_323, %c5_324, %c0_325] : memref<2x8x8xf32, #tpu.memory_space<vmem>>, vector<2x1x8xf32>
    %1088 = vector.shape_cast %1087 : vector<2x1x8xf32> to vector<2x8xf32>
    %1089 = vector.shape_cast %1086 : vector<2x8xf32> to vector<2x1x8xf32>
    tpu.vector_store %arg25[%c0_323, %c5_324, %c0_325], %1089 {strides = array<i32>} : memref<2x8x8xf32, #tpu.memory_space<vmem>>, vector<2x1x8xf32>,
    %1090 = vector.shape_cast %1086 : vector<2x8xf32> to vector<2x1x8xf32>
    %1091 = arith.truncf %1090 : vector<2x1x8xf32> to vector<2x1x8xbf16>
    "tpu.trace_start"() <{level = 10 : i32, message = "bqt,btk->bqk"}> : () -> ()
    %cst_326 = arith.constant dense<0.000000e+00> : vector<2x1x64xf32>
    %1092 = tpu.matmul %1091, %807, %cst_326 {dimension_numbers = #tpu.dot_dimension_numbers<[2], [1], [1], [2], [0, 0, 0, 1, 1, 2], [0], [0]>} : vector<2x1x8xbf16>, vector<2x8x64xbf16>, vector<2x1x64xf32> -> vector<2x1x64xf32>
    "tpu.trace_stop"() : () -> ()
    %1093 = vector.shape_cast %1092 : vector<2x1x64xf32> to vector<2x64xf32>
    %1094 = arith.truncf %1093 : vector<2x64xf32> to vector<2x64xbf16>
    %cst_327 = arith.constant dense<0.000000e+00> : vector<2x128xf32>
    %1095 = tpu.matmul %1094, %15, %cst_327 {dimension_numbers = #tpu.dot_dimension_numbers<[1], [0], [0], [1], [0, 0, 1, 1], [], []>} : vector<2x64xbf16>, vector<64x128xbf16>, vector<2x128xf32> -> vector<2x128xf32>
    %1096 = arith.addf %1095, %1070 : vector<2x128xf32>
    %1097 = vector.broadcast %16 : vector<1x128xf32> to vector<2x128xf32>
    %1098 = arith.addf %1096, %1097 : vector<2x128xf32>
    %1099 = arith.negf %1098 : vector<2x128xf32>
    %1100 = math.exp %1099 : vector<2x128xf32>
    %cst_328 = arith.constant 1.000000e+00 : f32
    %1101 = vector.broadcast %cst_328 : f32 to vector<2x128xf32>
    %1102 = arith.addf %1101, %1100 : vector<2x128xf32>
    %1103 = arith.divf %1101, %1102 : vector<2x128xf32>
    %1104 = math.tanh %1098 : vector<2x128xf32>
    %1105 = vector.extract_strided_slice %1103 {offsets = [0, 0], sizes = [2, 32], strides = [1, 1]} : vector<2x128xf32> to vector<2x32xf32>
    %1106 = vector.extract_strided_slice %1103 {offsets = [0, 32], sizes = [2, 32], strides = [1, 1]} : vector<2x128xf32> to vector<2x32xf32>
    %1107 = vector.extract_strided_slice %1104 {offsets = [0, 64], sizes = [2, 32], strides = [1, 1]} : vector<2x128xf32> to vector<2x32xf32>
    %1108 = vector.extract_strided_slice %1103 {offsets = [0, 96], sizes = [2, 32], strides = [1, 1]} : vector<2x128xf32> to vector<2x32xf32>
    %1109 = arith.mulf %1106, %1061 : vector<2x32xf32>
    %1110 = arith.mulf %1105, %1107 : vector<2x32xf32>
    %1111 = arith.addf %1109, %1110 : vector<2x32xf32>
    %1112 = math.tanh %1111 : vector<2x32xf32>
    %1113 = arith.mulf %1108, %1112 : vector<2x32xf32>
    %c0_329 = arith.constant 0 : index
    %c5_330 = arith.constant 5 : index
    %c0_331 = arith.constant 0 : index
    %1114 = vector.load %arg27[%c0_329, %c5_330, %c0_331] : memref<2x8x32xf32, #tpu.memory_space<vmem>>, vector<2x1x32xf32>
    %1115 = vector.shape_cast %1114 : vector<2x1x32xf32> to vector<2x32xf32>
    %1116 = vector.shape_cast %1113 : vector<2x32xf32> to vector<2x1x32xf32>
    tpu.vector_store %arg27[%c0_329, %c5_330, %c0_331], %1116 {strides = array<i32>} : memref<2x8x32xf32, #tpu.memory_space<vmem>>, vector<2x1x32xf32>,
    %1117 = arith.truncf %1113 : vector<2x32xf32> to vector<2x32xbf16>
    %cst_332 = arith.constant dense<0.000000e+00> : vector<2x160xf32>
    %1118 = tpu.matmul %1117, %14, %cst_332 {dimension_numbers = #tpu.dot_dimension_numbers<[1], [0], [0], [1], [0, 0, 1, 1], [], []>} : vector<2x32xbf16>, vector<32x160xbf16>, vector<2x160xf32> -> vector<2x160xf32>
    %1119 = vector.extract_strided_slice %1118 {offsets = [0, 0], sizes = [2, 32], strides = [1, 1]} : vector<2x160xf32> to vector<2x32xf32>
    %1120 = vector.extract_strided_slice %1118 {offsets = [0, 32], sizes = [2, 128], strides = [1, 1]} : vector<2x160xf32> to vector<2x128xf32>
    %1121 = vector.shape_cast %1119 : vector<2x32xf32> to vector<2x1x32xf32>
    %1122 = vector.broadcast %1121 : vector<2x1x32xf32> to vector<2x8x32xf32>
    %1123 = arith.addf %811, %1122 : vector<2x8x32xf32>
    %1124 = math.tanh %1123 : vector<2x8x32xf32>
    %1125 = arith.mulf %1124, %814 : vector<2x8x32xf32>
    %cst_333 = arith.constant dense<0.000000e+00> : vector<2x8xf32>
    %1126 = vector.multi_reduction <add>, %1125, %cst_333 [2] : vector<2x8x32xf32> to vector<2x8xf32>
    %cst_334 = arith.constant dense<0xFF800000> : vector<2xf32>
    %1127 = vector.multi_reduction <maximumf>, %1126, %cst_334 [1] : vector<2x8xf32> to vector<2xf32>
    %1128 = vector.shape_cast %1127 : vector<2xf32> to vector<2x1xf32>
    %1129 = vector.broadcast %1128 : vector<2x1xf32> to vector<2x8xf32>
    %1130 = arith.subf %1126, %1129 : vector<2x8xf32>
    %1131 = math.exp %1130 : vector<2x8xf32>
    %cst_335 = arith.constant dense<0.000000e+00> : vector<2xf32>
    %1132 = vector.multi_reduction <add>, %1131, %cst_335 [1] : vector<2x8xf32> to vector<2xf32>
    %1133 = vector.shape_cast %1132 : vector<2xf32> to vector<2x1xf32>
    %1134 = tpu.reciprocal %1133 : vector<2x1xf32> -> vector<2x1xf32>
    %1135 = vector.broadcast %1134 : vector<2x1xf32> to vector<2x8xf32>
    %1136 = arith.mulf %1131, %1135 : vector<2x8xf32>
    %c0_336 = arith.constant 0 : index
    %c6_337 = arith.constant 6 : index
    %c0_338 = arith.constant 0 : index
    %1137 = vector.load %arg25[%c0_336, %c6_337, %c0_338] : memref<2x8x8xf32, #tpu.memory_space<vmem>>, vector<2x1x8xf32>
    %1138 = vector.shape_cast %1137 : vector<2x1x8xf32> to vector<2x8xf32>
    %1139 = vector.shape_cast %1136 : vector<2x8xf32> to vector<2x1x8xf32>
    tpu.vector_store %arg25[%c0_336, %c6_337, %c0_338], %1139 {strides = array<i32>} : memref<2x8x8xf32, #tpu.memory_space<vmem>>, vector<2x1x8xf32>,
    %1140 = vector.shape_cast %1136 : vector<2x8xf32> to vector<2x1x8xf32>
    %1141 = arith.truncf %1140 : vector<2x1x8xf32> to vector<2x1x8xbf16>
    "tpu.trace_start"() <{level = 10 : i32, message = "bqt,btk->bqk"}> : () -> ()
    %cst_339 = arith.constant dense<0.000000e+00> : vector<2x1x64xf32>
    %1142 = tpu.matmul %1141, %807, %cst_339 {dimension_numbers = #tpu.dot_dimension_numbers<[2], [1], [1], [2], [0, 0, 0, 1, 1, 2], [0], [0]>} : vector<2x1x8xbf16>, vector<2x8x64xbf16>, vector<2x1x64xf32> -> vector<2x1x64xf32>
    "tpu.trace_stop"() : () -> ()
    %1143 = vector.shape_cast %1142 : vector<2x1x64xf32> to vector<2x64xf32>
    %1144 = arith.truncf %1143 : vector<2x64xf32> to vector<2x64xbf16>
    %cst_340 = arith.constant dense<0.000000e+00> : vector<2x128xf32>
    %1145 = tpu.matmul %1144, %15, %cst_340 {dimension_numbers = #tpu.dot_dimension_numbers<[1], [0], [0], [1], [0, 0, 1, 1], [], []>} : vector<2x64xbf16>, vector<64x128xbf16>, vector<2x128xf32> -> vector<2x128xf32>
    %1146 = arith.addf %1145, %1120 : vector<2x128xf32>
    %1147 = vector.broadcast %16 : vector<1x128xf32> to vector<2x128xf32>
    %1148 = arith.addf %1146, %1147 : vector<2x128xf32>
    %1149 = arith.negf %1148 : vector<2x128xf32>
    %1150 = math.exp %1149 : vector<2x128xf32>
    %cst_341 = arith.constant 1.000000e+00 : f32
    %1151 = vector.broadcast %cst_341 : f32 to vector<2x128xf32>
    %1152 = arith.addf %1151, %1150 : vector<2x128xf32>
    %1153 = arith.divf %1151, %1152 : vector<2x128xf32>
    %1154 = math.tanh %1148 : vector<2x128xf32>
    %1155 = vector.extract_strided_slice %1153 {offsets = [0, 0], sizes = [2, 32], strides = [1, 1]} : vector<2x128xf32> to vector<2x32xf32>
    %1156 = vector.extract_strided_slice %1153 {offsets = [0, 32], sizes = [2, 32], strides = [1, 1]} : vector<2x128xf32> to vector<2x32xf32>
    %1157 = vector.extract_strided_slice %1154 {offsets = [0, 64], sizes = [2, 32], strides = [1, 1]} : vector<2x128xf32> to vector<2x32xf32>
    %1158 = vector.extract_strided_slice %1153 {offsets = [0, 96], sizes = [2, 32], strides = [1, 1]} : vector<2x128xf32> to vector<2x32xf32>
    %1159 = arith.mulf %1156, %1111 : vector<2x32xf32>
    %1160 = arith.mulf %1155, %1157 : vector<2x32xf32>
    %1161 = arith.addf %1159, %1160 : vector<2x32xf32>
    %1162 = math.tanh %1161 : vector<2x32xf32>
    %1163 = arith.mulf %1158, %1162 : vector<2x32xf32>
    %c0_342 = arith.constant 0 : index
    %c6_343 = arith.constant 6 : index
    %c0_344 = arith.constant 0 : index
    %1164 = vector.load %arg27[%c0_342, %c6_343, %c0_344] : memref<2x8x32xf32, #tpu.memory_space<vmem>>, vector<2x1x32xf32>
    %1165 = vector.shape_cast %1164 : vector<2x1x32xf32> to vector<2x32xf32>
    %1166 = vector.shape_cast %1163 : vector<2x32xf32> to vector<2x1x32xf32>
    tpu.vector_store %arg27[%c0_342, %c6_343, %c0_344], %1166 {strides = array<i32>} : memref<2x8x32xf32, #tpu.memory_space<vmem>>, vector<2x1x32xf32>,
    %1167 = arith.truncf %1163 : vector<2x32xf32> to vector<2x32xbf16>
    %cst_345 = arith.constant dense<0.000000e+00> : vector<2x160xf32>
    %1168 = tpu.matmul %1167, %14, %cst_345 {dimension_numbers = #tpu.dot_dimension_numbers<[1], [0], [0], [1], [0, 0, 1, 1], [], []>} : vector<2x32xbf16>, vector<32x160xbf16>, vector<2x160xf32> -> vector<2x160xf32>
    %1169 = vector.extract_strided_slice %1168 {offsets = [0, 0], sizes = [2, 32], strides = [1, 1]} : vector<2x160xf32> to vector<2x32xf32>
    %1170 = vector.extract_strided_slice %1168 {offsets = [0, 32], sizes = [2, 128], strides = [1, 1]} : vector<2x160xf32> to vector<2x128xf32>
    %1171 = vector.shape_cast %1169 : vector<2x32xf32> to vector<2x1x32xf32>
    %1172 = vector.broadcast %1171 : vector<2x1x32xf32> to vector<2x8x32xf32>
    %1173 = arith.addf %811, %1172 : vector<2x8x32xf32>
    %1174 = math.tanh %1173 : vector<2x8x32xf32>
    %1175 = arith.mulf %1174, %814 : vector<2x8x32xf32>
    %cst_346 = arith.constant dense<0.000000e+00> : vector<2x8xf32>
    %1176 = vector.multi_reduction <add>, %1175, %cst_346 [2] : vector<2x8x32xf32> to vector<2x8xf32>
    %cst_347 = arith.constant dense<0xFF800000> : vector<2xf32>
    %1177 = vector.multi_reduction <maximumf>, %1176, %cst_347 [1] : vector<2x8xf32> to vector<2xf32>
    %1178 = vector.shape_cast %1177 : vector<2xf32> to vector<2x1xf32>
    %1179 = vector.broadcast %1178 : vector<2x1xf32> to vector<2x8xf32>
    %1180 = arith.subf %1176, %1179 : vector<2x8xf32>
    %1181 = math.exp %1180 : vector<2x8xf32>
    %cst_348 = arith.constant dense<0.000000e+00> : vector<2xf32>
    %1182 = vector.multi_reduction <add>, %1181, %cst_348 [1] : vector<2x8xf32> to vector<2xf32>
    %1183 = vector.shape_cast %1182 : vector<2xf32> to vector<2x1xf32>
    %1184 = tpu.reciprocal %1183 : vector<2x1xf32> -> vector<2x1xf32>
    %1185 = vector.broadcast %1184 : vector<2x1xf32> to vector<2x8xf32>
    %1186 = arith.mulf %1181, %1185 : vector<2x8xf32>
    %c0_349 = arith.constant 0 : index
    %c7_350 = arith.constant 7 : index
    %c0_351 = arith.constant 0 : index
    %1187 = vector.load %arg25[%c0_349, %c7_350, %c0_351] : memref<2x8x8xf32, #tpu.memory_space<vmem>>, vector<2x1x8xf32>
    %1188 = vector.shape_cast %1187 : vector<2x1x8xf32> to vector<2x8xf32>
    %1189 = vector.shape_cast %1186 : vector<2x8xf32> to vector<2x1x8xf32>
    tpu.vector_store %arg25[%c0_349, %c7_350, %c0_351], %1189 {strides = array<i32>} : memref<2x8x8xf32, #tpu.memory_space<vmem>>, vector<2x1x8xf32>,
    %1190 = vector.shape_cast %1186 : vector<2x8xf32> to vector<2x1x8xf32>
    %1191 = arith.truncf %1190 : vector<2x1x8xf32> to vector<2x1x8xbf16>
    "tpu.trace_start"() <{level = 10 : i32, message = "bqt,btk->bqk"}> : () -> ()
    %cst_352 = arith.constant dense<0.000000e+00> : vector<2x1x64xf32>
    %1192 = tpu.matmul %1191, %807, %cst_352 {dimension_numbers = #tpu.dot_dimension_numbers<[2], [1], [1], [2], [0, 0, 0, 1, 1, 2], [0], [0]>} : vector<2x1x8xbf16>, vector<2x8x64xbf16>, vector<2x1x64xf32> -> vector<2x1x64xf32>
    "tpu.trace_stop"() : () -> ()
    %1193 = vector.shape_cast %1192 : vector<2x1x64xf32> to vector<2x64xf32>
    %1194 = arith.truncf %1193 : vector<2x64xf32> to vector<2x64xbf16>
    %cst_353 = arith.constant dense<0.000000e+00> : vector<2x128xf32>
    %1195 = tpu.matmul %1194, %15, %cst_353 {dimension_numbers = #tpu.dot_dimension_numbers<[1], [0], [0], [1], [0, 0, 1, 1], [], []>} : vector<2x64xbf16>, vector<64x128xbf16>, vector<2x128xf32> -> vector<2x128xf32>
    %1196 = arith.addf %1195, %1170 : vector<2x128xf32>
    %1197 = vector.broadcast %16 : vector<1x128xf32> to vector<2x128xf32>
    %1198 = arith.addf %1196, %1197 : vector<2x128xf32>
    %1199 = arith.negf %1198 : vector<2x128xf32>
    %1200 = math.exp %1199 : vector<2x128xf32>
    %cst_354 = arith.constant 1.000000e+00 : f32
    %1201 = vector.broadcast %cst_354 : f32 to vector<2x128xf32>
    %1202 = arith.addf %1201, %1200 : vector<2x128xf32>
    %1203 = arith.divf %1201, %1202 : vector<2x128xf32>
    %1204 = math.tanh %1198 : vector<2x128xf32>
    %1205 = vector.extract_strided_slice %1203 {offsets = [0, 0], sizes = [2, 32], strides = [1, 1]} : vector<2x128xf32> to vector<2x32xf32>
    %1206 = vector.extract_strided_slice %1203 {offsets = [0, 32], sizes = [2, 32], strides = [1, 1]} : vector<2x128xf32> to vector<2x32xf32>
    %1207 = vector.extract_strided_slice %1204 {offsets = [0, 64], sizes = [2, 32], strides = [1, 1]} : vector<2x128xf32> to vector<2x32xf32>
    %1208 = vector.extract_strided_slice %1203 {offsets = [0, 96], sizes = [2, 32], strides = [1, 1]} : vector<2x128xf32> to vector<2x32xf32>
    %1209 = arith.mulf %1206, %1161 : vector<2x32xf32>
    %1210 = arith.mulf %1205, %1207 : vector<2x32xf32>
    %1211 = arith.addf %1209, %1210 : vector<2x32xf32>
    %1212 = math.tanh %1211 : vector<2x32xf32>
    %1213 = arith.mulf %1208, %1212 : vector<2x32xf32>
    %c0_355 = arith.constant 0 : index
    %c7_356 = arith.constant 7 : index
    %c0_357 = arith.constant 0 : index
    %1214 = vector.load %arg27[%c0_355, %c7_356, %c0_357] : memref<2x8x32xf32, #tpu.memory_space<vmem>>, vector<2x1x32xf32>
    %1215 = vector.shape_cast %1214 : vector<2x1x32xf32> to vector<2x32xf32>
    %1216 = vector.shape_cast %1213 : vector<2x32xf32> to vector<2x1x32xf32>
    tpu.vector_store %arg27[%c0_355, %c7_356, %c0_357], %1216 {strides = array<i32>} : memref<2x8x32xf32, #tpu.memory_space<vmem>>, vector<2x1x32xf32>,
    %c0_358 = arith.constant 0 : index
    %c0_359 = arith.constant 0 : index
    %c0_360 = arith.constant 0 : index
    %1217 = vector.load %arg27[%c0_358, %c0_359, %c0_360] : memref<2x8x32xf32, #tpu.memory_space<vmem>>, vector<2x8x32xf32>
    %1218 = vector.shape_cast %1217 : vector<2x8x32xf32> to vector<16x32xf32>
    %cst_361 = arith.constant dense<0.000000e+00> : vector<32xf32>
    %1219 = vector.multi_reduction <add>, %1218, %cst_361 [0] : vector<16x32xf32> to vector<32xf32>
    %1220 = vector.shape_cast %1219 : vector<32xf32> to vector<1x32xf32>
    %cst_362 = arith.constant 1.600000e+01 : f32
    %1221 = vector.broadcast %cst_362 : f32 to vector<1x32xf32>
    %1222 = arith.divf %1220, %1221 : vector<1x32xf32>
    %1223 = vector.broadcast %1222 : vector<1x32xf32> to vector<16x32xf32>
    %1224 = arith.subf %1218, %1223 : vector<16x32xf32>
    %1225 = arith.mulf %1224, %1224 : vector<16x32xf32>
    %cst_363 = arith.constant dense<0.000000e+00> : vector<32xf32>
    %1226 = vector.multi_reduction <add>, %1225, %cst_363 [0] : vector<16x32xf32> to vector<32xf32>
    %1227 = vector.shape_cast %1226 : vector<32xf32> to vector<1x32xf32>
    %cst_364 = arith.constant 1.600000e+01 : f32
    %1228 = vector.broadcast %cst_364 : f32 to vector<1x32xf32>
    %1229 = arith.divf %1227, %1228 : vector<1x32xf32>
    %1230 = vector.broadcast %1222 : vector<1x32xf32> to vector<16x32xf32>
    %1231 = arith.subf %1218, %1230 : vector<16x32xf32>
    %cst_365 = arith.constant 9.99999974E-6 : f32
    %1232 = vector.broadcast %cst_365 : f32 to vector<1x32xf32>
    %1233 = arith.addf %1229, %1232 : vector<1x32xf32>
    %1234 = math.rsqrt %1233 : vector<1x32xf32>
    %1235 = vector.broadcast %1234 : vector<1x32xf32> to vector<16x32xf32>
    %1236 = arith.mulf %1231, %1235 : vector<16x32xf32>
    %1237 = vector.broadcast %17 : vector<1x32xf32> to vector<16x32xf32>
    %1238 = arith.mulf %1236, %1237 : vector<16x32xf32>
    %1239 = vector.broadcast %18 : vector<1x32xf32> to vector<16x32xf32>
    %1240 = arith.addf %1238, %1239 : vector<16x32xf32>
    %1241 = arith.truncf %1240 : vector<16x32xf32> to vector<16x32xbf16>
    %cst_366 = arith.constant dense<0.000000e+00> : vector<16x32xf32>
    %1242 = tpu.matmul %1241, %19, %cst_366 {dimension_numbers = #tpu.dot_dimension_numbers<[1], [0], [0], [1], [0, 0, 1, 1], [], []>} : vector<16x32xbf16>, vector<32x32xbf16>, vector<16x32xf32> -> vector<16x32xf32>
    %1243 = vector.broadcast %20 : vector<1x32xf32> to vector<16x32xf32>
    %1244 = arith.addf %1242, %1243 : vector<16x32xf32>
    %1245 = math.tanh %1244 : vector<16x32xf32>
    %1246 = arith.truncf %1245 : vector<16x32xf32> to vector<16x32xbf16>
    %cst_367 = arith.constant dense<0.000000e+00> : vector<16x8xf32>
    %1247 = tpu.matmul %1246, %21, %cst_367 {dimension_numbers = #tpu.dot_dimension_numbers<[1], [0], [0], [1], [0, 0, 1, 1], [], []>} : vector<16x32xbf16>, vector<32x8xbf16>, vector<16x8xf32> -> vector<16x8xf32>
    %1248 = vector.broadcast %22 : vector<1x8xf32> to vector<16x8xf32>
    %1249 = arith.addf %1247, %1248 : vector<16x8xf32>
    %1250 = math.tanh %1249 : vector<16x8xf32>
    %cst_368 = arith.constant dense<0xFF800000> : vector<16xf32>
    %1251 = vector.multi_reduction <maximumf>, %1250, %cst_368 [1] : vector<16x8xf32> to vector<16xf32>
    %1252 = vector.shape_cast %1251 : vector<16xf32> to vector<16x1xf32>
    %1253 = vector.broadcast %1252 : vector<16x1xf32> to vector<16x8xf32>
    %1254 = arith.subf %1250, %1253 : vector<16x8xf32>
    %1255 = math.exp %1254 : vector<16x8xf32>
    %cst_369 = arith.constant dense<0.000000e+00> : vector<16xf32>
    %1256 = vector.multi_reduction <add>, %1255, %cst_369 [1] : vector<16x8xf32> to vector<16xf32>
    %1257 = vector.shape_cast %1256 : vector<16xf32> to vector<16x1xf32>
    %1258 = tpu.reciprocal %1257 : vector<16x1xf32> -> vector<16x1xf32>
    %1259 = vector.broadcast %1258 : vector<16x1xf32> to vector<16x8xf32>
    %1260 = arith.mulf %1255, %1259 : vector<16x8xf32>
    %c0_370 = arith.constant 0 : index
    %c0_371 = arith.constant 0 : index
    %1261 = vector.load %arg24[%c0_370, %c0_371] : memref<16x8xf32, #tpu.memory_space<vmem>>, vector<16x8xf32>
    tpu.vector_store %arg24[%c0_370, %c0_371], %1260 {strides = array<i32>} : memref<16x8xf32, #tpu.memory_space<vmem>>, vector<16x8xf32>,
    return
  }
}

</mosaic_0001>

<bundles_post_ra>
// kernel: slot_filling_forward.1
= control target key start
LH: loop header
LB: loop body
LE: loop exit
PB: predicated region body
PF: predicated region fallthrough
CT: control target
= control target key end

     0   :  { %s11300_s0 = inlined_call_operand.vmem [shape: f32[2,8,16], index: 0, kind: input, shape index: {}]   ;;  %s11301_s1 = inlined_call_operand.vmem [shape: bf16[16,256], index: 1, kind: input, shape index: {}]   ;;  %s11302_s2 = inlined_call_operand.vmem [shape: bf16[16,256], index: 2, kind: input, shape index: {}]   ;;  %s11303_s3 = inlined_call_operand.vmem [shape: bf16[64,256], index: 3, kind: input, shape index: {}]   ;;  %s11304_s4 = inlined_call_operand.vmem [shape: f32[1,256], index: 4, kind: input, shape index: {}]   ;;  %s11305_s5 = inlined_call_operand.vmem [shape: bf16[64,256], index: 5, kind: input, shape index: {}]   ;;  %s11306_s6 = inlined_call_operand.vmem [shape: bf16[64,256], index: 6, kind: input, shape index: {}]   ;;  %s11307_s7 = inlined_call_operand.vmem [shape: bf16[64,256], index: 7, kind: input, shape index: {}]   ;;  %s11308_s8 = inlined_call_operand.vmem [shape: f32[1,256], index: 8, kind: input, shape index: {}]   ;;  %s11309_s9 = inlined_call_operand.vmem [shape: bf16[64,256], index: 9, kind: input, shape index: {}]   ;;  %s11310_s10 = inlined_call_operand.vmem [shape: bf16[64,256], index: 10, kind: input, shape index: {}]   ;;  %s11311_s11 = inlined_call_operand.vmem [shape: bf16[64,256], index: 11, kind: input, shape index: {}]   ;;  %s11312_s12 = inlined_call_operand.vmem [shape: f32[1,256], index: 12, kind: input, shape index: {}]   ;;  %s11313_s13 = inlined_call_operand.vmem [shape: bf16[64,32], index: 13, kind: input, shape index: {}]   ;;  %s11314_s14 = inlined_call_operand.vmem [shape: f32[1,32], index: 14, kind: input, shape index: {}]   ;;  %s11315_s15 = inlined_call_operand.vmem [shape: bf16[32,160], index: 15, kind: input, shape index: {}]   ;;  %s11316_s16 = inlined_call_operand.vmem [shape: bf16[64,128], index: 16, kind: input, shape index: {}]   ;;  %s11317_s17 = inlined_call_operand.vmem [shape: f32[1,128], index: 17, kind: input, shape index: {}]   ;;  %s11318_s18 = inlined_call_operand.vmem [shape: f32[1,32], index: 18, kind: input, shape index: {}]   ;;  %s11319_s19 = inlined_call_operand.vmem [shape: f32[1,32], index: 19, kind: input, shape index: {}]   ;;  %s11320_s20 = inlined_call_operand.vmem [shape: bf16[32,32], index: 20, kind: input, shape index: {}]   ;;  %s11321_s21 = inlined_call_operand.vmem [shape: f32[1,32], index: 21, kind: input, shape index: {}]   ;;  %s11322_s22 = inlined_call_operand.vmem [shape: bf16[32,8], index: 22, kind: input, shape index: {}]   ;;  %s11323_s23 = inlined_call_operand.vmem [shape: f32[1,8], index: 23, kind: input, shape index: {}]   ;;  %s11324_s24 = inlined_call_operand.hbm [shape: f32[16,8], index: 24, kind: output, shape index: {0}]   ;;  %s11325_s25 = inlined_call_operand.hbm [shape: f32[2,8,8], index: 25, kind: output, shape index: {1}]  }
   0x1   :  { %11334 = sst [smem:[#allocation10_spill]] %s11300_s0 }
   0x2   :  { %11335 = sst [smem:[#allocation11_spill]] %s11301_s1 }
   0x3   :  { %11336 = sst [smem:[#allocation12_spill]] %s11302_s2 }
   0x4   :  { %11337 = sst [smem:[#allocation13_spill]] %s11303_s3 }
   0x5   :  { %11338 = sst [smem:[#allocation14_spill]] %s11304_s4 }
   0x6   :  { %11339 = sst [smem:[#allocation15_spill]] %s11305_s5 }
   0x7   :  { %11340 = sst [smem:[#allocation16_spill]] %s11306_s6 }
   0x8   :  { %11341 = sst [smem:[#allocation17_spill]] %s11307_s7 }
   0x9   :  { %11342 = sst [smem:[#allocation18_spill]] %s11308_s8 }
   0xa   :  { %11343 = sst [smem:[#allocation19_spill]] %s11309_s9 }
   0xb   :  { %31 = vsyncpa [#allocation5], 0  ;;  %s11344_s6 = sld [smem:[#allocation11_spill]]  ;;  %v8675_v2 = vmov 0   ;;  %vm192_vm0 = vcmask 130048  }
   0xc   :  { %228 = vmatprep.mubr.bf16.mxu0 %v8675_v2  ;;  %296 = vmatprep.mubr.bf16.mxu1 %v8675_v2  ;;  %s11345_s1 = sld [smem:[#allocation12_spill]] }
   0xd   :  { %s11346_s4 = sld [smem:[#allocation10_spill]]  ;;  %8062 = vset.pattern.permute.xlu1 %v8675_v2  ;;  %8061 = vset.pattern.permute.xlu0 %v8675_v2 }
  0x11   :  { %v8063_v0 = vld [vmem:[%s11344_s6 + $0x4] ss:$8 sps:$4 sm:$0xff]   ;;  %v8065_v1 = vld [vmem:[%s11344_s6] ss:$8 sps:$4 sm:$0xff]   ;;  %s11347_s6 = sld [smem:[#allocation13_spill]] }
  0x12   :  { %210 = vmatprep.subr.bf16.mxu0 %v8063_v0  ;;  %v8066_v3 = vld [vmem:[%s11345_s1 + $0x4] ss:$8 sps:$4 sm:$0xff]   ;;  %v8068_v7 = vld [vmem:[%s11345_s1] ss:$8 sps:$4 sm:$0xff]  }
  0x13   :  { %v179_v4 = vld [vmem:[%s11346_s4] sm:$0xff]  ;;  %v180_v5 = vld [vmem:[%s11346_s4 + $0x8] sm:$0xff]  ;;  %211 = vmatpush1.bf16.msra.mxu0 %v8065_v1  ;;  %278 = vmatprep.subr.bf16.mxu1 %v8066_v3 }
  0x14   :  { %v181_v6 = vpack.c.bf16 %v180_v5, %v179_v4  ;;  %279 = vmatpush1.bf16.msra.mxu1 %v8068_v7 }
  0x16   :  { %7549 = vmatmul.mubr.msk.bf16.vlgmr.msra.gmra.mxu0 %vm192_vm0, %v181_v6 }
  0x17   :  { %v8841_v8 = vld [vmem:[%s11347_s6 + $0x34] ss:$8 sps:$4 sm:$0xff]   ;;  %v8846_v9 = vld [vmem:[%s11347_s6 + $0x30] ss:$8 sps:$4 sm:$0xff]   ;;  %v8851_v10 = vld [vmem:[%s11347_s6 + $0x24] ss:$8 sps:$4 sm:$0xff]   ;;  %394 = vmatprep.mubr.bf16.mxu0 %v8675_v2  ;;  %7552 = vmatmul.mubr.msk.bf16.vlgmr.msra.gmra.mxu1 %vm192_vm0, %v181_v6 }
  0x18   :  { %370 = vmatprep.subr.bf16.mxu0 %v8841_v8  ;;  %v8858_v11 = vld [vmem:[%s11347_s6 + $0x20] ss:$8 sps:$4 sm:$0xff]   ;;  %v8865_v12 = vld [vmem:[%s11347_s6 + $0x14] ss:$8 sps:$4 sm:$0xff]   ;;  %v8870_v13 = vld [vmem:[%s11347_s6 + $0x10] ss:$8 sps:$4 sm:$0xff]   ;;  %503 = vmatprep.subr.bf16.mxu1 %v8841_v8 }
  0x19   :  { %371 = vmatpush1.bf16.msra.mxu0 %v8846_v9  ;;  %527 = vmatprep.mubr.bf16.mxu1 %v8675_v2  ;;  %v8877_v14 = vld [vmem:[%s11347_s6 + $0x4] ss:$8 sps:$4 sm:$0xff]   ;;  %v8886_v15 = vld [vmem:[%s11347_s6] ss:$8 sps:$4 sm:$0xff]  }
  0x1a   :  { %372 = vmatprep.subr.bf16.mxu0 %v8851_v10  ;;  %504 = vmatpush1.bf16.msra.mxu1 %v8846_v9 }
  0x1b   :  { %505 = vmatprep.subr.bf16.mxu1 %v8851_v10 }
  0x1d   :  { %373 = vmatpush1.bf16.msra.mxu0 %v8858_v11 }
  0x1e   :  { %374 = vmatprep.subr.bf16.mxu0 %v8865_v12  ;;  %506 = vmatpush1.bf16.msra.mxu1 %v8858_v11 }
  0x1f   :  { %507 = vmatprep.subr.bf16.mxu1 %v8865_v12 }
  0x21   :  { %375 = vmatpush1.bf16.msra.mxu0 %v8870_v13 }
  0x22   :  { %376 = vmatprep.subr.bf16.mxu0 %v8877_v14  ;;  %508 = vmatpush1.bf16.msra.mxu1 %v8870_v13 }
  0x23   :  { %509 = vmatprep.subr.bf16.mxu1 %v8877_v14 }
  0x25   :  { %377 = vmatpush1.bf16.msra.mxu0 %v8886_v15 }
  0x26   :  { %632 = vmatprep.subr.bf16.mxu0 %v8841_v8  ;;  %510 = vmatpush1.bf16.msra.mxu1 %v8886_v15 }
  0x27   :  { %761 = vmatprep.subr.bf16.mxu1 %v8841_v8 }
  0x28   :  { %395 = vmatmul.mubr.bf16.vlgmr.msra.gmra.mxu0 %v8675_v2 }
  0x29   :  { %633 = vmatpush1.bf16.msra.mxu0 %v8846_v9  ;;  %656 = vmatprep.mubr.bf16.mxu0 %v8675_v2 }
  0x2a   :  { %634 = vmatprep.subr.bf16.mxu0 %v8851_v10 }
  0x2d   :  { %635 = vmatpush1.bf16.msra.mxu0 %v8858_v11 }
  0x2e   :  { %636 = vmatprep.subr.bf16.mxu0 %v8865_v12 }
  0x31   :  { %637 = vmatpush1.bf16.msra.mxu0 %v8870_v13 }
  0x32   :  { %638 = vmatprep.subr.bf16.mxu0 %v8877_v14 }
  0x33   :  { %32 = vsyncpa [#allocation7], 0  ;;  %v240_v16 = vlaneseq  ;;  %s11348_s7 = sld [smem:[#allocation14_spill]]  ;;  %vm352_vm1 = vcmask 1041409   ;;  %s8676_s3 = smov 64   ;;  %vm358_vm2 = vcmask 523264  }
  0x34   :  { %vm476_vm3 = vcmask 253952   ;;  %vm479_vm4 = vcmask 516352   ;;  %s11349_s8 = sld [smem:[#allocation15_spill]]  ;;  %vm8679_vm5 = vmmov 0   ;;  %vm3986_vm6 = vcmask 261120   ;;  %s8681_s28 = smov 32  }
  0x35   :  { %639 = vmatpush1.bf16.msra.mxu0 %v8886_v15  ;;  %v8908_v17 = vshrl.u32 %v240_v16, 7  ;;  %v4079_v18 = vand.u32 127, %v240_v16  ;;  %s11350_s5 = sld [smem:[#allocation16_spill]]  ;;  %vm4183_vm7 = vcmask 1043456   ;;  %vm4090_vm8 = vcmask 58368   ;;  %s8683_s30 = smov [#allocation4]  }
  0x36   :  { %890 = vmatprep.subr.bf16.mxu0 %v8841_v8  ;;  %s11351_s2 = sld [smem:[#allocation17_spill]]  ;;  %vm4179_vm9 = vcmask 64512   ;;  %vm4321_vm10 = vcmask 785408   ;;  %vm4164_vm11 = vcmask 57344  }
  0x37   :  { %v8911_v19 = vsub.s32 %v4079_v18, %v8908_v17  ;;  %v8914_v20 = vsub.s32 0, %v8908_v17  ;;  %v8920_v22 = vsub.s32 1, %v8908_v17  ;;  %s11353_s27 = sld [smem:[#allocation19_spill]] }
  0x39   :  { %v94_v21 = vld [vmem:[%s11348_s7] sm:$0x3]  ;;  %s11352_s7 = sld [smem:[#allocation18_spill]] }
  0x3a   :  { %v243_v23 = vrot.slane %v94_v21, %v8914_v20  ;;  %v247_v24 = vrot.slane %v94_v21, %v8920_v22 }
  0xd6   :  { %v230_v25 = vpop.f32.mrf.mxu0 }
  0xd7   :  { %v8924_v26 = vadd.f32 %v243_v23, %v230_v25  ;;  %v8926_v28 = vpop.f32.mrf.mxu1 }
  0xd8   :  { %v232_v27 = vpop.f32.mrf.mxu0  ;;  %v536_v35 = vrot.slane %v8926_v28, 6  ;;  %v665_v41 = vrot.slane %v8926_v28, 5  ;;  %v794_v50 = vrot.slane %v8926_v28, 4  ;;  %v407_v55 = vrot.slane %v8926_v28, 7 }
  0xd9   :  { %v8928_v29 = vadd.f32 %v247_v24, %v232_v27  ;;  %v486_v30 = vrot.slane %v8924_v26, 1  ;;  %v8931_v32 = vpop.f32.mrf.mxu1  ;;  %v613_v36 = vrot.slane %v8924_v26, 2  ;;  %v742_v46 = vrot.slane %v8924_v26, 3 }
  0xda   :  { %v234_v31 = vpop.f32.mrf.mxu0  ;;  %v871_v63 = vrot.slane %v8924_v26, 4  ;;  %v923_v1 = vrot.slane %v8926_v28, 3 }
  0xdb   :  { %v8933_v33 = vadd.f32 %v243_v23, %v234_v31  ;;  %v8939_v38 = vpop.f32.mrf.mxu1  ;;  %v488_v40 = vrot.slane %v8928_v29, 1  ;;  %v616_v52 = vrot.slane %v8928_v29, 2  ;;  %v745_v60 = vrot.slane %v8928_v29, 3 }
  0xdc   :  { %v236_v34 = vpop.f32.mrf.mxu0  ;;  %v537_v42 = vrot.slane %v8939_v38, 5  ;;  %v666_v44 = vrot.slane %v8939_v38, 4  ;;  %v795_v57 = vrot.slane %v8939_v38, 3  ;;  %v408_v58 = vrot.slane %v8939_v38, 6 }
  0xdd   :  { %v8937_v37 = vadd.f32 %v247_v24, %v236_v34  ;;  %v8943_v39 = vsel %vm352_vm1, %v8933_v33, %v486_v30  ;;  %v614_v43 = vrot.slane %v8933_v33, 1  ;;  %v743_v45 = vrot.slane %v8933_v33, 2 }
  0xde   :  { %v8953_v47 = vsel %vm352_vm1, %v537_v42, %v536_v35  ;;  %v8964_v51 = vsel %vm352_vm1, %v666_v44, %v665_v41  ;;  %v351_v54 = vrot.slane %v8933_v33, 7  ;;  %v8981_v62 = vsel %vm352_vm1, %v795_v57, %v794_v50 }
  0xdf   :  { %v8957_v48 = vsel %vm352_vm1, %v8937_v37, %v488_v40  ;;  %v8960_v49 = vsel %vm352_vm1, %v614_v43, %v613_v36  ;;  %v617_v53 = vrot.slane %v8937_v37, 1  ;;  %v8971_v56 = vsel %vm352_vm1, %v743_v45, %v742_v46 }
  0xe0   :  { %v746_v61 = vrot.slane %v8937_v37, 2  ;;  %v872_v0 = vrot.slane %v8933_v33, 3  ;;  %v924_v4 = vrot.slane %v8939_v38, 2  ;;  %v353_v5 = vsel %vm352_vm1, %v351_v54, %v8924_v26 }
  0xe1   :  { %v8976_v59 = vsel %vm352_vm1, %v617_v53, %v616_v52  ;;  %v874_v16 = vrot.slane %v8928_v29, 4  ;;  %v875_v18 = vrot.slane %v8937_v37, 3  ;;  %v1000_v24 = vrot.slane %v8924_v26, 5 }
  0xe2   :  { %v8987_v3 = vsel %vm352_vm1, %v746_v61, %v745_v60  ;;  %v8993_v7 = vsel %vm352_vm1, %v872_v0, %v871_v63  ;;  %v8998_v23 = vsel %vm352_vm1, %v924_v4, %v923_v1  ;;  %v1001_v25 = vrot.slane %v8933_v33, 4 }
  0xe3   :  { %v409_v27 = vsel %vm352_vm1, %v408_v58, %v407_v55  ;;  %v9004_v31 = vsel %vm352_vm1, %v875_v18, %v874_v16  ;;  %v1052_v34 = vrot.slane %v8926_v28, 2  ;;  %v1053_v35 = vrot.slane %v8939_v38, 1 }
  0xe4   :  { %v9009_v40 = vsel %vm352_vm1, %v1001_v25, %v1000_v24  ;;  %v1003_v43 = vrot.slane %v8928_v29, 5  ;;  %v1004_v44 = vrot.slane %v8937_v37, 4  ;;  %v1129_v46 = vrot.slane %v8924_v26, 6 }
  0xe5   :  { %v9012_v42 = vsel %vm352_vm1, %v1053_v35, %v1052_v34  ;;  %v1130_v50 = vrot.slane %v8933_v33, 5  ;;  %v1181_v54 = vrot.slane %v8926_v28, 1  ;;  %v1132_v57 = vrot.slane %v8928_v29, 6 }
  0xe6   :  { %v9019_v53 = vsel %vm352_vm1, %v1004_v44, %v1003_v43  ;;  %v1133_v58 = vrot.slane %v8937_v37, 5  ;;  %v354_v60 = vrot.slane %v8937_v37, 7  ;;  %v1256_v0 = vrot.slane %v8924_v26, 7 }
  0xe7   :  { %v9023_v55 = vsel %vm352_vm1, %v1130_v50, %v1129_v46  ;;  %v9030_v61 = vsel %vm352_vm1, %v8939_v38, %v1181_v54  ;;  %v1257_v1 = vrot.slane %v8933_v33, 6  ;;  %v1308_v4 = vrot.slane %v8939_v38, 7 }
  0xe8   :  { %v396_v6 = vpop.f32.mrf.mxu0  ;;  %v9033_v63 = vsel %vm352_vm1, %v1133_v58, %v1132_v57  ;;  %v355_v26 = vsel %vm352_vm1, %v354_v60, %v8928_v29  ;;  %v410_v33 = vrot.slane %v8931_v32, 7 }
  0xe9   :  { %v397_v21 = vadd.f32 %v396_v6, %v353_v5  ;;  %v1259_v5 = vrot.slane %v8928_v29, 7  ;;  %v1260_v6 = vrot.slane %v8937_v37, 6  ;;  %v9041_v16 = vsel %vm352_vm1, %v1257_v1, %v1256_v0 }
  0xea   :  { %v398_v30 = vpop.f32.mrf.mxu0  ;;  %v9045_v18 = vsel %vm352_vm1, %v1308_v4, %v8926_v28  ;;  %v539_v0 = vrot.slane %v8931_v32, 6 }
  0xeb   :  { %v415_v36 = vadd.f32 %v409_v27, %v397_v21  ;;  %v9047_v21 = vpop.f32.mrf.mxu1  ;;  %v9050_v24 = vsel %vm352_vm1, %v1260_v6, %v1259_v5  ;;  %v399_v37 = vadd.f32 %v398_v30, %v355_v26 }
  0xec   :  { %v400_v41 = vpop.f32.mrf.mxu0  ;;  %v411_v38 = vrot.slane %v9047_v21, 6  ;;  %v540_v1 = vrot.slane %v9047_v21, 5 }
  0xed   :  { %v7561_v45 = vmul.f32 -1.442695, %v415_v36 }
  0xee   :  { %v401_v52 = vpop.f32.mrf.mxu0  ;;  %v412_v25 = vsel %vm352_vm1, %v411_v38, %v410_v33  ;;  %v541_v33 = vsel %vm352_vm1, %v540_v1, %v539_v0 }
  0xef   :  { %8171 = vpow2.f32 %v7561_v45  ;;  %v416_v27 = vadd.f32 %v412_v25, %v399_v37 }
  0xf1   :  { %8173 = vtanh.f32 %v416_v27  ;;  %v7562_v43 = vmul.f32 -1.442695, %v416_v27 }
  0xfc   :  { %v8172_v34 = vpop.eup %8171 }
  0xfd   :  { %v423_v35 = vadd.f32 1.0, %v8172_v34 }
  0xfe   :  { %v8174_v28 = vpop.eup %8173 }
  0xff   :  { %8175 = vrcp.f32 %v423_v35 }
 0x100   :  { %8177 = vpow2.f32 %v7562_v43 }
 0x10c   :  { %v8176_v36 = vpop.eup %8175 }
 0x10d   :  { %v431_v41 = vmul.f32 %v8176_v36, %v8174_v28  ;;  %v8178_v29 = vpop.eup %8177  ;;  %v430_v45 = vmul.f32 0.0, %v8176_v36 }
 0x10e   :  { %v424_v44 = vadd.f32 1.0, %v8178_v29 }
 0x10f   :  { %433 = vrot.lane.b32.xlu0 %v431_v41, %s8676_s3 }
 0x110   :  { %8179 = vrcp.f32 %v424_v44 }
 0x11d   :  { %v8180_v50 = vpop.eup %8179 }
 0x181   :  { %v434_v46 = vpop.permute.xlu0 %433 }
 0x182   :  { %v436_v30 = vadd.f32 %v434_v46, %v430_v45 }
 0x184   :  { %8181 = vtanh.f32 %v436_v30 }
 0x191   :  { %v8182_v52 = vpop.eup %8181 }
 0x192   :  { %v9058_v54 = vmul.f32 %v8182_v52, %v8180_v50 }
 0x194   :  { %v482_v57 = vpack.c.bf16 %v9058_v54, %v9058_v54 }
 0x196   :  { %484 = vrot.lane.b32.xlu0 %v482_v57, %s8676_s3 }
 0x208   :  { %v485_v58 = vpop.permute.xlu0 %484 }
 0x209   :  { %7563 = vmatmul.mubr.msk.bf16.vlgmr.msra.gmra.mxu1 %vm358_vm2, %v485_v58  ;;  %v668_v58 = vrot.slane %v8931_v32, 5 }
 0x20a   :  { %762 = vmatpush1.bf16.msra.mxu1 %v8846_v9  ;;  %785 = vmatprep.mubr.bf16.mxu1 %v8675_v2 }
 0x20b   :  { %763 = vmatprep.subr.bf16.mxu1 %v8851_v10 }
 0x20e   :  { %764 = vmatpush1.bf16.msra.mxu1 %v8858_v11 }
 0x20f   :  { %765 = vmatprep.subr.bf16.mxu1 %v8865_v12 }
 0x212   :  { %766 = vmatpush1.bf16.msra.mxu1 %v8870_v13 }
 0x213   :  { %767 = vmatprep.subr.bf16.mxu1 %v8877_v14 }
 0x216   :  { %768 = vmatpush1.bf16.msra.mxu1 %v8886_v15 }
 0x217   :  { %1019 = vmatprep.subr.bf16.mxu1 %v8841_v8 }
 0x2c9   :  { %v529_v60 = vpop.f32.mrf.mxu1 }
 0x2ca   :  { %v530_v4 = vadd.f32 %v529_v60, %v8943_v39  ;;  %v669_v60 = vrot.slane %v9047_v21, 4 }
 0x2cb   :  { %v531_v5 = vpop.f32.mrf.mxu1 }
 0x2cc   :  { %v544_v6 = vadd.f32 %v8953_v47, %v530_v4  ;;  %v532_v26 = vadd.f32 %v531_v5, %v8957_v48 }
 0x2cd   :  { %v533_v38 = vpop.f32.mrf.mxu1 }
 0x2ce   :  { %v7564_v37 = vmul.f32 -1.442695, %v544_v6  ;;  %v545_v25 = vadd.f32 %v541_v33, %v532_v26  ;;  %v670_v6 = vsel %vm352_vm1, %v669_v60, %v668_v58 }
 0x2cf   :  { %v534_v27 = vpop.f32.mrf.mxu1 }
 0x2d0   :  { %8183 = vpow2.f32 %v7564_v37  ;;  %v7565_v39 = vmul.f32 -1.442695, %v545_v25 }
 0x2d1   :  { %8185 = vtanh.f32 %v545_v25 }
 0x2dd   :  { %v8184_v34 = vpop.eup %8183 }
 0x2de   :  { %v552_v35 = vadd.f32 1.0, %v8184_v34  ;;  %v8186_v28 = vpop.eup %8185 }
 0x2e0   :  { %8187 = vrcp.f32 %v552_v35 }
 0x2e1   :  { %8189 = vpow2.f32 %v7565_v39 }
 0x2ed   :  { %v8188_v36 = vpop.eup %8187 }
 0x2ee   :  { %v560_v41 = vmul.f32 %v8188_v36, %v8186_v28  ;;  %v8190_v47 = vpop.eup %8189  ;;  %v559_v43 = vmul.f32 %v8188_v36, %v436_v30 }
 0x2ef   :  { %v553_v48 = vadd.f32 1.0, %v8190_v47 }
 0x2f0   :  { %562 = vrot.lane.b32.xlu1 %v560_v41, %s8676_s3 }
 0x2f1   :  { %8191 = vrcp.f32 %v553_v48 }
 0x2fe   :  { %v8192_v45 = vpop.eup %8191 }
 0x362   :  { %v563_v29 = vpop.permute.xlu1 %562 }
 0x363   :  { %v565_v44 = vadd.f32 %v563_v29, %v559_v43 }
 0x365   :  { %8193 = vtanh.f32 %v565_v44 }
 0x372   :  { %v8194_v46 = vpop.eup %8193 }
 0x373   :  { %v9080_v50 = vmul.f32 %v8194_v46, %v8192_v45  ;;  %v797_v46 = vrot.slane %v8931_v32, 4 }
 0x375   :  { %v609_v52 = vpack.c.bf16 %v9080_v50, %v9080_v50 }
 0x377   :  { %611 = vrot.lane.b32.xlu1 %v609_v52, %s8676_s3  ;;  %v798_v52 = vrot.slane %v9047_v21, 3 }
 0x3e9   :  { %v612_v57 = vpop.permute.xlu1 %611 }
 0x3ea   :  { %7566 = vmatmul.mubr.msk.bf16.vlgmr.msra.gmra.mxu0 %vm358_vm2, %v612_v57 }
 0x3eb   :  { %891 = vmatpush1.bf16.msra.mxu0 %v8846_v9  ;;  %914 = vmatprep.mubr.bf16.mxu0 %v8675_v2 }
 0x3ec   :  { %892 = vmatprep.subr.bf16.mxu0 %v8851_v10 }
 0x3ef   :  { %893 = vmatpush1.bf16.msra.mxu0 %v8858_v11 }
 0x3f0   :  { %894 = vmatprep.subr.bf16.mxu0 %v8865_v12 }
 0x3f3   :  { %895 = vmatpush1.bf16.msra.mxu0 %v8870_v13 }
 0x3f4   :  { %896 = vmatprep.subr.bf16.mxu0 %v8877_v14 }
 0x3f7   :  { %897 = vmatpush1.bf16.msra.mxu0 %v8886_v15 }
 0x3f8   :  { %1148 = vmatprep.subr.bf16.mxu0 %v8841_v8 }
 0x4aa   :  { %v658_v30 = vpop.f32.mrf.mxu0 }
 0x4ab   :  { %v659_v0 = vadd.f32 %v658_v30, %v8960_v49 }
 0x4ac   :  { %v660_v1 = vpop.f32.mrf.mxu0 }
 0x4ad   :  { %v673_v4 = vadd.f32 %v8964_v51, %v659_v0  ;;  %v661_v5 = vadd.f32 %v660_v1, %v8976_v59  ;;  %v799_v0 = vsel %vm352_vm1, %v798_v52, %v797_v46 }
 0x4ae   :  { %v662_v26 = vpop.f32.mrf.mxu0 }
 0x4af   :  { %v7567_v33 = vmul.f32 -1.442695, %v673_v4  ;;  %v674_v38 = vadd.f32 %v670_v6, %v661_v5 }
 0x4b0   :  { %v663_v37 = vpop.f32.mrf.mxu0 }
 0x4b1   :  { %8195 = vpow2.f32 %v7567_v33  ;;  %v7568_v49 = vmul.f32 -1.442695, %v674_v38 }
 0x4b2   :  { %8197 = vtanh.f32 %v674_v38 }
 0x4be   :  { %v8196_v25 = vpop.eup %8195 }
 0x4bf   :  { %v681_v27 = vadd.f32 1.0, %v8196_v25  ;;  %v8198_v34 = vpop.eup %8197 }
 0x4c1   :  { %8199 = vrcp.f32 %v681_v27 }
 0x4c2   :  { %8201 = vpow2.f32 %v7568_v49 }
 0x4ce   :  { %v8200_v35 = vpop.eup %8199 }
 0x4cf   :  { %v689_v28 = vmul.f32 %v8200_v35, %v8198_v34  ;;  %v8202_v51 = vpop.eup %8201  ;;  %v688_v36 = vmul.f32 %v8200_v35, %v565_v44 }
 0x4d0   :  { %v682_v59 = vadd.f32 1.0, %v8202_v51 }
 0x4d1   :  { %691 = vrot.lane.b32.xlu0 %v689_v28, %s8676_s3 }
 0x4d2   :  { %8203 = vrcp.f32 %v682_v59 }
 0x4df   :  { %v8204_v47 = vpop.eup %8203 }
 0x543   :  { %v692_v41 = vpop.permute.xlu0 %691 }
 0x544   :  { %v694_v39 = vadd.f32 %v692_v41, %v688_v36  ;;  %v926_v41 = vrot.slane %v8931_v32, 3 }
 0x546   :  { %8205 = vtanh.f32 %v694_v39 }
 0x553   :  { %v8206_v48 = vpop.eup %8205 }
 0x554   :  { %v9102_v43 = vmul.f32 %v8206_v48, %v8204_v47 }
 0x556   :  { %v738_v29 = vpack.c.bf16 %v9102_v43, %v9102_v43 }
 0x558   :  { %740 = vrot.lane.b32.xlu1 %v738_v29, %s8676_s3 }
 0x5ca   :  { %v741_v45 = vpop.permute.xlu1 %740 }
 0x5cb   :  { %7569 = vmatmul.mubr.msk.bf16.vlgmr.msra.gmra.mxu1 %vm358_vm2, %v741_v45 }
 0x5cc   :  { %1020 = vmatpush1.bf16.msra.mxu1 %v8846_v9  ;;  %1043 = vmatprep.mubr.bf16.mxu1 %v8675_v2 }
 0x5cd   :  { %1021 = vmatprep.subr.bf16.mxu1 %v8851_v10 }
 0x5d0   :  { %1022 = vmatpush1.bf16.msra.mxu1 %v8858_v11 }
 0x5d1   :  { %1023 = vmatprep.subr.bf16.mxu1 %v8865_v12 }
 0x5d4   :  { %1024 = vmatpush1.bf16.msra.mxu1 %v8870_v13 }
 0x5d5   :  { %1025 = vmatprep.subr.bf16.mxu1 %v8877_v14 }
 0x5d8   :  { %1026 = vmatpush1.bf16.msra.mxu1 %v8886_v15 }
 0x5d9   :  { %1275 = vmatprep.subr.bf16.mxu1 %v8841_v8 }
 0x68b   :  { %v787_v44 = vpop.f32.mrf.mxu1 }
 0x68c   :  { %v788_v57 = vadd.f32 %v787_v44, %v8971_v56 }
 0x68d   :  { %v789_v30 = vpop.f32.mrf.mxu1 }
 0x68e   :  { %v802_v58 = vadd.f32 %v8981_v62, %v788_v57  ;;  %v790_v60 = vadd.f32 %v789_v30, %v8987_v3 }
 0x68f   :  { %v791_v1 = vpop.f32.mrf.mxu1 }
 0x690   :  { %v7570_v4 = vmul.f32 -1.442695, %v802_v58  ;;  %v803_v5 = vadd.f32 %v799_v0, %v790_v60 }
 0x691   :  { %v792_v6 = vpop.f32.mrf.mxu1 }
 0x692   :  { %8207 = vpow2.f32 %v7570_v4  ;;  %v7571_v56 = vmul.f32 -1.442695, %v803_v5 }
 0x693   :  { %8209 = vtanh.f32 %v803_v5 }
 0x69f   :  { %v8208_v8 = vpop.eup %8207 }
 0x6a0   :  { %v810_v26 = vadd.f32 1.0, %v8208_v8  ;;  %v8210_v33 = vpop.eup %8209 }
 0x6a2   :  { %8211 = vrcp.f32 %v810_v26 }
 0x6a3   :  { %8213 = vpow2.f32 %v7571_v56 }
 0x6af   :  { %v8212_v38 = vpop.eup %8211 }
 0x6b0   :  { %v818_v37 = vmul.f32 %v8212_v38, %v8210_v33  ;;  %v8214_v62 = vpop.eup %8213  ;;  %v817_v25 = vmul.f32 %v8212_v38, %v694_v39  ;;  %v927_v39 = vrot.slane %v9047_v21, 2 }
 0x6b1   :  { %v811_v3 = vadd.f32 1.0, %v8214_v62 }
 0x6b2   :  { %820 = vrot.lane.b32.xlu0 %v818_v37, %s8676_s3  ;;  %v928_v44 = vsel %vm352_vm1, %v927_v39, %v926_v41 }
 0x6b3   :  { %8215 = vrcp.f32 %v811_v3  ;;  %v1055_v3 = vrot.slane %v8931_v32, 2 }
 0x6c0   :  { %v8216_v35 = vpop.eup %8215 }
 0x724   :  { %v821_v27 = vpop.permute.xlu0 %820 }
 0x725   :  { %v823_v34 = vadd.f32 %v821_v27, %v817_v25  ;;  %v1056_v25 = vrot.slane %v9047_v21, 1 }
 0x727   :  { %8217 = vtanh.f32 %v823_v34 }
 0x734   :  { %v8218_v28 = vpop.eup %8217 }
 0x735   :  { %v9124_v49 = vmul.f32 %v8218_v28, %v8216_v35 }
 0x737   :  { %v867_v51 = vpack.c.bf16 %v9124_v49, %v9124_v49 }
 0x739   :  { %869 = vrot.lane.b32.xlu1 %v867_v51, %s8676_s3 }
 0x7ab   :  { %v870_v59 = vpop.permute.xlu1 %869 }
 0x7ac   :  { %7572 = vmatmul.mubr.msk.bf16.vlgmr.msra.gmra.mxu0 %vm358_vm2, %v870_v59 }
 0x7ad   :  { %1149 = vmatpush1.bf16.msra.mxu0 %v8846_v9  ;;  %1172 = vmatprep.mubr.bf16.mxu0 %v8675_v2 }
 0x7ae   :  { %1150 = vmatprep.subr.bf16.mxu0 %v8851_v10 }
 0x7b1   :  { %1151 = vmatpush1.bf16.msra.mxu0 %v8858_v11 }
 0x7b2   :  { %1152 = vmatprep.subr.bf16.mxu0 %v8865_v12 }
 0x7b5   :  { %1153 = vmatpush1.bf16.msra.mxu0 %v8870_v13 }
 0x7b6   :  { %1154 = vmatprep.subr.bf16.mxu0 %v8877_v14 }
 0x7b9   :  { %1155 = vmatpush1.bf16.msra.mxu0 %v8886_v15 }
 0x86c   :  { %v916_v36 = vpop.f32.mrf.mxu0 }
 0x86d   :  { %v917_v47 = vadd.f32 %v916_v36, %v8993_v7 }
 0x86e   :  { %v918_v48 = vpop.f32.mrf.mxu0 }
 0x86f   :  { %v931_v29 = vadd.f32 %v8998_v23, %v917_v47  ;;  %v919_v45 = vadd.f32 %v918_v48, %v9004_v31 }
 0x870   :  { %v920_v46 = vpop.f32.mrf.mxu0 }
 0x871   :  { %v7573_v52 = vmul.f32 -1.442695, %v931_v29  ;;  %v932_v57 = vadd.f32 %v928_v44, %v919_v45 }
 0x872   :  { %v921_v30 = vpop.f32.mrf.mxu0 }
 0x873   :  { %8219 = vpow2.f32 %v7573_v52  ;;  %v7574_v7 = vmul.f32 -1.442695, %v932_v57 }
 0x874   :  { %8221 = vtanh.f32 %v932_v57  ;;  %v1183_v57 = vrot.slane %v8931_v32, 1 }
 0x880   :  { %v8220_v58 = vpop.eup %8219 }
 0x881   :  { %v939_v60 = vadd.f32 1.0, %v8220_v58  ;;  %v8222_v0 = vpop.eup %8221 }
 0x883   :  { %8223 = vrcp.f32 %v939_v60 }
 0x884   :  { %8225 = vpow2.f32 %v7574_v7 }
 0x890   :  { %v8224_v1 = vpop.eup %8223 }
 0x891   :  { %v947_v4 = vmul.f32 %v8224_v1, %v8222_v0  ;;  %v8226_v23 = vpop.eup %8225  ;;  %v946_v5 = vmul.f32 %v8224_v1, %v823_v34  ;;  %v1184_v1 = vsel %vm352_vm1, %v9047_v21, %v1183_v57 }
 0x892   :  { %v940_v31 = vadd.f32 1.0, %v8226_v23 }
 0x893   :  { %949 = vrot.lane.b32.xlu0 %v947_v4, %s8676_s3 }
 0x894   :  { %8227 = vrcp.f32 %v940_v31 }
 0x8a1   :  { %v8228_v26 = vpop.eup %8227 }
 0x905   :  { %v950_v6 = vpop.permute.xlu0 %949 }
 0x906   :  { %v952_v8 = vadd.f32 %v950_v6, %v946_v5 }
 0x908   :  { %8229 = vtanh.f32 %v952_v8 }
 0x915   :  { %v8230_v33 = vpop.eup %8229 }
 0x916   :  { %v9145_v38 = vmul.f32 %v8230_v33, %v8228_v26 }
 0x918   :  { %v996_v37 = vpack.c.bf16 %v9145_v38, %v9145_v38 }
 0x91a   :  { %998 = vrot.lane.b32.xlu1 %v996_v37, %s8676_s3 }
 0x98c   :  { %v999_v56 = vpop.permute.xlu1 %998 }
 0x98d   :  { %7575 = vmatmul.mubr.msk.bf16.vlgmr.msra.gmra.mxu1 %vm358_vm2, %v999_v56 }
 0x98e   :  { %1276 = vmatpush1.bf16.msra.mxu1 %v8846_v9  ;;  %1299 = vmatprep.mubr.bf16.mxu1 %v8675_v2 }
 0x98f   :  { %1277 = vmatprep.subr.bf16.mxu1 %v8851_v10 }
 0x992   :  { %1278 = vmatpush1.bf16.msra.mxu1 %v8858_v11 }
 0x993   :  { %1279 = vmatprep.subr.bf16.mxu1 %v8865_v12  ;;  %v1057_v12 = vsel %vm352_vm1, %v1056_v25, %v1055_v3  ;;  %v8677_v3 = vmov 1966171168  }
 0x994   :  { %v441_v25 = vunpack.c.l.s4 %v8677_v3 }
 0x996   :  { %1280 = vmatpush1.bf16.msra.mxu1 %v8870_v13 }
 0x997   :  { %1281 = vmatprep.subr.bf16.mxu1 %v8877_v14 }
 0x99a   :  { %1282 = vmatpush1.bf16.msra.mxu1 %v8886_v15 }
 0xa4d   :  { %v1045_v62 = vpop.f32.mrf.mxu1 }
 0xa4e   :  { %v1046_v9 = vadd.f32 %v1045_v62, %v9009_v40 }
 0xa4f   :  { %v1047_v27 = vpop.f32.mrf.mxu1 }
 0xa50   :  { %v1060_v10 = vadd.f32 %v9012_v42, %v1046_v9  ;;  %v1048_v11 = vadd.f32 %v1047_v27, %v9019_v53  ;;  %v442_v9 = vunpack.c.0.s8 %v441_v25 }
 0xa51   :  { %v1049_v34 = vpop.f32.mrf.mxu1 }
 0xa52   :  { %v7576_v13 = vmul.f32 -1.442695, %v1060_v10  ;;  %v1061_v35 = vadd.f32 %v1057_v12, %v1048_v11  ;;  %v9180_v27 = vsub.s32 %v442_v9, %v8908_v17 }
 0xa53   :  { %v1050_v14 = vpop.f32.mrf.mxu1 }
 0xa54   :  { %8231 = vpow2.f32 %v7576_v13  ;;  %v7577_v40 = vmul.f32 -1.442695, %v1061_v35  ;;  %v9184_v11 = vrot.slane %v9058_v54, %v9180_v27  ;;  %v9190_v14 = vrot.slane %v9080_v50, %v9180_v27 }
 0xa55   :  { %8233 = vtanh.f32 %v1061_v35  ;;  %v9198_v54 = vrot.slane %v9102_v43, %v9180_v27  ;;  %v9206_v50 = vrot.slane %v9124_v49, %v9180_v27  ;;  %v9214_v43 = vrot.slane %v9145_v38, %v9180_v27 }
 0xa56   :  { %v454_v35 = vrot.slane %v9184_v11, %v9180_v27 }
 0xa57   :  { %v834_v9 = vcombine.high %v9206_v50, %v9206_v50 }
 0xa58   :  { %v465_v17 = vrot.slane %v454_v35, %v8914_v20 }
 0xa61   :  { %v8232_v15 = vpop.eup %8231 }
 0xa62   :  { %v1068_v28 = vadd.f32 1.0, %v8232_v15  ;;  %v8234_v51 = vpop.eup %8233  ;;  %v583_v15 = vrot.slane %v9190_v14, %v9180_v27 }
 0xa64   :  { %8235 = vrcp.f32 %v1068_v28  ;;  %v594_v28 = vrot.slane %v583_v15, %v8914_v20  ;;  %v8084_v15 = vld [vmem:[%s11350_s5 + $0x30] ss:$8 sps:$4 sm:$0xff]  }
 0xa65   :  { %8237 = vpow2.f32 %v7577_v40 }
 0xa71   :  { %v8236_v59 = vpop.eup %8235 }
 0xa72   :  { %v1076_v36 = vmul.f32 %v8236_v59, %v8234_v51  ;;  %v8238_v42 = vpop.eup %8237  ;;  %v1075_v41 = vmul.f32 %v8236_v59, %v952_v8  ;;  %v712_v51 = vrot.slane %v9198_v54, %v9180_v27 }
 0xa73   :  { %v1069_v53 = vadd.f32 1.0, %v8238_v42  ;;  %v970_v42 = vrot.slane %v9214_v43, %v9180_v27 }
 0xa74   :  { %1078 = vrot.lane.b32.xlu0 %v1076_v36, %s8676_s3  ;;  %v723_v59 = vrot.slane %v712_v51, %v8914_v20  ;;  %v841_v36 = vrot.slane %v9206_v50, %v9180_v27 }
 0xa75   :  { %8239 = vrcp.f32 %v1069_v53  ;;  %v981_v53 = vrot.slane %v970_v42, %v8914_v20 }
 0xa76   :  { %v852_v40 = vrot.slane %v841_v36, %v8914_v20  ;;  %v8087_v36 = vld [vmem:[%s11349_s8 + $0x20] ss:$8 sps:$4 sm:$0xff]  }
 0xa82   :  { %v8240_v48 = vpop.eup %8239 }
 0xae6   :  { %v1079_v39 = vpop.permute.xlu0 %1078 }
 0xae7   :  { %v1081_v47 = vadd.f32 %v1079_v39, %v1075_v41 }
 0xae9   :  { %8241 = vtanh.f32 %v1081_v47 }
 0xaf6   :  { %v8242_v29 = vpop.eup %8241 }
 0xaf7   :  { %v1083_v45 = vmul.f32 %v8242_v29, %v8240_v48 }
 0xaf9   :  { %v1125_v44 = vpack.c.bf16 %v1083_v45, %v1083_v45  ;;  %v9221_v49 = vrot.slane %v1083_v45, %v9180_v27 }
 0xafb   :  { %1127 = vrot.lane.b32.xlu1 %v1125_v44, %s8676_s3  ;;  %v1099_v41 = vrot.slane %v9221_v49, %v9180_v27  ;;  %v1092_v35 = vcombine.high %v9221_v49, %v9221_v49 }
 0xafd   :  { %v1110_v39 = vrot.slane %v1099_v41, %v8914_v20  ;;  %v1106_v50 = vrot.slane %v1092_v35, %v9180_v27 }
 0xb6d   :  { %v1128_v46 = vpop.permute.xlu1 %1127 }
 0xb6e   :  { %7578 = vmatmul.mubr.msk.bf16.vlgmr.msra.gmra.mxu0 %vm358_vm2, %v1128_v46 }
 0xb6f   :  { %1457 = vmatprep.mubr.bf16.mxu0 %v8675_v2 }
 0xc2e   :  { %v1174_v52 = vpop.f32.mrf.mxu0 }
 0xc2f   :  { %v1175_v30 = vadd.f32 %v1174_v52, %v9023_v55 }
 0xc30   :  { %v1176_v58 = vpop.f32.mrf.mxu0 }
 0xc31   :  { %v1187_v60 = vadd.f32 %v9030_v61, %v1175_v30  ;;  %v1177_v0 = vadd.f32 %v1176_v58, %v9033_v63 }
 0xc32   :  { %v1178_v4 = vpop.f32.mrf.mxu0 }
 0xc33   :  { %v7579_v7 = vmul.f32 -1.442695, %v1187_v60  ;;  %v1188_v23 = vadd.f32 %v1184_v1, %v1177_v0  ;;  %v1310_v0 = vrot.slane %v9047_v21, 7 }
 0xc34   :  { %v1179_v31 = vpop.f32.mrf.mxu0 }
 0xc35   :  { %8243 = vpow2.f32 %v7579_v7  ;;  %v7580_v61 = vmul.f32 -1.442695, %v1188_v23  ;;  %v1311_v31 = vsel %vm352_vm1, %v1310_v0, %v8931_v32  ;;  %v576_v32 = vcombine.high %v9190_v14, %v9190_v14  ;;  %v8081_v14 = vld [vmem:[%s11349_s8 + $0x30] ss:$8 sps:$4 sm:$0xff]  }
 0xc36   :  { %8245 = vtanh.f32 %v1188_v23 }
 0xc42   :  { %v8244_v5 = vpop.eup %8243 }
 0xc43   :  { %v1195_v6 = vadd.f32 1.0, %v8244_v5  ;;  %v8246_v8 = vpop.eup %8245 }
 0xc45   :  { %8247 = vrcp.f32 %v1195_v6 }
 0xc46   :  { %8249 = vpow2.f32 %v7580_v61 }
 0xc52   :  { %v8248_v26 = vpop.eup %8247 }
 0xc53   :  { %v1203_v55 = vmul.f32 %v8248_v26, %v8246_v8  ;;  %v8250_v63 = vpop.eup %8249  ;;  %v1202_v37 = vmul.f32 %v8248_v26, %v1081_v47 }
 0xc54   :  { %v1196_v33 = vadd.f32 1.0, %v8250_v63 }
 0xc55   :  { %1205 = vrot.lane.b32.xlu0 %v1203_v55, %s8676_s3 }
 0xc56   :  { %8251 = vrcp.f32 %v1196_v33 }
 0xc63   :  { %v8252_v10 = vpop.eup %8251 }
 0xcc7   :  { %v1206_v56 = vpop.permute.xlu0 %1205 }
 0xcc8   :  { %v9176_v62 = vadd.f32 %v1206_v56, %v1202_v37  ;;  %v590_v37 = vrot.slane %v576_v32, %v9180_v27  ;;  %v705_v56 = vcombine.high %v9198_v54, %v9198_v54  ;;  %v8086_v54 = vld [vmem:[%s11350_s5 + $0x34] ss:$8 sps:$4 sm:$0xff]  }
 0xcc9   :  { %1531 = vmatprep.subr.bf16.mxu1 %v8086_v54 }
 0xcca   :  { %8253 = vtanh.f32 %v9176_v62  ;;  %v598_v3 = vrot.slane %v590_v37, %v8914_v20  ;;  %v719_v25 = vrot.slane %v705_v56, %v9180_v27  ;;  %v9379_v56 = vld [vmem:[%s11351_s2 + $0x30] ss:$8 sps:$4 sm:$0xff]  }
 0xcd7   :  { %v8254_v12 = vpop.eup %8253 }
 0xcd8   :  { %v1210_v34 = vmul.f32 %v8254_v12, %v8252_v10  ;;  %v727_v10 = vrot.slane %v719_v25, %v8914_v20  ;;  %v963_v12 = vcombine.high %v9214_v43, %v9214_v43  ;;  %v1114_v43 = vrot.slane %v1106_v50, %v8914_v20  ;;  %v9384_v25 = vld [vmem:[%s11351_s2 + $0x24] ss:$8 sps:$4 sm:$0xff]  }
 0xcda   :  { %v1252_v13 = vpack.c.bf16 %v1210_v34, %v1210_v34  ;;  %v9228_v38 = vrot.slane %v1210_v34, %v9180_v27 }
 0xcdc   :  { %1254 = vrot.lane.b32.xlu1 %v1252_v13, %s8676_s3  ;;  %v1226_v47 = vrot.slane %v9228_v38, %v9180_v27  ;;  %v977_v13 = vrot.slane %v963_v12, %v9180_v27  ;;  %v9414_v12 = vld [vmem:[%s11351_s2 + $0x4] ss:$8 sps:$4 sm:$0xff]  }
 0xcde   :  { %v1237_v48 = vrot.slane %v1226_v47, %v8914_v20  ;;  %v985_v51 = vrot.slane %v977_v13, %v8914_v20  ;;  %v119_v13 = vld [vmem:[%s11352_s7] sm:$0x3] }
 0xcdf   :  { %v1472_v35 = vrot.slane %v119_v13, %v8914_v20 }
 0xce0   :  { %470 = vrot.lane.b32.xlu1 %v465_v17, %s8676_s3  ;;  %v8083_v17 = vld [vmem:[%s11349_s8 + $0x34] ss:$8 sps:$4 sm:$0xff]  }
 0xce1   :  { %1433 = vmatprep.subr.bf16.mxu0 %v8083_v17 }
 0xce2   :  { %1434 = vmatpush1.bf16.msra.mxu0 %v8081_v14  ;;  %v1476_v14 = vrot.slane %v119_v13, %v8920_v22 }
 0xce4   :  { %599 = vrot.lane.b32.xlu1 %v594_v28, %s8676_s3  ;;  %v8089_v28 = vld [vmem:[%s11349_s8 + $0x24] ss:$8 sps:$4 sm:$0xff]  }
 0xce5   :  { %1435 = vmatprep.subr.bf16.mxu0 %v8089_v28 }
 0xce6   :  { %1436 = vmatpush1.bf16.msra.mxu0 %v8087_v36 }
 0xce8   :  { %728 = vrot.lane.b32.xlu1 %v723_v59, %s8676_s3  ;;  %v1219_v59 = vcombine.high %v9228_v38, %v9228_v38 }
 0xcec   :  { %857 = vrot.lane.b32.xlu1 %v852_v40, %s8676_s3  ;;  %v1233_v40 = vrot.slane %v1219_v59, %v9180_v27 }
 0xcee   :  { %v1241_v42 = vrot.slane %v1233_v40, %v8914_v20 }
 0xcf0   :  { %986 = vrot.lane.b32.xlu1 %v981_v53, %s8676_s3 }
 0xcf4   :  { %1115 = vrot.lane.b32.xlu1 %v1110_v39, %s8676_s3 }
 0xcf8   :  { %1242 = vrot.lane.b32.xlu1 %v1237_v48, %s8676_s3 }
 0xd4e   :  { %v1255_v29 = vpop.permute.xlu1 %1254 }
 0xd4f   :  { %7581 = vmatmul.mubr.msk.bf16.vlgmr.msra.gmra.mxu1 %vm358_vm2, %v1255_v29 }
 0xd50   :  { %1555 = vmatprep.mubr.bf16.mxu1 %v8675_v2  ;;  %1532 = vmatpush1.bf16.msra.mxu1 %v8084_v15 }
 0xd52   :  { %v471_v45 = vpop.permute.xlu1 %470 }
 0xd53   :  { %477 = vst.msk [vmem:[#allocation2] sm:$0x1] %vm476_vm3, %v471_v45 }
 0xd54   :  { %480 = vst.msk [vmem:[#allocation2 + $0x7] sm:$0x1] %vm479_vm4, %v471_v45 }
 0xd56   :  { %v600_v44 = vpop.permute.xlu1 %599 }
 0xd57   :  { %605 = vst.msk [vmem:[#allocation2 + $0x1] sm:$0x1] %vm476_vm3, %v600_v44 }
 0xd58   :  { %607 = vst.msk [vmem:[#allocation2 + $0x6] sm:$0x1] %vm479_vm4, %v600_v44 }
 0xd5a   :  { %v729_v46 = vpop.permute.xlu1 %728 }
 0xd5b   :  { %734 = vst.msk [vmem:[#allocation2 + $0x2] sm:$0x1] %vm476_vm3, %v729_v46 }
 0xd5c   :  { %736 = vst.msk [vmem:[#allocation2 + $0x5] sm:$0x1] %vm479_vm4, %v729_v46 }
 0xd5e   :  { %v858_v52 = vpop.permute.xlu1 %857 }
 0xd5f   :  { %863 = vst.msk [vmem:[#allocation2 + $0x3] sm:$0x1] %vm476_vm3, %v858_v52 }
 0xd60   :  { %865 = vst.msk [vmem:[#allocation2 + $0x4] sm:$0x1] %vm479_vm4, %v858_v52 }
 0xd62   :  { %v987_v57 = vpop.permute.xlu1 %986 }
 0xd63   :  { %992 = vst.msk [vmem:[#allocation2 + $0x4] sm:$0x1] %vm476_vm3, %v987_v57 }
 0xd64   :  { %994 = vst.msk [vmem:[#allocation2 + $0x3] sm:$0x1] %vm479_vm4, %v987_v57 }
 0xd66   :  { %v1116_v30 = vpop.permute.xlu1 %1115 }
 0xd67   :  { %1121 = vst.msk [vmem:[#allocation2 + $0x5] sm:$0x1] %vm476_vm3, %v1116_v30 }
 0xd68   :  { %1123 = vst.msk [vmem:[#allocation2 + $0x2] sm:$0x1] %vm479_vm4, %v1116_v30  ;;  %v8090_v30 = vld [vmem:[%s11350_s5 + $0x20] ss:$8 sps:$4 sm:$0xff]  }
 0xd6a   :  { %v1243_v58 = vpop.permute.xlu1 %1242 }
 0xd6b   :  { %1248 = vst.msk [vmem:[#allocation2 + $0x6] sm:$0x1] %vm476_vm3, %v1243_v58 }
 0xd6c   :  { %1250 = vst.msk [vmem:[#allocation2 + $0x1] sm:$0x1] %vm479_vm4, %v1243_v58  ;;  %v8092_v58 = vld [vmem:[%s11350_s5 + $0x24] ss:$8 sps:$4 sm:$0xff]  }
 0xd6d   :  { %1533 = vmatprep.subr.bf16.mxu1 %v8092_v58 }
 0xd6e   :  { %1534 = vmatpush1.bf16.msra.mxu1 %v8090_v30 }
 0xe0f   :  { %v1301_v60 = vpop.f32.mrf.mxu1 }
 0xe10   :  { %v1302_v1 = vadd.f32 %v1301_v60, %v9041_v16  ;;  %v447_v16 = vcombine.high %v9184_v11, %v9184_v11  ;;  %v848_v11 = vrot.slane %v834_v9, %v9180_v27  ;;  %v9392_v9 = vld [vmem:[%s11351_s2 + $0x20] ss:$8 sps:$4 sm:$0xff]  }
 0xe11   :  { %v1303_v4 = vpop.f32.mrf.mxu1 }
 0xe12   :  { %v1314_v7 = vadd.f32 %v9045_v18, %v1302_v1  ;;  %v1304_v23 = vadd.f32 %v1303_v4, %v9050_v24  ;;  %v461_v24 = vrot.slane %v447_v16, %v9180_v27  ;;  %v856_v34 = vrot.slane %v848_v11, %v8914_v20  ;;  %v8093_v4 = vld [vmem:[%s11349_s8 + $0x10] ss:$8 sps:$4 sm:$0xff]  }
 0xe13   :  { %v1305_v5 = vpop.f32.mrf.mxu1  ;;  %v9408_v11 = vld [vmem:[%s11351_s2 + $0x10] ss:$8 sps:$4 sm:$0xff]  }
 0xe14   :  { %v7582_v6 = vmul.f32 -1.442695, %v1314_v7  ;;  %v1315_v8 = vadd.f32 %v1311_v31, %v1304_v23  ;;  %v469_v33 = vrot.slane %v461_v24, %v8914_v20  ;;  %v8095_v7 = vld [vmem:[%s11349_s8 + $0x14] ss:$8 sps:$4 sm:$0xff]   ;;  %v8096_v23 = vld [vmem:[%s11350_s5 + $0x10] ss:$8 sps:$4 sm:$0xff]  }
 0xe15   :  { %v1306_v26 = vpop.f32.mrf.mxu1  ;;  %v8098_v31 = vld [vmem:[%s11350_s5 + $0x14] ss:$8 sps:$4 sm:$0xff]   ;;  %v8101_v5 = vld [vmem:[%s11349_s8 + $0x4] ss:$8 sps:$4 sm:$0xff]   ;;  %1437 = vmatprep.subr.bf16.mxu0 %v8095_v7 }
 0xe16   :  { %8255 = vpow2.f32 %v7582_v6  ;;  %v7583_v49 = vmul.f32 -1.442695, %v1315_v8  ;;  %v8104_v26 = vld [vmem:[%s11350_s5 + $0x4] ss:$8 sps:$4 sm:$0xff]   ;;  %1438 = vmatpush1.bf16.msra.mxu0 %v8093_v4  ;;  %1535 = vmatprep.subr.bf16.mxu1 %v8098_v31 }
 0xe17   :  { %8257 = vtanh.f32 %v1315_v8  ;;  %1439 = vmatprep.subr.bf16.mxu0 %v8101_v5  ;;  %1536 = vmatpush1.bf16.msra.mxu1 %v8096_v23 }
 0xe18   :  { %1537 = vmatprep.subr.bf16.mxu1 %v8104_v26 }
 0xe23   :  { %v8256_v55 = vpop.eup %8255 }
 0xe24   :  { %v1322_v61 = vadd.f32 1.0, %v8256_v55  ;;  %v8258_v21 = vpop.eup %8257 }
 0xe26   :  { %8259 = vrcp.f32 %v1322_v61  ;;  %v8099_v61 = vld [vmem:[%s11349_s8] ss:$8 sps:$4 sm:$0xff]  }
 0xe27   :  { %8261 = vpow2.f32 %v7583_v49  ;;  %1440 = vmatpush1.bf16.msra.mxu0 %v8099_v61 }
 0xe33   :  { %v8260_v63 = vpop.eup %8259 }
 0xe34   :  { %v1330_v18 = vmul.f32 %v8260_v63, %v8258_v21  ;;  %v8262_v53 = vpop.eup %8261  ;;  %v1329_v38 = vmul.f32 %v8260_v63, %v9176_v62  ;;  %v9362_v21 = vld [vmem:[%s11351_s2 + $0x34] ss:$8 sps:$4 sm:$0xff]   ;;  %v8102_v63 = vld [vmem:[%s11350_s5] ss:$8 sps:$4 sm:$0xff]  }
 0xe35   :  { %v1323_v41 = vadd.f32 1.0, %v8262_v53  ;;  %1624 = vmatprep.subr.bf16.mxu0 %v9362_v21  ;;  %1538 = vmatpush1.bf16.msra.mxu1 %v8102_v63 }
 0xe36   :  { %1332 = vrot.lane.b32.xlu0 %v1330_v18, %s8676_s3  ;;  %1755 = vmatprep.subr.bf16.mxu1 %v9362_v21 }
 0xe37   :  { %8263 = vrcp.f32 %v1323_v41 }
 0xe3a   :  { %472 = vrot.lane.b32.xlu0 %v469_v33, %s8676_s3 }
 0xe3e   :  { %601 = vrot.lane.b32.xlu0 %v598_v3, %s8676_s3 }
 0xe42   :  { %730 = vrot.lane.b32.xlu0 %v727_v10, %s8676_s3  ;;  %v9399_v10 = vld [vmem:[%s11351_s2 + $0x14] ss:$8 sps:$4 sm:$0xff]  }
 0xe44   :  { %v8264_v62 = vpop.eup %8263 }
 0xe46   :  { %859 = vrot.lane.b32.xlu0 %v856_v34, %s8676_s3  ;;  %v9422_v34 = vld [vmem:[%s11351_s2] ss:$8 sps:$4 sm:$0xff]  }
 0xe4a   :  { %988 = vrot.lane.b32.xlu0 %v985_v51, %s8676_s3 }
 0xe4e   :  { %1117 = vrot.lane.b32.xlu0 %v1114_v43, %s8676_s3 }
 0xe52   :  { %1244 = vrot.lane.b32.xlu0 %v1241_v42, %s8676_s3 }
 0xea8   :  { %v1333_v39 = vpop.permute.xlu0 %1332 }
 0xea9   :  { %v1335_v47 = vadd.f32 %v1333_v39, %v1329_v38 }
 0xeab   :  { %8265 = vtanh.f32 %v1335_v47 }
 0xeac   :  { %v473_v48 = vpop.permute.xlu0 %472 }
 0xead   :  { %478 = vst.msk [vmem:[#allocation2 + $0x8] sm:$0x1] %vm476_vm3, %v473_v48 }
 0xeae   :  { %481 = vst.msk [vmem:[#allocation2 + $0xf] sm:$0x1] %vm479_vm4, %v473_v48 }
 0xeb0   :  { %v602_v29 = vpop.permute.xlu0 %601 }
 0xeb1   :  { %606 = vst.msk [vmem:[#allocation2 + $0x9] sm:$0x1] %vm476_vm3, %v602_v29 }
 0xeb2   :  { %608 = vst.msk [vmem:[#allocation2 + $0xe] sm:$0x1] %vm479_vm4, %v602_v29 }
 0xeb4   :  { %v731_v45 = vpop.permute.xlu0 %730 }
 0xeb5   :  { %735 = vst.msk [vmem:[#allocation2 + $0xa] sm:$0x1] %vm476_vm3, %v731_v45 }
 0xeb6   :  { %737 = vst.msk [vmem:[#allocation2 + $0xd] sm:$0x1] %vm479_vm4, %v731_v45 }
 0xeb8   :  { %v8266_v44 = vpop.eup %8265  ;;  %v860_v46 = vpop.permute.xlu0 %859 }
 0xeb9   :  { %864 = vst.msk [vmem:[#allocation2 + $0xb] sm:$0x1] %vm476_vm3, %v860_v46  ;;  %v1337_v52 = vmul.f32 %v8266_v44, %v8264_v62 }
 0xeba   :  { %866 = vst.msk [vmem:[#allocation2 + $0xc] sm:$0x1] %vm479_vm4, %v860_v46 }
 0xebb   :  { %v1345_v57 = vrot.slane %v1337_v52, %v9180_v27 }
 0xebc   :  { %v989_v60 = vpop.permute.xlu0 %988 }
 0xebd   :  { %993 = vst.msk [vmem:[#allocation2 + $0xc] sm:$0x1] %vm476_vm3, %v989_v60  ;;  %v1353_v0 = vrot.slane %v1345_v57, %v9180_v27  ;;  %v1346_v1 = vcombine.high %v1345_v57, %v1345_v57 }
 0xebe   :  { %995 = vst.msk [vmem:[#allocation2 + $0xb] sm:$0x1] %vm479_vm4, %v989_v60 }
 0xebf   :  { %v1364_v6 = vrot.slane %v1353_v0, %v8914_v20  ;;  %v1360_v8 = vrot.slane %v1346_v1, %v9180_v27 }
 0xec0   :  { %v1118_v55 = vpop.permute.xlu0 %1117 }
 0xec1   :  { %1122 = vst.msk [vmem:[#allocation2 + $0xd] sm:$0x1] %vm476_vm3, %v1118_v55  ;;  %1369 = vrot.lane.b32.xlu1 %v1364_v6, %s8676_s3  ;;  %v1368_v16 = vrot.slane %v1360_v8, %v8914_v20 }
 0xec2   :  { %1124 = vst.msk [vmem:[#allocation2 + $0xa] sm:$0x1] %vm479_vm4, %v1118_v55 }
 0xec3   :  { %1371 = vrot.lane.b32.xlu0 %v1368_v16, %s8676_s3 }
 0xec4   :  { %v1245_v18 = vpop.permute.xlu0 %1244 }
 0xec5   :  { %1249 = vst.msk [vmem:[#allocation2 + $0xe] sm:$0x1] %vm476_vm3, %v1245_v18 }
 0xec6   :  { %1251 = vst.msk [vmem:[#allocation2 + $0x9] sm:$0x1] %vm479_vm4, %v1245_v18 }
 0xf33   :  { %v1370_v24 = vpop.permute.xlu1 %1369 }
 0xf34   :  { %1375 = vst.msk [vmem:[#allocation2 + $0x7] sm:$0x1] %vm476_vm3, %v1370_v24 }
 0xf35   :  { %1377 = vst.msk [vmem:[#allocation2] sm:$0x1] %vm479_vm4, %v1370_v24  ;;  %v1372_v32 = vpop.permute.xlu0 %1371 }
 0xf36   :  { %1376 = vst.msk [vmem:[#allocation2 + $0xf] sm:$0x1] %vm476_vm3, %v1372_v32 }
 0xf37   :  { %1378 = vst.msk [vmem:[#allocation2 + $0x8] sm:$0x1] %vm479_vm4, %v1372_v32 }
 0xf3c   :  { %v1379_v33 = vld [vmem:[#allocation2] sm:$0xff] }
 0xf3e   :  { %v1380_v37 = vld [vmem:[#allocation2 + $0x8] sm:$0xff] }
 0xf3f   :  { %v1381_v3 = vpack.c.bf16 %v1380_v37, %v1379_v33 }
 0xf41   :  { %7592 = vmatmul.mubr.msk.bf16.vlgmr.msra.gmra.mxu0 %vm358_vm2, %v1381_v3  ;;  %7601 = vmatmul.mubr.msk.bf16.vlgmr.msra.gmra.mxu1 %vm358_vm2, %v1381_v3 }
 0xf42   :  { %1625 = vmatpush1.bf16.msra.mxu0 %v9379_v56  ;;  %1648 = vmatprep.mubr.bf16.mxu0 %v8675_v2 }
 0xf43   :  { %1626 = vmatprep.subr.bf16.mxu0 %v9384_v25  ;;  %1756 = vmatpush1.bf16.msra.mxu1 %v9379_v56 }
 0xf44   :  { %1757 = vmatprep.subr.bf16.mxu1 %v9384_v25  ;;  %1779 = vmatprep.mubr.bf16.mxu1 %v8675_v2 }
 0xf46   :  { %1627 = vmatpush1.bf16.msra.mxu0 %v9392_v9 }
 0xf47   :  { %1628 = vmatprep.subr.bf16.mxu0 %v9399_v10  ;;  %1758 = vmatpush1.bf16.msra.mxu1 %v9392_v9 }
 0xf48   :  { %1759 = vmatprep.subr.bf16.mxu1 %v9399_v10 }
 0xf4a   :  { %1629 = vmatpush1.bf16.msra.mxu0 %v9408_v11 }
 0xf4b   :  { %1630 = vmatprep.subr.bf16.mxu0 %v9414_v12  ;;  %1760 = vmatpush1.bf16.msra.mxu1 %v9408_v11 }
 0xf4c   :  { %1761 = vmatprep.subr.bf16.mxu1 %v9414_v12 }
 0xf4e   :  { %1631 = vmatpush1.bf16.msra.mxu0 %v9422_v34 }
 0xf4f   :  { %1762 = vmatpush1.bf16.msra.mxu1 %v9422_v34  ;;  %1884 = vmatprep.subr.bf16.mxu0 %v9362_v21 }
 0xf50   :  { %2013 = vmatprep.subr.bf16.mxu1 %v9362_v21 }
 0xf51   :  { %1649 = vmatmul.mubr.bf16.vlgmr.msra.gmra.mxu0 %v8675_v2 }
 0xf52   :  { %1885 = vmatpush1.bf16.msra.mxu0 %v9379_v56  ;;  %1908 = vmatprep.mubr.bf16.mxu0 %v8675_v2 }
 0xf53   :  { %1886 = vmatprep.subr.bf16.mxu0 %v9384_v25 }
 0xf56   :  { %1887 = vmatpush1.bf16.msra.mxu0 %v9392_v9 }
 0xf57   :  { %1888 = vmatprep.subr.bf16.mxu0 %v9399_v10 }
 0xf5a   :  { %1889 = vmatpush1.bf16.msra.mxu0 %v9408_v11 }
 0xf5b   :  { %1890 = vmatprep.subr.bf16.mxu0 %v9414_v12 }
 0xf5e   :  { %1891 = vmatpush1.bf16.msra.mxu0 %v9422_v34 }
 0xf5f   :  { %2142 = vmatprep.subr.bf16.mxu0 %v9362_v21 }
0x1001   :  { %v1459_v17 = vpop.f32.mrf.mxu0  ;;  %v9446_v15 = vpop.f32.mrf.mxu1 }
0x1002   :  { %v9448_v54 = vadd.f32 %v1472_v35, %v1459_v17  ;;  %v1788_v53 = vrot.slane %v9446_v15, 6  ;;  %v1917_v47 = vrot.slane %v9446_v15, 5  ;;  %v1661_v46 = vrot.slane %v9446_v15, 7 }
0x1003   :  { %v1461_v28 = vpop.f32.mrf.mxu0  ;;  %v9450_v51 = vpop.f32.mrf.mxu1  ;;  %v2046_v57 = vrot.slane %v9446_v15, 4  ;;  %v2175_v8 = vrot.slane %v9446_v15, 3  ;;  %v2304_v13 = vrot.slane %v9446_v15, 2 }
0x1004   :  { %v9452_v50 = vadd.f32 %v1476_v14, %v1461_v28  ;;  %v1738_v49 = vrot.slane %v9448_v54, 1  ;;  %v1865_v62 = vrot.slane %v9448_v54, 2  ;;  %v1994_v4 = vrot.slane %v9448_v54, 3 }
0x1005   :  { %v1463_v59 = vpop.f32.mrf.mxu0  ;;  %v9454_v36 = vpop.f32.mrf.mxu1  ;;  %v2123_v55 = vrot.slane %v9448_v54, 4  ;;  %v2252_v17 = vrot.slane %v9448_v54, 5 }
0x1006   :  { %v9456_v43 = vadd.f32 %v1472_v35, %v1463_v59  ;;  %v1789_v40 = vrot.slane %v9454_v36, 5  ;;  %v1918_v41 = vrot.slane %v9454_v36, 4  ;;  %v1740_v39 = vrot.slane %v9452_v50, 1 }
0x1007   :  { %v1465_v42 = vpop.f32.mrf.mxu0  ;;  %v2047_v48 = vrot.slane %v9454_v36, 3  ;;  %v1868_v60 = vrot.slane %v9452_v50, 2  ;;  %v1997_v5 = vrot.slane %v9452_v50, 3  ;;  %v2176_v16 = vrot.slane %v9454_v36, 2 }
0x1008   :  { %v9462_v38 = vadd.f32 %v1476_v14, %v1465_v42  ;;  %v9469_v29 = vsel %vm352_vm1, %v9456_v43, %v1738_v49  ;;  %v9472_v45 = vsel %vm352_vm1, %v1789_v40, %v1788_v53  ;;  %v1866_v44 = vrot.slane %v9456_v43, 1 }
0x1009   :  { %v9486_v58 = vsel %vm352_vm1, %v1918_v41, %v1917_v47  ;;  %v1610_v1 = vrot.slane %v9456_v43, 7  ;;  %v1995_v7 = vrot.slane %v9456_v43, 2  ;;  %v9494_v23 = vsel %vm352_vm1, %v2047_v48, %v2046_v57 }
0x100a   :  { %v9479_v52 = vsel %vm352_vm1, %v9462_v38, %v1740_v39  ;;  %v9483_v30 = vsel %vm352_vm1, %v1866_v44, %v1865_v62  ;;  %v1869_v0 = vrot.slane %v9462_v38, 1  ;;  %v1998_v6 = vrot.slane %v9462_v38, 2 }
0x100b   :  { %v9503_v26 = vsel %vm352_vm1, %v1995_v7, %v1994_v4  ;;  %v2124_v61 = vrot.slane %v9456_v43, 3  ;;  %v1662_v63 = vrot.slane %v9454_v36, 6  ;;  %v2126_v24 = vrot.slane %v9452_v50, 4 }
0x100c   :  { %v9497_v31 = vsel %vm352_vm1, %v1869_v0, %v1868_v60  ;;  %v9510_v18 = vsel %vm352_vm1, %v1998_v6, %v1997_v5  ;;  %v2127_v32 = vrot.slane %v9462_v38, 3  ;;  %v1611_v33 = vsel %vm352_vm1, %v1610_v1, %v9448_v54 }
0x100d   :  { %v9517_v37 = vsel %vm352_vm1, %v2124_v61, %v2123_v55  ;;  %v9520_v3 = vsel %vm352_vm1, %v2176_v16, %v2175_v8  ;;  %v2253_v28 = vrot.slane %v9456_v43, 4  ;;  %v2305_v59 = vrot.slane %v9454_v36, 1 }
0x100e   :  { %v9524_v14 = vsel %vm352_vm1, %v2127_v32, %v2126_v24  ;;  %v2255_v42 = vrot.slane %v9452_v50, 5  ;;  %v2256_v49 = vrot.slane %v9462_v38, 4  ;;  %v1663_v53 = vsel %vm352_vm1, %v1662_v63, %v1661_v46 }
0x100f   :  { %v9533_v39 = vsel %vm352_vm1, %v2253_v28, %v2252_v17  ;;  %v9536_v47 = vsel %vm352_vm1, %v2305_v59, %v2304_v13  ;;  %v2433_v48 = vrot.slane %v9446_v15, 1  ;;  %v2381_v60 = vrot.slane %v9448_v54, 6 }
0x1010   :  { %v9540_v44 = vsel %vm352_vm1, %v2256_v49, %v2255_v42  ;;  %v2382_v0 = vrot.slane %v9456_v43, 5  ;;  %v2384_v4 = vrot.slane %v9452_v50, 6  ;;  %v2385_v7 = vrot.slane %v9462_v38, 5 }
0x1011   :  { %v1650_v35 = vpop.f32.mrf.mxu0  ;;  %v9546_v46 = vsel %vm352_vm1, %v9454_v36, %v2433_v48  ;;  %v2508_v8 = vrot.slane %v9448_v54, 7  ;;  %v2509_v55 = vrot.slane %v9456_v43, 6  ;;  %v2560_v61 = vrot.slane %v9454_v36, 7  ;;  %v9569_v43 = vpop.f32.mrf.mxu1 }
0x1012   :  { %v1651_v40 = vadd.f32 %v1650_v35, %v1611_v33  ;;  %v9551_v6 = vsel %vm352_vm1, %v2382_v0, %v2381_v60  ;;  %v9557_v16 = vsel %vm352_vm1, %v2385_v7, %v2384_v4  ;;  %v1612_v32 = vrot.slane %v9462_v38, 7 }
0x1013   :  { %v1652_v41 = vpop.f32.mrf.mxu0  ;;  %v9560_v63 = vsel %vm352_vm1, %v2509_v55, %v2508_v8  ;;  %v9564_v24 = vsel %vm352_vm1, %v2560_v61, %v9446_v15  ;;  %v2511_v33 = vrot.slane %v9452_v50, 7  ;;  %v2512_v54 = vrot.slane %v9462_v38, 6 }
0x1014   :  { %v1669_v62 = vadd.f32 %v1663_v53, %v1651_v40  ;;  %v1613_v13 = vsel %vm352_vm1, %v1612_v32, %v9452_v50  ;;  %v1665_v35 = vrot.slane %v9569_v43, 6  ;;  %v1664_v15 = vrot.slane %v9450_v51, 7 }
0x1015   :  { %v1654_v57 = vpop.f32.mrf.mxu0  ;;  %v9572_v36 = vsel %vm352_vm1, %v2512_v54, %v2511_v33  ;;  %v1653_v17 = vadd.f32 %v1652_v41, %v1613_v13  ;;  %v1792_v55 = vrot.slane %v9569_v43, 5  ;;  %v1791_v33 = vrot.slane %v9450_v51, 6 }
0x1016   :  { %v7610_v1 = vmul.f32 -1.442695, %v1669_v62  ;;  %v1666_v28 = vsel %vm352_vm1, %v1665_v35, %v1664_v15 }
0x1017   :  { %v1655_v5 = vpop.f32.mrf.mxu0  ;;  %v1670_v59 = vadd.f32 %v1666_v28, %v1653_v17  ;;  %v1793_v35 = vsel %vm352_vm1, %v1792_v55, %v1791_v33 }
0x1018   :  { %8267 = vpow2.f32 %v7610_v1 }
0x1019   :  { %8269 = vtanh.f32 %v1670_v59  ;;  %v7611_v48 = vmul.f32 -1.442695, %v1670_v59 }
0x1025   :  { %v8268_v40 = vpop.eup %8267 }
0x1026   :  { %v1677_v42 = vadd.f32 1.0, %v8268_v40  ;;  %v8270_v38 = vpop.eup %8269 }
0x1028   :  { %8271 = vrcp.f32 %v1677_v42 }
0x1029   :  { %8273 = vpow2.f32 %v7611_v48 }
0x1035   :  { %v8272_v49 = vpop.eup %8271 }
0x1036   :  { %v1685_v53 = vmul.f32 %v8272_v49, %v8270_v38  ;;  %v8274_v50 = vpop.eup %8273  ;;  %v1684_v57 = vmul.f32 0.0, %v8272_v49 }
0x1037   :  { %v1678_v62 = vadd.f32 1.0, %v8274_v50 }
0x1038   :  { %1687 = vrot.lane.b32.xlu1 %v1685_v53, %s8676_s3 }
0x1039   :  { %8275 = vrcp.f32 %v1678_v62 }
0x1046   :  { %v8276_v0 = vpop.eup %8275 }
0x10aa   :  { %v1688_v41 = vpop.permute.xlu1 %1687 }
0x10ab   :  { %v1690_v60 = vadd.f32 %v1688_v41, %v1684_v57 }
0x10ad   :  { %8277 = vtanh.f32 %v1690_v60 }
0x10ba   :  { %v8278_v1 = vpop.eup %8277 }
0x10bb   :  { %v9580_v4 = vmul.f32 %v8278_v1, %v8276_v0 }
0x10bd   :  { %v1734_v7 = vpack.c.bf16 %v9580_v4, %v9580_v4 }
0x10bf   :  { %1736 = vrot.lane.b32.xlu0 %v1734_v7, %s8676_s3 }
0x1131   :  { %v1737_v5 = vpop.permute.xlu0 %1736 }
0x1132   :  { %7612 = vmatmul.mubr.msk.bf16.vlgmr.msra.gmra.mxu1 %vm358_vm2, %v1737_v5  ;;  %v1921_v5 = vrot.slane %v9569_v43, 4 }
0x1133   :  { %2014 = vmatpush1.bf16.msra.mxu1 %v9379_v56  ;;  %2037 = vmatprep.mubr.bf16.mxu1 %v8675_v2 }
0x1134   :  { %2015 = vmatprep.subr.bf16.mxu1 %v9384_v25 }
0x1137   :  { %2016 = vmatpush1.bf16.msra.mxu1 %v9392_v9 }
0x1138   :  { %2017 = vmatprep.subr.bf16.mxu1 %v9399_v10 }
0x113b   :  { %2018 = vmatpush1.bf16.msra.mxu1 %v9408_v11 }
0x113c   :  { %2019 = vmatprep.subr.bf16.mxu1 %v9414_v12 }
0x113f   :  { %2020 = vmatpush1.bf16.msra.mxu1 %v9422_v34 }
0x1140   :  { %2271 = vmatprep.subr.bf16.mxu1 %v9362_v21 }
0x11f2   :  { %v1781_v8 = vpop.f32.mrf.mxu1 }
0x11f3   :  { %v1782_v61 = vadd.f32 %v1781_v8, %v9469_v29 }
0x11f4   :  { %v1783_v32 = vpop.f32.mrf.mxu1 }
0x11f5   :  { %v1796_v54 = vadd.f32 %v9472_v45, %v1782_v61  ;;  %v1784_v13 = vadd.f32 %v1783_v32, %v9479_v52  ;;  %v1920_v61 = vrot.slane %v9450_v51, 5 }
0x11f6   :  { %v1785_v17 = vpop.f32.mrf.mxu1 }
0x11f7   :  { %v7613_v15 = vmul.f32 -1.442695, %v1796_v54  ;;  %v1797_v28 = vadd.f32 %v1793_v35, %v1784_v13  ;;  %v1922_v54 = vsel %vm352_vm1, %v1921_v5, %v1920_v61 }
0x11f8   :  { %v1786_v59 = vpop.f32.mrf.mxu1 }
0x11f9   :  { %8279 = vpow2.f32 %v7613_v15  ;;  %v7614_v53 = vmul.f32 -1.442695, %v1797_v28 }
0x11fa   :  { %8281 = vtanh.f32 %v1797_v28 }
0x1206   :  { %v8280_v40 = vpop.eup %8279 }
0x1207   :  { %v1804_v42 = vadd.f32 1.0, %v8280_v40  ;;  %v8282_v38 = vpop.eup %8281 }
0x1209   :  { %8283 = vrcp.f32 %v1804_v42 }
0x120a   :  { %8285 = vpow2.f32 %v7614_v53 }
0x1216   :  { %v8284_v29 = vpop.eup %8283 }
0x1217   :  { %v1812_v49 = vmul.f32 %v8284_v29, %v8282_v38  ;;  %v8286_v45 = vpop.eup %8285  ;;  %v1811_v48 = vmul.f32 %v8284_v29, %v1690_v60 }
0x1218   :  { %v1805_v52 = vadd.f32 1.0, %v8286_v45 }
0x1219   :  { %1814 = vrot.lane.b32.xlu1 %v1812_v49, %s8676_s3 }
0x121a   :  { %8287 = vrcp.f32 %v1805_v52 }
0x1227   :  { %v8288_v57 = vpop.eup %8287 }
0x128b   :  { %v1815_v50 = vpop.permute.xlu1 %1814 }
0x128c   :  { %v1817_v62 = vadd.f32 %v1815_v50, %v1811_v48 }
0x128e   :  { %8289 = vtanh.f32 %v1817_v62 }
0x129b   :  { %v8290_v41 = vpop.eup %8289 }
0x129c   :  { %v9602_v0 = vmul.f32 %v8290_v41, %v8288_v57  ;;  %v2050_v41 = vrot.slane %v9569_v43, 3 }
0x129e   :  { %v1861_v1 = vpack.c.bf16 %v9602_v0, %v9602_v0 }
0x12a0   :  { %1863 = vrot.lane.b32.xlu0 %v1861_v1, %s8676_s3 }
0x1312   :  { %v1864_v7 = vpop.permute.xlu0 %1863 }
0x1313   :  { %7615 = vmatmul.mubr.msk.bf16.vlgmr.msra.gmra.mxu0 %vm358_vm2, %v1864_v7 }
0x1314   :  { %2143 = vmatpush1.bf16.msra.mxu0 %v9379_v56  ;;  %2166 = vmatprep.mubr.bf16.mxu0 %v8675_v2 }
0x1315   :  { %2144 = vmatprep.subr.bf16.mxu0 %v9384_v25 }
0x1318   :  { %2145 = vmatpush1.bf16.msra.mxu0 %v9392_v9 }
0x1319   :  { %2146 = vmatprep.subr.bf16.mxu0 %v9399_v10 }
0x131c   :  { %2147 = vmatpush1.bf16.msra.mxu0 %v9408_v11 }
0x131d   :  { %2148 = vmatprep.subr.bf16.mxu0 %v9414_v12 }
0x1320   :  { %2149 = vmatpush1.bf16.msra.mxu0 %v9422_v34 }
0x1321   :  { %2400 = vmatprep.subr.bf16.mxu0 %v9362_v21 }
0x13d3   :  { %v1910_v60 = vpop.f32.mrf.mxu0 }
0x13d4   :  { %v1911_v8 = vadd.f32 %v1910_v60, %v9483_v30  ;;  %v2049_v60 = vrot.slane %v9450_v51, 4 }
0x13d5   :  { %v1912_v55 = vpop.f32.mrf.mxu0 }
0x13d6   :  { %v1925_v32 = vadd.f32 %v9486_v58, %v1911_v8  ;;  %v1913_v33 = vadd.f32 %v1912_v55, %v9497_v31  ;;  %v2051_v55 = vsel %vm352_vm1, %v2050_v41, %v2049_v60 }
0x13d7   :  { %v1914_v13 = vpop.f32.mrf.mxu0 }
0x13d8   :  { %v7616_v35 = vmul.f32 -1.442695, %v1925_v32  ;;  %v1926_v17 = vadd.f32 %v1922_v54, %v1913_v33 }
0x13d9   :  { %v1915_v15 = vpop.f32.mrf.mxu0 }
0x13da   :  { %8291 = vpow2.f32 %v7616_v35  ;;  %v7617_v38 = vmul.f32 -1.442695, %v1926_v17 }
0x13db   :  { %8293 = vtanh.f32 %v1926_v17 }
0x13e7   :  { %v8292_v28 = vpop.eup %8291 }
0x13e8   :  { %v1933_v59 = vadd.f32 1.0, %v8292_v28  ;;  %v8294_v40 = vpop.eup %8293 }
0x13ea   :  { %8295 = vrcp.f32 %v1933_v59 }
0x13eb   :  { %8297 = vpow2.f32 %v7617_v38 }
0x13f7   :  { %v8296_v30 = vpop.eup %8295 }
0x13f8   :  { %v1941_v42 = vmul.f32 %v8296_v30, %v8294_v40  ;;  %v8298_v58 = vpop.eup %8297  ;;  %v1940_v29 = vmul.f32 %v8296_v30, %v1817_v62 }
0x13f9   :  { %v1934_v31 = vadd.f32 1.0, %v8298_v58 }
0x13fa   :  { %1943 = vrot.lane.b32.xlu1 %v1941_v42, %s8676_s3 }
0x13fb   :  { %8299 = vrcp.f32 %v1934_v31 }
0x1408   :  { %v8300_v45 = vpop.eup %8299 }
0x146c   :  { %v1944_v49 = vpop.permute.xlu1 %1943 }
0x146d   :  { %v1946_v53 = vadd.f32 %v1944_v49, %v1940_v29  ;;  %v2179_v49 = vrot.slane %v9569_v43, 2 }
0x146f   :  { %8301 = vtanh.f32 %v1946_v53 }
0x147c   :  { %v8302_v52 = vpop.eup %8301 }
0x147d   :  { %v9624_v48 = vmul.f32 %v8302_v52, %v8300_v45  ;;  %v2178_v52 = vrot.slane %v9450_v51, 3 }
0x147f   :  { %v1990_v50 = vpack.c.bf16 %v9624_v48, %v9624_v48 }
0x1481   :  { %1992 = vrot.lane.b32.xlu0 %v1990_v50, %s8676_s3 }
0x14f3   :  { %v1993_v57 = vpop.permute.xlu0 %1992 }
0x14f4   :  { %7618 = vmatmul.mubr.msk.bf16.vlgmr.msra.gmra.mxu1 %vm358_vm2, %v1993_v57 }
0x14f5   :  { %2272 = vmatpush1.bf16.msra.mxu1 %v9379_v56  ;;  %2295 = vmatprep.mubr.bf16.mxu1 %v8675_v2 }
0x14f6   :  { %2273 = vmatprep.subr.bf16.mxu1 %v9384_v25 }
0x14f9   :  { %2274 = vmatpush1.bf16.msra.mxu1 %v9392_v9 }
0x14fa   :  { %2275 = vmatprep.subr.bf16.mxu1 %v9399_v10 }
0x14fd   :  { %2276 = vmatpush1.bf16.msra.mxu1 %v9408_v11 }
0x14fe   :  { %2277 = vmatprep.subr.bf16.mxu1 %v9414_v12 }
0x1501   :  { %2278 = vmatpush1.bf16.msra.mxu1 %v9422_v34 }
0x1502   :  { %2527 = vmatprep.subr.bf16.mxu1 %v9362_v21 }
0x15b4   :  { %v2039_v62 = vpop.f32.mrf.mxu1 }
0x15b5   :  { %v2040_v1 = vadd.f32 %v2039_v62, %v9503_v26  ;;  %v2180_v62 = vsel %vm352_vm1, %v2179_v49, %v2178_v52 }
0x15b6   :  { %v2041_v7 = vpop.f32.mrf.mxu1 }
0x15b7   :  { %v2054_v5 = vadd.f32 %v9494_v23, %v2040_v1  ;;  %v2042_v8 = vadd.f32 %v2041_v7, %v9510_v18 }
0x15b8   :  { %v2043_v61 = vpop.f32.mrf.mxu1 }
0x15b9   :  { %v7619_v32 = vmul.f32 -1.442695, %v2054_v5  ;;  %v2055_v33 = vadd.f32 %v2051_v55, %v2042_v8 }
0x15ba   :  { %v2044_v54 = vpop.f32.mrf.mxu1 }
0x15bb   :  { %8303 = vpow2.f32 %v7619_v32  ;;  %v7620_v15 = vmul.f32 -1.442695, %v2055_v33 }
0x15bc   :  { %8305 = vtanh.f32 %v2055_v33 }
0x15c8   :  { %v8304_v21 = vpop.eup %8303 }
0x15c9   :  { %v2062_v13 = vadd.f32 1.0, %v8304_v21  ;;  %v8306_v35 = vpop.eup %8305 }
0x15cb   :  { %8307 = vrcp.f32 %v2062_v13 }
0x15cc   :  { %8309 = vpow2.f32 %v7620_v15 }
0x15d8   :  { %v8308_v26 = vpop.eup %8307 }
0x15d9   :  { %v2070_v17 = vmul.f32 %v8308_v26, %v8306_v35  ;;  %v8310_v23 = vpop.eup %8309  ;;  %v2069_v28 = vmul.f32 %v8308_v26, %v1946_v53 }
0x15da   :  { %v2063_v18 = vadd.f32 1.0, %v8310_v23 }
0x15db   :  { %2072 = vrot.lane.b32.xlu1 %v2070_v17, %s8676_s3 }
0x15dc   :  { %8311 = vrcp.f32 %v2063_v18  ;;  %v2308_v18 = vrot.slane %v9569_v43, 1 }
0x15e9   :  { %v8312_v30 = vpop.eup %8311 }
0x164d   :  { %v2073_v59 = vpop.permute.xlu1 %2072 }
0x164e   :  { %v2075_v40 = vadd.f32 %v2073_v59, %v2069_v28  ;;  %v2307_v59 = vrot.slane %v9450_v51, 2 }
0x1650   :  { %8313 = vtanh.f32 %v2075_v40 }
0x165d   :  { %v8314_v42 = vpop.eup %8313 }
0x165e   :  { %v9646_v38 = vmul.f32 %v8314_v42, %v8312_v30 }
0x1660   :  { %v2119_v58 = vpack.c.bf16 %v9646_v38, %v9646_v38 }
0x1662   :  { %2121 = vrot.lane.b32.xlu0 %v2119_v58, %s8676_s3 }
0x16d4   :  { %v2122_v31 = vpop.permute.xlu0 %2121 }
0x16d5   :  { %7621 = vmatmul.mubr.msk.bf16.vlgmr.msra.gmra.mxu0 %vm358_vm2, %v2122_v31 }
0x16d6   :  { %2401 = vmatpush1.bf16.msra.mxu0 %v9379_v56  ;;  %2424 = vmatprep.mubr.bf16.mxu0 %v8675_v2 }
0x16d7   :  { %2402 = vmatprep.subr.bf16.mxu0 %v9384_v25 }
0x16da   :  { %2403 = vmatpush1.bf16.msra.mxu0 %v9392_v9 }
0x16db   :  { %2404 = vmatprep.subr.bf16.mxu0 %v9399_v10 }
0x16de   :  { %2405 = vmatpush1.bf16.msra.mxu0 %v9408_v11 }
0x16df   :  { %2406 = vmatprep.subr.bf16.mxu0 %v9414_v12 }
0x16e2   :  { %2407 = vmatpush1.bf16.msra.mxu0 %v9422_v34 }
0x1795   :  { %v2168_v29 = vpop.f32.mrf.mxu0 }
0x1796   :  { %v2169_v53 = vadd.f32 %v2168_v29, %v9517_v37 }
0x1797   :  { %v2170_v45 = vpop.f32.mrf.mxu0 }
0x1798   :  { %v2183_v50 = vadd.f32 %v9520_v3, %v2169_v53  ;;  %v2171_v57 = vadd.f32 %v2170_v45, %v9524_v14 }
0x1799   :  { %v2172_v41 = vpop.f32.mrf.mxu0 }
0x179a   :  { %v7622_v1 = vmul.f32 -1.442695, %v2183_v50  ;;  %v2184_v7 = vadd.f32 %v2180_v62, %v2171_v57 }
0x179b   :  { %v2173_v60 = vpop.f32.mrf.mxu0 }
0x179c   :  { %8315 = vpow2.f32 %v7622_v1  ;;  %v7623_v32 = vmul.f32 -1.442695, %v2184_v7 }
0x179d   :  { %8317 = vtanh.f32 %v2184_v7 }
0x17a9   :  { %v8316_v5 = vpop.eup %8315 }
0x17aa   :  { %v2191_v8 = vadd.f32 1.0, %v8316_v5  ;;  %v8318_v55 = vpop.eup %8317  ;;  %v2435_v5 = vrot.slane %v9450_v51, 1 }
0x17ac   :  { %8319 = vrcp.f32 %v2191_v8 }
0x17ad   :  { %8321 = vpow2.f32 %v7623_v32 }
0x17b9   :  { %v8320_v37 = vpop.eup %8319 }
0x17ba   :  { %v2199_v61 = vmul.f32 %v8320_v37, %v8318_v55  ;;  %v8322_v3 = vpop.eup %8321  ;;  %v2198_v33 = vmul.f32 %v8320_v37, %v2075_v40  ;;  %v2436_v37 = vsel %vm352_vm1, %v9569_v43, %v2435_v5 }
0x17bb   :  { %v2192_v14 = vadd.f32 1.0, %v8322_v3 }
0x17bc   :  { %2201 = vrot.lane.b32.xlu1 %v2199_v61, %s8676_s3 }
0x17bd   :  { %8323 = vrcp.f32 %v2192_v14 }
0x17ca   :  { %v8324_v13 = vpop.eup %8323 }
0x182e   :  { %v2202_v54 = vpop.permute.xlu1 %2201 }
0x182f   :  { %v2204_v21 = vadd.f32 %v2202_v54, %v2198_v33 }
0x1831   :  { %8325 = vtanh.f32 %v2204_v21 }
0x183e   :  { %v8326_v35 = vpop.eup %8325 }
0x183f   :  { %v9667_v26 = vmul.f32 %v8326_v35, %v8324_v13 }
0x1841   :  { %v2248_v17 = vpack.c.bf16 %v9667_v26, %v9667_v26 }
0x1843   :  { %2250 = vrot.lane.b32.xlu0 %v2248_v17, %s8676_s3 }
0x18b5   :  { %v2251_v15 = vpop.permute.xlu0 %2250 }
0x18b6   :  { %7624 = vmatmul.mubr.msk.bf16.vlgmr.msra.gmra.mxu1 %vm358_vm2, %v2251_v15 }
0x18b7   :  { %2528 = vmatpush1.bf16.msra.mxu1 %v9379_v56  ;;  %2551 = vmatprep.mubr.bf16.mxu1 %v8675_v2 }
0x18b8   :  { %2529 = vmatprep.subr.bf16.mxu1 %v9384_v25 }
0x18bb   :  { %2530 = vmatpush1.bf16.msra.mxu1 %v9392_v9 }
0x18bc   :  { %2531 = vmatprep.subr.bf16.mxu1 %v9399_v10  ;;  %v2309_v10 = vsel %vm352_vm1, %v2308_v18, %v2307_v59 }
0x18bf   :  { %2532 = vmatpush1.bf16.msra.mxu1 %v9408_v11 }
0x18c0   :  { %2533 = vmatprep.subr.bf16.mxu1 %v9414_v12 }
0x18c3   :  { %2534 = vmatpush1.bf16.msra.mxu1 %v9422_v34 }
0x1976   :  { %v2297_v23 = vpop.f32.mrf.mxu1 }
0x1977   :  { %v2298_v28 = vadd.f32 %v2297_v23, %v9533_v39 }
0x1978   :  { %v2299_v56 = vpop.f32.mrf.mxu1 }
0x1979   :  { %v2312_v25 = vadd.f32 %v9536_v47, %v2298_v28  ;;  %v2300_v9 = vadd.f32 %v2299_v56, %v9540_v44  ;;  %v9703_v28 = vrot.slane %v9580_v4, %v9180_v27  ;;  %v9717_v4 = vrot.slane %v9624_v48, %v9180_v27 }
0x197a   :  { %v2301_v40 = vpop.f32.mrf.mxu1  ;;  %v9733_v48 = vrot.slane %v9667_v26, %v9180_v27 }
0x197b   :  { %v7625_v11 = vmul.f32 -1.442695, %v2312_v25  ;;  %v2313_v30 = vadd.f32 %v2309_v10, %v2300_v9  ;;  %v1708_v9 = vrot.slane %v9703_v28, %v9180_v27  ;;  %v9709_v10 = vrot.slane %v9602_v0, %v9180_v27 }
0x197c   :  { %v2302_v12 = vpop.f32.mrf.mxu1  ;;  %v9725_v0 = vrot.slane %v9646_v38, %v9180_v27 }
0x197d   :  { %8327 = vpow2.f32 %v7625_v11  ;;  %v7626_v29 = vmul.f32 -1.442695, %v2313_v30  ;;  %v1719_v40 = vrot.slane %v1708_v9, %v8914_v20  ;;  %v1835_v11 = vrot.slane %v9709_v10, %v9180_v27 }
0x197e   :  { %8329 = vtanh.f32 %v2313_v30  ;;  %v1964_v12 = vrot.slane %v9717_v4, %v9180_v27 }
0x197f   :  { %v1846_v30 = vrot.slane %v1835_v11, %v8914_v20  ;;  %v8120_v11 = vld [vmem:[%s11310_s10 + $0x30] ss:$8 sps:$4 sm:$0xff]  }
0x198a   :  { %v8328_v34 = vpop.eup %8327 }
0x198b   :  { %v2320_v42 = vadd.f32 1.0, %v8328_v34  ;;  %v8330_v58 = vpop.eup %8329  ;;  %v1975_v34 = vrot.slane %v1964_v12, %v8914_v20 }
0x198d   :  { %8331 = vrcp.f32 %v2320_v42  ;;  %v2093_v42 = vrot.slane %v9725_v0, %v9180_v27 }
0x198e   :  { %8333 = vpow2.f32 %v7626_v29 }
0x199a   :  { %v8332_v39 = vpop.eup %8331 }
0x199b   :  { %v2328_v31 = vmul.f32 %v8332_v39, %v8330_v58  ;;  %v8334_v47 = vpop.eup %8333  ;;  %v2327_v49 = vmul.f32 %v8332_v39, %v2204_v21  ;;  %v2104_v58 = vrot.slane %v2093_v42, %v8914_v20  ;;  %v2222_v39 = vrot.slane %v9733_v48, %v9180_v27  ;;  %v8123_v42 = vld [vmem:[%s11353_s27 + $0x20] ss:$8 sps:$4 sm:$0xff]  }
0x199c   :  { %v2321_v44 = vadd.f32 1.0, %v8334_v47 }
0x199d   :  { %2330 = vrot.lane.b32.xlu1 %v2328_v31, %s8676_s3  ;;  %v2233_v31 = vrot.slane %v2222_v39, %v8914_v20 }
0x199e   :  { %8335 = vrcp.f32 %v2321_v44 }
0x19ab   :  { %v8336_v52 = vpop.eup %8335 }
0x1a0f   :  { %v2331_v53 = vpop.permute.xlu1 %2330 }
0x1a10   :  { %v2333_v45 = vadd.f32 %v2331_v53, %v2327_v49 }
0x1a12   :  { %8337 = vtanh.f32 %v2333_v45 }
0x1a1f   :  { %v8338_v50 = vpop.eup %8337 }
0x1a20   :  { %v2335_v57 = vmul.f32 %v8338_v50, %v8336_v52 }
0x1a22   :  { %v2377_v62 = vpack.c.bf16 %v2335_v57, %v2335_v57  ;;  %v9740_v38 = vrot.slane %v2335_v57, %v9180_v27 }
0x1a24   :  { %2379 = vrot.lane.b32.xlu0 %v2377_v62, %s8676_s3  ;;  %v2351_v29 = vrot.slane %v9740_v38, %v9180_v27  ;;  %v2344_v9 = vcombine.high %v9740_v38, %v9740_v38 }
0x1a26   :  { %v2362_v47 = vrot.slane %v2351_v29, %v8914_v20 }
0x1a96   :  { %v2380_v41 = vpop.permute.xlu0 %2379 }
0x1a97   :  { %7627 = vmatmul.mubr.msk.bf16.vlgmr.msra.gmra.mxu0 %vm358_vm2, %v2380_v41 }
0x1a98   :  { %2709 = vmatprep.mubr.bf16.mxu0 %v8675_v2 }
0x1b57   :  { %v2426_v1 = vpop.f32.mrf.mxu0 }
0x1b58   :  { %v2427_v7 = vadd.f32 %v2426_v1, %v9551_v6 }
0x1b59   :  { %v2428_v60 = vpop.f32.mrf.mxu0 }
0x1b5a   :  { %v2439_v8 = vadd.f32 %v9546_v46, %v2427_v7  ;;  %v2429_v55 = vadd.f32 %v2428_v60, %v9557_v16  ;;  %v2562_v60 = vrot.slane %v9569_v43, 7 }
0x1b5b   :  { %v2430_v61 = vpop.f32.mrf.mxu0 }
0x1b5c   :  { %v7628_v32 = vmul.f32 -1.442695, %v2439_v8  ;;  %v2440_v3 = vadd.f32 %v2436_v37, %v2429_v55  ;;  %v2563_v61 = vsel %vm352_vm1, %v2562_v60, %v9450_v51  ;;  %v1828_v51 = vcombine.high %v9709_v10, %v9709_v10  ;;  %v8117_v10 = vld [vmem:[%s11353_s27 + $0x30] ss:$8 sps:$4 sm:$0xff]  }
0x1b5d   :  { %v2431_v14 = vpop.f32.mrf.mxu0 }
0x1b5e   :  { %8339 = vpow2.f32 %v7628_v32  ;;  %v7629_v46 = vmul.f32 -1.442695, %v2440_v3 }
0x1b5f   :  { %8341 = vtanh.f32 %v2440_v3 }
0x1b6b   :  { %v8340_v33 = vpop.eup %8339 }
0x1b6c   :  { %v2447_v54 = vadd.f32 1.0, %v8340_v33  ;;  %v8342_v6 = vpop.eup %8341 }
0x1b6e   :  { %8343 = vrcp.f32 %v2447_v54 }
0x1b6f   :  { %8345 = vpow2.f32 %v7629_v46  ;;  %v1842_v46 = vrot.slane %v1828_v51, %v9180_v27 }
0x1b7b   :  { %v8344_v21 = vpop.eup %8343 }
0x1b7c   :  { %v2455_v13 = vmul.f32 %v8344_v21, %v8342_v6  ;;  %v8346_v16 = vpop.eup %8345  ;;  %v2454_v17 = vmul.f32 %v8344_v21, %v2333_v45 }
0x1b7d   :  { %v2448_v35 = vadd.f32 1.0, %v8346_v16  ;;  %v1957_v16 = vcombine.high %v9717_v4, %v9717_v4  ;;  %v8122_v4 = vld [vmem:[%s11310_s10 + $0x34] ss:$8 sps:$4 sm:$0xff]  }
0x1b7e   :  { %2457 = vrot.lane.b32.xlu1 %v2455_v13, %s8676_s3  ;;  %2783 = vmatprep.subr.bf16.mxu1 %v8122_v4 }
0x1b7f   :  { %8347 = vrcp.f32 %v2448_v35  ;;  %v1850_v35 = vrot.slane %v1842_v46, %v8914_v20 }
0x1b8c   :  { %v8348_v18 = vpop.eup %8347 }
0x1bf0   :  { %v2458_v15 = vpop.permute.xlu1 %2457 }
0x1bf1   :  { %v9698_v23 = vadd.f32 %v2458_v15, %v2454_v17  ;;  %v1971_v17 = vrot.slane %v1957_v16, %v9180_v27  ;;  %v2086_v15 = vcombine.high %v9725_v0, %v9725_v0  ;;  %v2358_v0 = vrot.slane %v2344_v9, %v9180_v27  ;;  %v9898_v16 = vld [vmem:[%s11311_s11 + $0x30] ss:$8 sps:$4 sm:$0xff]  }
0x1bf3   :  { %8349 = vtanh.f32 %v9698_v23 }
0x1c00   :  { %v8350_v56 = vpop.eup %8349 }
0x1c01   :  { %v2462_v59 = vmul.f32 %v8350_v56, %v8348_v18  ;;  %v1979_v18 = vrot.slane %v1971_v17, %v8914_v20  ;;  %v2215_v56 = vcombine.high %v9733_v48, %v9733_v48  ;;  %v2366_v48 = vrot.slane %v2358_v0, %v8914_v20  ;;  %v9903_v17 = vld [vmem:[%s11311_s11 + $0x24] ss:$8 sps:$4 sm:$0xff]  }
0x1c03   :  { %v2504_v25 = vpack.c.bf16 %v2462_v59, %v2462_v59  ;;  %v9747_v26 = vrot.slane %v2462_v59, %v9180_v27 }
0x1c05   :  { %2506 = vrot.lane.b32.xlu0 %v2504_v25, %s8676_s3  ;;  %v2478_v44 = vrot.slane %v9747_v26, %v9180_v27  ;;  %v2229_v25 = vrot.slane %v2215_v56, %v9180_v27  ;;  %v9933_v56 = vld [vmem:[%s11311_s11 + $0x4] ss:$8 sps:$4 sm:$0xff]  }
0x1c07   :  { %v2489_v49 = vrot.slane %v2478_v44, %v8914_v20  ;;  %v2237_v12 = vrot.slane %v2229_v25, %v8914_v20  ;;  %v144_v25 = vld [vmem:[%s11312_s12] sm:$0x3]  ;;  %s8680_s12 = smov 96  }
0x1c08   :  { %v2724_v9 = vrot.slane %v144_v25, %v8914_v20 }
0x1c09   :  { %1724 = vrot.lane.b32.xlu0 %v1719_v40, %s8676_s3  ;;  %v8119_v40 = vld [vmem:[%s11353_s27 + $0x34] ss:$8 sps:$4 sm:$0xff]  }
0x1c0a   :  { %2685 = vmatprep.subr.bf16.mxu0 %v8119_v40 }
0x1c0b   :  { %2686 = vmatpush1.bf16.msra.mxu0 %v8117_v10  ;;  %v2728_v10 = vrot.slane %v144_v25, %v8920_v22 }
0x1c0d   :  { %1851 = vrot.lane.b32.xlu0 %v1846_v30, %s8676_s3  ;;  %v8125_v30 = vld [vmem:[%s11353_s27 + $0x24] ss:$8 sps:$4 sm:$0xff]  }
0x1c0e   :  { %2687 = vmatprep.subr.bf16.mxu0 %v8125_v30 }
0x1c0f   :  { %2688 = vmatpush1.bf16.msra.mxu0 %v8123_v42 }
0x1c11   :  { %1980 = vrot.lane.b32.xlu0 %v1975_v34, %s8676_s3  ;;  %v2471_v34 = vcombine.high %v9747_v26, %v9747_v26 }
0x1c15   :  { %2109 = vrot.lane.b32.xlu0 %v2104_v58, %s8676_s3  ;;  %v2485_v58 = vrot.slane %v2471_v34, %v9180_v27 }
0x1c17   :  { %v2493_v39 = vrot.slane %v2485_v58, %v8914_v20 }
0x1c19   :  { %2238 = vrot.lane.b32.xlu0 %v2233_v31, %s8676_s3 }
0x1c1d   :  { %2367 = vrot.lane.b32.xlu0 %v2362_v47, %s8676_s3 }
0x1c21   :  { %2494 = vrot.lane.b32.xlu0 %v2489_v49, %s8676_s3 }
0x1c77   :  { %v2507_v53 = vpop.permute.xlu0 %2506 }
0x1c78   :  { %7630 = vmatmul.mubr.msk.bf16.vlgmr.msra.gmra.mxu1 %vm358_vm2, %v2507_v53 }
0x1c79   :  { %2807 = vmatprep.mubr.bf16.mxu1 %v8675_v2  ;;  %2784 = vmatpush1.bf16.msra.mxu1 %v8120_v11 }
0x1c7b   :  { %v1725_v45 = vpop.permute.xlu0 %1724 }
0x1c7c   :  { %1730 = vst.msk [vmem:[#allocation2] sm:$0x1] %vm476_vm3, %v1725_v45 }
0x1c7d   :  { %1732 = vst.msk [vmem:[#allocation2 + $0x7] sm:$0x1] %vm479_vm4, %v1725_v45 }
0x1c7f   :  { %v1852_v52 = vpop.permute.xlu0 %1851 }
0x1c80   :  { %1857 = vst.msk [vmem:[#allocation2 + $0x1] sm:$0x1] %vm476_vm3, %v1852_v52 }
0x1c81   :  { %1859 = vst.msk [vmem:[#allocation2 + $0x6] sm:$0x1] %vm479_vm4, %v1852_v52 }
0x1c83   :  { %v1981_v50 = vpop.permute.xlu0 %1980 }
0x1c84   :  { %1986 = vst.msk [vmem:[#allocation2 + $0x2] sm:$0x1] %vm476_vm3, %v1981_v50 }
0x1c85   :  { %1988 = vst.msk [vmem:[#allocation2 + $0x5] sm:$0x1] %vm479_vm4, %v1981_v50 }
0x1c87   :  { %v2110_v57 = vpop.permute.xlu0 %2109 }
0x1c88   :  { %2115 = vst.msk [vmem:[#allocation2 + $0x3] sm:$0x1] %vm476_vm3, %v2110_v57 }
0x1c89   :  { %2117 = vst.msk [vmem:[#allocation2 + $0x4] sm:$0x1] %vm479_vm4, %v2110_v57 }
0x1c8b   :  { %v2239_v62 = vpop.permute.xlu0 %2238 }
0x1c8c   :  { %2244 = vst.msk [vmem:[#allocation2 + $0x4] sm:$0x1] %vm476_vm3, %v2239_v62 }
0x1c8d   :  { %2246 = vst.msk [vmem:[#allocation2 + $0x3] sm:$0x1] %vm479_vm4, %v2239_v62 }
0x1c8f   :  { %v2368_v41 = vpop.permute.xlu0 %2367 }
0x1c90   :  { %2373 = vst.msk [vmem:[#allocation2 + $0x5] sm:$0x1] %vm476_vm3, %v2368_v41 }
0x1c91   :  { %2375 = vst.msk [vmem:[#allocation2 + $0x2] sm:$0x1] %vm479_vm4, %v2368_v41  ;;  %v8126_v41 = vld [vmem:[%s11310_s10 + $0x20] ss:$8 sps:$4 sm:$0xff]  }
0x1c93   :  { %v2495_v1 = vpop.permute.xlu0 %2494 }
0x1c94   :  { %2500 = vst.msk [vmem:[#allocation2 + $0x6] sm:$0x1] %vm476_vm3, %v2495_v1 }
0x1c95   :  { %2502 = vst.msk [vmem:[#allocation2 + $0x1] sm:$0x1] %vm479_vm4, %v2495_v1  ;;  %v8128_v1 = vld [vmem:[%s11310_s10 + $0x24] ss:$8 sps:$4 sm:$0xff]  }
0x1c96   :  { %2785 = vmatprep.subr.bf16.mxu1 %v8128_v1 }
0x1c97   :  { %2786 = vmatpush1.bf16.msra.mxu1 %v8126_v41 }
0x1d38   :  { %v2553_v7 = vpop.f32.mrf.mxu1 }
0x1d39   :  { %v2554_v5 = vadd.f32 %v2553_v7, %v9560_v63  ;;  %v1701_v63 = vcombine.high %v9703_v28, %v9703_v28  ;;  %v2100_v28 = vrot.slane %v2086_v15, %v9180_v27  ;;  %v9911_v15 = vld [vmem:[%s11311_s11 + $0x20] ss:$8 sps:$4 sm:$0xff]  }
0x1d3a   :  { %v2555_v8 = vpop.f32.mrf.mxu1 }
0x1d3b   :  { %v2566_v55 = vadd.f32 %v9564_v24, %v2554_v5  ;;  %v2556_v37 = vadd.f32 %v2555_v8, %v9572_v36  ;;  %v1715_v36 = vrot.slane %v1701_v63, %v9180_v27  ;;  %v2108_v59 = vrot.slane %v2100_v28, %v8914_v20  ;;  %v8129_v8 = vld [vmem:[%s11353_s27 + $0x10] ss:$8 sps:$4 sm:$0xff]  }
0x1d3c   :  { %v2557_v32 = vpop.f32.mrf.mxu1  ;;  %v9927_v28 = vld [vmem:[%s11311_s11 + $0x10] ss:$8 sps:$4 sm:$0xff]  }
0x1d3d   :  { %v7631_v3 = vmul.f32 -1.442695, %v2566_v55  ;;  %v2567_v14 = vadd.f32 %v2563_v61, %v2556_v37  ;;  %v1723_v13 = vrot.slane %v1715_v36, %v8914_v20  ;;  %v8131_v55 = vld [vmem:[%s11353_s27 + $0x14] ss:$8 sps:$4 sm:$0xff]   ;;  %v8132_v37 = vld [vmem:[%s11310_s10 + $0x10] ss:$8 sps:$4 sm:$0xff]  }
0x1d3e   :  { %v2558_v33 = vpop.f32.mrf.mxu1  ;;  %v8134_v61 = vld [vmem:[%s11310_s10 + $0x14] ss:$8 sps:$4 sm:$0xff]   ;;  %v8137_v32 = vld [vmem:[%s11353_s27 + $0x4] ss:$8 sps:$4 sm:$0xff]   ;;  %2689 = vmatprep.subr.bf16.mxu0 %v8131_v55 }
0x1d3f   :  { %8351 = vpow2.f32 %v7631_v3  ;;  %v7632_v38 = vmul.f32 -1.442695, %v2567_v14  ;;  %v8140_v33 = vld [vmem:[%s11310_s10 + $0x4] ss:$8 sps:$4 sm:$0xff]   ;;  %2690 = vmatpush1.bf16.msra.mxu0 %v8129_v8  ;;  %2787 = vmatprep.subr.bf16.mxu1 %v8134_v61 }
0x1d40   :  { %8353 = vtanh.f32 %v2567_v14  ;;  %2691 = vmatprep.subr.bf16.mxu0 %v8137_v32  ;;  %2788 = vmatpush1.bf16.msra.mxu1 %v8132_v37 }
0x1d41   :  { %2789 = vmatprep.subr.bf16.mxu1 %v8140_v33 }
0x1d4c   :  { %v8352_v54 = vpop.eup %8351 }
0x1d4d   :  { %v2574_v6 = vadd.f32 1.0, %v8352_v54  ;;  %v8354_v43 = vpop.eup %8353 }
0x1d4f   :  { %8355 = vrcp.f32 %v2574_v6  ;;  %v8135_v6 = vld [vmem:[%s11353_s27] ss:$8 sps:$4 sm:$0xff]  }
0x1d50   :  { %8357 = vpow2.f32 %v7632_v38  ;;  %2692 = vmatpush1.bf16.msra.mxu0 %v8135_v6 }
0x1d5c   :  { %v8356_v21 = vpop.eup %8355 }
0x1d5d   :  { %v2582_v24 = vmul.f32 %v8356_v21, %v8354_v43  ;;  %v8358_v31 = vpop.eup %8357  ;;  %v2581_v26 = vmul.f32 %v8356_v21, %v9698_v23  ;;  %v9881_v43 = vld [vmem:[%s11311_s11 + $0x34] ss:$8 sps:$4 sm:$0xff]   ;;  %v8138_v21 = vld [vmem:[%s11310_s10] ss:$8 sps:$4 sm:$0xff]  }
0x1d5e   :  { %v2575_v29 = vadd.f32 1.0, %v8358_v31  ;;  %2876 = vmatprep.subr.bf16.mxu0 %v9881_v43  ;;  %2790 = vmatpush1.bf16.msra.mxu1 %v8138_v21 }
0x1d5f   :  { %2584 = vrot.lane.b32.xlu1 %v2582_v24, %s8676_s3  ;;  %3007 = vmatprep.subr.bf16.mxu1 %v9881_v43 }
0x1d60   :  { %8359 = vrcp.f32 %v2575_v29 }
0x1d63   :  { %1726 = vrot.lane.b32.xlu1 %v1723_v13, %s8676_s3 }
0x1d67   :  { %1853 = vrot.lane.b32.xlu1 %v1850_v35, %s8676_s3 }
0x1d6b   :  { %1982 = vrot.lane.b32.xlu1 %v1979_v18, %s8676_s3  ;;  %v9918_v18 = vld [vmem:[%s11311_s11 + $0x14] ss:$8 sps:$4 sm:$0xff]  }
0x1d6d   :  { %v8360_v23 = vpop.eup %8359 }
0x1d6f   :  { %2111 = vrot.lane.b32.xlu1 %v2108_v59, %s8676_s3  ;;  %v9941_v59 = vld [vmem:[%s11311_s11] ss:$8 sps:$4 sm:$0xff]  }
0x1d73   :  { %2240 = vrot.lane.b32.xlu1 %v2237_v12, %s8676_s3 }
0x1d77   :  { %2369 = vrot.lane.b32.xlu1 %v2366_v48, %s8676_s3 }
0x1d7b   :  { %2496 = vrot.lane.b32.xlu1 %v2493_v39, %s8676_s3 }
0x1dd1   :  { %v2585_v47 = vpop.permute.xlu1 %2584 }
0x1dd2   :  { %v2587_v44 = vadd.f32 %v2585_v47, %v2581_v26 }
0x1dd4   :  { %8361 = vtanh.f32 %v2587_v44 }
0x1dd5   :  { %v1727_v49 = vpop.permute.xlu1 %1726 }
0x1dd6   :  { %1731 = vst.msk [vmem:[#allocation2 + $0x8] sm:$0x1] %vm476_vm3, %v1727_v49 }
0x1dd7   :  { %1733 = vst.msk [vmem:[#allocation2 + $0xf] sm:$0x1] %vm479_vm4, %v1727_v49 }
0x1dd9   :  { %v1854_v53 = vpop.permute.xlu1 %1853 }
0x1dda   :  { %1858 = vst.msk [vmem:[#allocation2 + $0x9] sm:$0x1] %vm476_vm3, %v1854_v53 }
0x1ddb   :  { %1860 = vst.msk [vmem:[#allocation2 + $0xe] sm:$0x1] %vm479_vm4, %v1854_v53 }
0x1ddd   :  { %v1983_v45 = vpop.permute.xlu1 %1982 }
0x1dde   :  { %1987 = vst.msk [vmem:[#allocation2 + $0xa] sm:$0x1] %vm476_vm3, %v1983_v45 }
0x1ddf   :  { %1989 = vst.msk [vmem:[#allocation2 + $0xd] sm:$0x1] %vm479_vm4, %v1983_v45 }
0x1de1   :  { %v8362_v52 = vpop.eup %8361  ;;  %v2112_v50 = vpop.permute.xlu1 %2111 }
0x1de2   :  { %2116 = vst.msk [vmem:[#allocation2 + $0xb] sm:$0x1] %vm476_vm3, %v2112_v50  ;;  %v2589_v57 = vmul.f32 %v8362_v52, %v8360_v23 }
0x1de3   :  { %2118 = vst.msk [vmem:[#allocation2 + $0xc] sm:$0x1] %vm479_vm4, %v2112_v50 }
0x1de4   :  { %v2597_v62 = vrot.slane %v2589_v57, %v9180_v27 }
0x1de5   :  { %v2241_v7 = vpop.permute.xlu1 %2240 }
0x1de6   :  { %2245 = vst.msk [vmem:[#allocation2 + $0xc] sm:$0x1] %vm476_vm3, %v2241_v7  ;;  %v2605_v60 = vrot.slane %v2597_v62, %v9180_v27  ;;  %v2598_v5 = vcombine.high %v2597_v62, %v2597_v62 }
0x1de7   :  { %2247 = vst.msk [vmem:[#allocation2 + $0xb] sm:$0x1] %vm479_vm4, %v2241_v7 }
0x1de8   :  { %v2616_v3 = vrot.slane %v2605_v60, %v8914_v20  ;;  %v2612_v14 = vrot.slane %v2598_v5, %v9180_v27 }
0x1de9   :  { %v2370_v54 = vpop.permute.xlu1 %2369 }
0x1dea   :  { %2374 = vst.msk [vmem:[#allocation2 + $0xd] sm:$0x1] %vm476_vm3, %v2370_v54  ;;  %2621 = vrot.lane.b32.xlu0 %v2616_v3, %s8676_s3  ;;  %v2620_v63 = vrot.slane %v2612_v14, %v8914_v20 }
0x1deb   :  { %2376 = vst.msk [vmem:[#allocation2 + $0xa] sm:$0x1] %vm479_vm4, %v2370_v54 }
0x1dec   :  { %2623 = vrot.lane.b32.xlu1 %v2620_v63, %s8676_s3 }
0x1ded   :  { %v2497_v24 = vpop.permute.xlu1 %2496 }
0x1dee   :  { %2501 = vst.msk [vmem:[#allocation2 + $0xe] sm:$0x1] %vm476_vm3, %v2497_v24 }
0x1def   :  { %2503 = vst.msk [vmem:[#allocation2 + $0x9] sm:$0x1] %vm479_vm4, %v2497_v24 }
0x1e5c   :  { %v2622_v36 = vpop.permute.xlu0 %2621 }
0x1e5d   :  { %2627 = vst.msk [vmem:[#allocation2 + $0x7] sm:$0x1] %vm476_vm3, %v2622_v36 }
0x1e5e   :  { %2629 = vst.msk [vmem:[#allocation2] sm:$0x1] %vm479_vm4, %v2622_v36  ;;  %v2624_v51 = vpop.permute.xlu1 %2623 }
0x1e5f   :  { %2628 = vst.msk [vmem:[#allocation2 + $0xf] sm:$0x1] %vm476_vm3, %v2624_v51 }
0x1e60   :  { %2630 = vst.msk [vmem:[#allocation2 + $0x8] sm:$0x1] %vm479_vm4, %v2624_v51 }
0x1e65   :  { %v2631_v13 = vld [vmem:[#allocation2] sm:$0xff] }
0x1e67   :  { %v2632_v46 = vld [vmem:[#allocation2 + $0x8] sm:$0xff] }
0x1e68   :  { %v2633_v35 = vpack.c.bf16 %v2632_v46, %v2631_v13 }
0x1e6a   :  { %7641 = vmatmul.mubr.msk.bf16.vlgmr.msra.gmra.mxu0 %vm358_vm2, %v2633_v35  ;;  %7650 = vmatmul.mubr.msk.bf16.vlgmr.msra.gmra.mxu1 %vm358_vm2, %v2633_v35 }
0x1e6b   :  { %2877 = vmatpush1.bf16.msra.mxu0 %v9898_v16  ;;  %2900 = vmatprep.mubr.bf16.mxu0 %v8675_v2 }
0x1e6c   :  { %2878 = vmatprep.subr.bf16.mxu0 %v9903_v17  ;;  %3008 = vmatpush1.bf16.msra.mxu1 %v9898_v16 }
0x1e6d   :  { %3009 = vmatprep.subr.bf16.mxu1 %v9903_v17  ;;  %3031 = vmatprep.mubr.bf16.mxu1 %v8675_v2 }
0x1e6f   :  { %2879 = vmatpush1.bf16.msra.mxu0 %v9911_v15 }
0x1e70   :  { %2880 = vmatprep.subr.bf16.mxu0 %v9918_v18  ;;  %3010 = vmatpush1.bf16.msra.mxu1 %v9911_v15 }
0x1e71   :  { %3011 = vmatprep.subr.bf16.mxu1 %v9918_v18 }
0x1e73   :  { %2881 = vmatpush1.bf16.msra.mxu0 %v9927_v28 }
0x1e74   :  { %2882 = vmatprep.subr.bf16.mxu0 %v9933_v56  ;;  %3012 = vmatpush1.bf16.msra.mxu1 %v9927_v28 }
0x1e75   :  { %3013 = vmatprep.subr.bf16.mxu1 %v9933_v56 }
0x1e77   :  { %2883 = vmatpush1.bf16.msra.mxu0 %v9941_v59 }
0x1e78   :  { %3014 = vmatpush1.bf16.msra.mxu1 %v9941_v59  ;;  %3136 = vmatprep.subr.bf16.mxu0 %v9881_v43 }
0x1e79   :  { %3265 = vmatprep.subr.bf16.mxu1 %v9881_v43 }
0x1e7a   :  { %2901 = vmatmul.mubr.bf16.vlgmr.msra.gmra.mxu0 %v8675_v2 }
0x1e7b   :  { %3137 = vmatpush1.bf16.msra.mxu0 %v9898_v16  ;;  %3160 = vmatprep.mubr.bf16.mxu0 %v8675_v2 }
0x1e7c   :  { %3138 = vmatprep.subr.bf16.mxu0 %v9903_v17 }
0x1e7f   :  { %3139 = vmatpush1.bf16.msra.mxu0 %v9911_v15 }
0x1e80   :  { %3140 = vmatprep.subr.bf16.mxu0 %v9918_v18 }
0x1e83   :  { %3141 = vmatpush1.bf16.msra.mxu0 %v9927_v28 }
0x1e84   :  { %3142 = vmatprep.subr.bf16.mxu0 %v9933_v56 }
0x1e87   :  { %3143 = vmatpush1.bf16.msra.mxu0 %v9941_v59 }
0x1e88   :  { %3394 = vmatprep.subr.bf16.mxu0 %v9881_v43 }
0x1f2a   :  { %v2711_v40 = vpop.f32.mrf.mxu0  ;;  %v9965_v11 = vpop.f32.mrf.mxu1 }
0x1f2b   :  { %v9967_v4 = vadd.f32 %v2724_v9, %v2711_v40  ;;  %v3040_v31 = vrot.slane %v9965_v11, 6  ;;  %v3169_v44 = vrot.slane %v9965_v11, 5  ;;  %v2913_v50 = vrot.slane %v9965_v11, 7 }
0x1f2c   :  { %v2713_v30 = vpop.f32.mrf.mxu0  ;;  %v9969_v12 = vpop.f32.mrf.mxu1  ;;  %v3298_v62 = vrot.slane %v9965_v11, 4  ;;  %v3427_v14 = vrot.slane %v9965_v11, 3  ;;  %v3556_v25 = vrot.slane %v9965_v11, 2 }
0x1f2d   :  { %v9971_v0 = vadd.f32 %v2728_v10, %v2713_v30  ;;  %v2990_v38 = vrot.slane %v9967_v4, 1  ;;  %v3117_v23 = vrot.slane %v9967_v4, 2  ;;  %v3246_v8 = vrot.slane %v9967_v4, 3 }
0x1f2e   :  { %v2715_v34 = vpop.f32.mrf.mxu0  ;;  %v9973_v42 = vpop.f32.mrf.mxu1  ;;  %v3375_v54 = vrot.slane %v9967_v4, 4  ;;  %v3504_v40 = vrot.slane %v9967_v4, 5 }
0x1f2f   :  { %v9975_v48 = vadd.f32 %v2724_v9, %v2715_v34  ;;  %v3041_v58 = vrot.slane %v9973_v42, 5  ;;  %v3170_v29 = vrot.slane %v9973_v42, 4  ;;  %v2992_v47 = vrot.slane %v9971_v0, 1 }
0x1f30   :  { %v2717_v39 = vpop.f32.mrf.mxu0  ;;  %v3299_v49 = vrot.slane %v9973_v42, 3  ;;  %v3120_v7 = vrot.slane %v9971_v0, 2  ;;  %v3249_v32 = vrot.slane %v9971_v0, 3  ;;  %v3428_v63 = vrot.slane %v9973_v42, 2 }
0x1f31   :  { %v9981_v26 = vadd.f32 %v2728_v10, %v2717_v39  ;;  %v9988_v53 = vsel %vm352_vm1, %v9975_v48, %v2990_v38  ;;  %v9991_v45 = vsel %vm352_vm1, %v3041_v58, %v3040_v31  ;;  %v3118_v52 = vrot.slane %v9975_v48, 1 }
0x1f32   :  { %v10005_v1 = vsel %vm352_vm1, %v3170_v29, %v3169_v44  ;;  %v2862_v5 = vrot.slane %v9975_v48, 7  ;;  %v3247_v55 = vrot.slane %v9975_v48, 2  ;;  %v10013_v37 = vsel %vm352_vm1, %v3299_v49, %v3298_v62 }
0x1f33   :  { %v9998_v57 = vsel %vm352_vm1, %v9981_v26, %v2992_v47  ;;  %v10002_v41 = vsel %vm352_vm1, %v3118_v52, %v3117_v23  ;;  %v3121_v60 = vrot.slane %v9981_v26, 1  ;;  %v3250_v3 = vrot.slane %v9981_v26, 2 }
0x1f34   :  { %v10022_v33 = vsel %vm352_vm1, %v3247_v55, %v3246_v8  ;;  %v3376_v6 = vrot.slane %v9975_v48, 3  ;;  %v2914_v21 = vrot.slane %v9973_v42, 6  ;;  %v3378_v36 = vrot.slane %v9971_v0, 4 }
0x1f35   :  { %v10016_v61 = vsel %vm352_vm1, %v3121_v60, %v3120_v7  ;;  %v10029_v24 = vsel %vm352_vm1, %v3250_v3, %v3249_v32  ;;  %v3379_v51 = vrot.slane %v9981_v26, 3  ;;  %v2863_v13 = vsel %vm352_vm1, %v2862_v5, %v9967_v4 }
0x1f36   :  { %v10036_v46 = vsel %vm352_vm1, %v3376_v6, %v3375_v54  ;;  %v10039_v35 = vsel %vm352_vm1, %v3428_v63, %v3427_v14  ;;  %v3505_v30 = vrot.slane %v9975_v48, 4  ;;  %v3557_v34 = vrot.slane %v9973_v42, 1 }
0x1f37   :  { %v10043_v10 = vsel %vm352_vm1, %v3379_v51, %v3378_v36  ;;  %v3507_v39 = vrot.slane %v9971_v0, 5  ;;  %v3508_v38 = vrot.slane %v9981_v26, 4  ;;  %v2915_v31 = vsel %vm352_vm1, %v2914_v21, %v2913_v50 }
0x1f38   :  { %v10052_v47 = vsel %vm352_vm1, %v3505_v30, %v3504_v40  ;;  %v10055_v44 = vsel %vm352_vm1, %v3557_v34, %v3556_v25  ;;  %v3685_v49 = vrot.slane %v9965_v11, 1  ;;  %v3633_v7 = vrot.slane %v9967_v4, 6 }
0x1f39   :  { %v10059_v52 = vsel %vm352_vm1, %v3508_v38, %v3507_v39  ;;  %v3634_v60 = vrot.slane %v9975_v48, 5  ;;  %v3636_v8 = vrot.slane %v9971_v0, 6  ;;  %v3637_v55 = vrot.slane %v9981_v26, 5 }
0x1f3a   :  { %v2902_v9 = vpop.f32.mrf.mxu0  ;;  %v10065_v50 = vsel %vm352_vm1, %v9973_v42, %v3685_v49  ;;  %v3760_v14 = vrot.slane %v9967_v4, 7  ;;  %v3761_v54 = vrot.slane %v9975_v48, 6  ;;  %v3812_v6 = vrot.slane %v9973_v42, 7  ;;  %v10088_v48 = vpop.f32.mrf.mxu1 }
0x1f3b   :  { %v2903_v58 = vadd.f32 %v2902_v9, %v2863_v13  ;;  %v10070_v3 = vsel %vm352_vm1, %v3634_v60, %v3633_v7  ;;  %v10076_v63 = vsel %vm352_vm1, %v3637_v55, %v3636_v8  ;;  %v2864_v51 = vrot.slane %v9981_v26, 7 }
0x1f3c   :  { %v2904_v29 = vpop.f32.mrf.mxu0  ;;  %v10079_v21 = vsel %vm352_vm1, %v3761_v54, %v3760_v14  ;;  %v10083_v36 = vsel %vm352_vm1, %v3812_v6, %v9965_v11  ;;  %v3763_v13 = vrot.slane %v9971_v0, 7  ;;  %v3764_v4 = vrot.slane %v9981_v26, 6 }
0x1f3d   :  { %v2921_v23 = vadd.f32 %v2915_v31, %v2903_v58  ;;  %v2865_v25 = vsel %vm352_vm1, %v2864_v51, %v9971_v0  ;;  %v2917_v9 = vrot.slane %v10088_v48, 6  ;;  %v2916_v11 = vrot.slane %v9969_v12, 7 }
0x1f3e   :  { %v2906_v62 = vpop.f32.mrf.mxu0  ;;  %v10091_v42 = vsel %vm352_vm1, %v3764_v4, %v3763_v13  ;;  %v2905_v40 = vadd.f32 %v2904_v29, %v2865_v25  ;;  %v3044_v54 = vrot.slane %v10088_v48, 5  ;;  %v3043_v13 = vrot.slane %v9969_v12, 6 }
0x1f3f   :  { %v7659_v5 = vmul.f32 -1.442695, %v2921_v23  ;;  %v2918_v30 = vsel %vm352_vm1, %v2917_v9, %v2916_v11 }
0x1f40   :  { %v2907_v32 = vpop.f32.mrf.mxu0  ;;  %v2922_v34 = vadd.f32 %v2918_v30, %v2905_v40  ;;  %v3045_v9 = vsel %vm352_vm1, %v3044_v54, %v3043_v13 }
0x1f41   :  { %8363 = vpow2.f32 %v7659_v5 }
0x1f42   :  { %8365 = vtanh.f32 %v2922_v34  ;;  %v7660_v49 = vmul.f32 -1.442695, %v2922_v34 }
0x1f4e   :  { %v8364_v58 = vpop.eup %8363 }
0x1f4f   :  { %v2929_v39 = vadd.f32 1.0, %v8364_v58  ;;  %v8366_v26 = vpop.eup %8365 }
0x1f51   :  { %8367 = vrcp.f32 %v2929_v39 }
0x1f52   :  { %8369 = vpow2.f32 %v7660_v49 }
0x1f5e   :  { %v8368_v38 = vpop.eup %8367 }
0x1f5f   :  { %v2937_v31 = vmul.f32 %v8368_v38, %v8366_v26  ;;  %v8370_v0 = vpop.eup %8369  ;;  %v2936_v62 = vmul.f32 0.0, %v8368_v38 }
0x1f60   :  { %v2930_v23 = vadd.f32 1.0, %v8370_v0 }
0x1f61   :  { %2939 = vrot.lane.b32.xlu0 %v2937_v31, %s8676_s3 }
0x1f62   :  { %8371 = vrcp.f32 %v2930_v23 }
0x1f6f   :  { %v8372_v60 = vpop.eup %8371 }
0x1fd3   :  { %v2940_v29 = vpop.permute.xlu0 %2939 }
0x1fd4   :  { %v2942_v7 = vadd.f32 %v2940_v29, %v2936_v62 }
0x1fd6   :  { %8373 = vtanh.f32 %v2942_v7 }
0x1fe3   :  { %v8374_v5 = vpop.eup %8373 }
0x1fe4   :  { %v10099_v8 = vmul.f32 %v8374_v5, %v8372_v60 }
0x1fe6   :  { %v2986_v55 = vpack.c.bf16 %v10099_v8, %v10099_v8 }
0x1fe8   :  { %2988 = vrot.lane.b32.xlu1 %v2986_v55, %s8676_s3 }
0x205a   :  { %v2989_v32 = vpop.permute.xlu1 %2988 }
0x205b   :  { %7661 = vmatmul.mubr.msk.bf16.vlgmr.msra.gmra.mxu1 %vm358_vm2, %v2989_v32  ;;  %v3173_v32 = vrot.slane %v10088_v48, 4 }
0x205c   :  { %3266 = vmatpush1.bf16.msra.mxu1 %v9898_v16  ;;  %3289 = vmatprep.mubr.bf16.mxu1 %v8675_v2 }
0x205d   :  { %3267 = vmatprep.subr.bf16.mxu1 %v9903_v17 }
0x2060   :  { %3268 = vmatpush1.bf16.msra.mxu1 %v9911_v15 }
0x2061   :  { %3269 = vmatprep.subr.bf16.mxu1 %v9918_v18 }
0x2064   :  { %3270 = vmatpush1.bf16.msra.mxu1 %v9927_v28 }
0x2065   :  { %3271 = vmatprep.subr.bf16.mxu1 %v9933_v56 }
0x2068   :  { %3272 = vmatpush1.bf16.msra.mxu1 %v9941_v59 }
0x2069   :  { %3523 = vmatprep.subr.bf16.mxu1 %v9881_v43 }
0x211b   :  { %v3033_v14 = vpop.f32.mrf.mxu1 }
0x211c   :  { %v3034_v6 = vadd.f32 %v3033_v14, %v9988_v53 }
0x211d   :  { %v3035_v51 = vpop.f32.mrf.mxu1 }
0x211e   :  { %v3048_v4 = vadd.f32 %v9991_v45, %v3034_v6  ;;  %v3036_v25 = vadd.f32 %v3035_v51, %v9998_v57  ;;  %v3172_v6 = vrot.slane %v9969_v12, 5 }
0x211f   :  { %v3037_v40 = vpop.f32.mrf.mxu1 }
0x2120   :  { %v7662_v11 = vmul.f32 -1.442695, %v3048_v4  ;;  %v3049_v30 = vadd.f32 %v3045_v9, %v3036_v25  ;;  %v3174_v4 = vsel %vm352_vm1, %v3173_v32, %v3172_v6 }
0x2121   :  { %v3038_v34 = vpop.f32.mrf.mxu1 }
0x2122   :  { %8375 = vpow2.f32 %v7662_v11  ;;  %v7663_v31 = vmul.f32 -1.442695, %v3049_v30 }
0x2123   :  { %8377 = vtanh.f32 %v3049_v30 }
0x212f   :  { %v8376_v58 = vpop.eup %8375 }
0x2130   :  { %v3056_v39 = vadd.f32 1.0, %v8376_v58  ;;  %v8378_v26 = vpop.eup %8377 }
0x2132   :  { %8379 = vrcp.f32 %v3056_v39 }
0x2133   :  { %8381 = vpow2.f32 %v7663_v31 }
0x213f   :  { %v8380_v53 = vpop.eup %8379 }
0x2140   :  { %v3064_v38 = vmul.f32 %v8380_v53, %v8378_v26  ;;  %v8382_v45 = vpop.eup %8381  ;;  %v3063_v49 = vmul.f32 %v8380_v53, %v2942_v7 }
0x2141   :  { %v3057_v57 = vadd.f32 1.0, %v8382_v45 }
0x2142   :  { %3066 = vrot.lane.b32.xlu0 %v3064_v38, %s8676_s3 }
0x2143   :  { %8383 = vrcp.f32 %v3057_v57 }
0x2150   :  { %v8384_v62 = vpop.eup %8383 }
0x21b4   :  { %v3067_v0 = vpop.permute.xlu0 %3066 }
0x21b5   :  { %v3069_v23 = vadd.f32 %v3067_v0, %v3063_v49 }
0x21b7   :  { %8385 = vtanh.f32 %v3069_v23 }
0x21c4   :  { %v8386_v29 = vpop.eup %8385 }
0x21c5   :  { %v10121_v60 = vmul.f32 %v8386_v29, %v8384_v62  ;;  %v3302_v29 = vrot.slane %v10088_v48, 3 }
0x21c7   :  { %v3113_v5 = vpack.c.bf16 %v10121_v60, %v10121_v60 }
0x21c9   :  { %3115 = vrot.lane.b32.xlu1 %v3113_v5, %s8676_s3 }
0x223b   :  { %v3116_v55 = vpop.permute.xlu1 %3115 }
0x223c   :  { %7664 = vmatmul.mubr.msk.bf16.vlgmr.msra.gmra.mxu0 %vm358_vm2, %v3116_v55 }
0x223d   :  { %3395 = vmatpush1.bf16.msra.mxu0 %v9898_v16  ;;  %3418 = vmatprep.mubr.bf16.mxu0 %v8675_v2 }
0x223e   :  { %3396 = vmatprep.subr.bf16.mxu0 %v9903_v17 }
0x2241   :  { %3397 = vmatpush1.bf16.msra.mxu0 %v9911_v15 }
0x2242   :  { %3398 = vmatprep.subr.bf16.mxu0 %v9918_v18 }
0x2245   :  { %3399 = vmatpush1.bf16.msra.mxu0 %v9927_v28 }
0x2246   :  { %3400 = vmatprep.subr.bf16.mxu0 %v9933_v56 }
0x2249   :  { %3401 = vmatpush1.bf16.msra.mxu0 %v9941_v59 }
0x224a   :  { %3652 = vmatprep.subr.bf16.mxu0 %v9881_v43 }
0x22fc   :  { %v3162_v7 = vpop.f32.mrf.mxu0 }
0x22fd   :  { %v3163_v14 = vadd.f32 %v3162_v7, %v10002_v41  ;;  %v3301_v7 = vrot.slane %v9969_v12, 4 }
0x22fe   :  { %v3164_v54 = vpop.f32.mrf.mxu0 }
0x22ff   :  { %v3177_v51 = vadd.f32 %v10005_v1, %v3163_v14  ;;  %v3165_v13 = vadd.f32 %v3164_v54, %v10016_v61  ;;  %v3303_v54 = vsel %vm352_vm1, %v3302_v29, %v3301_v7 }
0x2300   :  { %v3166_v25 = vpop.f32.mrf.mxu0 }
0x2301   :  { %v7665_v9 = vmul.f32 -1.442695, %v3177_v51  ;;  %v3178_v40 = vadd.f32 %v3174_v4, %v3165_v13 }
0x2302   :  { %v3167_v11 = vpop.f32.mrf.mxu0 }
0x2303   :  { %8387 = vpow2.f32 %v7665_v9  ;;  %v7666_v26 = vmul.f32 -1.442695, %v3178_v40 }
0x2304   :  { %8389 = vtanh.f32 %v3178_v40 }
0x2310   :  { %v8388_v30 = vpop.eup %8387 }
0x2311   :  { %v3185_v34 = vadd.f32 1.0, %v8388_v30  ;;  %v8390_v58 = vpop.eup %8389 }
0x2313   :  { %8391 = vrcp.f32 %v3185_v34 }
0x2314   :  { %8393 = vpow2.f32 %v7666_v26 }
0x2320   :  { %v8392_v41 = vpop.eup %8391 }
0x2321   :  { %v3193_v39 = vmul.f32 %v8392_v41, %v8390_v58  ;;  %v8394_v1 = vpop.eup %8393  ;;  %v3192_v53 = vmul.f32 %v8392_v41, %v3069_v23 }
0x2322   :  { %v3186_v61 = vadd.f32 1.0, %v8394_v1 }
0x2323   :  { %3195 = vrot.lane.b32.xlu0 %v3193_v39, %s8676_s3 }
0x2324   :  { %8395 = vrcp.f32 %v3186_v61 }
0x2331   :  { %v8396_v45 = vpop.eup %8395 }
0x2395   :  { %v3196_v38 = vpop.permute.xlu0 %3195 }
0x2396   :  { %v3198_v31 = vadd.f32 %v3196_v38, %v3192_v53  ;;  %v3431_v38 = vrot.slane %v10088_v48, 2 }
0x2398   :  { %8397 = vtanh.f32 %v3198_v31 }
0x23a5   :  { %v8398_v57 = vpop.eup %8397 }
0x23a6   :  { %v10143_v49 = vmul.f32 %v8398_v57, %v8396_v45  ;;  %v3430_v57 = vrot.slane %v9969_v12, 3 }
0x23a8   :  { %v3242_v0 = vpack.c.bf16 %v10143_v49, %v10143_v49 }
0x23aa   :  { %3244 = vrot.lane.b32.xlu1 %v3242_v0, %s8676_s3 }
0x241c   :  { %v3245_v62 = vpop.permute.xlu1 %3244 }
0x241d   :  { %7667 = vmatmul.mubr.msk.bf16.vlgmr.msra.gmra.mxu1 %vm358_vm2, %v3245_v62 }
0x241e   :  { %3524 = vmatpush1.bf16.msra.mxu1 %v9898_v16  ;;  %3547 = vmatprep.mubr.bf16.mxu1 %v8675_v2 }
0x241f   :  { %3525 = vmatprep.subr.bf16.mxu1 %v9903_v17 }
0x2422   :  { %3526 = vmatpush1.bf16.msra.mxu1 %v9911_v15 }
0x2423   :  { %3527 = vmatprep.subr.bf16.mxu1 %v9918_v18 }
0x2426   :  { %3528 = vmatpush1.bf16.msra.mxu1 %v9927_v28 }
0x2427   :  { %3529 = vmatprep.subr.bf16.mxu1 %v9933_v56 }
0x242a   :  { %3530 = vmatpush1.bf16.msra.mxu1 %v9941_v59 }
0x242b   :  { %3779 = vmatprep.subr.bf16.mxu1 %v9881_v43 }
0x24dd   :  { %v3291_v23 = vpop.f32.mrf.mxu1 }
0x24de   :  { %v3292_v5 = vadd.f32 %v3291_v23, %v10022_v33  ;;  %v3432_v23 = vsel %vm352_vm1, %v3431_v38, %v3430_v57 }
0x24df   :  { %v3293_v55 = vpop.f32.mrf.mxu1 }
0x24e0   :  { %v3306_v32 = vadd.f32 %v10013_v37, %v3292_v5  ;;  %v3294_v14 = vadd.f32 %v3293_v55, %v10029_v24 }
0x24e1   :  { %v3295_v6 = vpop.f32.mrf.mxu1 }
0x24e2   :  { %v7668_v51 = vmul.f32 -1.442695, %v3306_v32  ;;  %v3307_v13 = vadd.f32 %v3303_v54, %v3294_v14 }
0x24e3   :  { %v3296_v4 = vpop.f32.mrf.mxu1 }
0x24e4   :  { %8399 = vpow2.f32 %v7668_v51  ;;  %v7669_v11 = vmul.f32 -1.442695, %v3307_v13 }
0x24e5   :  { %8401 = vtanh.f32 %v3307_v13 }
0x24f1   :  { %v8400_v43 = vpop.eup %8399 }
0x24f2   :  { %v3314_v25 = vadd.f32 1.0, %v8400_v43  ;;  %v8402_v9 = vpop.eup %8401 }
0x24f4   :  { %8403 = vrcp.f32 %v3314_v25 }
0x24f5   :  { %8405 = vpow2.f32 %v7669_v11 }
0x2501   :  { %v8404_v33 = vpop.eup %8403 }
0x2502   :  { %v3322_v40 = vmul.f32 %v8404_v33, %v8402_v9  ;;  %v8406_v37 = vpop.eup %8405  ;;  %v3321_v30 = vmul.f32 %v8404_v33, %v3198_v31 }
0x2503   :  { %v3315_v24 = vadd.f32 1.0, %v8406_v37 }
0x2504   :  { %3324 = vrot.lane.b32.xlu0 %v3322_v40, %s8676_s3 }
0x2505   :  { %8407 = vrcp.f32 %v3315_v24  ;;  %v3560_v24 = vrot.slane %v10088_v48, 1 }
0x2512   :  { %v8408_v41 = vpop.eup %8407 }
0x2576   :  { %v3325_v34 = vpop.permute.xlu0 %3324 }
0x2577   :  { %v3327_v58 = vadd.f32 %v3325_v34, %v3321_v30  ;;  %v3559_v34 = vrot.slane %v9969_v12, 2 }
0x2579   :  { %8409 = vtanh.f32 %v3327_v58 }
0x2586   :  { %v8410_v39 = vpop.eup %8409 }
0x2587   :  { %v10165_v26 = vmul.f32 %v8410_v39, %v8408_v41 }
0x2589   :  { %v3371_v1 = vpack.c.bf16 %v10165_v26, %v10165_v26 }
0x258b   :  { %3373 = vrot.lane.b32.xlu1 %v3371_v1, %s8676_s3 }
0x25fd   :  { %v3374_v61 = vpop.permute.xlu1 %3373 }
0x25fe   :  { %7670 = vmatmul.mubr.msk.bf16.vlgmr.msra.gmra.mxu0 %vm358_vm2, %v3374_v61 }
0x25ff   :  { %3653 = vmatpush1.bf16.msra.mxu0 %v9898_v16  ;;  %3676 = vmatprep.mubr.bf16.mxu0 %v8675_v2 }
0x2600   :  { %3654 = vmatprep.subr.bf16.mxu0 %v9903_v17 }
0x2603   :  { %3655 = vmatpush1.bf16.msra.mxu0 %v9911_v15 }
0x2604   :  { %3656 = vmatprep.subr.bf16.mxu0 %v9918_v18 }
0x2607   :  { %3657 = vmatpush1.bf16.msra.mxu0 %v9927_v28 }
0x2608   :  { %3658 = vmatprep.subr.bf16.mxu0 %v9933_v56 }
0x260b   :  { %3659 = vmatpush1.bf16.msra.mxu0 %v9941_v59 }
0x26be   :  { %v3420_v53 = vpop.f32.mrf.mxu0 }
0x26bf   :  { %v3421_v31 = vadd.f32 %v3420_v53, %v10036_v46 }
0x26c0   :  { %v3422_v45 = vpop.f32.mrf.mxu0 }
0x26c1   :  { %v3435_v0 = vadd.f32 %v10039_v35, %v3421_v31  ;;  %v3423_v62 = vadd.f32 %v3422_v45, %v10043_v10 }
0x26c2   :  { %v3424_v29 = vpop.f32.mrf.mxu0 }
0x26c3   :  { %v7671_v5 = vmul.f32 -1.442695, %v3435_v0  ;;  %v3436_v55 = vadd.f32 %v3432_v23, %v3423_v62 }
0x26c4   :  { %v3425_v7 = vpop.f32.mrf.mxu0 }
0x26c5   :  { %8411 = vpow2.f32 %v7671_v5  ;;  %v7672_v51 = vmul.f32 -1.442695, %v3436_v55 }
0x26c6   :  { %8413 = vtanh.f32 %v3436_v55 }
0x26d2   :  { %v8412_v32 = vpop.eup %8411 }
0x26d3   :  { %v3443_v14 = vadd.f32 1.0, %v8412_v32  ;;  %v8414_v54 = vpop.eup %8413  ;;  %v3687_v32 = vrot.slane %v9969_v12, 1 }
0x26d5   :  { %8415 = vrcp.f32 %v3443_v14 }
0x26d6   :  { %8417 = vpow2.f32 %v7672_v51 }
0x26e2   :  { %v8416_v46 = vpop.eup %8415 }
0x26e3   :  { %v3451_v6 = vmul.f32 %v8416_v46, %v8414_v54  ;;  %v8418_v35 = vpop.eup %8417  ;;  %v3450_v13 = vmul.f32 %v8416_v46, %v3327_v58  ;;  %v3688_v46 = vsel %vm352_vm1, %v10088_v48, %v3687_v32 }
0x26e4   :  { %v3444_v10 = vadd.f32 1.0, %v8418_v35 }
0x26e5   :  { %3453 = vrot.lane.b32.xlu0 %v3451_v6, %s8676_s3 }
0x26e6   :  { %8419 = vrcp.f32 %v3444_v10 }
0x26f3   :  { %v8420_v25 = vpop.eup %8419 }
0x2757   :  { %v3454_v4 = vpop.permute.xlu0 %3453 }
0x2758   :  { %v3456_v43 = vadd.f32 %v3454_v4, %v3450_v13 }
0x275a   :  { %8421 = vtanh.f32 %v3456_v43 }
0x2767   :  { %v8422_v9 = vpop.eup %8421 }
0x2768   :  { %v10186_v33 = vmul.f32 %v8422_v9, %v8420_v25 }
0x276a   :  { %v3500_v40 = vpack.c.bf16 %v10186_v33, %v10186_v33 }
0x276c   :  { %3502 = vrot.lane.b32.xlu1 %v3500_v40, %s8676_s3 }
0x27de   :  { %v3503_v11 = vpop.permute.xlu1 %3502 }
0x27df   :  { %7673 = vmatmul.mubr.msk.bf16.vlgmr.msra.gmra.mxu1 %vm358_vm2, %v3503_v11 }
0x27e0   :  { %3780 = vmatpush1.bf16.msra.mxu1 %v9898_v16  ;;  %3803 = vmatprep.mubr.bf16.mxu1 %v8675_v2 }
0x27e1   :  { %3781 = vmatprep.subr.bf16.mxu1 %v9903_v17 }
0x27e4   :  { %3782 = vmatpush1.bf16.msra.mxu1 %v9911_v15 }
0x27e5   :  { %3783 = vmatprep.subr.bf16.mxu1 %v9918_v18  ;;  %v3561_v18 = vsel %vm352_vm1, %v3560_v24, %v3559_v34 }
0x27e8   :  { %3784 = vmatpush1.bf16.msra.mxu1 %v9927_v28 }
0x27e9   :  { %3785 = vmatprep.subr.bf16.mxu1 %v9933_v56 }
0x27ec   :  { %3786 = vmatpush1.bf16.msra.mxu1 %v9941_v59 }
0x289f   :  { %v3549_v37 = vpop.f32.mrf.mxu1 }
0x28a0   :  { %v3550_v30 = vadd.f32 %v3549_v37, %v10052_v47 }
0x28a1   :  { %v3551_v16 = vpop.f32.mrf.mxu1 }
0x28a2   :  { %v3564_v17 = vadd.f32 %v10055_v44, %v3550_v30  ;;  %v3552_v15 = vadd.f32 %v3551_v16, %v10059_v52  ;;  %v10221_v30 = vrot.slane %v10099_v8, %v9180_v27  ;;  %v10235_v8 = vrot.slane %v10143_v49, %v9180_v27 }
0x28a3   :  { %v3553_v58 = vpop.f32.mrf.mxu1  ;;  %v10251_v49 = vrot.slane %v10186_v33, %v9180_v27 }
0x28a4   :  { %v7674_v28 = vmul.f32 -1.442695, %v3564_v17  ;;  %v3565_v41 = vadd.f32 %v3561_v18, %v3552_v15  ;;  %v2960_v15 = vrot.slane %v10221_v30, %v9180_v27  ;;  %v10227_v18 = vrot.slane %v10121_v60, %v9180_v27 }
0x28a5   :  { %v3554_v56 = vpop.f32.mrf.mxu1  ;;  %v10243_v60 = vrot.slane %v10165_v26, %v9180_v27 }
0x28a6   :  { %8423 = vpow2.f32 %v7674_v28  ;;  %v7675_v53 = vmul.f32 -1.442695, %v3565_v41  ;;  %v2971_v58 = vrot.slane %v2960_v15, %v8914_v20  ;;  %v3087_v28 = vrot.slane %v10227_v18, %v9180_v27 }
0x28a7   :  { %8425 = vtanh.f32 %v3565_v41  ;;  %v3216_v56 = vrot.slane %v10235_v8, %v9180_v27 }
0x28a8   :  { %v3098_v41 = vrot.slane %v3087_v28, %v8914_v20  ;;  %v10332_v28 = vld [vmem:[%s11315_s15 + $0x10] ss:$8 sps:$4 sm:$0xff]  }
0x28b3   :  { %v8424_v59 = vpop.eup %8423 }
0x28b4   :  { %v3572_v39 = vadd.f32 1.0, %v8424_v59  ;;  %v8426_v1 = vpop.eup %8425  ;;  %v3227_v59 = vrot.slane %v3216_v56, %v8914_v20 }
0x28b6   :  { %8427 = vrcp.f32 %v3572_v39  ;;  %v3345_v39 = vrot.slane %v10243_v60, %v9180_v27 }
0x28b7   :  { %8429 = vpow2.f32 %v7675_v53 }
0x28c3   :  { %v8428_v47 = vpop.eup %8427 }
0x28c4   :  { %v3580_v61 = vmul.f32 %v8428_v47, %v8426_v1  ;;  %v8430_v44 = vpop.eup %8429  ;;  %v3579_v38 = vmul.f32 %v8428_v47, %v3456_v43  ;;  %v3356_v1 = vrot.slane %v3345_v39, %v8914_v20  ;;  %v3474_v47 = vrot.slane %v10251_v49, %v9180_v27 }
0x28c5   :  { %v3573_v52 = vadd.f32 1.0, %v8430_v44 }
0x28c6   :  { %3582 = vrot.lane.b32.xlu0 %v3580_v61, %s8676_s3  ;;  %v3485_v61 = vrot.slane %v3474_v47, %v8914_v20 }
0x28c7   :  { %8431 = vrcp.f32 %v3573_v52 }
0x28d4   :  { %v8432_v57 = vpop.eup %8431 }
0x2938   :  { %v3583_v31 = vpop.permute.xlu0 %3582 }
0x2939   :  { %v3585_v45 = vadd.f32 %v3583_v31, %v3579_v38 }
0x293b   :  { %8433 = vtanh.f32 %v3585_v45 }
0x2948   :  { %v8434_v0 = vpop.eup %8433 }
0x2949   :  { %v3587_v62 = vmul.f32 %v8434_v0, %v8432_v57 }
0x294b   :  { %v3629_v23 = vpack.c.bf16 %v3587_v62, %v3587_v62  ;;  %v10258_v26 = vrot.slane %v3587_v62, %v9180_v27 }
0x294d   :  { %3631 = vrot.lane.b32.xlu1 %v3629_v23, %s8676_s3  ;;  %v3603_v53 = vrot.slane %v10258_v26, %v9180_v27  ;;  %v3596_v15 = vcombine.high %v10258_v26, %v10258_v26 }
0x294f   :  { %v3614_v44 = vrot.slane %v3603_v53, %v8914_v20  ;;  %v3610_v56 = vrot.slane %v3596_v15, %v9180_v27 }
0x29bf   :  { %v3632_v29 = vpop.permute.xlu1 %3631 }
0x29c0   :  { %7676 = vmatmul.mubr.msk.bf16.vlgmr.msra.gmra.mxu0 %vm358_vm2, %v3632_v29 }
0x2a80   :  { %v3678_v5 = vpop.f32.mrf.mxu0 }
0x2a81   :  { %v3679_v55 = vadd.f32 %v3678_v5, %v10070_v3 }
0x2a82   :  { %v3680_v7 = vpop.f32.mrf.mxu0 }
0x2a83   :  { %v3691_v14 = vadd.f32 %v10065_v50, %v3679_v55  ;;  %v3681_v54 = vadd.f32 %v3680_v7, %v10076_v63  ;;  %v3814_v7 = vrot.slane %v10088_v48, 7 }
0x2a84   :  { %v3682_v6 = vpop.f32.mrf.mxu0 }
0x2a85   :  { %v7677_v51 = vmul.f32 -1.442695, %v3691_v14  ;;  %v3692_v35 = vadd.f32 %v3688_v46, %v3681_v54  ;;  %v3815_v6 = vsel %vm352_vm1, %v3814_v7, %v9969_v12  ;;  %v3080_v12 = vcombine.high %v10227_v18, %v10227_v18  ;;  %v10324_v18 = vld [vmem:[%s11315_s15 + $0x14] ss:$8 sps:$4 sm:$0xff]  }
0x2a86   :  { %v3683_v10 = vpop.f32.mrf.mxu0  ;;  %4002 = vmatprep.subr.bf16.mxu1 %v10324_v18 }
0x2a87   :  { %8435 = vpow2.f32 %v7677_v51  ;;  %v7678_v50 = vmul.f32 -1.442695, %v3692_v35 }
0x2a88   :  { %8437 = vtanh.f32 %v3692_v35 }
0x2a94   :  { %v8436_v13 = vpop.eup %8435 }
0x2a95   :  { %v3699_v4 = vadd.f32 1.0, %v8436_v13  ;;  %v8438_v3 = vpop.eup %8437 }
0x2a97   :  { %8439 = vrcp.f32 %v3699_v4 }
0x2a98   :  { %8441 = vpow2.f32 %v7678_v50  ;;  %v3094_v50 = vrot.slane %v3080_v12, %v9180_v27 }
0x2aa4   :  { %v8440_v43 = vpop.eup %8439 }
0x2aa5   :  { %v3707_v25 = vmul.f32 %v8440_v43, %v8438_v3  ;;  %v8442_v63 = vpop.eup %8441  ;;  %v3706_v40 = vmul.f32 %v8440_v43, %v3585_v45 }
0x2aa6   :  { %v3700_v9 = vadd.f32 1.0, %v8442_v63  ;;  %v3209_v63 = vcombine.high %v10235_v8, %v10235_v8  ;;  %v8678_v8 = vmov 0.0  }
0x2aa7   :  { %3709 = vrot.lane.b32.xlu0 %v3707_v25, %s8676_s3  ;;  %7830 = vmatprep.subr.bf16.mxu0 %v8678_v8 }
0x2aa8   :  { %8443 = vrcp.f32 %v3700_v9  ;;  %v3102_v9 = vrot.slane %v3094_v50, %v8914_v20  ;;  %7838 = vmatprep.mubr.msk.bf16.mxu0 %vm8679_vm5, %v8678_v8 }
0x2ab5   :  { %v8444_v24 = vpop.eup %8443 }
0x2b19   :  { %v3710_v11 = vpop.permute.xlu0 %3709 }
0x2b1a   :  { %v10216_v37 = vadd.f32 %v3710_v11, %v3706_v40  ;;  %v3223_v40 = vrot.slane %v3209_v63, %v9180_v27  ;;  %v3338_v11 = vcombine.high %v10243_v60, %v10243_v60 }
0x2b1c   :  { %8445 = vtanh.f32 %v10216_v37 }
0x2b29   :  { %v8446_v16 = vpop.eup %8445 }
0x2b2a   :  { %v3714_v34 = vmul.f32 %v8446_v16, %v8444_v24  ;;  %v3231_v24 = vrot.slane %v3223_v40, %v8914_v20  ;;  %v3467_v16 = vcombine.high %v10251_v49, %v10251_v49 }
0x2b2c   :  { %v3756_v17 = vpack.c.bf16 %v3714_v34, %v3714_v34  ;;  %v10265_v33 = vrot.slane %v3714_v34, %v9180_v27 }
0x2b2e   :  { %3758 = vrot.lane.b32.xlu1 %v3756_v17, %s8676_s3  ;;  %v3730_v52 = vrot.slane %v10265_v33, %v9180_v27  ;;  %v3481_v17 = vrot.slane %v3467_v16, %v9180_v27  ;;  %v3723_v60 = vcombine.high %v10265_v33, %v10265_v33 }
0x2b30   :  { %v3741_v38 = vrot.slane %v3730_v52, %v8914_v20  ;;  %v3737_v39 = vrot.slane %v3723_v60, %v9180_v27 }
0x2b32   :  { %2976 = vrot.lane.b32.xlu1 %v2971_v58, %s8676_s3  ;;  %v8155_v58 = vld [vmem:[%s11313_s13 + $0x18] sm:$0xff]   ;;  %v3745_v49 = vrot.slane %v3737_v39, %v8914_v20  ;;  %v10434_v39 = vld [vmem:[%s11314_s14] ss:$0 sm:$0xff] }
0x2b33   :  { %7831 = vmatpush3.bf16.msra.mxu0 %v8155_v58 }
0x2b34   :  { %7832 = vmatprep.subr.bf16.mxu0 %v8678_v8 }
0x2b36   :  { %3103 = vrot.lane.b32.xlu1 %v3098_v41, %s8676_s3  ;;  %v3489_v41 = vrot.slane %v3481_v17, %v8914_v20 }
0x2b3a   :  { %3232 = vrot.lane.b32.xlu1 %v3227_v59, %s8676_s3  ;;  %v3618_v59 = vrot.slane %v3610_v56, %v8914_v20 }
0x2b3e   :  { %3361 = vrot.lane.b32.xlu1 %v3356_v1, %s8676_s3 }
0x2b42   :  { %3490 = vrot.lane.b32.xlu1 %v3485_v61, %s8676_s3 }
0x2b46   :  { %3619 = vrot.lane.b32.xlu1 %v3614_v44, %s8676_s3 }
0x2b4a   :  { %3746 = vrot.lane.b32.xlu1 %v3741_v38, %s8676_s3 }
0x2ba0   :  { %v3759_v31 = vpop.permute.xlu1 %3758 }
0x2ba1   :  { %7679 = vmatmul.mubr.msk.bf16.vlgmr.msra.gmra.mxu1 %vm358_vm2, %v3759_v31  ;;  %v10357_v31 = vld [vmem:[%s11315_s15 + $0x4] ss:$8 sps:$4 sm:$0xff]  }
0x2ba2   :  { %4022 = vmatprep.mubr.bf16.mxu1 %v8675_v2  ;;  %4003 = vmatpush1.bf16.msra.mxu1 %v10332_v28 }
0x2ba3   :  { %4004 = vmatprep.subr.bf16.mxu1 %v10357_v31 }
0x2ba4   :  { %v2977_v45 = vpop.permute.xlu1 %2976 }
0x2ba5   :  { %2982 = vst.msk [vmem:[#allocation2] sm:$0x1] %vm476_vm3, %v2977_v45 }
0x2ba6   :  { %2984 = vst.msk [vmem:[#allocation2 + $0x7] sm:$0x1] %vm479_vm4, %v2977_v45  ;;  %v10365_v45 = vld [vmem:[%s11315_s15] ss:$8 sps:$4 sm:$0xff]  }
0x2ba7   :  { %4005 = vmatpush1.bf16.msra.mxu1 %v10365_v45 }
0x2ba8   :  { %v3104_v57 = vpop.permute.xlu1 %3103  ;;  %7842 = vmatprep.subr.bf16.mxu1 %v8678_v8 }
0x2ba9   :  { %3109 = vst.msk [vmem:[#allocation2 + $0x1] sm:$0x1] %vm476_vm3, %v3104_v57 }
0x2baa   :  { %3111 = vst.msk [vmem:[#allocation2 + $0x6] sm:$0x1] %vm479_vm4, %v3104_v57 }
0x2bac   :  { %v3233_v0 = vpop.permute.xlu1 %3232 }
0x2bad   :  { %3238 = vst.msk [vmem:[#allocation2 + $0x2] sm:$0x1] %vm476_vm3, %v3233_v0 }
0x2bae   :  { %3240 = vst.msk [vmem:[#allocation2 + $0x5] sm:$0x1] %vm479_vm4, %v3233_v0 }
0x2bb0   :  { %v3362_v62 = vpop.permute.xlu1 %3361 }
0x2bb1   :  { %3367 = vst.msk [vmem:[#allocation2 + $0x3] sm:$0x1] %vm476_vm3, %v3362_v62 }
0x2bb2   :  { %3369 = vst.msk [vmem:[#allocation2 + $0x4] sm:$0x1] %vm479_vm4, %v3362_v62 }
0x2bb4   :  { %v3491_v23 = vpop.permute.xlu1 %3490 }
0x2bb5   :  { %3496 = vst.msk [vmem:[#allocation2 + $0x4] sm:$0x1] %vm476_vm3, %v3491_v23 }
0x2bb6   :  { %3498 = vst.msk [vmem:[#allocation2 + $0x3] sm:$0x1] %vm479_vm4, %v3491_v23  ;;  %v8161_v23 = vld [vmem:[%s11313_s13 + $0x8] sm:$0xff]  }
0x2bb8   :  { %v3620_v29 = vpop.permute.xlu1 %3619 }
0x2bb9   :  { %3625 = vst.msk [vmem:[#allocation2 + $0x5] sm:$0x1] %vm476_vm3, %v3620_v29 }
0x2bba   :  { %3627 = vst.msk [vmem:[#allocation2 + $0x2] sm:$0x1] %vm479_vm4, %v3620_v29 }
0x2bbc   :  { %v3747_v5 = vpop.permute.xlu1 %3746 }
0x2bbd   :  { %3752 = vst.msk [vmem:[#allocation2 + $0x6] sm:$0x1] %vm476_vm3, %v3747_v5 }
0x2bbe   :  { %3754 = vst.msk [vmem:[#allocation2 + $0x1] sm:$0x1] %vm479_vm4, %v3747_v5  ;;  %v8162_v5 = vld [vmem:[%s11313_s13] sm:$0xff]  }
0x2c61   :  { %v3805_v55 = vpop.f32.mrf.mxu1 }
0x2c62   :  { %v3806_v32 = vadd.f32 %v3805_v55, %v10079_v21  ;;  %v2953_v21 = vcombine.high %v10221_v30, %v10221_v30  ;;  %v3352_v30 = vrot.slane %v3338_v11, %v9180_v27 }
0x2c63   :  { %v3807_v14 = vpop.f32.mrf.mxu1 }
0x2c64   :  { %v3818_v54 = vadd.f32 %v10083_v36, %v3806_v32  ;;  %v3808_v46 = vadd.f32 %v3807_v14, %v10091_v42  ;;  %v2967_v42 = vrot.slane %v2953_v21, %v9180_v27  ;;  %v3360_v34 = vrot.slane %v3352_v30, %v8914_v20 }
0x2c65   :  { %v3809_v51 = vpop.f32.mrf.mxu1 }
0x2c66   :  { %v7680_v35 = vmul.f32 -1.442695, %v3818_v54  ;;  %v3819_v10 = vadd.f32 %v3815_v6, %v3808_v46  ;;  %v2975_v25 = vrot.slane %v2967_v42, %v8914_v20 }
0x2c67   :  { %v3810_v13 = vpop.f32.mrf.mxu1 }
0x2c68   :  { %8447 = vpow2.f32 %v7680_v35  ;;  %v7681_v1 = vmul.f32 -1.442695, %v3819_v10 }
0x2c69   :  { %8449 = vtanh.f32 %v3819_v10 }
0x2c75   :  { %v8448_v4 = vpop.eup %8447 }
0x2c76   :  { %v3826_v3 = vadd.f32 1.0, %v8448_v4  ;;  %v8450_v48 = vpop.eup %8449 }
0x2c78   :  { %8451 = vrcp.f32 %v3826_v3 }
0x2c79   :  { %8453 = vpow2.f32 %v7681_v1 }
0x2c85   :  { %v8452_v43 = vpop.eup %8451 }
0x2c86   :  { %v3834_v36 = vmul.f32 %v8452_v43, %v8450_v48  ;;  %v8454_v47 = vpop.eup %8453  ;;  %v3833_v61 = vmul.f32 %v8452_v43, %v10216_v37  ;;  %v8159_v37 = vld [vmem:[%s11313_s13 + $0x10] sm:$0xff]  }
0x2c87   :  { %v3827_v26 = vadd.f32 1.0, %v8454_v47  ;;  %7833 = vmatpush3.bf16.msra.mxu0 %v8159_v37 }
0x2c88   :  { %3836 = vrot.lane.b32.xlu0 %v3834_v36, %s8676_s3  ;;  %7834 = vmatprep.subr.bf16.mxu0 %v8678_v8 }
0x2c89   :  { %8455 = vrcp.f32 %v3827_v26 }
0x2c8b   :  { %7835 = vmatpush3.bf16.msra.mxu0 %v8161_v23 }
0x2c8c   :  { %2978 = vrot.lane.b32.xlu0 %v2975_v25, %s8676_s3  ;;  %7836 = vmatprep.subr.bf16.mxu0 %v8678_v8 }
0x2c8f   :  { %7837 = vmatpush3.bf16.msra.mxu0 %v8162_v5 }
0x2c90   :  { %3105 = vrot.lane.b32.xlu0 %v3102_v9, %s8676_s3  ;;  %7848 = vmatprep.subr.bf16.mxu0 %v8678_v8 }
0x2c94   :  { %3234 = vrot.lane.b32.xlu0 %v3231_v24, %s8676_s3 }
0x2c96   :  { %v8456_v57 = vpop.eup %8455 }
0x2c98   :  { %3363 = vrot.lane.b32.xlu0 %v3360_v34, %s8676_s3 }
0x2c9c   :  { %3492 = vrot.lane.b32.xlu0 %v3489_v41, %s8676_s3 }
0x2ca0   :  { %3621 = vrot.lane.b32.xlu0 %v3618_v59, %s8676_s3 }
0x2ca4   :  { %3748 = vrot.lane.b32.xlu0 %v3745_v49, %s8676_s3 }
0x2cfa   :  { %v3837_v53 = vpop.permute.xlu0 %3836 }
0x2cfb   :  { %v3839_v33 = vadd.f32 %v3837_v53, %v3833_v61 }
0x2cfd   :  { %8457 = vtanh.f32 %v3839_v33 }
0x2cfe   :  { %v2979_v44 = vpop.permute.xlu0 %2978 }
0x2cff   :  { %2983 = vst.msk [vmem:[#allocation2 + $0x8] sm:$0x1] %vm476_vm3, %v2979_v44 }
0x2d00   :  { %2985 = vst.msk [vmem:[#allocation2 + $0xf] sm:$0x1] %vm479_vm4, %v2979_v44 }
0x2d02   :  { %v3106_v52 = vpop.permute.xlu0 %3105 }
0x2d03   :  { %3110 = vst.msk [vmem:[#allocation2 + $0x9] sm:$0x1] %vm476_vm3, %v3106_v52 }
0x2d04   :  { %3112 = vst.msk [vmem:[#allocation2 + $0xe] sm:$0x1] %vm479_vm4, %v3106_v52 }
0x2d06   :  { %v3235_v38 = vpop.permute.xlu0 %3234 }
0x2d07   :  { %3239 = vst.msk [vmem:[#allocation2 + $0xa] sm:$0x1] %vm476_vm3, %v3235_v38 }
0x2d08   :  { %3241 = vst.msk [vmem:[#allocation2 + $0xd] sm:$0x1] %vm479_vm4, %v3235_v38 }
0x2d0a   :  { %v8458_v0 = vpop.eup %8457  ;;  %v3364_v62 = vpop.permute.xlu0 %3363 }
0x2d0b   :  { %3368 = vst.msk [vmem:[#allocation2 + $0xb] sm:$0x1] %vm476_vm3, %v3364_v62  ;;  %v3841_v29 = vmul.f32 %v8458_v0, %v8456_v57 }
0x2d0c   :  { %3370 = vst.msk [vmem:[#allocation2 + $0xc] sm:$0x1] %vm479_vm4, %v3364_v62 }
0x2d0d   :  { %v3849_v55 = vrot.slane %v3841_v29, %v9180_v27  ;;  %v3962_v35 = vpack.c.bf16 %v3841_v29, %v3841_v29 }
0x2d0e   :  { %v3493_v7 = vpop.permute.xlu0 %3492 }
0x2d0f   :  { %3497 = vst.msk [vmem:[#allocation2 + $0xc] sm:$0x1] %vm476_vm3, %v3493_v7  ;;  %v3857_v32 = vrot.slane %v3849_v55, %v9180_v27  ;;  %v3850_v14 = vcombine.high %v3849_v55, %v3849_v55 }
0x2d10   :  { %3499 = vst.msk [vmem:[#allocation2 + $0xb] sm:$0x1] %vm479_vm4, %v3493_v7 }
0x2d11   :  { %v3868_v54 = vrot.slane %v3857_v32, %v8914_v20  ;;  %v3864_v46 = vrot.slane %v3850_v14, %v9180_v27 }
0x2d12   :  { %v3622_v6 = vpop.permute.xlu0 %3621 }
0x2d13   :  { %3626 = vst.msk [vmem:[#allocation2 + $0xd] sm:$0x1] %vm476_vm3, %v3622_v6  ;;  %3873 = vrot.lane.b32.xlu1 %v3868_v54, %s8676_s3  ;;  %v3872_v51 = vrot.slane %v3864_v46, %v8914_v20 }
0x2d14   :  { %3628 = vst.msk [vmem:[#allocation2 + $0xa] sm:$0x1] %vm479_vm4, %v3622_v6 }
0x2d15   :  { %3875 = vrot.lane.b32.xlu0 %v3872_v51, %s8676_s3 }
0x2d16   :  { %v3749_v10 = vpop.permute.xlu0 %3748 }
0x2d17   :  { %3753 = vst.msk [vmem:[#allocation2 + $0xe] sm:$0x1] %vm476_vm3, %v3749_v10  ;;  %3964 = vrot.lane.b32.xlu1 %v3962_v35, %s8676_s3 }
0x2d18   :  { %3755 = vst.msk [vmem:[#allocation2 + $0x9] sm:$0x1] %vm479_vm4, %v3749_v10 }
0x2d85   :  { %v3874_v13 = vpop.permute.xlu1 %3873 }
0x2d86   :  { %3879 = vst.msk [vmem:[#allocation2 + $0x7] sm:$0x1] %vm476_vm3, %v3874_v13 }
0x2d87   :  { %3881 = vst.msk [vmem:[#allocation2] sm:$0x1] %vm479_vm4, %v3874_v13  ;;  %v3876_v4 = vpop.permute.xlu0 %3875 }
0x2d88   :  { %3880 = vst.msk [vmem:[#allocation2 + $0xf] sm:$0x1] %vm476_vm3, %v3876_v4 }
0x2d89   :  { %3882 = vst.msk [vmem:[#allocation2 + $0x8] sm:$0x1] %vm479_vm4, %v3876_v4  ;;  %v3965_v3 = vpop.permute.xlu1 %3964 }
0x2d8a   :  { %7692 = vmatmul.mubr.msk.bf16.vlgmr.msra.gmra.mxu1 %vm3986_vm6, %v3965_v3 }
0x2d8b   :  { %7844 = vmatprep.mubr.msk.bf16.mxu1 %vm8679_vm5, %v8678_v8 }
0x2d8e   :  { %v3883_v21 = vld [vmem:[#allocation2] sm:$0xff] }
0x2d8f   :  { %v3885_v48 = vpack.c.bf16 %v3883_v21, %v3883_v21 }
0x2d90   :  { %v3884_v43 = vld [vmem:[#allocation2 + $0x8] sm:$0xff] }
0x2d91   :  { %v10406_v36 = vsel %vm4183_vm7, %v3885_v48, 0  ;;  %v3886_v42 = vpack.c.bf16 %v3884_v43, %v3884_v43  ;;  %v3887_v12 = vpack.c.bf16 %v3884_v43, %v3883_v21 }
0x2d92   :  { %7843 = vmatpush3.bf16.msra.mxu1 %v10406_v36 }
0x2d93   :  { %7839 = vmatmul.mubr.msk.bf16.vlgmr.msra.gmra.mxu0 %vm358_vm2, %v3887_v12  ;;  %v10410_v25 = vsel %vm4183_vm7, %v3886_v42, 0  ;;  %7854 = vmatprep.subr.bf16.mxu1 %v8678_v8 }
0x2d94   :  { %7849 = vmatpush3.bf16.msra.mxu0 %v10410_v25  ;;  %7850 = vmatprep.mubr.msk.bf16.mxu0 %vm8679_vm5, %v8678_v8 }
0x2d95   :  { %4456 = vmatprep.subr.bf16.mxu0 %v10324_v18 }
0x2e4a   :  { %v10417_v50 = vpop.f32.mrf.mxu1 }
0x2e4b   :  { %v4038_v63 = vrot.slane %v10417_v50, %v9180_v27 }
0x2e4c   :  { %v4026_v9 = vpop.f32.mrf.mxu1 }
0x2e4d   :  { %v4039_v40 = vcombine.high %v4038_v63, %v4038_v63  ;;  %v4046_v11 = vrot.slane %v4038_v63, %v9180_v27 }
0x2e4e   :  { %v4028_v24 = vpop.f32.mrf.mxu1 }
0x2e4f   :  { %v4053_v16 = vrot.slane %v4039_v40, %v9180_v27  ;;  %v4057_v34 = vrot.slane %v4046_v11, %v8914_v20 }
0x2e50   :  { %v4029_v30 = vpop.f32.mrf.mxu1 }
0x2e51   :  { %v4061_v41 = vrot.slane %v4053_v16, %v8914_v20 }
0x2e53   :  { %v10424_v17 = vpop.f32.mrf.mxu0 }
0x2e54   :  { %v4064_v15 = vadd.f32 %v4057_v34, %v10424_v17  ;;  %v10469_v34 = vld [vmem:[%s11316_s16 + $0x18] sm:$0xff]  }
0x2e55   :  { %v7840_v58 = vpop.f32.mrf.mxu0 }
0x2e56   :  { %8459 = vtanh.f32 %v4064_v15  ;;  %v10484_v15 = vld [vmem:[%s11316_s16 + $0x10] sm:$0xff]   ;;  %v10491_v58 = vld [vmem:[%s11316_s16 + $0x8] sm:$0xff]  }
0x2e57   :  { %v10428_v56 = vpop.f32.mrf.mxu0 }
0x2e58   :  { %v4065_v60 = vadd.f32 %v4061_v41, %v10428_v56  ;;  %v10497_v41 = vld [vmem:[%s11316_s16] sm:$0xff]  }
0x2e59   :  { %v7841_v59 = vpop.f32.mrf.mxu0 }
0x2e5a   :  { %8461 = vtanh.f32 %v4065_v60 }
0x2e63   :  { %v8460_v49 = vpop.eup %8459 }
0x2e64   :  { %v4068_v1 = vmul.f32 %v8460_v49, %v10434_v39 }
0x2e66   :  { %v4070_v47 = vsel %vm3986_vm6, %v4068_v1, 0.0 }
0x2e67   :  { %v8462_v26 = vpop.eup %8461  ;;  %4071 = vadd.xlane.f32.xlu0 %v4070_v47 }
0x2e68   :  { %v4069_v61 = vmul.f32 %v8462_v26, %v10434_v39 }
0x2e6a   :  { %v4073_v53 = vsel %vm3986_vm6, %v4069_v61, 0.0 }
0x2e6b   :  { %4074 = vadd.xlane.f32.xlu1 %v4073_v53 }
0x2ef0   :  { %v4072_v33 = vpop.xlane.xlu0 %4071 }
0x2ef1   :  { %v4083_v52 = vrot.slane %v4072_v33, %v8911_v19 }
0x2ef4   :  { %v4075_v44 = vpop.xlane.xlu1 %4074 }
0x2ef5   :  { %v4087_v38 = vrot.slane %v4075_v44, %v8911_v19 }
0x2ef7   :  { %v4088_v37 = vsel %vm352_vm1, %v4087_v38, %v4083_v52 }
0x2ef8   :  { %v4091_v57 = vsel %vm4090_vm8, %v4088_v37, -inf }
0x2ef9   :  { %4092 = vmax.xlane.f32.xlu0 %v4091_v57 }
0x2f82   :  { %v4093_v0 = vpop.xlane.xlu0 %4092 }
0x2f83   :  { %v4098_v62 = vrot.slane %v4093_v0, %v8914_v20  ;;  %v4102_v23 = vrot.slane %v4093_v0, %v8920_v22 }
0x2f85   :  { %v4105_v29 = vsub.f32 %v4072_v33, %v4098_v62  ;;  %v4106_v5 = vsub.f32 %v4075_v44, %v4102_v23 }
0x2f87   :  { %v4107_v55 = vmul.f32 1.442695, %v4105_v29  ;;  %v4109_v7 = vmul.f32 1.442695, %v4106_v5  ;;  %v10511_v29 = vld [vmem:[%s11317_s17] ss:$0 sm:$0xff] }
0x2f89   :  { %8463 = vpow2.f32 %v4107_v55 }
0x2f8a   :  { %8465 = vpow2.f32 %v4109_v7 }
0x2f96   :  { %v8464_v32 = vpop.eup %8463 }
0x2f97   :  { %v8466_v14 = vpop.eup %8465  ;;  %4114 = vperm.xlu0 %8061, %v8464_v32  }
0x2f98   :  { %4117 = vperm.xlu1 %8062, %v8466_v14  }
0x3012   :  { %v4115_v54 = vpop.permute.xlu0 %4114 }
0x3013   :  { %v4118_v46 = vpop.permute.xlu1 %4117  ;;  %v4122_v6 = vrot.slane %v4115_v54, %v8911_v19 }
0x3014   :  { %v4126_v51 = vrot.slane %v4118_v46, %v8911_v19 }
0x3016   :  { %v4127_v35 = vsel %vm352_vm1, %v4126_v51, %v4122_v6 }
0x3017   :  { %v4129_v10 = vsel %vm4090_vm8, %v4127_v35, 0.0 }
0x3018   :  { %4130 = vadd.xlane.f32.xlu1 %v4129_v10 }
0x3029   :  { %4319 = vrot.lane.b32.xlu1 %v4026_v9, %s8680_s12 }
0x30a1   :  { %v4131_v13 = vpop.xlane.xlu1 %4130 }
0x30a2   :  { %8467 = vrcp.f32 %v4131_v13 }
0x30a5   :  { %v4320_v23 = vpop.permute.xlu1 %4319 }
0x30af   :  { %v8468_v4 = vpop.eup %8467 }
0x30b0   :  { %v4141_v3 = vrot.slane %v8468_v4, %v8920_v22  ;;  %v4137_v21 = vrot.slane %v8468_v4, %v8914_v20 }
0x30b2   :  { %v10453_v48 = vmul.f32 %v8466_v14, %v4141_v3  ;;  %v10455_v43 = vmul.f32 %v8464_v32, %v4137_v21 }
0x30b4   :  { %v4168_v42 = vpack.c.bf16 %v10453_v48, %v10453_v48  ;;  %v4167_v63 = vpack.c.bf16 %v10455_v43, %v10455_v43 }
0x30b6   :  { %v4228_v12 = vunpack.c.l.b16 %v4168_v42  ;;  %v4170_v9 = vunpack.c.l.b16 %v4167_v63 }
0x30b8   :  { %4230 = vperm.xlu0 %8061, %v4228_v12  }
0x30bc   :  { %4172 = vperm.xlu0 %8061, %v4170_v9  }
0x30c0   :  { %4317 = vrot.lane.b32.xlu0 %v10417_v50, %s8680_s12 }
0x3133   :  { %v4231_v40 = vpop.permute.xlu0 %4230 }
0x3134   :  { %v4235_v11 = vrot.slane %v4231_v40, %v8911_v19 }
0x3136   :  { %v4236_v24 = vpack.c.b16 %v4235_v11, %v4235_v11 }
0x3137   :  { %v4173_v30 = vpop.permute.xlu0 %4172 }
0x3138   :  { %v4177_v16 = vrot.slane %v4173_v30, %v8911_v19  ;;  %7851 = vmatmul.mubr.msk.bf16.vlgmr.msra.gmra.mxu0 %vm4179_vm9, %v4236_v24 }
0x3139   :  { %4457 = vmatpush1.bf16.msra.mxu0 %v10332_v28  ;;  %4476 = vmatprep.mubr.bf16.mxu0 %v8675_v2 }
0x313a   :  { %v4178_v50 = vpack.c.b16 %v4177_v16, %v4177_v16  ;;  %4458 = vmatprep.subr.bf16.mxu0 %v10357_v31 }
0x313b   :  { %v4318_v62 = vpop.permute.xlu0 %4317 }
0x313c   :  { %7845 = vmatmul.mubr.msk.bf16.vlgmr.msra.gmra.mxu1 %vm4179_vm9, %v4178_v50  ;;  %v4322_v5 = vsel %vm4321_vm10, %v4318_v62, %v4320_v23 }
0x313d   :  { %7855 = vmatpush3.bf16.msra.mxu1 %v10469_v34  ;;  %7862 = vmatprep.mubr.msk.bf16.mxu1 %vm8679_vm5, %v8678_v8 }
0x313e   :  { %7856 = vmatprep.subr.bf16.mxu1 %v8678_v8  ;;  %4459 = vmatpush1.bf16.msra.mxu0 %v10365_v45 }
0x313f   :  { %7866 = vmatprep.subr.bf16.mxu0 %v8678_v8 }
0x3141   :  { %7857 = vmatpush3.bf16.msra.mxu1 %v10484_v15 }
0x3142   :  { %7858 = vmatprep.subr.bf16.mxu1 %v8678_v8 }
0x3145   :  { %7859 = vmatpush3.bf16.msra.mxu1 %v10491_v58 }
0x3146   :  { %7860 = vmatprep.subr.bf16.mxu1 %v8678_v8 }
0x3149   :  { %7861 = vmatpush3.bf16.msra.mxu1 %v10497_v41 }
0x314a   :  { %7872 = vmatprep.subr.bf16.mxu1 %v8678_v8 }
0x31f8   :  { %v4277_v60 = vpop.f32.mrf.mxu0 }
0x31f9   :  { %v4284_v59 = vpack.c.bf16 %v4277_v60, %v4277_v60 }
0x31fa   :  { %v7852_v49 = vpop.f32.mrf.mxu0 }
0x31fb   :  { %v4288_v1 = vunpack.c.l.b16 %v4284_v59 }
0x31fc   :  { %v4221_v47 = vpop.f32.mrf.mxu1  ;;  %v4280_v26 = vpop.f32.mrf.mxu0 }
0x31fd   :  { %v4283_v61 = vpack.c.bf16 %v4221_v47, %v4221_v47  ;;  %v4289_v44 = vrot.slane %v4288_v1, 7 }
0x31fe   :  { %v7846_v53 = vpop.f32.mrf.mxu1  ;;  %v7853_v33 = vpop.f32.mrf.mxu0 }
0x31ff   :  { %v4287_v52 = vunpack.c.l.b16 %v4283_v61 }
0x3200   :  { %v4224_v38 = vpop.f32.mrf.mxu1 }
0x3201   :  { %v4290_v37 = vsel %vm352_vm1, %v4289_v44, %v4287_v52 }
0x3202   :  { %v4291_v57 = vpack.c.b16 %v4290_v37, %v4290_v37  ;;  %v7847_v0 = vpop.f32.mrf.mxu1 }
0x3204   :  { %7863 = vmatmul.mubr.msk.bf16.vlgmr.msra.gmra.mxu1 %vm358_vm2, %v4291_v57 }
0x3205   :  { %7873 = vmatpush3.bf16.msra.mxu1 %v10410_v25  ;;  %7874 = vmatprep.mubr.msk.bf16.mxu1 %vm8679_vm5, %v8678_v8 }
0x3206   :  { %4867 = vmatprep.subr.bf16.mxu1 %v10324_v18 }
0x32c4   :  { %v4361_v55 = vpop.f32.mrf.mxu1 }
0x32c5   :  { %v4362_v7 = vadd.f32 %v4361_v55, %v4322_v5 }
0x32c6   :  { %v7864_v32 = vpop.f32.mrf.mxu1 }
0x32c7   :  { %v4373_v14 = vadd.f32 %v10511_v29, %v4362_v7 }
0x32c8   :  { %v4364_v54 = vpop.f32.mrf.mxu1 }
0x32c9   :  { %8469 = vtanh.f32 %v4373_v14  ;;  %v7701_v51 = vmul.f32 -1.442695, %v4373_v14 }
0x32ca   :  { %v7865_v46 = vpop.f32.mrf.mxu1 }
0x32cb   :  { %8471 = vpow2.f32 %v7701_v51 }
0x32d6   :  { %v8470_v6 = vpop.eup %8469 }
0x32d7   :  { %4383 = vrot.lane.b32.xlu0 %v8470_v6, %s8676_s3 }
0x32d8   :  { %v8472_v35 = vpop.eup %8471 }
0x32d9   :  { %v4377_v10 = vadd.f32 1.0, %v8472_v35 }
0x32db   :  { %8473 = vrcp.f32 %v4377_v10 }
0x32e8   :  { %v8474_v13 = vpop.eup %8473 }
0x32e9   :  { %v4381_v21 = vmul.f32 0.0, %v8474_v13 }
0x3349   :  { %v4384_v4 = vpop.permute.xlu0 %4383 }
0x334a   :  { %v4386_v3 = vmul.f32 %v8474_v13, %v4384_v4 }
0x334c   :  { %4388 = vrot.lane.b32.xlu0 %v4386_v3, %s8681_s28 }
0x33be   :  { %v4389_v42 = vpop.permute.xlu0 %4388 }
0x33bf   :  { %v10517_v12 = vadd.f32 %v4389_v42, %v4381_v21 }
0x33c1   :  { %8475 = vtanh.f32 %v10517_v12 }
0x33ce   :  { %v8476_v63 = vpop.eup %8475 }
0x33cf   :  { %4394 = vrot.lane.b32.xlu0 %v8476_v63, %s8676_s3 }
0x3441   :  { %v4395_v9 = vpop.permute.xlu0 %4394 }
0x3442   :  { %v10521_v40 = vmul.f32 %v8474_v13, %v4395_v9 }
0x3444   :  { %v4437_v11 = vpack.c.bf16 %v10521_v40, %v10521_v40 }
0x3446   :  { %4439 = vrot.lane.b32.xlu0 %v4437_v11, %s8681_s28 }
0x34b8   :  { %v4440_v24 = vpop.permute.xlu0 %4439 }
0x34b9   :  { %7702 = vmatmul.mubr.msk.bf16.vlgmr.msra.gmra.mxu0 %vm3986_vm6, %v4440_v24 }
0x34ba   :  { %7867 = vmatpush3.bf16.msra.mxu0 %v10406_v36  ;;  %7868 = vmatprep.mubr.msk.bf16.mxu0 %vm8679_vm5, %v8678_v8 }
0x34bb   :  { %7878 = vmatprep.subr.bf16.mxu0 %v8678_v8 }
0x3579   :  { %v4478_v30 = vpop.f32.mrf.mxu0 }
0x357a   :  { %v4492_v16 = vrot.slane %v4478_v30, %v9180_v27 }
0x357b   :  { %v4480_v50 = vpop.f32.mrf.mxu0 }
0x357c   :  { %v4493_v60 = vcombine.high %v4492_v16, %v4492_v16  ;;  %v4500_v59 = vrot.slane %v4492_v16, %v9180_v27 }
0x357d   :  { %v4482_v49 = vpop.f32.mrf.mxu0 }
0x357e   :  { %v4507_v1 = vrot.slane %v4493_v60, %v9180_v27  ;;  %v4511_v47 = vrot.slane %v4500_v59, %v8914_v20 }
0x357f   :  { %v4483_v26 = vpop.f32.mrf.mxu0 }
0x3580   :  { %v4515_v61 = vrot.slane %v4507_v1, %v8914_v20  ;;  %v4518_v53 = vadd.f32 %v4511_v47, %v10424_v17 }
0x3582   :  { %v4519_v33 = vadd.f32 %v4515_v61, %v10428_v56  ;;  %8477 = vtanh.f32 %v4518_v53 }
0x3584   :  { %8479 = vtanh.f32 %v4519_v33 }
0x358f   :  { %v8478_v44 = vpop.eup %8477 }
0x3590   :  { %v4522_v52 = vmul.f32 %v8478_v44, %v10434_v39 }
0x3591   :  { %v8480_v38 = vpop.eup %8479 }
0x3592   :  { %v4524_v37 = vsel %vm3986_vm6, %v4522_v52, 0.0  ;;  %v4523_v57 = vmul.f32 %v8480_v38, %v10434_v39 }
0x3593   :  { %4525 = vadd.xlane.f32.xlu1 %v4524_v37 }
0x3594   :  { %v4527_v0 = vsel %vm3986_vm6, %v4523_v57, 0.0 }
0x3595   :  { %4528 = vadd.xlane.f32.xlu0 %v4527_v0 }
0x361c   :  { %v4526_v62 = vpop.xlane.xlu1 %4525 }
0x361d   :  { %v4535_v5 = vrot.slane %v4526_v62, %v8911_v19 }
0x361e   :  { %v4529_v23 = vpop.xlane.xlu0 %4528 }
0x361f   :  { %v4539_v55 = vrot.slane %v4529_v23, %v8911_v19 }
0x3621   :  { %v4540_v7 = vsel %vm352_vm1, %v4539_v55, %v4535_v5 }
0x3622   :  { %v4542_v32 = vsel %vm4090_vm8, %v4540_v7, -inf }
0x3623   :  { %4543 = vmax.xlane.f32.xlu0 %v4542_v32 }
0x36ac   :  { %v4544_v14 = vpop.xlane.xlu0 %4543 }
0x36ad   :  { %v4549_v54 = vrot.slane %v4544_v14, %v8914_v20  ;;  %v4553_v46 = vrot.slane %v4544_v14, %v8920_v22 }
0x36af   :  { %v4556_v6 = vsub.f32 %v4526_v62, %v4549_v54  ;;  %v4557_v51 = vsub.f32 %v4529_v23, %v4553_v46 }
0x36b1   :  { %v4558_v35 = vmul.f32 1.442695, %v4556_v6  ;;  %v4560_v10 = vmul.f32 1.442695, %v4557_v51 }
0x36b3   :  { %8481 = vpow2.f32 %v4558_v35 }
0x36b4   :  { %8483 = vpow2.f32 %v4560_v10 }
0x36c0   :  { %v8482_v13 = vpop.eup %8481 }
0x36c1   :  { %v8484_v4 = vpop.eup %8483  ;;  %4565 = vperm.xlu0 %8061, %v8482_v13  }
0x36c2   :  { %4568 = vperm.xlu1 %8062, %v8484_v4  }
0x373c   :  { %v4566_v3 = vpop.permute.xlu0 %4565 }
0x373d   :  { %v4569_v21 = vpop.permute.xlu1 %4568  ;;  %v4573_v42 = vrot.slane %v4566_v3, %v8911_v19 }
0x373e   :  { %v4577_v63 = vrot.slane %v4569_v21, %v8911_v19 }
0x3740   :  { %v4578_v9 = vsel %vm352_vm1, %v4577_v63, %v4573_v42 }
0x3741   :  { %v4580_v11 = vsel %vm4090_vm8, %v4578_v9, 0.0 }
0x3742   :  { %4581 = vadd.xlane.f32.xlu1 %v4580_v11 }
0x37cb   :  { %v4582_v24 = vpop.xlane.xlu1 %4581 }
0x37cc   :  { %8485 = vrcp.f32 %v4582_v24 }
0x37d9   :  { %v8486_v16 = vpop.eup %8485 }
0x37da   :  { %v4592_v60 = vrot.slane %v8486_v16, %v8920_v22  ;;  %v4588_v59 = vrot.slane %v8486_v16, %v8914_v20 }
0x37dc   :  { %v10554_v49 = vmul.f32 %v8484_v4, %v4592_v60  ;;  %v10556_v1 = vmul.f32 %v8482_v13, %v4588_v59 }
0x37de   :  { %v4618_v47 = vpack.c.bf16 %v10554_v49, %v10554_v49  ;;  %v4617_v61 = vpack.c.bf16 %v10556_v1, %v10556_v1 }
0x37e0   :  { %v4673_v26 = vunpack.c.l.b16 %v4618_v47  ;;  %v4620_v53 = vunpack.c.l.b16 %v4617_v61 }
0x37e2   :  { %4675 = vperm.xlu0 %8061, %v4673_v26  }
0x37e6   :  { %4622 = vperm.xlu0 %8061, %v4620_v53  }
0x37ea   :  { %4735 = vrot.lane.b32.xlu0 %v4478_v30, %s8680_s12 }
0x37ee   :  { %4737 = vrot.lane.b32.xlu0 %v4480_v50, %s8680_s12 }
0x385d   :  { %v4676_v33 = vpop.permute.xlu0 %4675 }
0x385e   :  { %v4680_v44 = vrot.slane %v4676_v33, %v8911_v19 }
0x3860   :  { %v4681_v52 = vpack.c.b16 %v4680_v44, %v4680_v44 }
0x3861   :  { %v4623_v38 = vpop.permute.xlu0 %4622 }
0x3862   :  { %v4627_v37 = vrot.slane %v4623_v38, %v8911_v19  ;;  %7875 = vmatmul.mubr.msk.bf16.vlgmr.msra.gmra.mxu1 %vm4179_vm9, %v4681_v52 }
0x3863   :  { %4868 = vmatpush1.bf16.msra.mxu1 %v10332_v28  ;;  %4887 = vmatprep.mubr.bf16.mxu1 %v8675_v2 }
0x3864   :  { %v4628_v57 = vpack.c.b16 %v4627_v37, %v4627_v37  ;;  %4869 = vmatprep.subr.bf16.mxu1 %v10357_v31 }
0x3865   :  { %v4736_v10 = vpop.permute.xlu0 %4735 }
0x3866   :  { %7869 = vmatmul.mubr.msk.bf16.vlgmr.msra.gmra.mxu0 %vm4179_vm9, %v4628_v57 }
0x3867   :  { %7879 = vmatpush3.bf16.msra.mxu0 %v10469_v34  ;;  %7886 = vmatprep.mubr.msk.bf16.mxu0 %vm8679_vm5, %v8678_v8 }
0x3868   :  { %7880 = vmatprep.subr.bf16.mxu0 %v8678_v8  ;;  %4870 = vmatpush1.bf16.msra.mxu1 %v10365_v45 }
0x3869   :  { %7890 = vmatprep.subr.bf16.mxu1 %v8678_v8  ;;  %v4738_v13 = vpop.permute.xlu0 %4737 }
0x386a   :  { %v4739_v4 = vsel %vm4321_vm10, %v4736_v10, %v4738_v13 }
0x386b   :  { %7881 = vmatpush3.bf16.msra.mxu0 %v10484_v15 }
0x386c   :  { %7882 = vmatprep.subr.bf16.mxu0 %v8678_v8 }
0x386f   :  { %7883 = vmatpush3.bf16.msra.mxu0 %v10491_v58 }
0x3870   :  { %7884 = vmatprep.subr.bf16.mxu0 %v8678_v8 }
0x3873   :  { %7885 = vmatpush3.bf16.msra.mxu0 %v10497_v41 }
0x3874   :  { %7896 = vmatprep.subr.bf16.mxu0 %v8678_v8 }
0x3922   :  { %v4719_v30 = vpop.f32.mrf.mxu1 }
0x3923   :  { %v4726_v50 = vpack.c.bf16 %v4719_v30, %v4719_v30 }
0x3924   :  { %v7876_v0 = vpop.f32.mrf.mxu1 }
0x3925   :  { %v4730_v62 = vunpack.c.l.b16 %v4726_v50 }
0x3926   :  { %v4666_v23 = vpop.f32.mrf.mxu0  ;;  %v4722_v5 = vpop.f32.mrf.mxu1 }
0x3927   :  { %v4725_v55 = vpack.c.bf16 %v4666_v23, %v4666_v23  ;;  %v4731_v14 = vrot.slane %v4730_v62, 7 }
0x3928   :  { %v7870_v7 = vpop.f32.mrf.mxu0  ;;  %v7877_v32 = vpop.f32.mrf.mxu1 }
0x3929   :  { %v4729_v54 = vunpack.c.l.b16 %v4725_v55 }
0x392a   :  { %v4669_v46 = vpop.f32.mrf.mxu0 }
0x392b   :  { %v4732_v6 = vsel %vm352_vm1, %v4731_v14, %v4729_v54 }
0x392c   :  { %v4733_v51 = vpack.c.b16 %v4732_v6, %v4732_v6  ;;  %v7871_v35 = vpop.f32.mrf.mxu0 }
0x392e   :  { %7887 = vmatmul.mubr.msk.bf16.vlgmr.msra.gmra.mxu0 %vm358_vm2, %v4733_v51 }
0x392f   :  { %7897 = vmatpush3.bf16.msra.mxu0 %v10410_v25  ;;  %7898 = vmatprep.mubr.msk.bf16.mxu0 %vm8679_vm5, %v8678_v8 }
0x3930   :  { %5278 = vmatprep.subr.bf16.mxu0 %v10324_v18 }
0x39ee   :  { %v4778_v3 = vpop.f32.mrf.mxu0 }
0x39ef   :  { %v4779_v21 = vadd.f32 %v4778_v3, %v4739_v4 }
0x39f0   :  { %v7888_v42 = vpop.f32.mrf.mxu0 }
0x39f1   :  { %v4784_v63 = vadd.f32 %v10511_v29, %v4779_v21 }
0x39f2   :  { %v4781_v9 = vpop.f32.mrf.mxu0 }
0x39f3   :  { %8487 = vtanh.f32 %v4784_v63  ;;  %v7706_v16 = vmul.f32 -1.442695, %v4784_v63 }
0x39f4   :  { %v7889_v11 = vpop.f32.mrf.mxu0 }
0x39f5   :  { %8489 = vpow2.f32 %v7706_v16 }
0x3a00   :  { %v8488_v24 = vpop.eup %8487 }
0x3a01   :  { %4794 = vrot.lane.b32.xlu0 %v8488_v24, %s8676_s3 }
0x3a02   :  { %v8490_v60 = vpop.eup %8489 }
0x3a03   :  { %v4788_v59 = vadd.f32 1.0, %v8490_v60 }
0x3a05   :  { %8491 = vrcp.f32 %v4788_v59 }
0x3a12   :  { %v8492_v47 = vpop.eup %8491 }
0x3a13   :  { %v4792_v53 = vmul.f32 %v8492_v47, %v10517_v12 }
0x3a73   :  { %v4795_v26 = vpop.permute.xlu0 %4794 }
0x3a74   :  { %v4797_v61 = vmul.f32 %v8492_v47, %v4795_v26 }
0x3a76   :  { %4799 = vrot.lane.b32.xlu0 %v4797_v61, %s8681_s28 }
0x3ae8   :  { %v4800_v33 = vpop.permute.xlu0 %4799 }
0x3ae9   :  { %v10594_v44 = vadd.f32 %v4800_v33, %v4792_v53 }
0x3aeb   :  { %8493 = vtanh.f32 %v10594_v44 }
0x3af8   :  { %v8494_v52 = vpop.eup %8493 }
0x3af9   :  { %4805 = vrot.lane.b32.xlu0 %v8494_v52, %s8676_s3 }
0x3b6b   :  { %v4806_v38 = vpop.permute.xlu0 %4805 }
0x3b6c   :  { %v10598_v37 = vmul.f32 %v8492_v47, %v4806_v38 }
0x3b6e   :  { %v4848_v57 = vpack.c.bf16 %v10598_v37, %v10598_v37 }
0x3b70   :  { %4850 = vrot.lane.b32.xlu0 %v4848_v57, %s8681_s28 }
0x3be2   :  { %v4851_v30 = vpop.permute.xlu0 %4850 }
0x3be3   :  { %7707 = vmatmul.mubr.msk.bf16.vlgmr.msra.gmra.mxu1 %vm3986_vm6, %v4851_v30 }
0x3be4   :  { %7891 = vmatpush3.bf16.msra.mxu1 %v10406_v36  ;;  %7892 = vmatprep.mubr.msk.bf16.mxu1 %vm8679_vm5, %v8678_v8 }
0x3be5   :  { %7902 = vmatprep.subr.bf16.mxu1 %v8678_v8 }
0x3ca3   :  { %v4889_v12 = vpop.f32.mrf.mxu1 }
0x3ca4   :  { %v4903_v50 = vrot.slane %v4889_v12, %v9180_v27 }
0x3ca5   :  { %v4891_v0 = vpop.f32.mrf.mxu1 }
0x3ca6   :  { %v4904_v62 = vcombine.high %v4903_v50, %v4903_v50  ;;  %v4911_v23 = vrot.slane %v4903_v50, %v9180_v27 }
0x3ca7   :  { %v4893_v5 = vpop.f32.mrf.mxu1 }
0x3ca8   :  { %v4918_v55 = vrot.slane %v4904_v62, %v9180_v27  ;;  %v4922_v7 = vrot.slane %v4911_v23, %v8914_v20 }
0x3ca9   :  { %v4894_v32 = vpop.f32.mrf.mxu1 }
0x3caa   :  { %v4926_v14 = vrot.slane %v4918_v55, %v8914_v20  ;;  %v4929_v54 = vadd.f32 %v4922_v7, %v10424_v17 }
0x3cac   :  { %v4930_v46 = vadd.f32 %v4926_v14, %v10428_v56  ;;  %8495 = vtanh.f32 %v4929_v54 }
0x3cae   :  { %8497 = vtanh.f32 %v4930_v46 }
0x3cb9   :  { %v8496_v6 = vpop.eup %8495 }
0x3cba   :  { %v4933_v51 = vmul.f32 %v8496_v6, %v10434_v39 }
0x3cbb   :  { %v8498_v35 = vpop.eup %8497 }
0x3cbc   :  { %v4935_v10 = vsel %vm3986_vm6, %v4933_v51, 0.0  ;;  %v4934_v13 = vmul.f32 %v8498_v35, %v10434_v39 }
0x3cbd   :  { %4936 = vadd.xlane.f32.xlu1 %v4935_v10 }
0x3cbe   :  { %v4938_v4 = vsel %vm3986_vm6, %v4934_v13, 0.0 }
0x3cbf   :  { %4939 = vadd.xlane.f32.xlu0 %v4938_v4 }
0x3d46   :  { %v4937_v3 = vpop.xlane.xlu1 %4936 }
0x3d47   :  { %v4946_v42 = vrot.slane %v4937_v3, %v8911_v19 }
0x3d48   :  { %v4940_v21 = vpop.xlane.xlu0 %4939 }
0x3d49   :  { %v4950_v63 = vrot.slane %v4940_v21, %v8911_v19 }
0x3d4b   :  { %v4951_v9 = vsel %vm352_vm1, %v4950_v63, %v4946_v42 }
0x3d4c   :  { %v4953_v11 = vsel %vm4090_vm8, %v4951_v9, -inf }
0x3d4d   :  { %4954 = vmax.xlane.f32.xlu1 %v4953_v11 }
0x3dd6   :  { %v4955_v24 = vpop.xlane.xlu1 %4954 }
0x3dd7   :  { %v4960_v16 = vrot.slane %v4955_v24, %v8914_v20  ;;  %v4964_v60 = vrot.slane %v4955_v24, %v8920_v22 }
0x3dd9   :  { %v4967_v59 = vsub.f32 %v4937_v3, %v4960_v16  ;;  %v4968_v47 = vsub.f32 %v4940_v21, %v4964_v60 }
0x3ddb   :  { %v4969_v26 = vmul.f32 1.442695, %v4967_v59  ;;  %v4971_v61 = vmul.f32 1.442695, %v4968_v47 }
0x3ddd   :  { %8499 = vpow2.f32 %v4969_v26 }
0x3dde   :  { %8501 = vpow2.f32 %v4971_v61 }
0x3dea   :  { %v8500_v53 = vpop.eup %8499 }
0x3deb   :  { %4976 = vperm.xlu1 %8062, %v8500_v53   ;;  %v8502_v33 = vpop.eup %8501 }
0x3def   :  { %4979 = vperm.xlu1 %8062, %v8502_v33  }
0x3e66   :  { %v4977_v52 = vpop.permute.xlu1 %4976 }
0x3e67   :  { %v4984_v57 = vrot.slane %v4977_v52, %v8911_v19 }
0x3e6a   :  { %v4980_v38 = vpop.permute.xlu1 %4979 }
0x3e6b   :  { %v4988_v30 = vrot.slane %v4980_v38, %v8911_v19 }
0x3e6d   :  { %v4989_v50 = vsel %vm352_vm1, %v4988_v30, %v4984_v57 }
0x3e6e   :  { %v4991_v62 = vsel %vm4090_vm8, %v4989_v50, 0.0 }
0x3e6f   :  { %4992 = vadd.xlane.f32.xlu1 %v4991_v62 }
0x3ef8   :  { %v4993_v23 = vpop.xlane.xlu1 %4992 }
0x3ef9   :  { %8503 = vrcp.f32 %v4993_v23 }
0x3f06   :  { %v8504_v5 = vpop.eup %8503 }
0x3f07   :  { %v5003_v55 = vrot.slane %v8504_v5, %v8920_v22  ;;  %v4999_v7 = vrot.slane %v8504_v5, %v8914_v20 }
0x3f09   :  { %v10631_v32 = vmul.f32 %v8502_v33, %v5003_v55  ;;  %v10633_v14 = vmul.f32 %v8500_v53, %v4999_v7 }
0x3f0b   :  { %v5029_v54 = vpack.c.bf16 %v10631_v32, %v10631_v32  ;;  %v5028_v6 = vpack.c.bf16 %v10633_v14, %v10633_v14 }
0x3f0d   :  { %v5084_v46 = vunpack.c.l.b16 %v5029_v54  ;;  %v5031_v51 = vunpack.c.l.b16 %v5028_v6 }
0x3f0f   :  { %5086 = vperm.xlu0 %8061, %v5084_v46  }
0x3f13   :  { %5033 = vperm.xlu0 %8061, %v5031_v51  }
0x3f17   :  { %5146 = vrot.lane.b32.xlu0 %v4889_v12, %s8680_s12 }
0x3f1b   :  { %5148 = vrot.lane.b32.xlu0 %v4891_v0, %s8680_s12 }
0x3f8a   :  { %v5087_v35 = vpop.permute.xlu0 %5086 }
0x3f8b   :  { %v5091_v10 = vrot.slane %v5087_v35, %v8911_v19 }
0x3f8d   :  { %v5092_v13 = vpack.c.b16 %v5091_v10, %v5091_v10 }
0x3f8e   :  { %v5034_v4 = vpop.permute.xlu0 %5033 }
0x3f8f   :  { %v5038_v3 = vrot.slane %v5034_v4, %v8911_v19  ;;  %7899 = vmatmul.mubr.msk.bf16.vlgmr.msra.gmra.mxu0 %vm4179_vm9, %v5092_v13 }
0x3f90   :  { %5279 = vmatpush1.bf16.msra.mxu0 %v10332_v28  ;;  %5298 = vmatprep.mubr.bf16.mxu0 %v8675_v2 }
0x3f91   :  { %v5039_v21 = vpack.c.b16 %v5038_v3, %v5038_v3  ;;  %5280 = vmatprep.subr.bf16.mxu0 %v10357_v31 }
0x3f92   :  { %v5147_v61 = vpop.permute.xlu0 %5146 }
0x3f93   :  { %7893 = vmatmul.mubr.msk.bf16.vlgmr.msra.gmra.mxu1 %vm4179_vm9, %v5039_v21 }
0x3f94   :  { %7903 = vmatpush3.bf16.msra.mxu1 %v10469_v34  ;;  %7910 = vmatprep.mubr.msk.bf16.mxu1 %vm8679_vm5, %v8678_v8 }
0x3f95   :  { %7904 = vmatprep.subr.bf16.mxu1 %v8678_v8  ;;  %5281 = vmatpush1.bf16.msra.mxu0 %v10365_v45 }
0x3f96   :  { %7914 = vmatprep.subr.bf16.mxu0 %v8678_v8  ;;  %v5149_v53 = vpop.permute.xlu0 %5148 }
0x3f97   :  { %v5150_v33 = vsel %vm4321_vm10, %v5147_v61, %v5149_v53 }
0x3f98   :  { %7905 = vmatpush3.bf16.msra.mxu1 %v10484_v15 }
0x3f99   :  { %7906 = vmatprep.subr.bf16.mxu1 %v8678_v8 }
0x3f9c   :  { %7907 = vmatpush3.bf16.msra.mxu1 %v10491_v58 }
0x3f9d   :  { %7908 = vmatprep.subr.bf16.mxu1 %v8678_v8 }
0x3fa0   :  { %7909 = vmatpush3.bf16.msra.mxu1 %v10497_v41 }
0x3fa1   :  { %7920 = vmatprep.subr.bf16.mxu1 %v8678_v8 }
0x404f   :  { %v5130_v28 = vpop.f32.mrf.mxu0 }
0x4050   :  { %v5137_v31 = vpack.c.bf16 %v5130_v28, %v5130_v28 }
0x4051   :  { %v7900_v12 = vpop.f32.mrf.mxu0 }
0x4052   :  { %v5141_v0 = vunpack.c.l.b16 %v5137_v31 }
0x4053   :  { %v5077_v42 = vpop.f32.mrf.mxu1  ;;  %v5133_v45 = vpop.f32.mrf.mxu0 }
0x4054   :  { %v5136_v63 = vpack.c.bf16 %v5077_v42, %v5077_v42  ;;  %v5142_v24 = vrot.slane %v5141_v0, 7 }
0x4055   :  { %v7894_v9 = vpop.f32.mrf.mxu1  ;;  %v7901_v11 = vpop.f32.mrf.mxu0 }
0x4056   :  { %v5140_v16 = vunpack.c.l.b16 %v5136_v63 }
0x4057   :  { %v5080_v60 = vpop.f32.mrf.mxu1 }
0x4058   :  { %v5143_v59 = vsel %vm352_vm1, %v5142_v24, %v5140_v16 }
0x4059   :  { %v5144_v47 = vpack.c.b16 %v5143_v59, %v5143_v59  ;;  %v7895_v26 = vpop.f32.mrf.mxu1 }
0x405b   :  { %7911 = vmatmul.mubr.msk.bf16.vlgmr.msra.gmra.mxu1 %vm358_vm2, %v5144_v47 }
0x405c   :  { %7921 = vmatpush3.bf16.msra.mxu1 %v10410_v25  ;;  %7922 = vmatprep.mubr.msk.bf16.mxu1 %vm8679_vm5, %v8678_v8 }
0x405d   :  { %5689 = vmatprep.subr.bf16.mxu1 %v10324_v18 }
0x411b   :  { %v5189_v52 = vpop.f32.mrf.mxu1 }
0x411c   :  { %v5190_v38 = vadd.f32 %v5189_v52, %v5150_v33 }
0x411d   :  { %v7912_v57 = vpop.f32.mrf.mxu1 }
0x411e   :  { %v5195_v30 = vadd.f32 %v10511_v29, %v5190_v38 }
0x411f   :  { %v5192_v50 = vpop.f32.mrf.mxu1 }
0x4120   :  { %8505 = vtanh.f32 %v5195_v30  ;;  %v7711_v5 = vmul.f32 -1.442695, %v5195_v30 }
0x4121   :  { %v7913_v62 = vpop.f32.mrf.mxu1 }
0x4122   :  { %8507 = vpow2.f32 %v7711_v5 }
0x412d   :  { %v8506_v23 = vpop.eup %8505 }
0x412e   :  { %5205 = vrot.lane.b32.xlu1 %v8506_v23, %s8676_s3 }
0x412f   :  { %v8508_v55 = vpop.eup %8507 }
0x4130   :  { %v5199_v7 = vadd.f32 1.0, %v8508_v55 }
0x4132   :  { %8509 = vrcp.f32 %v5199_v7 }
0x413f   :  { %v8510_v18 = vpop.eup %8509 }
0x4140   :  { %v5203_v6 = vmul.f32 %v8510_v18, %v10594_v44 }
0x41a0   :  { %v5206_v54 = vpop.permute.xlu1 %5205 }
0x41a1   :  { %v5208_v46 = vmul.f32 %v8510_v18, %v5206_v54 }
0x41a3   :  { %5210 = vrot.lane.b32.xlu0 %v5208_v46, %s8681_s28 }
0x4215   :  { %v5211_v51 = vpop.permute.xlu0 %5210 }
0x4216   :  { %v10671_v35 = vadd.f32 %v5211_v51, %v5203_v6 }
0x4218   :  { %8511 = vtanh.f32 %v10671_v35 }
0x4225   :  { %v8512_v10 = vpop.eup %8511 }
0x4226   :  { %5216 = vrot.lane.b32.xlu0 %v8512_v10, %s8676_s3 }
0x4298   :  { %v5217_v13 = vpop.permute.xlu0 %5216 }
0x4299   :  { %v10675_v4 = vmul.f32 %v8510_v18, %v5217_v13 }
0x429b   :  { %v5259_v3 = vpack.c.bf16 %v10675_v4, %v10675_v4 }
0x429d   :  { %5261 = vrot.lane.b32.xlu0 %v5259_v3, %s8681_s28 }
0x430f   :  { %v5262_v21 = vpop.permute.xlu0 %5261 }
0x4310   :  { %7712 = vmatmul.mubr.msk.bf16.vlgmr.msra.gmra.mxu0 %vm3986_vm6, %v5262_v21 }
0x4311   :  { %7915 = vmatpush3.bf16.msra.mxu0 %v10406_v36  ;;  %7916 = vmatprep.mubr.msk.bf16.mxu0 %vm8679_vm5, %v8678_v8 }
0x4312   :  { %7926 = vmatprep.subr.bf16.mxu0 %v8678_v8 }
0x43d0   :  { %v5300_v44 = vpop.f32.mrf.mxu0 }
0x43d1   :  { %v5314_v28 = vrot.slane %v5300_v44, %v9180_v27 }
0x43d2   :  { %v5302_v31 = vpop.f32.mrf.mxu0 }
0x43d3   :  { %v5315_v12 = vcombine.high %v5314_v28, %v5314_v28  ;;  %v5322_v0 = vrot.slane %v5314_v28, %v9180_v27 }
0x43d4   :  { %v5304_v42 = vpop.f32.mrf.mxu0 }
0x43d5   :  { %v5329_v45 = vrot.slane %v5315_v12, %v9180_v27  ;;  %v5333_v63 = vrot.slane %v5322_v0, %v8914_v20 }
0x43d6   :  { %v5305_v9 = vpop.f32.mrf.mxu0 }
0x43d7   :  { %v5337_v11 = vrot.slane %v5329_v45, %v8914_v20  ;;  %v5340_v24 = vadd.f32 %v5333_v63, %v10424_v17 }
0x43d9   :  { %v5341_v16 = vadd.f32 %v5337_v11, %v10428_v56  ;;  %8513 = vtanh.f32 %v5340_v24 }
0x43db   :  { %8515 = vtanh.f32 %v5341_v16 }
0x43e6   :  { %v8514_v60 = vpop.eup %8513 }
0x43e7   :  { %v5344_v59 = vmul.f32 %v8514_v60, %v10434_v39 }
0x43e8   :  { %v8516_v47 = vpop.eup %8515 }
0x43e9   :  { %v5346_v26 = vsel %vm3986_vm6, %v5344_v59, 0.0  ;;  %v5345_v61 = vmul.f32 %v8516_v47, %v10434_v39 }
0x43ea   :  { %5347 = vadd.xlane.f32.xlu0 %v5346_v26 }
0x43eb   :  { %v5349_v53 = vsel %vm3986_vm6, %v5345_v61, 0.0 }
0x43ec   :  { %5350 = vadd.xlane.f32.xlu1 %v5349_v53  ;;  %v10724_v53 = vld [vmem:[%s11315_s15 + $0x10] ss:$8 sps:$4 sm:$0xff]  }
0x4473   :  { %v5348_v33 = vpop.xlane.xlu0 %5347 }
0x4474   :  { %v5357_v38 = vrot.slane %v5348_v33, %v8911_v19 }
0x4475   :  { %v5351_v52 = vpop.xlane.xlu1 %5350 }
0x4476   :  { %v5361_v57 = vrot.slane %v5351_v52, %v8911_v19 }
0x4478   :  { %v5362_v30 = vsel %vm352_vm1, %v5361_v57, %v5357_v38 }
0x4479   :  { %v5364_v50 = vsel %vm4090_vm8, %v5362_v30, -inf }
0x447a   :  { %5365 = vmax.xlane.f32.xlu0 %v5364_v50 }
0x4503   :  { %v5366_v62 = vpop.xlane.xlu0 %5365 }
0x4504   :  { %v5371_v23 = vrot.slane %v5366_v62, %v8914_v20  ;;  %v5375_v39 = vrot.slane %v5366_v62, %v8920_v22 }
0x4506   :  { %v5378_v5 = vsub.f32 %v5348_v33, %v5371_v23  ;;  %v5379_v55 = vsub.f32 %v5351_v52, %v5375_v39  ;;  %v10742_v33 = vld [vmem:[%s11315_s15] ss:$8 sps:$4 sm:$0xff]  }
0x4508   :  { %v5380_v7 = vmul.f32 1.442695, %v5378_v5  ;;  %v5382_v18 = vmul.f32 1.442695, %v5379_v55 }
0x450a   :  { %8517 = vpow2.f32 %v5380_v7 }
0x450b   :  { %8519 = vpow2.f32 %v5382_v18 }
0x4517   :  { %v8518_v54 = vpop.eup %8517 }
0x4518   :  { %v8520_v46 = vpop.eup %8519  ;;  %5387 = vperm.xlu0 %8061, %v8518_v54  }
0x4519   :  { %5390 = vperm.xlu1 %8062, %v8520_v46  }
0x4593   :  { %v5388_v6 = vpop.permute.xlu0 %5387 }
0x4594   :  { %v5391_v51 = vpop.permute.xlu1 %5390  ;;  %v5395_v10 = vrot.slane %v5388_v6, %v8911_v19 }
0x4595   :  { %v5399_v13 = vrot.slane %v5391_v51, %v8911_v19 }
0x4597   :  { %v5400_v3 = vsel %vm352_vm1, %v5399_v13, %v5395_v10 }
0x4598   :  { %v5402_v21 = vsel %vm4090_vm8, %v5400_v3, 0.0 }
0x4599   :  { %5403 = vadd.xlane.f32.xlu0 %v5402_v21 }
0x4622   :  { %v5404_v28 = vpop.xlane.xlu0 %5403 }
0x4623   :  { %8521 = vrcp.f32 %v5404_v28 }
0x4630   :  { %v8522_v12 = vpop.eup %8521 }
0x4631   :  { %v5414_v0 = vrot.slane %v8522_v12, %v8920_v22  ;;  %v5410_v42 = vrot.slane %v8522_v12, %v8914_v20 }
0x4633   :  { %v10708_v45 = vmul.f32 %v8520_v46, %v5414_v0  ;;  %v10710_v63 = vmul.f32 %v8518_v54, %v5410_v42 }
0x4635   :  { %v5440_v9 = vpack.c.bf16 %v10708_v45, %v10708_v45  ;;  %v5439_v24 = vpack.c.bf16 %v10710_v63, %v10710_v63 }
0x4637   :  { %v5495_v11 = vunpack.c.l.b16 %v5440_v9  ;;  %v5442_v16 = vunpack.c.l.b16 %v5439_v24 }
0x4639   :  { %5497 = vperm.xlu1 %8062, %v5495_v11  }
0x463d   :  { %5444 = vperm.xlu1 %8062, %v5442_v16  }
0x4641   :  { %5557 = vrot.lane.b32.xlu1 %v5300_v44, %s8680_s12 }
0x4645   :  { %5559 = vrot.lane.b32.xlu1 %v5302_v31, %s8680_s12  ;;  %v10731_v31 = vld [vmem:[%s11315_s15 + $0x4] ss:$8 sps:$4 sm:$0xff]  }
0x46b4   :  { %v5498_v60 = vpop.permute.xlu1 %5497 }
0x46b5   :  { %v5502_v59 = vrot.slane %v5498_v60, %v8911_v19 }
0x46b7   :  { %v5503_v47 = vpack.c.b16 %v5502_v59, %v5502_v59 }
0x46b8   :  { %v5445_v26 = vpop.permute.xlu1 %5444 }
0x46b9   :  { %v5449_v61 = vrot.slane %v5445_v26, %v8911_v19  ;;  %7923 = vmatmul.mubr.msk.bf16.vlgmr.msra.gmra.mxu1 %vm4179_vm9, %v5503_v47 }
0x46ba   :  { %5690 = vmatpush1.bf16.msra.mxu1 %v10724_v53  ;;  %5709 = vmatprep.mubr.bf16.mxu1 %v8675_v2 }
0x46bb   :  { %v5450_v44 = vpack.c.b16 %v5449_v61, %v5449_v61  ;;  %5691 = vmatprep.subr.bf16.mxu1 %v10731_v31 }
0x46bc   :  { %v5558_v54 = vpop.permute.xlu1 %5557 }
0x46bd   :  { %7917 = vmatmul.mubr.msk.bf16.vlgmr.msra.gmra.mxu0 %vm4179_vm9, %v5450_v44 }
0x46be   :  { %7927 = vmatpush3.bf16.msra.mxu0 %v10469_v34  ;;  %7934 = vmatprep.mubr.msk.bf16.mxu0 %vm8679_vm5, %v8678_v8 }
0x46bf   :  { %7928 = vmatprep.subr.bf16.mxu0 %v8678_v8  ;;  %5692 = vmatpush1.bf16.msra.mxu1 %v10742_v33 }
0x46c0   :  { %7938 = vmatprep.subr.bf16.mxu1 %v8678_v8  ;;  %v5560_v46 = vpop.permute.xlu1 %5559 }
0x46c1   :  { %v5561_v6 = vsel %vm4321_vm10, %v5558_v54, %v5560_v46 }
0x46c2   :  { %7929 = vmatpush3.bf16.msra.mxu0 %v10484_v15 }
0x46c3   :  { %7930 = vmatprep.subr.bf16.mxu0 %v8678_v8 }
0x46c6   :  { %7931 = vmatpush3.bf16.msra.mxu0 %v10491_v58 }
0x46c7   :  { %7932 = vmatprep.subr.bf16.mxu0 %v8678_v8 }
0x46ca   :  { %7933 = vmatpush3.bf16.msra.mxu0 %v10497_v41  ;;  %v10760_v41 = vld [vmem:[%s11315_s15 + $0x14] ss:$8 sps:$4 sm:$0xff]  }
0x46cb   :  { %7944 = vmatprep.subr.bf16.mxu0 %v8678_v8 }
0x4779   :  { %v5541_v34 = vpop.f32.mrf.mxu1 }
0x477a   :  { %v5548_v52 = vpack.c.bf16 %v5541_v34, %v5541_v34 }
0x477b   :  { %v7924_v38 = vpop.f32.mrf.mxu1 }
0x477c   :  { %v5552_v57 = vunpack.c.l.b16 %v5548_v52 }
0x477d   :  { %v5488_v30 = vpop.f32.mrf.mxu0  ;;  %v5544_v50 = vpop.f32.mrf.mxu1 }
0x477e   :  { %v5547_v62 = vpack.c.bf16 %v5488_v30, %v5488_v30  ;;  %v5553_v15 = vrot.slane %v5552_v57, 7 }
0x477f   :  { %v7918_v23 = vpop.f32.mrf.mxu0  ;;  %v7925_v39 = vpop.f32.mrf.mxu1 }
0x4780   :  { %v5551_v5 = vunpack.c.l.b16 %v5547_v62 }
0x4781   :  { %v5491_v55 = vpop.f32.mrf.mxu0 }
0x4782   :  { %v5554_v58 = vsel %vm352_vm1, %v5553_v15, %v5551_v5 }
0x4783   :  { %v5555_v7 = vpack.c.b16 %v5554_v58, %v5554_v58  ;;  %v7919_v18 = vpop.f32.mrf.mxu0 }
0x4785   :  { %7935 = vmatmul.mubr.msk.bf16.vlgmr.msra.gmra.mxu0 %vm358_vm2, %v5555_v7  ;;  %v10792_v7 = vld [vmem:[%s11314_s14] ss:$0 sm:$0xff]  ;;  %s7520_s14 = sshll.u32 %s8683_s30, 4  ;;  %s7521_s14 = int_to_ptr.vmem [resolvable:$true] %s7520_s14 }
0x4786   :  { %7945 = vmatpush3.bf16.msra.mxu0 %v10410_v25  ;;  %7946 = vmatprep.mubr.msk.bf16.mxu0 %vm8679_vm5, %v8678_v8 }
0x4787   :  { %6100 = vmatprep.subr.bf16.mxu0 %v10760_v41 }
0x4845   :  { %v5600_v51 = vpop.f32.mrf.mxu0 }
0x4846   :  { %v5601_v10 = vadd.f32 %v5600_v51, %v5561_v6 }
0x4847   :  { %v7936_v13 = vpop.f32.mrf.mxu0 }
0x4848   :  { %v5606_v3 = vadd.f32 %v10511_v29, %v5601_v10 }
0x4849   :  { %v5603_v21 = vpop.f32.mrf.mxu0 }
0x484a   :  { %8523 = vtanh.f32 %v5606_v3  ;;  %v7716_v0 = vmul.f32 -1.442695, %v5606_v3 }
0x484b   :  { %v7937_v28 = vpop.f32.mrf.mxu0 }
0x484c   :  { %8525 = vpow2.f32 %v7716_v0 }
0x4857   :  { %v8524_v12 = vpop.eup %8523 }
0x4858   :  { %5616 = vrot.lane.b32.xlu1 %v8524_v12, %s8676_s3 }
0x4859   :  { %v8526_v42 = vpop.eup %8525 }
0x485a   :  { %v5610_v9 = vadd.f32 1.0, %v8526_v42 }
0x485c   :  { %8527 = vrcp.f32 %v5610_v9 }
0x4869   :  { %v8528_v11 = vpop.eup %8527 }
0x486a   :  { %v5614_v60 = vmul.f32 %v8528_v11, %v10671_v35 }
0x48ca   :  { %v5617_v24 = vpop.permute.xlu1 %5616 }
0x48cb   :  { %v5619_v16 = vmul.f32 %v8528_v11, %v5617_v24 }
0x48cd   :  { %5621 = vrot.lane.b32.xlu1 %v5619_v16, %s8681_s28 }
0x493f   :  { %v5622_v59 = vpop.permute.xlu1 %5621 }
0x4940   :  { %v10768_v29 = vadd.f32 %v5622_v59, %v5614_v60 }
0x4942   :  { %8529 = vtanh.f32 %v10768_v29 }
0x494f   :  { %v8530_v47 = vpop.eup %8529 }
0x4950   :  { %5627 = vrot.lane.b32.xlu1 %v8530_v47, %s8676_s3 }
0x49c2   :  { %v5628_v26 = vpop.permute.xlu1 %5627 }
0x49c3   :  { %v10772_v61 = vmul.f32 %v8528_v11, %v5628_v26 }
0x49c5   :  { %v5670_v44 = vpack.c.bf16 %v10772_v61, %v10772_v61 }
0x49c7   :  { %5672 = vrot.lane.b32.xlu1 %v5670_v44, %s8681_s28 }
0x4a39   :  { %v5673_v34 = vpop.permute.xlu1 %5672 }
0x4a3a   :  { %7717 = vmatmul.mubr.msk.bf16.vlgmr.msra.gmra.mxu1 %vm3986_vm6, %v5673_v34 }
0x4a3b   :  { %7939 = vmatpush3.bf16.msra.mxu1 %v10406_v36  ;;  %7940 = vmatprep.mubr.msk.bf16.mxu1 %vm8679_vm5, %v8678_v8 }
0x4a3c   :  { %7950 = vmatprep.subr.bf16.mxu1 %v8678_v8 }
0x4afa   :  { %v5711_v35 = vpop.f32.mrf.mxu1 }
0x4afb   :  { %v5725_v52 = vrot.slane %v5711_v35, %v9180_v27 }
0x4afc   :  { %v5713_v38 = vpop.f32.mrf.mxu1 }
0x4afd   :  { %v5726_v57 = vcombine.high %v5725_v52, %v5725_v52  ;;  %v5733_v30 = vrot.slane %v5725_v52, %v9180_v27 }
0x4afe   :  { %v5715_v50 = vpop.f32.mrf.mxu1 }
0x4aff   :  { %v5740_v62 = vrot.slane %v5726_v57, %v9180_v27  ;;  %v5744_v23 = vrot.slane %v5733_v30, %v8914_v20 }
0x4b00   :  { %v5716_v39 = vpop.f32.mrf.mxu1 }
0x4b01   :  { %v5748_v15 = vrot.slane %v5740_v62, %v8914_v20  ;;  %v5751_v5 = vadd.f32 %v5744_v23, %v10424_v17 }
0x4b03   :  { %v5752_v55 = vadd.f32 %v5748_v15, %v10428_v56  ;;  %8531 = vtanh.f32 %v5751_v5 }
0x4b05   :  { %8533 = vtanh.f32 %v5752_v55 }
0x4b10   :  { %v8532_v58 = vpop.eup %8531 }
0x4b11   :  { %v5755_v18 = vmul.f32 %v10792_v7, %v8532_v58 }
0x4b12   :  { %v8534_v54 = vpop.eup %8533 }
0x4b13   :  { %v5757_v46 = vsel %vm3986_vm6, %v5755_v18, 0.0  ;;  %v5756_v6 = vmul.f32 %v10792_v7, %v8534_v54 }
0x4b14   :  { %5758 = vadd.xlane.f32.xlu0 %v5757_v46 }
0x4b15   :  { %v5760_v51 = vsel %vm3986_vm6, %v5756_v6, 0.0 }
0x4b16   :  { %5761 = vadd.xlane.f32.xlu1 %v5760_v51 }
0x4b9d   :  { %v5759_v10 = vpop.xlane.xlu0 %5758 }
0x4b9e   :  { %v5768_v3 = vrot.slane %v5759_v10, %v8911_v19 }
0x4b9f   :  { %v5762_v13 = vpop.xlane.xlu1 %5761 }
0x4ba0   :  { %v5772_v21 = vrot.slane %v5762_v13, %v8911_v19 }
0x4ba2   :  { %v5773_v28 = vsel %vm352_vm1, %v5772_v21, %v5768_v3  ;;  %v10848_v21 = vld [vmem:[%s11316_s16 + $0x8] sm:$0xff]  }
0x4ba3   :  { %v5775_v12 = vsel %vm4090_vm8, %v5773_v28, -inf  ;;  %v10855_v28 = vld [vmem:[%s11316_s16] sm:$0xff]  }
0x4ba4   :  { %5776 = vmax.xlane.f32.xlu0 %v5775_v12 }
0x4c2d   :  { %v5777_v0 = vpop.xlane.xlu0 %5776 }
0x4c2e   :  { %v5782_v42 = vrot.slane %v5777_v0, %v8914_v20  ;;  %v5786_v9 = vrot.slane %v5777_v0, %v8920_v22 }
0x4c30   :  { %v5789_v11 = vsub.f32 %v5759_v10, %v5782_v42  ;;  %v5790_v24 = vsub.f32 %v5762_v13, %v5786_v9 }
0x4c32   :  { %v5791_v16 = vmul.f32 1.442695, %v5789_v11  ;;  %v5793_v60 = vmul.f32 1.442695, %v5790_v24 }
0x4c34   :  { %8535 = vpow2.f32 %v5791_v16 }
0x4c35   :  { %8537 = vpow2.f32 %v5793_v60 }
0x4c41   :  { %v8536_v59 = vpop.eup %8535 }
0x4c42   :  { %5798 = vperm.xlu0 %8061, %v8536_v59   ;;  %v8538_v47 = vpop.eup %8537 }
0x4c46   :  { %5801 = vperm.xlu0 %8061, %v8538_v47  }
0x4cbd   :  { %v5799_v26 = vpop.permute.xlu0 %5798 }
0x4cbe   :  { %v5806_v34 = vrot.slane %v5799_v26, %v8911_v19 }
0x4cc1   :  { %v5802_v44 = vpop.permute.xlu0 %5801 }
0x4cc2   :  { %v5810_v52 = vrot.slane %v5802_v44, %v8911_v19 }
0x4cc4   :  { %v5811_v57 = vsel %vm352_vm1, %v5810_v52, %v5806_v34 }
0x4cc5   :  { %v5813_v30 = vsel %vm4090_vm8, %v5811_v57, 0.0 }
0x4cc6   :  { %5814 = vadd.xlane.f32.xlu0 %v5813_v30 }
0x4d4f   :  { %v5815_v50 = vpop.xlane.xlu0 %5814 }
0x4d50   :  { %8539 = vrcp.f32 %v5815_v50 }
0x4d5d   :  { %v8540_v62 = vpop.eup %8539 }
0x4d5e   :  { %v5825_v23 = vrot.slane %v8540_v62, %v8920_v22  ;;  %v5821_v39 = vrot.slane %v8540_v62, %v8914_v20 }
0x4d60   :  { %v10810_v15 = vmul.f32 %v8538_v47, %v5825_v23  ;;  %v10812_v5 = vmul.f32 %v8536_v59, %v5821_v39 }
0x4d62   :  { %v5851_v55 = vpack.c.bf16 %v10810_v15, %v10810_v15  ;;  %v5850_v18 = vpack.c.bf16 %v10812_v5, %v10812_v5 }
0x4d64   :  { %v5906_v58 = vunpack.c.l.b16 %v5851_v55  ;;  %v5853_v54 = vunpack.c.l.b16 %v5850_v18 }
0x4d66   :  { %5908 = vperm.xlu1 %8062, %v5906_v58   ;;  %v10869_v58 = vld [vmem:[%s11317_s17] ss:$0 sm:$0xff] }
0x4d6a   :  { %5855 = vperm.xlu1 %8062, %v5853_v54  }
0x4d6e   :  { %5968 = vrot.lane.b32.xlu1 %v5711_v35, %s8680_s12  ;;  %v10830_v35 = vld [vmem:[%s11316_s16 + $0x18] sm:$0xff]  }
0x4d72   :  { %5970 = vrot.lane.b32.xlu1 %v5713_v38, %s8680_s12  ;;  %v10841_v38 = vld [vmem:[%s11316_s16 + $0x10] sm:$0xff]  }
0x4de1   :  { %v5909_v46 = vpop.permute.xlu1 %5908 }
0x4de2   :  { %v5913_v6 = vrot.slane %v5909_v46, %v8911_v19 }
0x4de4   :  { %v5914_v51 = vpack.c.b16 %v5913_v6, %v5913_v6 }
0x4de5   :  { %v5856_v10 = vpop.permute.xlu1 %5855 }
0x4de6   :  { %v5860_v13 = vrot.slane %v5856_v10, %v8911_v19  ;;  %7947 = vmatmul.mubr.msk.bf16.vlgmr.msra.gmra.mxu0 %vm4179_vm9, %v5914_v51 }
0x4de7   :  { %6101 = vmatpush1.bf16.msra.mxu0 %v10724_v53  ;;  %6120 = vmatprep.mubr.bf16.mxu0 %v8675_v2 }
0x4de8   :  { %v5861_v3 = vpack.c.b16 %v5860_v13, %v5860_v13  ;;  %6102 = vmatprep.subr.bf16.mxu0 %v10731_v31 }
0x4de9   :  { %v5969_v30 = vpop.permute.xlu1 %5968 }
0x4dea   :  { %7941 = vmatmul.mubr.msk.bf16.vlgmr.msra.gmra.mxu1 %vm4179_vm9, %v5861_v3 }
0x4deb   :  { %7951 = vmatpush3.bf16.msra.mxu1 %v10830_v35  ;;  %7958 = vmatprep.mubr.msk.bf16.mxu1 %vm8679_vm5, %v8678_v8 }
0x4dec   :  { %7952 = vmatprep.subr.bf16.mxu1 %v8678_v8  ;;  %6103 = vmatpush1.bf16.msra.mxu0 %v10742_v33 }
0x4ded   :  { %7962 = vmatprep.subr.bf16.mxu0 %v8678_v8  ;;  %v5971_v50 = vpop.permute.xlu1 %5970 }
0x4dee   :  { %v5972_v62 = vsel %vm4321_vm10, %v5969_v30, %v5971_v50 }
0x4def   :  { %7953 = vmatpush3.bf16.msra.mxu1 %v10841_v38 }
0x4df0   :  { %7954 = vmatprep.subr.bf16.mxu1 %v8678_v8 }
0x4df3   :  { %7955 = vmatpush3.bf16.msra.mxu1 %v10848_v21 }
0x4df4   :  { %7956 = vmatprep.subr.bf16.mxu1 %v8678_v8 }
0x4df7   :  { %7957 = vmatpush3.bf16.msra.mxu1 %v10855_v28 }
0x4df8   :  { %7968 = vmatprep.subr.bf16.mxu1 %v8678_v8 }
0x4ea6   :  { %v5952_v12 = vpop.f32.mrf.mxu0 }
0x4ea7   :  { %v5959_v0 = vpack.c.bf16 %v5952_v12, %v5952_v12 }
0x4ea8   :  { %v7948_v42 = vpop.f32.mrf.mxu0 }
0x4ea9   :  { %v5963_v9 = vunpack.c.l.b16 %v5959_v0 }
0x4eaa   :  { %v5899_v11 = vpop.f32.mrf.mxu1  ;;  %v5955_v24 = vpop.f32.mrf.mxu0 }
0x4eab   :  { %v5958_v16 = vpack.c.bf16 %v5899_v11, %v5899_v11  ;;  %v5964_v47 = vrot.slane %v5963_v9, 7 }
0x4eac   :  { %v7942_v60 = vpop.f32.mrf.mxu1  ;;  %v7949_v59 = vpop.f32.mrf.mxu0 }
0x4ead   :  { %v5962_v26 = vunpack.c.l.b16 %v5958_v16 }
0x4eae   :  { %v5902_v44 = vpop.f32.mrf.mxu1 }
0x4eaf   :  { %v5965_v34 = vsel %vm352_vm1, %v5964_v47, %v5962_v26 }
0x4eb0   :  { %v5966_v52 = vpack.c.b16 %v5965_v34, %v5965_v34  ;;  %v7943_v57 = vpop.f32.mrf.mxu1 }
0x4eb2   :  { %7959 = vmatmul.mubr.msk.bf16.vlgmr.msra.gmra.mxu1 %vm358_vm2, %v5966_v52 }
0x4eb3   :  { %7969 = vmatpush3.bf16.msra.mxu1 %v10410_v25  ;;  %7970 = vmatprep.mubr.msk.bf16.mxu1 %vm8679_vm5, %v8678_v8 }
0x4eb4   :  { %6511 = vmatprep.subr.bf16.mxu1 %v10760_v41 }
0x4f72   :  { %v6011_v23 = vpop.f32.mrf.mxu1 }
0x4f73   :  { %v6012_v39 = vadd.f32 %v6011_v23, %v5972_v62 }
0x4f74   :  { %v7960_v55 = vpop.f32.mrf.mxu1 }
0x4f75   :  { %v6017_v18 = vadd.f32 %v10869_v58, %v6012_v39 }
0x4f76   :  { %v6014_v54 = vpop.f32.mrf.mxu1 }
0x4f77   :  { %8541 = vtanh.f32 %v6017_v18  ;;  %v7721_v51 = vmul.f32 -1.442695, %v6017_v18 }
0x4f78   :  { %v7961_v46 = vpop.f32.mrf.mxu1 }
0x4f79   :  { %8543 = vpow2.f32 %v7721_v51 }
0x4f84   :  { %v8542_v6 = vpop.eup %8541 }
0x4f85   :  { %6027 = vrot.lane.b32.xlu0 %v8542_v6, %s8676_s3 }
0x4f86   :  { %v8544_v10 = vpop.eup %8543 }
0x4f87   :  { %v6021_v13 = vadd.f32 1.0, %v8544_v10 }
0x4f89   :  { %8545 = vrcp.f32 %v6021_v13 }
0x4f96   :  { %v8546_v3 = vpop.eup %8545 }
0x4f97   :  { %v6025_v42 = vmul.f32 %v8546_v3, %v10768_v29 }
0x4ff7   :  { %v6028_v12 = vpop.permute.xlu0 %6027 }
0x4ff8   :  { %v6030_v0 = vmul.f32 %v8546_v3, %v6028_v12 }
0x4ffa   :  { %6032 = vrot.lane.b32.xlu1 %v6030_v0, %s8681_s28 }
0x506c   :  { %v6033_v9 = vpop.permute.xlu1 %6032 }
0x506d   :  { %v10875_v11 = vadd.f32 %v6033_v9, %v6025_v42 }
0x506f   :  { %8547 = vtanh.f32 %v10875_v11 }
0x507c   :  { %v8548_v24 = vpop.eup %8547 }
0x507d   :  { %6038 = vrot.lane.b32.xlu1 %v8548_v24, %s8676_s3 }
0x50ef   :  { %v6039_v16 = vpop.permute.xlu1 %6038 }
0x50f0   :  { %v10879_v60 = vmul.f32 %v8546_v3, %v6039_v16 }
0x50f2   :  { %v6081_v59 = vpack.c.bf16 %v10879_v60, %v10879_v60 }
0x50f4   :  { %6083 = vrot.lane.b32.xlu1 %v6081_v59, %s8681_s28 }
0x5166   :  { %v6084_v47 = vpop.permute.xlu1 %6083 }
0x5167   :  { %7722 = vmatmul.mubr.msk.bf16.vlgmr.msra.gmra.mxu0 %vm3986_vm6, %v6084_v47 }
0x5168   :  { %7963 = vmatpush3.bf16.msra.mxu0 %v10406_v36  ;;  %7964 = vmatprep.mubr.msk.bf16.mxu0 %vm8679_vm5, %v8678_v8 }
0x5169   :  { %7974 = vmatprep.subr.bf16.mxu0 %v8678_v8 }
0x5227   :  { %v6122_v29 = vpop.f32.mrf.mxu0 }
0x5228   :  { %v6136_v26 = vrot.slane %v6122_v29, %v9180_v27 }
0x5229   :  { %v6124_v44 = vpop.f32.mrf.mxu0 }
0x522a   :  { %v6137_v34 = vcombine.high %v6136_v26, %v6136_v26  ;;  %v6144_v52 = vrot.slane %v6136_v26, %v9180_v27 }
0x522b   :  { %v6126_v57 = vpop.f32.mrf.mxu0 }
0x522c   :  { %v6151_v30 = vrot.slane %v6137_v34, %v9180_v27  ;;  %v6155_v50 = vrot.slane %v6144_v52, %v8914_v20 }
0x522d   :  { %v6127_v62 = vpop.f32.mrf.mxu0 }
0x522e   :  { %v6159_v23 = vrot.slane %v6151_v30, %v8914_v20  ;;  %v6162_v39 = vadd.f32 %v6155_v50, %v10424_v17 }
0x5230   :  { %v6163_v55 = vadd.f32 %v6159_v23, %v10428_v56  ;;  %8549 = vtanh.f32 %v6162_v39 }
0x5232   :  { %8551 = vtanh.f32 %v6163_v55 }
0x523d   :  { %v8550_v18 = vpop.eup %8549 }
0x523e   :  { %v6166_v54 = vmul.f32 %v10792_v7, %v8550_v18 }
0x523f   :  { %v8552_v46 = vpop.eup %8551 }
0x5240   :  { %v6168_v6 = vsel %vm3986_vm6, %v6166_v54, 0.0  ;;  %v6167_v51 = vmul.f32 %v10792_v7, %v8552_v46 }
0x5241   :  { %6169 = vadd.xlane.f32.xlu1 %v6168_v6 }
0x5242   :  { %v6171_v10 = vsel %vm3986_vm6, %v6167_v51, 0.0 }
0x5243   :  { %6172 = vadd.xlane.f32.xlu0 %v6171_v10 }
0x52ca   :  { %v6170_v13 = vpop.xlane.xlu1 %6169 }
0x52cb   :  { %v6179_v12 = vrot.slane %v6170_v13, %v8911_v19 }
0x52cc   :  { %v6173_v3 = vpop.xlane.xlu0 %6172 }
0x52cd   :  { %v6183_v0 = vrot.slane %v6173_v3, %v8911_v19 }
0x52cf   :  { %v6184_v42 = vsel %vm352_vm1, %v6183_v0, %v6179_v12 }
0x52d0   :  { %v6186_v9 = vsel %vm4090_vm8, %v6184_v42, -inf }
0x52d1   :  { %6187 = vmax.xlane.f32.xlu1 %v6186_v9 }
0x535a   :  { %v6188_v24 = vpop.xlane.xlu1 %6187 }
0x535b   :  { %v6193_v16 = vrot.slane %v6188_v24, %v8914_v20  ;;  %v6197_v59 = vrot.slane %v6188_v24, %v8920_v22 }
0x535d   :  { %v6200_v47 = vsub.f32 %v6170_v13, %v6193_v16  ;;  %v6201_v26 = vsub.f32 %v6173_v3, %v6197_v59 }
0x535f   :  { %v6202_v34 = vmul.f32 1.442695, %v6200_v47  ;;  %v6204_v52 = vmul.f32 1.442695, %v6201_v26 }
0x5361   :  { %8553 = vpow2.f32 %v6202_v34 }
0x5362   :  { %8555 = vpow2.f32 %v6204_v52 }
0x536e   :  { %v8554_v57 = vpop.eup %8553 }
0x536f   :  { %v8556_v30 = vpop.eup %8555  ;;  %6209 = vperm.xlu0 %8061, %v8554_v57  }
0x5370   :  { %6212 = vperm.xlu1 %8062, %v8556_v30  }
0x53ea   :  { %v6210_v50 = vpop.permute.xlu0 %6209 }
0x53eb   :  { %v6213_v62 = vpop.permute.xlu1 %6212  ;;  %v6217_v23 = vrot.slane %v6210_v50, %v8911_v19 }
0x53ec   :  { %v6221_v39 = vrot.slane %v6213_v62, %v8911_v19 }
0x53ee   :  { %v6222_v55 = vsel %vm352_vm1, %v6221_v39, %v6217_v23 }
0x53ef   :  { %v6224_v18 = vsel %vm4090_vm8, %v6222_v55, 0.0 }
0x53f0   :  { %6225 = vadd.xlane.f32.xlu1 %v6224_v18 }
0x5479   :  { %v6226_v54 = vpop.xlane.xlu1 %6225 }
0x547a   :  { %8557 = vrcp.f32 %v6226_v54 }
0x5487   :  { %v8558_v46 = vpop.eup %8557 }
0x5488   :  { %v6236_v6 = vrot.slane %v8558_v46, %v8920_v22  ;;  %v6232_v51 = vrot.slane %v8558_v46, %v8914_v20 }
0x548a   :  { %v10912_v10 = vmul.f32 %v8556_v30, %v6236_v6  ;;  %v10914_v13 = vmul.f32 %v8554_v57, %v6232_v51 }
0x548c   :  { %v6262_v3 = vpack.c.bf16 %v10912_v10, %v10912_v10  ;;  %v6261_v0 = vpack.c.bf16 %v10914_v13, %v10914_v13 }
0x548e   :  { %v6317_v12 = vunpack.c.l.b16 %v6262_v3  ;;  %v6264_v42 = vunpack.c.l.b16 %v6261_v0 }
0x5490   :  { %6319 = vperm.xlu0 %8061, %v6317_v12  }
0x5494   :  { %6266 = vperm.xlu0 %8061, %v6264_v42  }
0x5498   :  { %6379 = vrot.lane.b32.xlu0 %v6122_v29, %s8680_s12 }
0x549c   :  { %6381 = vrot.lane.b32.xlu0 %v6124_v44, %s8680_s12 }
0x550b   :  { %v6320_v9 = vpop.permute.xlu0 %6319 }
0x550c   :  { %v6324_v24 = vrot.slane %v6320_v9, %v8911_v19 }
0x550e   :  { %v6325_v16 = vpack.c.b16 %v6324_v24, %v6324_v24 }
0x550f   :  { %v6267_v59 = vpop.permute.xlu0 %6266 }
0x5510   :  { %v6271_v47 = vrot.slane %v6267_v59, %v8911_v19  ;;  %7971 = vmatmul.mubr.msk.bf16.vlgmr.msra.gmra.mxu1 %vm4179_vm9, %v6325_v16 }
0x5511   :  { %6512 = vmatpush1.bf16.msra.mxu1 %v10724_v53  ;;  %6531 = vmatprep.mubr.bf16.mxu1 %v8675_v2 }
0x5512   :  { %v6272_v26 = vpack.c.b16 %v6271_v47, %v6271_v47  ;;  %6513 = vmatprep.subr.bf16.mxu1 %v10731_v31 }
0x5513   :  { %v6380_v51 = vpop.permute.xlu0 %6379 }
0x5514   :  { %7965 = vmatmul.mubr.msk.bf16.vlgmr.msra.gmra.mxu0 %vm4179_vm9, %v6272_v26 }
0x5515   :  { %7975 = vmatpush3.bf16.msra.mxu0 %v10830_v35  ;;  %7982 = vmatprep.mubr.msk.bf16.mxu0 %vm8679_vm5, %v8678_v8 }
0x5516   :  { %7976 = vmatprep.subr.bf16.mxu0 %v8678_v8  ;;  %6514 = vmatpush1.bf16.msra.mxu1 %v10742_v33 }
0x5517   :  { %7986 = vmatprep.subr.bf16.mxu1 %v8678_v8  ;;  %v6382_v3 = vpop.permute.xlu0 %6381 }
0x5518   :  { %v6383_v12 = vsel %vm4321_vm10, %v6380_v51, %v6382_v3 }
0x5519   :  { %7977 = vmatpush3.bf16.msra.mxu0 %v10841_v38 }
0x551a   :  { %7978 = vmatprep.subr.bf16.mxu0 %v8678_v8 }
0x551d   :  { %7979 = vmatpush3.bf16.msra.mxu0 %v10848_v21 }
0x551e   :  { %7980 = vmatprep.subr.bf16.mxu0 %v8678_v8 }
0x5521   :  { %7981 = vmatpush3.bf16.msra.mxu0 %v10855_v28 }
0x5522   :  { %7992 = vmatprep.subr.bf16.mxu0 %v8678_v8 }
0x55d0   :  { %v6363_v29 = vpop.f32.mrf.mxu1 }
0x55d1   :  { %v6370_v44 = vpack.c.bf16 %v6363_v29, %v6363_v29 }
0x55d2   :  { %v7972_v34 = vpop.f32.mrf.mxu1 }
0x55d3   :  { %v6374_v52 = vunpack.c.l.b16 %v6370_v44 }
0x55d4   :  { %v6310_v57 = vpop.f32.mrf.mxu0  ;;  %v6366_v30 = vpop.f32.mrf.mxu1 }
0x55d5   :  { %v6369_v50 = vpack.c.bf16 %v6310_v57, %v6310_v57  ;;  %v6375_v39 = vrot.slane %v6374_v52, 7 }
0x55d6   :  { %v7966_v62 = vpop.f32.mrf.mxu0  ;;  %v7973_v23 = vpop.f32.mrf.mxu1 }
0x55d7   :  { %v6373_v55 = vunpack.c.l.b16 %v6369_v50 }
0x55d8   :  { %v6313_v18 = vpop.f32.mrf.mxu0 }
0x55d9   :  { %v6376_v54 = vsel %vm352_vm1, %v6375_v39, %v6373_v55 }
0x55da   :  { %v6377_v46 = vpack.c.b16 %v6376_v54, %v6376_v54  ;;  %v7967_v6 = vpop.f32.mrf.mxu0 }
0x55dc   :  { %7983 = vmatmul.mubr.msk.bf16.vlgmr.msra.gmra.mxu0 %vm358_vm2, %v6377_v46 }
0x55dd   :  { %7993 = vmatpush3.bf16.msra.mxu0 %v10410_v25  ;;  %7994 = vmatprep.mubr.msk.bf16.mxu0 %vm8679_vm5, %v8678_v8 }
0x55de   :  { %6922 = vmatprep.subr.bf16.mxu0 %v10760_v41 }
0x569c   :  { %v6422_v0 = vpop.f32.mrf.mxu0 }
0x569d   :  { %v6423_v42 = vadd.f32 %v6422_v0, %v6383_v12 }
0x569e   :  { %v7984_v9 = vpop.f32.mrf.mxu0 }
0x569f   :  { %v6428_v24 = vadd.f32 %v10869_v58, %v6423_v42 }
0x56a0   :  { %v6425_v16 = vpop.f32.mrf.mxu0 }
0x56a1   :  { %8559 = vtanh.f32 %v6428_v24  ;;  %v7726_v26 = vmul.f32 -1.442695, %v6428_v24 }
0x56a2   :  { %v7985_v59 = vpop.f32.mrf.mxu0 }
0x56a3   :  { %8561 = vpow2.f32 %v7726_v26 }
0x56ae   :  { %v8560_v47 = vpop.eup %8559 }
0x56af   :  { %6438 = vrot.lane.b32.xlu0 %v8560_v47, %s8676_s3 }
0x56b0   :  { %v8562_v29 = vpop.eup %8561 }
0x56b1   :  { %v6432_v44 = vadd.f32 1.0, %v8562_v29 }
0x56b3   :  { %8563 = vrcp.f32 %v6432_v44 }
0x56c0   :  { %v8564_v41 = vpop.eup %8563 }
0x56c1   :  { %v6436_v57 = vmul.f32 %v8564_v41, %v10875_v11 }
0x5721   :  { %v6439_v34 = vpop.permute.xlu0 %6438 }
0x5722   :  { %v6441_v52 = vmul.f32 %v8564_v41, %v6439_v34 }
0x5724   :  { %6443 = vrot.lane.b32.xlu0 %v6441_v52, %s8681_s28 }
0x5796   :  { %v6444_v30 = vpop.permute.xlu0 %6443 }
0x5797   :  { %v10952_v50 = vadd.f32 %v6444_v30, %v6436_v57 }
0x5799   :  { %8565 = vtanh.f32 %v10952_v50 }
0x57a6   :  { %v8566_v62 = vpop.eup %8565 }
0x57a7   :  { %6449 = vrot.lane.b32.xlu0 %v8566_v62, %s8676_s3 }
0x5819   :  { %v6450_v23 = vpop.permute.xlu0 %6449 }
0x581a   :  { %v10956_v39 = vmul.f32 %v8564_v41, %v6450_v23 }
0x581c   :  { %v6492_v55 = vpack.c.bf16 %v10956_v39, %v10956_v39 }
0x581e   :  { %6494 = vrot.lane.b32.xlu0 %v6492_v55, %s8681_s28 }
0x5890   :  { %v6495_v18 = vpop.permute.xlu0 %6494 }
0x5891   :  { %7727 = vmatmul.mubr.msk.bf16.vlgmr.msra.gmra.mxu1 %vm3986_vm6, %v6495_v18 }
0x5892   :  { %7987 = vmatpush3.bf16.msra.mxu1 %v10406_v36  ;;  %7988 = vmatprep.mubr.msk.bf16.mxu1 %vm8679_vm5, %v8678_v8 }
0x5893   :  { %7998 = vmatprep.subr.bf16.mxu1 %v8678_v8 }
0x5951   :  { %v6533_v11 = vpop.f32.mrf.mxu1 }
0x5952   :  { %v6547_v54 = vrot.slane %v6533_v11, %v9180_v27 }
0x5953   :  { %v6535_v46 = vpop.f32.mrf.mxu1 }
0x5954   :  { %v6548_v6 = vcombine.high %v6547_v54, %v6547_v54  ;;  %v6555_v51 = vrot.slane %v6547_v54, %v9180_v27 }
0x5955   :  { %v6537_v3 = vpop.f32.mrf.mxu1 }
0x5956   :  { %v6562_v12 = vrot.slane %v6548_v6, %v9180_v27  ;;  %v6566_v0 = vrot.slane %v6555_v51, %v8914_v20 }
0x5957   :  { %v6538_v42 = vpop.f32.mrf.mxu1 }
0x5958   :  { %v6570_v9 = vrot.slane %v6562_v12, %v8914_v20  ;;  %v6573_v24 = vadd.f32 %v6566_v0, %v10424_v17 }
0x595a   :  { %v6574_v16 = vadd.f32 %v6570_v9, %v10428_v56  ;;  %8567 = vtanh.f32 %v6573_v24 }
0x595c   :  { %8569 = vtanh.f32 %v6574_v16 }
0x5967   :  { %v8568_v59 = vpop.eup %8567 }
0x5968   :  { %v6577_v47 = vmul.f32 %v10792_v7, %v8568_v59 }
0x5969   :  { %v8570_v26 = vpop.eup %8569 }
0x596a   :  { %v6579_v29 = vsel %vm3986_vm6, %v6577_v47, 0.0  ;;  %v6578_v44 = vmul.f32 %v10792_v7, %v8570_v26 }
0x596b   :  { %6580 = vadd.xlane.f32.xlu1 %v6579_v29 }
0x596c   :  { %v6582_v41 = vsel %vm3986_vm6, %v6578_v44, 0.0 }
0x596d   :  { %6583 = vadd.xlane.f32.xlu0 %v6582_v41 }
0x59f4   :  { %v6581_v34 = vpop.xlane.xlu1 %6580 }
0x59f5   :  { %v6590_v57 = vrot.slane %v6581_v34, %v8911_v19 }
0x59f6   :  { %v6584_v52 = vpop.xlane.xlu0 %6583 }
0x59f7   :  { %v6594_v30 = vrot.slane %v6584_v52, %v8911_v19 }
0x59f9   :  { %v6595_v62 = vsel %vm352_vm1, %v6594_v30, %v6590_v57 }
0x59fa   :  { %v6597_v23 = vsel %vm4090_vm8, %v6595_v62, -inf }
0x59fb   :  { %6598 = vmax.xlane.f32.xlu1 %v6597_v23 }
0x5a84   :  { %v6599_v55 = vpop.xlane.xlu1 %6598 }
0x5a85   :  { %v6604_v18 = vrot.slane %v6599_v55, %v8914_v20  ;;  %v6608_v54 = vrot.slane %v6599_v55, %v8920_v22 }
0x5a87   :  { %v6611_v6 = vsub.f32 %v6581_v34, %v6604_v18  ;;  %v6612_v51 = vsub.f32 %v6584_v52, %v6608_v54 }
0x5a89   :  { %v6613_v3 = vmul.f32 1.442695, %v6611_v6  ;;  %v6615_v12 = vmul.f32 1.442695, %v6612_v51 }
0x5a8b   :  { %8571 = vpow2.f32 %v6613_v3 }
0x5a8c   :  { %8573 = vpow2.f32 %v6615_v12 }
0x5a98   :  { %v8572_v0 = vpop.eup %8571 }
0x5a99   :  { %6620 = vperm.xlu1 %8062, %v8572_v0   ;;  %v8574_v42 = vpop.eup %8573 }
0x5a9d   :  { %6623 = vperm.xlu1 %8062, %v8574_v42  }
0x5b14   :  { %v6621_v9 = vpop.permute.xlu1 %6620 }
0x5b15   :  { %v6628_v16 = vrot.slane %v6621_v9, %v8911_v19 }
0x5b18   :  { %v6624_v24 = vpop.permute.xlu1 %6623 }
0x5b19   :  { %v6632_v59 = vrot.slane %v6624_v24, %v8911_v19 }
0x5b1b   :  { %v6633_v47 = vsel %vm352_vm1, %v6632_v59, %v6628_v16 }
0x5b1c   :  { %v6635_v26 = vsel %vm4090_vm8, %v6633_v47, 0.0 }
0x5b1d   :  { %6636 = vadd.xlane.f32.xlu1 %v6635_v26 }
0x5ba6   :  { %v6637_v29 = vpop.xlane.xlu1 %6636 }
0x5ba7   :  { %8575 = vrcp.f32 %v6637_v29 }
0x5bb4   :  { %v8576_v44 = vpop.eup %8575 }
0x5bb5   :  { %v6647_v41 = vrot.slane %v8576_v44, %v8920_v22  ;;  %v6643_v34 = vrot.slane %v8576_v44, %v8914_v20 }
0x5bb7   :  { %v10989_v52 = vmul.f32 %v8574_v42, %v6647_v41  ;;  %v10991_v57 = vmul.f32 %v8572_v0, %v6643_v34 }
0x5bb9   :  { %v6673_v30 = vpack.c.bf16 %v10989_v52, %v10989_v52  ;;  %v6672_v23 = vpack.c.bf16 %v10991_v57, %v10991_v57 }
0x5bbb   :  { %v6728_v62 = vunpack.c.l.b16 %v6673_v30  ;;  %v6675_v55 = vunpack.c.l.b16 %v6672_v23 }
0x5bbd   :  { %6730 = vperm.xlu0 %8061, %v6728_v62  }
0x5bc1   :  { %6677 = vperm.xlu0 %8061, %v6675_v55  }
0x5bc5   :  { %6790 = vrot.lane.b32.xlu0 %v6533_v11, %s8680_s12 }
0x5bc9   :  { %6792 = vrot.lane.b32.xlu0 %v6535_v46, %s8680_s12 }
0x5c38   :  { %v6731_v18 = vpop.permute.xlu0 %6730 }
0x5c39   :  { %v6735_v54 = vrot.slane %v6731_v18, %v8911_v19 }
0x5c3b   :  { %v6736_v6 = vpack.c.b16 %v6735_v54, %v6735_v54 }
0x5c3c   :  { %v6678_v51 = vpop.permute.xlu0 %6677 }
0x5c3d   :  { %v6682_v3 = vrot.slane %v6678_v51, %v8911_v19  ;;  %7995 = vmatmul.mubr.msk.bf16.vlgmr.msra.gmra.mxu0 %vm4179_vm9, %v6736_v6 }
0x5c3e   :  { %6923 = vmatpush1.bf16.msra.mxu0 %v10724_v53  ;;  %6942 = vmatprep.mubr.bf16.mxu0 %v8675_v2 }
0x5c3f   :  { %v6683_v12 = vpack.c.b16 %v6682_v3, %v6682_v3  ;;  %6924 = vmatprep.subr.bf16.mxu0 %v10731_v31 }
0x5c40   :  { %v6791_v44 = vpop.permute.xlu0 %6790 }
0x5c41   :  { %7989 = vmatmul.mubr.msk.bf16.vlgmr.msra.gmra.mxu1 %vm4179_vm9, %v6683_v12 }
0x5c42   :  { %7999 = vmatpush3.bf16.msra.mxu1 %v10830_v35  ;;  %8006 = vmatprep.mubr.msk.bf16.mxu1 %vm8679_vm5, %v8678_v8 }
0x5c43   :  { %8000 = vmatprep.subr.bf16.mxu1 %v8678_v8  ;;  %6925 = vmatpush1.bf16.msra.mxu0 %v10742_v33 }
0x5c44   :  { %8010 = vmatprep.subr.bf16.mxu0 %v8678_v8  ;;  %v6793_v41 = vpop.permute.xlu0 %6792 }
0x5c45   :  { %v6794_v34 = vsel %vm4321_vm10, %v6791_v44, %v6793_v41 }
0x5c46   :  { %8001 = vmatpush3.bf16.msra.mxu1 %v10841_v38 }
0x5c47   :  { %8002 = vmatprep.subr.bf16.mxu1 %v8678_v8 }
0x5c4a   :  { %8003 = vmatpush3.bf16.msra.mxu1 %v10848_v21 }
0x5c4b   :  { %8004 = vmatprep.subr.bf16.mxu1 %v8678_v8 }
0x5c4e   :  { %8005 = vmatpush3.bf16.msra.mxu1 %v10855_v28 }
0x5c4f   :  { %8016 = vmatprep.subr.bf16.mxu1 %v8678_v8 }
0x5cfd   :  { %v6774_v2 = vpop.f32.mrf.mxu0 }
0x5cfe   :  { %v6781_v53 = vpack.c.bf16 %v6774_v2, %v6774_v2 }
0x5cff   :  { %v7996_v31 = vpop.f32.mrf.mxu0 }
0x5d00   :  { %v6785_v11 = vunpack.c.l.b16 %v6781_v53 }
0x5d01   :  { %v6721_v46 = vpop.f32.mrf.mxu1  ;;  %v6777_v33 = vpop.f32.mrf.mxu0 }
0x5d02   :  { %v6780_v0 = vpack.c.bf16 %v6721_v46, %v6721_v46  ;;  %v6786_v24 = vrot.slane %v6785_v11, 7 }
0x5d03   :  { %v7990_v42 = vpop.f32.mrf.mxu1  ;;  %v7997_v9 = vpop.f32.mrf.mxu0 }
0x5d04   :  { %v6784_v16 = vunpack.c.l.b16 %v6780_v0 }
0x5d05   :  { %v6724_v59 = vpop.f32.mrf.mxu1 }
0x5d06   :  { %v6787_v47 = vsel %vm352_vm1, %v6786_v24, %v6784_v16 }
0x5d07   :  { %v6788_v26 = vpack.c.b16 %v6787_v47, %v6787_v47  ;;  %v7991_v29 = vpop.f32.mrf.mxu1 }
0x5d09   :  { %8007 = vmatmul.mubr.msk.bf16.vlgmr.msra.gmra.mxu1 %vm358_vm2, %v6788_v26 }
0x5d0a   :  { %8017 = vmatpush3.bf16.msra.mxu1 %v10410_v25  ;;  %8018 = vmatprep.mubr.msk.bf16.mxu1 %vm8679_vm5, %v8678_v8 }
0x5d0b   :  { %8034 = vmatprep.subr.bf16.mxu1 %v8678_v8 }
0x5dc9   :  { %v6833_v30 = vpop.f32.mrf.mxu1 }
0x5dca   :  { %v6834_v62 = vadd.f32 %v6833_v30, %v6794_v34 }
0x5dcb   :  { %v8008_v23 = vpop.f32.mrf.mxu1 }
0x5dcc   :  { %v6839_v55 = vadd.f32 %v10869_v58, %v6834_v62 }
0x5dcd   :  { %v6836_v18 = vpop.f32.mrf.mxu1 }
0x5dce   :  { %8577 = vtanh.f32 %v6839_v55  ;;  %v7731_v25 = vmul.f32 -1.442695, %v6839_v55 }
0x5dcf   :  { %v8009_v54 = vpop.f32.mrf.mxu1 }
0x5dd0   :  { %8579 = vpow2.f32 %v7731_v25 }
0x5ddb   :  { %v8578_v6 = vpop.eup %8577 }
0x5ddc   :  { %6849 = vrot.lane.b32.xlu1 %v8578_v6, %s8676_s3 }
0x5ddd   :  { %v8580_v51 = vpop.eup %8579 }
0x5dde   :  { %v6843_v3 = vadd.f32 1.0, %v8580_v51 }
0x5de0   :  { %8581 = vrcp.f32 %v6843_v3 }
0x5ded   :  { %v8582_v12 = vpop.eup %8581 }
0x5dee   :  { %v6847_v31 = vmul.f32 %v8582_v12, %v10952_v50 }
0x5e4e   :  { %v6850_v2 = vpop.permute.xlu1 %6849 }
0x5e4f   :  { %v6852_v53 = vmul.f32 %v8582_v12, %v6850_v2 }
0x5e51   :  { %6854 = vrot.lane.b32.xlu0 %v6852_v53, %s8681_s28 }
0x5ec3   :  { %v6855_v11 = vpop.permute.xlu0 %6854 }
0x5ec4   :  { %v11029_v46 = vadd.f32 %v6855_v11, %v6847_v31 }
0x5ec6   :  { %8583 = vtanh.f32 %v11029_v46 }
0x5ed3   :  { %v8584_v33 = vpop.eup %8583 }
0x5ed4   :  { %6860 = vrot.lane.b32.xlu0 %v8584_v33, %s8676_s3 }
0x5f46   :  { %v6861_v0 = vpop.permute.xlu0 %6860 }
0x5f47   :  { %v11033_v42 = vmul.f32 %v8582_v12, %v6861_v0 }
0x5f49   :  { %v6903_v9 = vpack.c.bf16 %v11033_v42, %v11033_v42 }
0x5f4b   :  { %6905 = vrot.lane.b32.xlu0 %v6903_v9, %s8681_s28 }
0x5fbd   :  { %v6906_v24 = vpop.permute.xlu0 %6905 }
0x5fbe   :  { %7732 = vmatmul.mubr.msk.bf16.vlgmr.msra.gmra.mxu0 %vm3986_vm6, %v6906_v24 }
0x5fbf   :  { %8011 = vmatpush3.bf16.msra.mxu0 %v10406_v36  ;;  %8012 = vmatprep.mubr.msk.bf16.mxu0 %vm8679_vm5, %v8678_v8 }
0x5fc0   :  { %8022 = vmatprep.subr.bf16.mxu0 %v8678_v8 }
0x607e   :  { %v11043_v50 = vpop.f32.mrf.mxu0 }
0x607f   :  { %v6958_v16 = vrot.slane %v11043_v50, %v9180_v27 }
0x6080   :  { %v11047_v59 = vpop.f32.mrf.mxu0 }
0x6081   :  { %v6959_v47 = vcombine.high %v6958_v16, %v6958_v16  ;;  %v6966_v26 = vrot.slane %v6958_v16, %v9180_v27 }
0x6082   :  { %v6948_v29 = vpop.f32.mrf.mxu0 }
0x6083   :  { %v6973_v44 = vrot.slane %v6959_v47, %v9180_v27  ;;  %v6977_v36 = vrot.slane %v6966_v26, %v8914_v20 }
0x6084   :  { %v6949_v41 = vpop.f32.mrf.mxu0 }
0x6085   :  { %v6981_v34 = vrot.slane %v6973_v44, %v8914_v20  ;;  %v6984_v30 = vadd.f32 %v6977_v36, %v10424_v17 }
0x6087   :  { %v6985_v62 = vadd.f32 %v6981_v34, %v10428_v56  ;;  %8585 = vtanh.f32 %v6984_v30  ;;  %v11071_v34 = vrot.slane %v10521_v40, %v9180_v27 }
0x6089   :  { %8587 = vtanh.f32 %v6985_v62  ;;  %v4406_v30 = vcombine.high %v11071_v34, %v11071_v34 }
0x608b   :  { %v4420_v62 = vrot.slane %v4406_v30, %v9180_v27 }
0x6094   :  { %v8586_v23 = vpop.eup %8585 }
0x6095   :  { %v6988_v55 = vmul.f32 %v10792_v7, %v8586_v23  ;;  %v11078_v23 = vrot.slane %v10879_v60, %v9180_v27  ;;  %v11093_v60 = vrot.slane %v11033_v42, %v9180_v27 }
0x6096   :  { %v8588_v18 = vpop.eup %8587 }
0x6097   :  { %v6990_v54 = vsel %vm3986_vm6, %v6988_v55, 0.0  ;;  %v6989_v6 = vmul.f32 %v10792_v7, %v8588_v18  ;;  %v6057_v55 = vrot.slane %v11078_v23, %v9180_v27  ;;  %v11084_v18 = vrot.slane %v10956_v39, %v9180_v27 }
0x6098   :  { %6991 = vadd.xlane.f32.xlu0 %v6990_v54  ;;  %v4428_v54 = vrot.slane %v4420_v62, %v8914_v20  ;;  %v6879_v39 = vrot.slane %v11093_v60, %v9180_v27 }
0x6099   :  { %v6993_v25 = vsel %vm3986_vm6, %v6989_v6, 0.0  ;;  %v6068_v40 = vrot.slane %v6057_v55, %v8914_v20  ;;  %v6468_v6 = vrot.slane %v11084_v18, %v9180_v27 }
0x609a   :  { %6994 = vadd.xlane.f32.xlu1 %v6993_v25 }
0x609b   :  { %v6479_v25 = vrot.slane %v6468_v6, %v8914_v20 }
0x6121   :  { %v6992_v51 = vpop.xlane.xlu0 %6991 }
0x6122   :  { %v7001_v17 = vrot.slane %v6992_v51, %v8911_v19 }
0x6123   :  { %v6995_v3 = vpop.xlane.xlu1 %6994 }
0x6124   :  { %v7005_v56 = vrot.slane %v6995_v3, %v8911_v19 }
0x6126   :  { %v7006_v12 = vsel %vm352_vm1, %v7005_v56, %v7001_v17 }
0x6127   :  { %v7008_v2 = vsel %vm4090_vm8, %v7006_v12, -inf }
0x6128   :  { %7009 = vmax.xlane.f32.xlu0 %v7008_v2 }
0x61b1   :  { %v7010_v53 = vpop.xlane.xlu0 %7009 }
0x61b2   :  { %v7015_v31 = vrot.slane %v7010_v53, %v8914_v20  ;;  %v7019_v7 = vrot.slane %v7010_v53, %v8920_v22 }
0x61b4   :  { %v7022_v11 = vsub.f32 %v6992_v51, %v7015_v31  ;;  %v7023_v33 = vsub.f32 %v6995_v3, %v7019_v7  ;;  %v6890_v51 = vrot.slane %v6879_v39, %v8914_v20 }
0x61b6   :  { %v7024_v0 = vmul.f32 1.442695, %v7022_v11  ;;  %v7026_v9 = vmul.f32 1.442695, %v7023_v33 }
0x61b8   :  { %8589 = vpow2.f32 %v7024_v0 }
0x61b9   :  { %8591 = vpow2.f32 %v7026_v9 }
0x61c5   :  { %v8590_v24 = vpop.eup %8589 }
0x61c6   :  { %v8592_v16 = vpop.eup %8591  ;;  %7031 = vperm.xlu0 %8061, %v8590_v24  }
0x61c7   :  { %7034 = vperm.xlu1 %8062, %v8592_v16  }
0x6241   :  { %v7032_v47 = vpop.permute.xlu0 %7031 }
0x6242   :  { %v7035_v26 = vpop.permute.xlu1 %7034  ;;  %v7039_v29 = vrot.slane %v7032_v47, %v8911_v19 }
0x6243   :  { %v7043_v44 = vrot.slane %v7035_v26, %v8911_v19 }
0x6245   :  { %v7044_v36 = vsel %vm352_vm1, %v7043_v44, %v7039_v29 }
0x6246   :  { %v7046_v41 = vsel %vm4090_vm8, %v7044_v36, 0.0 }
0x6247   :  { %7047 = vadd.xlane.f32.xlu0 %v7046_v41 }
0x625d   :  { %4431 = vrot.lane.b32.xlu0 %v4428_v54, %s8681_s28 }
0x6261   :  { %6073 = vrot.lane.b32.xlu0 %v6068_v40, %s8681_s28 }
0x6265   :  { %6484 = vrot.lane.b32.xlu0 %v6479_v25, %s8681_s28 }
0x6269   :  { %6895 = vrot.lane.b32.xlu0 %v6890_v51, %s8681_s28 }
0x62d0   :  { %v7048_v3 = vpop.xlane.xlu0 %7047 }
0x62d1   :  { %8593 = vrcp.f32 %v7048_v3 }
0x62d4   :  { %v4432_v17 = vpop.permute.xlu0 %4431 }
0x62d5   :  { %4436 = vst.msk [vmem:[#allocation3 + $0x8] sm:$0x1] %vm476_vm3, %v4432_v17 }
0x62d8   :  { %v6074_v42 = vpop.permute.xlu0 %6073 }
0x62d9   :  { %6079 = vst.msk [vmem:[#allocation3 + $0x4] sm:$0x1] %vm476_vm3, %v6074_v42 }
0x62dc   :  { %v6485_v56 = vpop.permute.xlu0 %6484 }
0x62dd   :  { %6490 = vst.msk [vmem:[#allocation3 + $0x5] sm:$0x1] %vm476_vm3, %v6485_v56 }
0x62de   :  { %v8594_v12 = vpop.eup %8593 }
0x62df   :  { %v7058_v2 = vrot.slane %v8594_v12, %v8920_v22  ;;  %v7054_v53 = vrot.slane %v8594_v12, %v8914_v20 }
0x62e0   :  { %v6896_v31 = vpop.permute.xlu0 %6895 }
0x62e1   :  { %6901 = vst.msk [vmem:[#allocation3 + $0x6] sm:$0x1] %vm476_vm3, %v6896_v31  ;;  %v11108_v7 = vmul.f32 %v8592_v16, %v7058_v2  ;;  %v11110_v11 = vmul.f32 %v8590_v24, %v7054_v53 }
0x62e3   :  { %v7084_v33 = vpack.c.bf16 %v11108_v7, %v11108_v7  ;;  %v7083_v9 = vpack.c.bf16 %v11110_v11, %v11110_v11 }
0x62e5   :  { %v7139_v0 = vunpack.c.l.b16 %v7084_v33  ;;  %v7086_v47 = vunpack.c.l.b16 %v7083_v9 }
0x62e7   :  { %7141 = vperm.xlu1 %8062, %v7139_v0  }
0x62eb   :  { %7088 = vperm.xlu1 %8062, %v7086_v47  }
0x62ef   :  { %7201 = vrot.lane.b32.xlu1 %v11043_v50, %s8680_s12 }
0x62f3   :  { %7203 = vrot.lane.b32.xlu1 %v11047_v59, %s8680_s12 }
0x6362   :  { %v7142_v22 = vpop.permute.xlu1 %7141 }
0x6363   :  { %v7146_v24 = vrot.slane %v7142_v22, %v8911_v19 }
0x6365   :  { %v7147_v16 = vpack.c.b16 %v7146_v24, %v7146_v24 }
0x6366   :  { %v7089_v26 = vpop.permute.xlu1 %7088 }
0x6367   :  { %v7093_v29 = vrot.slane %v7089_v26, %v8911_v19  ;;  %8019 = vmatmul.mubr.msk.bf16.vlgmr.msra.gmra.mxu1 %vm4179_vm9, %v7147_v16 }
0x6368   :  { %8038 = vmatprep.mubr.msk.bf16.mxu1 %vm8679_vm5, %v8678_v8 }
0x6369   :  { %v7094_v44 = vpack.c.b16 %v7093_v29, %v7093_v29  ;;  %v4413_v29 = vrot.slane %v11071_v34, %v9180_v27 }
0x636a   :  { %v7202_v51 = vpop.permute.xlu1 %7201 }
0x636b   :  { %8013 = vmatmul.mubr.msk.bf16.vlgmr.msra.gmra.mxu0 %vm4179_vm9, %v7094_v44  ;;  %v4816_v44 = vrot.slane %v10598_v37, %v9180_v27 }
0x636c   :  { %8023 = vmatpush3.bf16.msra.mxu0 %v10830_v35  ;;  %8030 = vmatprep.mubr.msk.bf16.mxu0 %vm8679_vm5, %v8678_v8 }
0x636d   :  { %8024 = vmatprep.subr.bf16.mxu0 %v8678_v8 }
0x6370   :  { %8025 = vmatpush3.bf16.msra.mxu0 %v10841_v38 }
0x6371   :  { %8026 = vmatprep.subr.bf16.mxu0 %v8678_v8 }
0x6374   :  { %8027 = vmatpush3.bf16.msra.mxu0 %v10848_v21 }
0x6375   :  { %8028 = vmatprep.subr.bf16.mxu0 %v8678_v8 }
0x6378   :  { %8029 = vmatpush3.bf16.msra.mxu0 %v10855_v28  ;;  %v7204_v28 = vpop.permute.xlu1 %7203 }
0x6379   :  { %v7205_v3 = vsel %vm4321_vm10, %v7202_v51, %v7204_v28  ;;  %v6461_v51 = vcombine.high %v11084_v18, %v11084_v18 }
0x6427   :  { %v7185_v50 = vpop.f32.mrf.mxu1 }
0x6428   :  { %v7192_v59 = vpack.c.bf16 %v7185_v50, %v7185_v50 }
0x6429   :  { %v8020_v36 = vpop.f32.mrf.mxu1 }
0x642a   :  { %v7196_v41 = vunpack.c.l.b16 %v7192_v59  ;;  %v4817_v59 = vcombine.high %v4816_v44, %v4816_v44  ;;  %v4824_v36 = vrot.slane %v4816_v44, %v9180_v27 }
0x642b   :  { %v7132_v35 = vpop.f32.mrf.mxu0  ;;  %v7188_v30 = vpop.f32.mrf.mxu1 }
0x642c   :  { %v7191_v62 = vpack.c.bf16 %v7132_v35, %v7132_v35  ;;  %v7197_v40 = vrot.slane %v7196_v41, 7  ;;  %v4424_v41 = vrot.slane %v4413_v29, %v8914_v20  ;;  %v5227_v35 = vrot.slane %v10675_v4, %v9180_v27 }
0x642d   :  { %v8014_v55 = vpop.f32.mrf.mxu0  ;;  %v8021_v54 = vpop.f32.mrf.mxu1  ;;  %v4835_v34 = vrot.slane %v4824_v36, %v8914_v20 }
0x642e   :  { %v7195_v6 = vunpack.c.l.b16 %v7191_v62  ;;  %v5228_v37 = vcombine.high %v5227_v35, %v5227_v35  ;;  %v5235_v30 = vrot.slane %v5227_v35, %v9180_v27 }
0x642f   :  { %v7135_v38 = vpop.f32.mrf.mxu0 }
0x6430   :  { %v7198_v25 = vsel %vm352_vm1, %v7197_v40, %v7195_v6  ;;  %v5242_v55 = vrot.slane %v5228_v37, %v9180_v27  ;;  %v5246_v54 = vrot.slane %v5235_v30, %v8914_v20  ;;  %v5638_v40 = vrot.slane %v10772_v61, %v9180_v27 }
0x6431   :  { %v7199_v39 = vpack.c.b16 %v7198_v25, %v7198_v25  ;;  %v8015_v21 = vpop.f32.mrf.mxu0 }
0x6432   :  { %v5639_v4 = vcombine.high %v5638_v40, %v5638_v40  ;;  %v5646_v6 = vrot.slane %v5638_v40, %v9180_v27  ;;  %v5250_v38 = vrot.slane %v5242_v55, %v8914_v20 }
0x6433   :  { %8031 = vmatmul.mubr.msk.bf16.vlgmr.msra.gmra.mxu0 %vm358_vm2, %v7199_v39  ;;  %v6050_v39 = vcombine.high %v11078_v23, %v11078_v23 }
0x6434   :  { %v5653_v25 = vrot.slane %v5639_v4, %v9180_v27  ;;  %v5657_v21 = vrot.slane %v5646_v6, %v8914_v20 }
0x6435   :  { %v6064_v61 = vrot.slane %v6050_v39, %v9180_v27 }
0x6436   :  { %v5661_v28 = vrot.slane %v5653_v25, %v8914_v20 }
0x6437   :  { %v6072_v23 = vrot.slane %v6064_v61, %v8914_v20 }
0x64f3   :  { %v7244_v17 = vpop.f32.mrf.mxu0 }
0x64f4   :  { %v7245_v42 = vadd.f32 %v7244_v17, %v7205_v3  ;;  %v6475_v3 = vrot.slane %v6461_v51, %v9180_v27  ;;  %v6872_v17 = vcombine.high %v11093_v60, %v11093_v60  ;;  %v8168_v60 = vld [vmem:[%s11320_s20] sm:$0xff]  }
0x64f5   :  { %v8032_v56 = vpop.f32.mrf.mxu0 }
0x64f6   :  { %v7250_v12 = vadd.f32 %v10869_v58, %v7245_v42  ;;  %v6886_v42 = vrot.slane %v6872_v17, %v9180_v27  ;;  %v6483_v56 = vrot.slane %v6475_v3, %v8914_v20 }
0x64f7   :  { %v7247_v2 = vpop.f32.mrf.mxu0 }
0x64f8   :  { %8595 = vtanh.f32 %v7250_v12  ;;  %v7736_v33 = vmul.f32 -1.442695, %v7250_v12  ;;  %v6894_v18 = vrot.slane %v6886_v42, %v8914_v20  ;;  %v8167_v12 = vld [vmem:[%s11320_s20 + $0x8] sm:$0xff]  }
0x64f9   :  { %v8033_v53 = vpop.f32.mrf.mxu0  ;;  %8035 = vmatpush3.bf16.msra.mxu1 %v8167_v12 }
0x64fa   :  { %8597 = vpow2.f32 %v7736_v33  ;;  %8036 = vmatprep.subr.bf16.mxu1 %v8678_v8 }
0x64fd   :  { %8037 = vmatpush3.bf16.msra.mxu1 %v8168_v60 }
0x64fe   :  { %8042 = vmatprep.subr.bf16.mxu1 %v8678_v8 }
0x6505   :  { %v8596_v31 = vpop.eup %8595 }
0x6506   :  { %7260 = vrot.lane.b32.xlu1 %v8596_v31, %s8676_s3 }
0x6507   :  { %v8598_v0 = vpop.eup %8597 }
0x6508   :  { %v7254_v9 = vadd.f32 1.0, %v8598_v0 }
0x650a   :  { %8599 = vrcp.f32 %v7254_v9 }
0x6517   :  { %v8600_v47 = vpop.eup %8599 }
0x6518   :  { %v7258_v16 = vmul.f32 %v8600_v47, %v11029_v46  ;;  %v4831_v46 = vrot.slane %v4817_v59, %v9180_v27 }
0x651a   :  { %v4839_v62 = vrot.slane %v4831_v46, %v8914_v20 }
0x6578   :  { %v7261_v22 = vpop.permute.xlu1 %7260 }
0x6579   :  { %v7263_v24 = vmul.f32 %v8600_v47, %v7261_v22 }
0x657b   :  { %7265 = vrot.lane.b32.xlu1 %v7263_v24, %s8681_s28 }
0x65ed   :  { %v7266_v26 = vpop.permute.xlu1 %7265 }
0x65ee   :  { %v7268_v58 = vadd.f32 %v7266_v26, %v7258_v16 }
0x65f0   :  { %8601 = vtanh.f32 %v7268_v58 }
0x65fd   :  { %v8602_v50 = vpop.eup %8601 }
0x65fe   :  { %7271 = vrot.lane.b32.xlu1 %v8602_v50, %s8676_s3 }
0x6602   :  { %4429 = vrot.lane.b32.xlu1 %v4424_v41, %s8681_s28 }
0x6606   :  { %4840 = vrot.lane.b32.xlu1 %v4835_v34, %s8681_s28 }
0x660a   :  { %4842 = vrot.lane.b32.xlu1 %v4839_v62, %s8681_s28 }
0x660e   :  { %5251 = vrot.lane.b32.xlu1 %v5246_v54, %s8681_s28 }
0x6612   :  { %5253 = vrot.lane.b32.xlu1 %v5250_v38, %s8681_s28 }
0x6616   :  { %5662 = vrot.lane.b32.xlu1 %v5657_v21, %s8681_s28 }
0x661a   :  { %5664 = vrot.lane.b32.xlu1 %v5661_v28, %s8681_s28 }
0x661e   :  { %6075 = vrot.lane.b32.xlu1 %v6072_v23, %s8681_s28 }
0x6622   :  { %6486 = vrot.lane.b32.xlu1 %v6483_v56, %s8681_s28 }
0x6626   :  { %6897 = vrot.lane.b32.xlu1 %v6894_v18, %s8681_s28 }
0x6670   :  { %v7272_v2 = vpop.permute.xlu1 %7271 }
0x6671   :  { %v7274_v53 = vmul.f32 %v8600_v47, %v7272_v2 }
0x6673   :  { %v7282_v31 = vrot.slane %v7274_v53, %v9180_v27 }
0x6674   :  { %v4430_v33 = vpop.permute.xlu1 %4429 }
0x6675   :  { %v7283_v0 = vcombine.high %v7282_v31, %v7282_v31  ;;  %v7290_v9 = vrot.slane %v7282_v31, %v9180_v27  ;;  %4435 = vst.msk [vmem:[#allocation3] sm:$0x1] %vm476_vm3, %v4430_v33  ;;  %v7737_v31 = vld [vmem:[%s11318_s18] ss:$0 sm:$0xff] }
0x6677   :  { %v7297_v22 = vrot.slane %v7283_v0, %v9180_v27  ;;  %v7301_v24 = vrot.slane %v7290_v9, %v8914_v20  ;;  %v7738_v9 = vld [vmem:[%s11319_s19] ss:$0 sm:$0xff] }
0x6678   :  { %v4841_v16 = vpop.permute.xlu1 %4840 }
0x6679   :  { %4846 = vst.msk [vmem:[#allocation3 + $0x1] sm:$0x1] %vm476_vm3, %v4841_v16  ;;  %7306 = vrot.lane.b32.xlu0 %v7301_v24, %s8681_s28  ;;  %v7305_v47 = vrot.slane %v7297_v22, %v8914_v20 }
0x667b   :  { %7308 = vrot.lane.b32.xlu1 %v7305_v47, %s8681_s28 }
0x667c   :  { %v4843_v26 = vpop.permute.xlu1 %4842 }
0x667d   :  { %4847 = vst.msk [vmem:[#allocation3 + $0x9] sm:$0x1] %vm476_vm3, %v4843_v26 }
0x6680   :  { %v5252_v58 = vpop.permute.xlu1 %5251 }
0x6681   :  { %5257 = vst.msk [vmem:[#allocation3 + $0x2] sm:$0x1] %vm476_vm3, %v5252_v58  ;;  %v8169_v58 = vld [vmem:[%s11322_s22 + $0x8] sm:$0xff]  }
0x6684   :  { %v5254_v29 = vpop.permute.xlu1 %5253 }
0x6685   :  { %5258 = vst.msk [vmem:[#allocation3 + $0xa] sm:$0x1] %vm476_vm3, %v5254_v29  ;;  %v8170_v29 = vld [vmem:[%s11322_s22] sm:$0xff]  }
0x6688   :  { %v5663_v27 = vpop.permute.xlu1 %5662 }
0x6689   :  { %5668 = vst.msk [vmem:[#allocation3 + $0x3] sm:$0x1] %vm476_vm3, %v5663_v27  ;;  %v7739_v27 = vld [vmem:[%s11321_s21] ss:$0 sm:$0xff]  ;;  %s8682_s21 = smov [#allocation6]  }
0x668c   :  { %v5665_v44 = vpop.permute.xlu1 %5664 }
0x668d   :  { %5669 = vst.msk [vmem:[#allocation3 + $0xb] sm:$0x1] %vm476_vm3, %v5665_v44 }
0x6690   :  { %v6076_v50 = vpop.permute.xlu1 %6075 }
0x6691   :  { %6080 = vst.msk [vmem:[#allocation3 + $0xc] sm:$0x1] %vm476_vm3, %v6076_v50 }
0x6694   :  { %v6487_v20 = vpop.permute.xlu1 %6486 }
0x6695   :  { %6491 = vst.msk [vmem:[#allocation3 + $0xd] sm:$0x1] %vm476_vm3, %v6487_v20 }
0x6698   :  { %v6898_v59 = vpop.permute.xlu1 %6897 }
0x6699   :  { %6902 = vst.msk [vmem:[#allocation3 + $0xe] sm:$0x1] %vm476_vm3, %v6898_v59 }
0x66eb   :  { %v7307_v36 = vpop.permute.xlu0 %7306 }
0x66ec   :  { %7312 = vst.msk [vmem:[#allocation3 + $0x7] sm:$0x1] %vm476_vm3, %v7307_v36 }
0x66ed   :  { %v7309_v41 = vpop.permute.xlu1 %7308 }
0x66ee   :  { %7313 = vst.msk [vmem:[#allocation3 + $0xf] sm:$0x1] %vm476_vm3, %v7309_v41 }
0x66f3   :  { %v7314_v46 = vld [vmem:[#allocation3] sm:$0xff] }
0x66f4   :  { %v7316_v34 = vsel %vm3986_vm6, %v7314_v46, 0.0 }
0x66f5   :  { %v7315_v35 = vld [vmem:[#allocation3 + $0x8] sm:$0xff] }
0x66f6   :  { %v7317_v37 = vsel %vm3986_vm6, %v7315_v35, 0.0 }
0x66f7   :  { %v7318_v30 = vadd.f32 %v7317_v37, %v7316_v34 }
0x66f9   :  { %v7319_v62 = vrot.slane %v7318_v30, 4 }
0x66fb   :  { %v7320_v55 = vadd.f32 %v7319_v62, %v7318_v30 }
0x66fd   :  { %v7321_v54 = vrot.slane %v7320_v55, 2 }
0x66ff   :  { %v7322_v40 = vadd.f32 %v7321_v54, %v7320_v55 }
0x6701   :  { %v7323_v4 = vrot.slane %v7322_v40, 1 }
0x6703   :  { %v7324_v6 = vadd.f32 %v7323_v4, %v7322_v40 }
0x6705   :  { %v7326_v38 = vmul.f32 0.0625, %v7324_v6 }
0x6707   :  { %v7327_v25 = vsub.f32 %v7314_v46, %v7326_v38  ;;  %v7328_v39 = vsub.f32 %v7315_v35, %v7326_v38 }
0x6709   :  { %v7329_v21 = vmul.f32 %v7327_v25, %v7327_v25  ;;  %v7330_v61 = vmul.f32 %v7328_v39, %v7328_v39 }
0x670b   :  { %v7331_v51 = vsel %vm3986_vm6, %v7329_v21, 0.0  ;;  %v7332_v28 = vsel %vm3986_vm6, %v7330_v61, 0.0 }
0x670c   :  { %v7333_v3 = vadd.f32 %v7332_v28, %v7331_v51 }
0x670e   :  { %v7334_v17 = vrot.slane %v7333_v3, 4 }
0x6710   :  { %v7335_v23 = vadd.f32 %v7334_v17, %v7333_v3 }
0x6712   :  { %v7336_v42 = vrot.slane %v7335_v23, 2 }
0x6714   :  { %v7337_v56 = vadd.f32 %v7336_v42, %v7335_v23 }
0x6716   :  { %v7338_v18 = vrot.slane %v7337_v56, 1 }
0x6718   :  { %v7339_v12 = vadd.f32 %v7338_v18, %v7337_v56 }
0x671a   :  { %v7340_v2 = vmul.f32 0.0625, %v7339_v12 }
0x671c   :  { %v7341_v60 = vadd.f32 1e-05, %v7340_v2 }
0x671e   :  { %8603 = vrsqrt.f32 %v7341_v60 }
0x672b   :  { %v8604_v53 = vpop.eup %8603 }
0x672c   :  { %v7343_v33 = vmul.f32 %v8604_v53, %v7327_v25  ;;  %v7344_v0 = vmul.f32 %v8604_v53, %v7328_v39 }
0x672e   :  { %v7351_v22 = vmul.f32 %v7737_v31, %v7343_v33  ;;  %v7352_v24 = vmul.f32 %v7737_v31, %v7344_v0 }
0x6730   :  { %v7359_v16 = vadd.f32 %v7738_v9, %v7351_v22  ;;  %v7360_v47 = vadd.f32 %v7738_v9, %v7352_v24 }
0x6732   :  { %v7361_v26 = vpack.c.bf16 %v7360_v47, %v7359_v16 }
0x6734   :  { %8039 = vmatmul.mubr.msk.bf16.vlgmr.msra.gmra.mxu1 %vm3986_vm6, %v7361_v26 }
0x6735   :  { %8046 = vmatprep.mubr.msk.bf16.mxu1 %vm8679_vm5, %v8678_v8  ;;  %8043 = vmatpush3.bf16.msra.mxu1 %v8169_v58 }
0x6736   :  { %8044 = vmatprep.subr.bf16.mxu1 %v8678_v8  ;;  %v7743_v8 = vld [vmem:[%s11323_s23] ss:$0 sm:$0xff]  ;;  %s7532_s23 = sshll.u32 %s8682_s21, 4  ;;  %s7533_s23 = int_to_ptr.vmem [resolvable:$true] %s7532_s23 }
0x6737   :  { %s8631_s8 = scalar_lea.vmem %s7533_s23, 256  ;;  %p8636_p1 = scmp.lt.s32.totalorder %s7533_s23, %s7533_s23 }
0x6738   :  { %p8632_p0 = scmp.ne.s32.totalorder %s7533_s23, %s8631_s8  ;;  %p8637_p2 = scmp.lt.s32.totalorder %s8631_s8, %s8631_s8 }
0x6739   :  { %8045 = vmatpush3.bf16.msra.mxu1 %v8170_v29 }
0x673a   :  { %p8638_p3 = por %p8637_p2, %p8636_p1 }
0x673c   :  { %p8639_p4 = pnand %p8638_p3, %p8632_p0 }
0x67f4   :  { %v7417_v44 = vpop.f32.mrf.mxu1 }
0x67f5   :  { %v7418_v50 = vadd.f32 %v7739_v27, %v7417_v44 }
0x67f6   :  { %v8040_v20 = vpop.f32.mrf.mxu1 }
0x67f7   :  { %8605 = vtanh.f32 %v7418_v50 }
0x67f8   :  { %v7420_v59 = vpop.f32.mrf.mxu1 }
0x67f9   :  { %v7421_v36 = vadd.f32 %v7739_v27, %v7420_v59 }
0x67fa   :  { %v8041_v41 = vpop.f32.mrf.mxu1 }
0x67fb   :  { %8607 = vtanh.f32 %v7421_v36 }
0x6804   :  { %v8606_v46 = vpop.eup %8605 }
0x6808   :  { %v8608_v35 = vpop.eup %8607 }
0x6809   :  { %v7426_v34 = vpack.c.bf16 %v8608_v35, %v8606_v46 }
0x680b   :  { %8047 = vmatmul.mubr.msk.bf16.vlgmr.msra.gmra.mxu1 %vm3986_vm6, %v7426_v34 }
0x68cb   :  { %v7482_v37 = vpop.f32.mrf.mxu1 }
0x68cc   :  { %v7483_v30 = vadd.f32 %v7743_v8, %v7482_v37 }
0x68cd   :  { %v8048_v62 = vpop.f32.mrf.mxu1 }
0x68ce   :  { %8609 = vtanh.f32 %v7483_v30 }
0x68cf   :  { %v7485_v55 = vpop.f32.mrf.mxu1 }
0x68d0   :  { %v7486_v54 = vadd.f32 %v7743_v8, %v7485_v55 }
0x68d1   :  { %v8049_v40 = vpop.f32.mrf.mxu1 }
0x68d2   :  { %8611 = vtanh.f32 %v7486_v54 }
0x68db   :  { %v8610_v4 = vpop.eup %8609 }
0x68dc   :  { %v7491_v6 = vsel %vm4179_vm9, %v8610_v4, -inf }
0x68dd   :  { %7492 = vmax.xlane.f32.xlu0 %v7491_v6 }
0x68df   :  { %v8612_v38 = vpop.eup %8611 }
0x68e0   :  { %v7494_v25 = vsel %vm4179_vm9, %v8612_v38, -inf }
0x68e1   :  { %7495 = vmax.xlane.f32.xlu1 %v7494_v25 }
0x68f2   :  { %4152 = vperm.xlu1 %8062, %v10453_v48  }
0x68f3   :  { %4149 = vperm.xlu0 %8061, %v10455_v43  }
0x68f6   :  { %4600 = vperm.xlu1 %8062, %v10556_v1  }
0x68f7   :  { %5011 = vperm.xlu0 %8061, %v10633_v14  }
0x68fa   :  { %4603 = vperm.xlu1 %8062, %v10554_v49  }
0x68fb   :  { %5422 = vperm.xlu0 %8061, %v10710_v63  }
0x68fe   :  { %5014 = vperm.xlu1 %8062, %v10631_v32  }
0x68ff   :  { %5833 = vperm.xlu0 %8061, %v10812_v5  }
0x6902   :  { %5425 = vperm.xlu1 %8062, %v10708_v45  }
0x6903   :  { %6244 = vperm.xlu0 %8061, %v10914_v13  }
0x6906   :  { %5836 = vperm.xlu1 %8062, %v10810_v15  }
0x6907   :  { %6655 = vperm.xlu0 %8061, %v10991_v57  }
0x690a   :  { %6247 = vperm.xlu1 %8062, %v10912_v10  }
0x690e   :  { %6658 = vperm.xlu1 %8062, %v10989_v52  }
0x6912   :  { %7069 = vperm.xlu1 %8062, %v11108_v7  }
0x6966   :  { %v7493_v48 = vpop.xlane.xlu0 %7492 }
0x6967   :  { %v7497_v43 = vsub.f32 %v8610_v4, %v7493_v48 }
0x6969   :  { %v7499_v49 = vmul.f32 1.442695, %v7497_v43 }
0x696a   :  { %v7496_v1 = vpop.xlane.xlu1 %7495 }
0x696b   :  { %8613 = vpow2.f32 %v7499_v49  ;;  %v7498_v32 = vsub.f32 %v8612_v38, %v7496_v1 }
0x696d   :  { %v7501_v14 = vmul.f32 1.442695, %v7498_v32 }
0x696e   :  { %v4150_v45 = vpop.permute.xlu0 %4149  ;;  %v4153_v63 = vpop.permute.xlu1 %4152 }
0x696f   :  { %8615 = vpow2.f32 %v7501_v14  ;;  %v4157_v15 = vrot.slane %v4150_v45, %v8911_v19  ;;  %v4161_v5 = vrot.slane %v4153_v63, %v8911_v19 }
0x6971   :  { %4165 = vst.msk [vmem:[#allocation6] sm:$0x1] %vm4164_vm11, %v4157_v15  ;;  %4166 = vst.msk [vmem:[#allocation6 + $0x8] sm:$0x1] %vm4164_vm11, %v4161_v5 }
0x6972   :  { %v5012_v10 = vpop.permute.xlu0 %5011  ;;  %v4601_v13 = vpop.permute.xlu1 %4600 }
0x6973   :  { %v5019_v52 = vrot.slane %v5012_v10, %v8911_v19  ;;  %v4608_v57 = vrot.slane %v4601_v13, %v8911_v19 }
0x6975   :  { %5026 = vst.msk [vmem:[#allocation6 + $0x2] sm:$0x1] %vm4164_vm11, %v5019_v52  ;;  %4615 = vst.msk [vmem:[#allocation6 + $0x1] sm:$0x1] %vm4164_vm11, %v4608_v57 }
0x6976   :  { %v5423_v7 = vpop.permute.xlu0 %5422  ;;  %v4604_v39 = vpop.permute.xlu1 %4603 }
0x6977   :  { %v5430_v21 = vrot.slane %v5423_v7, %v8911_v19  ;;  %v4612_v61 = vrot.slane %v4604_v39, %v8911_v19 }
0x6978   :  { %v8614_v51 = vpop.eup %8613 }
0x6979   :  { %5437 = vst.msk [vmem:[#allocation6 + $0x3] sm:$0x1] %vm4164_vm11, %v5430_v21  ;;  %4616 = vst.msk [vmem:[#allocation6 + $0x9] sm:$0x1] %vm4164_vm11, %v4612_v61  ;;  %v7503_v28 = vsel %vm4179_vm9, %v8614_v51, 0.0 }
0x697a   :  { %7504 = vadd.xlane.f32.xlu0 %v7503_v28  ;;  %v5834_v3 = vpop.permute.xlu0 %5833  ;;  %v5015_v17 = vpop.permute.xlu1 %5014 }
0x697b   :  { %v5841_v23 = vrot.slane %v5834_v3, %v8911_v19  ;;  %v5023_v42 = vrot.slane %v5015_v17, %v8911_v19 }
0x697c   :  { %v8616_v56 = vpop.eup %8615 }
0x697d   :  { %5848 = vst.msk [vmem:[#allocation6 + $0x4] sm:$0x1] %vm4164_vm11, %v5841_v23  ;;  %5027 = vst.msk [vmem:[#allocation6 + $0xa] sm:$0x1] %vm4164_vm11, %v5023_v42  ;;  %v7506_v18 = vsel %vm4179_vm9, %v8616_v56, 0.0 }
0x697e   :  { %v6245_v12 = vpop.permute.xlu0 %6244  ;;  %7507 = vadd.xlane.f32.xlu0 %v7506_v18  ;;  %v5426_v2 = vpop.permute.xlu1 %5425 }
0x697f   :  { %v6252_v60 = vrot.slane %v6245_v12, %v8911_v19  ;;  %v5434_v53 = vrot.slane %v5426_v2, %v8911_v19 }
0x6981   :  { %6259 = vst.msk [vmem:[#allocation6 + $0x5] sm:$0x1] %vm4164_vm11, %v6252_v60  ;;  %5438 = vst.msk [vmem:[#allocation6 + $0xb] sm:$0x1] %vm4164_vm11, %v5434_v53 }
0x6982   :  { %v6656_v31 = vpop.permute.xlu0 %6655  ;;  %v5837_v33 = vpop.permute.xlu1 %5836 }
0x6983   :  { %v6663_v0 = vrot.slane %v6656_v31, %v8911_v19  ;;  %v5845_v9 = vrot.slane %v5837_v33, %v8911_v19 }
0x6985   :  { %6670 = vst.msk [vmem:[#allocation6 + $0x6] sm:$0x1] %vm4164_vm11, %v6663_v0  ;;  %5849 = vst.msk [vmem:[#allocation6 + $0xc] sm:$0x1] %vm4164_vm11, %v5845_v9 }
0x6986   :  { %v6248_v22 = vpop.permute.xlu1 %6247 }
0x6987   :  { %v6256_v24 = vrot.slane %v6248_v22, %v8911_v19 }
0x6989   :  { %6260 = vst.msk [vmem:[#allocation6 + $0xd] sm:$0x1] %vm4164_vm11, %v6256_v24 }
0x698a   :  { %v6659_v16 = vpop.permute.xlu1 %6658 }
0x698b   :  { %v6667_v47 = vrot.slane %v6659_v16, %v8911_v19 }
0x698d   :  { %6671 = vst.msk [vmem:[#allocation6 + $0xe] sm:$0x1] %vm4164_vm11, %v6667_v47 }
0x698e   :  { %v7070_v26 = vpop.permute.xlu1 %7069 }
0x698f   :  { %v7078_v58 = vrot.slane %v7070_v26, %v8911_v19 }
0x6991   :  { %7082 = vst.msk [vmem:[#allocation6 + $0xf] sm:$0x1] %vm4164_vm11, %v7078_v58 }
0x6994   :  { %7066 = vperm.xlu0 %8061, %v11110_v11  }
0x6a03   :  { %v7505_v29 = vpop.xlane.xlu0 %7504 }
0x6a04   :  { %8617 = vrcp.f32 %v7505_v29 }
0x6a07   :  { %v7508_v27 = vpop.xlane.xlu0 %7507 }
0x6a08   :  { %8619 = vrcp.f32 %v7508_v27 }
0x6a0f   :  { %v7067_v44 = vpop.permute.xlu0 %7066 }
0x6a10   :  { %v7074_v50 = vrot.slane %v7067_v44, %v8911_v19 }
0x6a11   :  { %v8618_v20 = vpop.eup %8617 }
0x6a12   :  { %7081 = vst.msk [vmem:[#allocation6 + $0x7] sm:$0x1] %vm4164_vm11, %v7074_v50  ;;  %v7511_v59 = vmul.f32 %v8618_v20, %v8614_v51 }
0x6a13   :  { %8642 = shalt.err (!%p8639_p4)
}
0x6a14   :  { %s8684_s2 = smov 128   ;;  %s8685_s5 = smov 8   ;;  %7513 = vst.msk [vmem:[#allocation4] sm:$0xff] %vm4179_vm9, %v7511_v59 }
0x6a15   :  { %7538 = dma.vmem_to_hbm [thread:$0]  %s7533_s23, 256, %s11325_s25, [#allocation7], %s8684_s2, %s8684_s2, %s8685_s5   ;;  %v8620_v19 = vpop.eup %8619 }
0x6a16   :  { %v7512_v11 = vmul.f32 %v8620_v19, %v8616_v56  ;;  %s8651_s1 = scalar_lea.vmem %s7521_s14, 256  ;;  %p8656_p6 = scmp.lt.s32.totalorder %s7521_s14, %s7521_s14 }
0x6a17   :  { %p8652_p5 = scmp.ne.s32.totalorder %s7521_s14, %s8651_s1  ;;  %p8657_p7 = scmp.lt.s32.totalorder %s8651_s1, %s8651_s1 }
0x6a18   :  { %7514 = vst.msk [vmem:[#allocation4 + $0x8] sm:$0xff] %vm4179_vm9, %v7512_v11 }
0x6a19   :  { %p8658_p8 = por %p8657_p7, %p8656_p6 }
0x6a1b   :  { %p8659_p9 = pnand %p8658_p8, %p8652_p5 }
0x6a1d   :  { %8662 = shalt.err (!%p8659_p9)
}
0x6a1e   :  { %7526 = dma.vmem_to_hbm [thread:$0]  %s7521_s14, 256, %s11324_s24, [#allocation5], %s8684_s2, %s8684_s2, %s8685_s5  }
0x6a1f   :  { %8671 = dma.done.wait [#allocation5], 256  }
0x6a20   :  { %8672 = vsyncadd [#allocation5], 4294967040 }
0x6a21   :  { %8673 = dma.done.wait [#allocation7], 256  }
0x6a22   :  { %8674 = vsyncadd [#allocation7], 4294967040 }
0x6a23   :  { %7545 = vsyncpa [#allocation5], 1 }
0x6a24   :  { %7546 = vsyncpa [#allocation7], 1 }

</bundles_post_ra>
